<compile_context>
chip_gen: v7x
topology: tpu7x:2x2x1
jax: 0.10.0
libtpu: 0.0.40
codegen_flags: <defaults>
</compile_context>

<pallas_src>
import math

import jax
import jax.numpy as jnp
from jax import lax
from jax.experimental import pallas as pl
from jax.experimental.pallas import tpu as pltpu

# ---- small synthetic "BERT-for-QA" config ----
VOCAB = 100
TYPE_VOCAB = 2
MAX_POS = 64
SEQ = 40                       # must be >= 32 (largest selected index is 31)
HIDDEN = 128
NUM_HEADS = 4
HEAD_DIM = HIDDEN // NUM_HEADS
FFN = 256
NUM_LAYERS = 2
NUM_CLASS = 7
LN_EPS = 1e-12

# index selections from BERT_MRC_ALL_ISEAR.forward
TEXT_START_IDX = (12, 14, 16, 18, 20, 22, 24)    # from start_logits
TEXT_END_IDX = (13, 15, 17, 19, 21, 23, 25)      # from end_logits
OTHER_START_IDX = (17, 19, 21, 23, 25, 27, 29)   # from start_logits
OTHER_END_IDX = (18, 20, 22, 24, 26, 28, 31)     # from start_logits (as in the module)


# ------------------------- in-kernel helpers -------------------------
def _layer_norm(x, gamma, beta):
    mu = jnp.mean(x, axis=-1, keepdims=True)
    var = jnp.mean((x - mu) ** 2, axis=-1, keepdims=True)
    return (x - mu) * lax.rsqrt(var + LN_EPS) * gamma + beta


def _gelu(x):
    # TODO(synk): HF BERT default is exact erf GELU; tanh approximation used (EUP-friendly).
    c = math.sqrt(2.0 / math.pi)
    return 0.5 * x * (1.0 + jnp.tanh(c * (x + 0.044715 * x * x * x)))


def _log_softmax_row(v):
    m = jnp.max(v, axis=-1, keepdims=True)
    z = v - m
    return z - jnp.log(jnp.sum(jnp.exp(z), axis=-1, keepdims=True))


# ------------------------- single fused kernel -------------------------
def fused_bert_kernel(emb_ref, mask_ref, eg_ref, eb_ref,
                      wqkv_ref, bqkv_ref, wo_ref, bo_ref, g1_ref, be1_ref,
                      w1_ref, bb1_ref, w2_ref, bb2_ref, g2_ref, be2_ref,
                      wqa_ref, bqa_ref, sel_ref,
                      out_ref):
    B, S, H = emb_ref.shape
    M = B * S
    scale = 1.0 / math.sqrt(HEAD_DIM)

    # ---- embedding LayerNorm, batch folded into the matmul M dimension ----
    x = _layer_norm(emb_ref[...].reshape(M, H), eg_ref[...], eb_ref[...])   # (M, H) f32

    # ---- statically unrolled encoder layers; x stays resident in VMEM/vregs ----
    for l in range(NUM_LAYERS):
        xb = x.astype(jnp.bfloat16)
        qkv = jnp.dot(xb, wqkv_ref[l],
                      preferred_element_type=jnp.float32) + bqkv_ref[l]     # (M, 3H) f32
        wo_l = wo_ref[l]                                                    # (H, H) bf16

        attn_rows = []
        for b in range(B):                      # per-sequence attention (static unroll)
            qkv_b = qkv[b * S:(b + 1) * S, :]   # (S, 3H) f32 (8-row aligned slice)
            mask_b = mask_ref[b]                # (S,) additive key mask, f32
            attn_b = jnp.zeros((S, H), jnp.float32)
            for h in range(NUM_HEADS):
                lo = h * HEAD_DIM
                qh = qkv_b[:, lo:lo + HEAD_DIM].astype(jnp.bfloat16)
                kh = qkv_b[:, HIDDEN + lo:HIDDEN + lo + HEAD_DIM].astype(jnp.bfloat16)
                vh = qkv_b[:, 2 * HIDDEN + lo:2 * HIDDEN + lo + HEAD_DIM].astype(jnp.bfloat16)
                scores = lax.dot_general(qh, kh, (((1,), (1,)), ((), ())),
                                         preferred_element_type=jnp.float32) * scale
                scores = scores + mask_b                          # masking in f32
                scores = scores - jnp.max(scores, axis=-1, keepdims=True)
                p = jnp.exp(scores)
                p = p * pl.reciprocal(jnp.sum(p, axis=-1, keepdims=True), approx=True)
                ctx = jnp.dot(p.astype(jnp.bfloat16), vh,
                              preferred_element_type=jnp.float32)  # (S, D)
                # accumulate through Wo: no head concat / lane relayout
                attn_b = attn_b + jnp.dot(ctx.astype(jnp.bfloat16),
                                          wo_l[lo:lo + HEAD_DIM, :],
                                          preferred_element_type=jnp.float32)
            attn_rows.append(attn_b)
        attn = jnp.concatenate(attn_rows, axis=0) + bo_ref[l]     # (M, H), sublane-aligned

        h1 = _layer_norm(x + attn, g1_ref[l], be1_ref[l])
        ff = _gelu(jnp.dot(h1.astype(jnp.bfloat16), w1_ref[l],
                           preferred_element_type=jnp.float32) + bb1_ref[l])
        ff = jnp.dot(ff.astype(jnp.bfloat16), w2_ref[l],
                     preferred_element_type=jnp.float32) + bb2_ref[l]
        x = _layer_norm(h1 + ff, g2_ref[l], be2_ref[l])

    # ---- fused QA head: Linear(H, 2) replicated per selected index, one-hot
    #      row select, log_softmax over the 7-wide selections, lane-dense output ----
    sel = sel_ref[...]                                            # (S, 2*NC) one-hot, f32
    out_rows = []
    for b in range(B):
        x_b = x[b * S:(b + 1) * S, :].astype(jnp.bfloat16)        # (S, H)
        y = jnp.dot(x_b, wqa_ref[...],
                    preferred_element_type=jnp.float32) + bqa_ref[...]   # (S, 2*NC)
        row = jnp.sum(y * sel, axis=0, keepdims=True)             # (1, 2*NC) lane-dense
        out_rows.append(jnp.concatenate(
            [_log_softmax_row(row[:, :NUM_CLASS]),
             _log_softmax_row(row[:, NUM_CLASS:])], axis=1))
    out_ref[...] = jnp.concatenate(out_rows, axis=0)              # (B, 2*NC)


# ------------------------- parameters -------------------------
def init_params(seed=0):
    key = jax.random.PRNGKey(seed)
    keys = iter(jax.random.split(key, 16))

    def nrm(shape):
        return 0.02 * jax.random.normal(next(keys), shape, jnp.float32)

    def stack(shape):     # weights stacked over layers
        return nrm((NUM_LAYERS,) + shape)

    # TODO(synk): pretrained HF BERT weights cannot be loaded; encoder weights are synthetic.
    params = {
        'word_emb': nrm((VOCAB, HIDDEN)),
        'pos_emb': nrm((MAX_POS, HIDDEN)),
        'type_emb': nrm((TYPE_VOCAB, HIDDEN)),
        'emb_gamma': jnp.ones((1, HIDDEN), jnp.float32),
        'emb_beta': jnp.zeros((1, HIDDEN), jnp.float32),
        # matmul weights stored in bf16 (MXU fast path, f32 accumulate); biases / LN in f32
        'wqkv': stack((HIDDEN, 3 * HIDDEN)).astype(jnp.bfloat16),
        'bqkv': jnp.zeros((NUM_LAYERS, 1, 3 * HIDDEN), jnp.float32),
        'wo': stack((HIDDEN, HIDDEN)).astype(jnp.bfloat16),
        'bo': jnp.zeros((NUM_LAYERS, 1, HIDDEN), jnp.float32),
        'g1': jnp.ones((NUM_LAYERS, 1, HIDDEN), jnp.float32),
        'be1': jnp.zeros((NUM_LAYERS, 1, HIDDEN), jnp.float32),
        'w1': stack((HIDDEN, FFN)).astype(jnp.bfloat16),
        'bb1': jnp.zeros((NUM_LAYERS, 1, FFN), jnp.float32),
        'w2': stack((FFN, HIDDEN)).astype(jnp.bfloat16),
        'bb2': jnp.zeros((NUM_LAYERS, 1, HIDDEN), jnp.float32),
        'g2': jnp.ones((NUM_LAYERS, 1, HIDDEN), jnp.float32),
        'be2': jnp.zeros((NUM_LAYERS, 1, HIDDEN), jnp.float32),
        'wqa': nrm((HIDDEN, 2)),
        'bqa': jnp.zeros((1, 2), jnp.float32),
    }
    return params


def _build_qa_selection(wqa, bqa, textname, seq):
    """Fold the fixed index selection into the QA head: (H, 2*NC) weight,
    (1, 2*NC) bias and an (S, 2*NC) one-hot row-selection mask."""
    if textname == 'text':
        start_idx, start_col = TEXT_START_IDX, 0
        end_idx, end_col = TEXT_END_IDX, 1
    else:
        start_idx, start_col = OTHER_START_IDX, 0
        end_idx, end_col = OTHER_END_IDX, 0      # faithful: else-branch reads start_logits twice
    cols = jnp.array([start_col] * NUM_CLASS + [end_col] * NUM_CLASS, jnp.int32)
    wqa_sel = wqa[:, cols].astype(jnp.bfloat16)                      # (H, 2*NC)
    bqa_sel = bqa[:, cols]                                           # (1, 2*NC)
    rows = jnp.array(list(start_idx) + list(end_idx), jnp.int32)
    sel = jnp.zeros((seq, 2 * NUM_CLASS), jnp.float32).at[
        rows, jnp.arange(2 * NUM_CLASS)].set(1.0)
    return wqa_sel, bqa_sel, sel


def _cost_estimate(args, batch, seq):
    m = batch * seq
    flops = 0
    flops += NUM_LAYERS * 2 * m * HIDDEN * 3 * HIDDEN                          # QKV
    flops += NUM_LAYERS * batch * NUM_HEADS * 2 * (2 * seq * seq * HEAD_DIM)   # scores + ctx
    flops += NUM_LAYERS * batch * NUM_HEADS * 2 * seq * HEAD_DIM * HIDDEN      # per-head Wo
    flops += NUM_LAYERS * 2 * (2 * m * HIDDEN * FFN)                           # FFN
    flops += batch * 2 * seq * HIDDEN * (2 * NUM_CLASS)                        # QA head
    transcendentals = (NUM_LAYERS * batch * NUM_HEADS * seq * seq              # softmax exp
                       + NUM_LAYERS * m * FFN                                  # gelu tanh
                       + 2 * batch * NUM_CLASS)                                # log_softmax exp
    bytes_accessed = sum(math.prod(a.shape) * a.dtype.itemsize for a in args)
    bytes_accessed += batch * 2 * NUM_CLASS * 4
    return pl.CostEstimate(flops=flops, transcendentals=transcendentals,
                           bytes_accessed=bytes_accessed)


# ------------------------- forward -------------------------
def bert_mrc_forward(params, input_ids, token_type_ids, attention_mask, textname='text'):
    B, S = input_ids.shape

    # Glue: integer embedding gather stays in plain JAX (no tiny-Pallas equivalent).
    emb = (params['word_emb'][input_ids]
           + params['pos_emb'][None, :S, :]
           + params['type_emb'][token_type_ids])                   # (B, S, H) f32

    # additive attention mask over keys (0 valid, -1e9 padded); kept in f32 in-kernel
    add_mask = (1.0 - attention_mask.astype(jnp.float32)) * -1e9   # (B, S)

    wqa_sel, bqa_sel, sel = _build_qa_selection(
        params['wqa'], params['bqa'], textname, S)

    args = (emb, add_mask, params['emb_gamma'], params['emb_beta'],
            params['wqkv'], params['bqkv'], params['wo'], params['bo'],
            params['g1'], params['be1'], params['w1'], params['bb1'],
            params['w2'], params['bb2'], params['g2'], params['be2'],
            wqa_sel, bqa_sel, sel)

    # Single fused pallas_call: no grid, everything (≈0.7 MB) resident in VMEM.
    out = pl.pallas_call(
        fused_bert_kernel,
        out_shape=jax.ShapeDtypeStruct((B, 2 * NUM_CLASS), jnp.float32),
        compiler_params=pltpu.CompilerParams(vmem_limit_bytes=32 * 1024 * 1024),
        cost_estimate=_cost_estimate(args, B, S),
    )(*args)

    return out[:, :NUM_CLASS], out[:, NUM_CLASS:]


# ------------------------- main -------------------------
if __name__ == "__main__":
    params = init_params(0)

    B = 2
    key = jax.random.PRNGKey(0)
    k_ids, _ = jax.random.split(key)
    input_ids = jax.random.randint(k_ids, (B, SEQ), 0, VOCAB, dtype=jnp.int32)
    token_type_ids = jnp.concatenate(
        [jnp.zeros((B, SEQ // 2), jnp.int32),
         jnp.ones((B, SEQ - SEQ // 2), jnp.int32)], axis=1)
    attention_mask = jnp.ones((B, SEQ), jnp.int32).at[1, SEQ - 4:].set(0)

    fwd = jax.jit(bert_mrc_forward, static_argnames="textname")

    for name in ("text", "other"):
        start_log, end_log = fwd(params, input_ids, token_type_ids,
                                 attention_mask, textname=name)
        jax.block_until_ready((start_log, end_log))
        assert start_log.shape == (B, NUM_CLASS) and end_log.shape == (B, NUM_CLASS)
        # each row of a log_softmax output must sum to ~1 after exp
        assert jnp.allclose(jnp.exp(start_log).sum(-1), 1.0, atol=1e-4)
        assert jnp.allclose(jnp.exp(end_log).sum(-1), 1.0, atol=1e-4)
        assert bool(jnp.all(jnp.isfinite(start_log))) and bool(jnp.all(jnp.isfinite(end_log)))

    print("KERNEL_OK")
</pallas_src>

<mosaic_0001>
module attributes {stable_mosaic.version = 11 : i64} {
  func.func @fused_bert_kernel(%arg0: memref<2x40x128xf32, #tpu.memory_space<vmem>>, %arg1: memref<2x40xf32, #tpu.memory_space<vmem>>, %arg2: memref<1x128xf32, #tpu.memory_space<vmem>>, %arg3: memref<1x128xf32, #tpu.memory_space<vmem>>, %arg4: memref<2x128x384xbf16, #tpu.memory_space<vmem>>, %arg5: memref<2x1x384xf32, #tpu.memory_space<vmem>>, %arg6: memref<2x128x128xbf16, #tpu.memory_space<vmem>>, %arg7: memref<2x1x128xf32, #tpu.memory_space<vmem>>, %arg8: memref<2x1x128xf32, #tpu.memory_space<vmem>>, %arg9: memref<2x1x128xf32, #tpu.memory_space<vmem>>, %arg10: memref<2x128x256xbf16, #tpu.memory_space<vmem>>, %arg11: memref<2x1x256xf32, #tpu.memory_space<vmem>>, %arg12: memref<2x256x128xbf16, #tpu.memory_space<vmem>>, %arg13: memref<2x1x128xf32, #tpu.memory_space<vmem>>, %arg14: memref<2x1x128xf32, #tpu.memory_space<vmem>>, %arg15: memref<2x1x128xf32, #tpu.memory_space<vmem>>, %arg16: memref<128x14xbf16, #tpu.memory_space<vmem>>, %arg17: memref<1x14xf32, #tpu.memory_space<vmem>>, %arg18: memref<40x14xf32, #tpu.memory_space<vmem>>, %arg19: memref<2x14xf32, #tpu.memory_space<vmem>>) attributes {dimension_semantics = [], scalar_prefetch = 0 : i64, scratch_operands = 0 : i64, tpu.core_type = #tpu.core_type<tc>} {
    %c0 = arith.constant 0 : index
    %c0_0 = arith.constant 0 : index
    %c0_1 = arith.constant 0 : index
    %0 = vector.load %arg0[%c0, %c0_0, %c0_1] : memref<2x40x128xf32, #tpu.memory_space<vmem>>, vector<2x40x128xf32>
    %1 = vector.shape_cast %0 : vector<2x40x128xf32> to vector<80x128xf32>
    %c0_2 = arith.constant 0 : index
    %c0_3 = arith.constant 0 : index
    %2 = vector.load %arg2[%c0_2, %c0_3] : memref<1x128xf32, #tpu.memory_space<vmem>>, vector<1x128xf32>
    %c0_4 = arith.constant 0 : index
    %c0_5 = arith.constant 0 : index
    %3 = vector.load %arg3[%c0_4, %c0_5] : memref<1x128xf32, #tpu.memory_space<vmem>>, vector<1x128xf32>
    %cst = arith.constant dense<0.000000e+00> : vector<80xf32>
    %4 = vector.multi_reduction <add>, %1, %cst [1] : vector<80x128xf32> to vector<80xf32>
    %5 = vector.shape_cast %4 : vector<80xf32> to vector<80x1xf32>
    %cst_6 = arith.constant 1.280000e+02 : f32
    %6 = vector.broadcast %cst_6 : f32 to vector<80x1xf32>
    %7 = arith.divf %5, %6 : vector<80x1xf32>
    %8 = vector.broadcast %7 : vector<80x1xf32> to vector<80x128xf32>
    %9 = arith.subf %1, %8 : vector<80x128xf32>
    %10 = arith.mulf %9, %9 : vector<80x128xf32>
    %cst_7 = arith.constant dense<0.000000e+00> : vector<80xf32>
    %11 = vector.multi_reduction <add>, %10, %cst_7 [1] : vector<80x128xf32> to vector<80xf32>
    %12 = vector.shape_cast %11 : vector<80xf32> to vector<80x1xf32>
    %cst_8 = arith.constant 1.280000e+02 : f32
    %13 = vector.broadcast %cst_8 : f32 to vector<80x1xf32>
    %14 = arith.divf %12, %13 : vector<80x1xf32>
    %15 = vector.broadcast %7 : vector<80x1xf32> to vector<80x128xf32>
    %16 = arith.subf %1, %15 : vector<80x128xf32>
    %cst_9 = arith.constant 9.99999996E-13 : f32
    %17 = vector.broadcast %cst_9 : f32 to vector<80x1xf32>
    %18 = arith.addf %14, %17 : vector<80x1xf32>
    %19 = math.rsqrt %18 : vector<80x1xf32>
    %20 = vector.broadcast %19 : vector<80x1xf32> to vector<80x128xf32>
    %21 = arith.mulf %16, %20 : vector<80x128xf32>
    %22 = vector.broadcast %2 : vector<1x128xf32> to vector<80x128xf32>
    %23 = arith.mulf %21, %22 : vector<80x128xf32>
    %24 = vector.broadcast %3 : vector<1x128xf32> to vector<80x128xf32>
    %25 = arith.addf %23, %24 : vector<80x128xf32>
    %26 = arith.truncf %25 : vector<80x128xf32> to vector<80x128xbf16>
    %c0_10 = arith.constant 0 : index
    %c0_11 = arith.constant 0 : index
    %c0_12 = arith.constant 0 : index
    %27 = vector.load %arg4[%c0_10, %c0_11, %c0_12] : memref<2x128x384xbf16, #tpu.memory_space<vmem>>, vector<1x128x384xbf16>
    %28 = vector.shape_cast %27 : vector<1x128x384xbf16> to vector<128x384xbf16>
    %cst_13 = arith.constant dense<0.000000e+00> : vector<80x384xf32>
    %29 = tpu.matmul %26, %28, %cst_13 {dimension_numbers = #tpu.dot_dimension_numbers<[1], [0], [0], [1], [0, 0, 1, 1], [], []>} : vector<80x128xbf16>, vector<128x384xbf16>, vector<80x384xf32> -> vector<80x384xf32>
    %c0_14 = arith.constant 0 : index
    %c0_15 = arith.constant 0 : index
    %c0_16 = arith.constant 0 : index
    %30 = vector.load %arg5[%c0_14, %c0_15, %c0_16] : memref<2x1x384xf32, #tpu.memory_space<vmem>>, vector<1x1x384xf32>
    %31 = vector.shape_cast %30 : vector<1x1x384xf32> to vector<1x384xf32>
    %32 = vector.broadcast %31 : vector<1x384xf32> to vector<80x384xf32>
    %33 = arith.addf %29, %32 : vector<80x384xf32>
    %c0_17 = arith.constant 0 : index
    %c0_18 = arith.constant 0 : index
    %c0_19 = arith.constant 0 : index
    %34 = vector.load %arg6[%c0_17, %c0_18, %c0_19] : memref<2x128x128xbf16, #tpu.memory_space<vmem>>, vector<1x128x128xbf16>
    %35 = vector.shape_cast %34 : vector<1x128x128xbf16> to vector<128x128xbf16>
    %36 = vector.extract_strided_slice %33 {offsets = [0, 0], sizes = [40, 384], strides = [1, 1]} : vector<80x384xf32> to vector<40x384xf32>
    %c0_20 = arith.constant 0 : index
    %c0_21 = arith.constant 0 : index
    %37 = vector.load %arg1[%c0_20, %c0_21] : memref<2x40xf32, #tpu.memory_space<vmem>>, vector<1x40xf32>
    %38 = vector.shape_cast %37 : vector<1x40xf32> to vector<40xf32>
    %cst_22 = arith.constant 0.000000e+00 : f32
    %39 = vector.broadcast %cst_22 : f32 to vector<40x128xf32>
    %40 = vector.extract_strided_slice %36 {offsets = [0, 0], sizes = [40, 32], strides = [1, 1]} : vector<40x384xf32> to vector<40x32xf32>
    %41 = arith.truncf %40 : vector<40x32xf32> to vector<40x32xbf16>
    %42 = vector.extract_strided_slice %36 {offsets = [0, 128], sizes = [40, 32], strides = [1, 1]} : vector<40x384xf32> to vector<40x32xf32>
    %43 = arith.truncf %42 : vector<40x32xf32> to vector<40x32xbf16>
    %44 = vector.extract_strided_slice %36 {offsets = [0, 256], sizes = [40, 32], strides = [1, 1]} : vector<40x384xf32> to vector<40x32xf32>
    %45 = arith.truncf %44 : vector<40x32xf32> to vector<40x32xbf16>
    %cst_23 = arith.constant dense<0.000000e+00> : vector<40x40xf32>
    %46 = tpu.matmul %41, %43, %cst_23 {dimension_numbers = #tpu.dot_dimension_numbers<[1], [1], [0], [0], [0, 0, 1, 0], [], []>} : vector<40x32xbf16>, vector<40x32xbf16>, vector<40x40xf32> -> vector<40x40xf32>
    %cst_24 = arith.constant 0.176776692 : f32
    %47 = vector.broadcast %cst_24 : f32 to vector<40x40xf32>
    %48 = arith.mulf %46, %47 : vector<40x40xf32>
    %49 = vector.shape_cast %38 : vector<40xf32> to vector<1x40xf32>
    %50 = vector.broadcast %49 : vector<1x40xf32> to vector<40x40xf32>
    %51 = arith.addf %48, %50 : vector<40x40xf32>
    %cst_25 = arith.constant dense<0xFF800000> : vector<40xf32>
    %52 = vector.multi_reduction <maximumf>, %51, %cst_25 [1] : vector<40x40xf32> to vector<40xf32>
    %53 = vector.shape_cast %52 : vector<40xf32> to vector<40x1xf32>
    %54 = vector.broadcast %53 : vector<40x1xf32> to vector<40x40xf32>
    %55 = arith.subf %51, %54 : vector<40x40xf32>
    %56 = math.exp %55 : vector<40x40xf32>
    %cst_26 = arith.constant dense<0.000000e+00> : vector<40xf32>
    %57 = vector.multi_reduction <add>, %56, %cst_26 [1] : vector<40x40xf32> to vector<40xf32>
    %58 = vector.shape_cast %57 : vector<40xf32> to vector<40x1xf32>
    %59 = tpu.reciprocal %58 {approx = true} : vector<40x1xf32> -> vector<40x1xf32>
    %60 = vector.broadcast %59 : vector<40x1xf32> to vector<40x40xf32>
    %61 = arith.mulf %56, %60 : vector<40x40xf32>
    %62 = arith.truncf %61 : vector<40x40xf32> to vector<40x40xbf16>
    %cst_27 = arith.constant dense<0.000000e+00> : vector<40x32xf32>
    %63 = tpu.matmul %62, %45, %cst_27 {dimension_numbers = #tpu.dot_dimension_numbers<[1], [0], [0], [1], [0, 0, 1, 1], [], []>} : vector<40x40xbf16>, vector<40x32xbf16>, vector<40x32xf32> -> vector<40x32xf32>
    %64 = arith.truncf %63 : vector<40x32xf32> to vector<40x32xbf16>
    %65 = vector.extract_strided_slice %35 {offsets = [0, 0], sizes = [32, 128], strides = [1, 1]} : vector<128x128xbf16> to vector<32x128xbf16>
    %cst_28 = arith.constant dense<0.000000e+00> : vector<40x128xf32>
    %66 = tpu.matmul %64, %65, %cst_28 {dimension_numbers = #tpu.dot_dimension_numbers<[1], [0], [0], [1], [0, 0, 1, 1], [], []>} : vector<40x32xbf16>, vector<32x128xbf16>, vector<40x128xf32> -> vector<40x128xf32>
    %67 = arith.addf %39, %66 : vector<40x128xf32>
    %68 = vector.extract_strided_slice %36 {offsets = [0, 32], sizes = [40, 32], strides = [1, 1]} : vector<40x384xf32> to vector<40x32xf32>
    %69 = arith.truncf %68 : vector<40x32xf32> to vector<40x32xbf16>
    %70 = vector.extract_strided_slice %36 {offsets = [0, 160], sizes = [40, 32], strides = [1, 1]} : vector<40x384xf32> to vector<40x32xf32>
    %71 = arith.truncf %70 : vector<40x32xf32> to vector<40x32xbf16>
    %72 = vector.extract_strided_slice %36 {offsets = [0, 288], sizes = [40, 32], strides = [1, 1]} : vector<40x384xf32> to vector<40x32xf32>
    %73 = arith.truncf %72 : vector<40x32xf32> to vector<40x32xbf16>
    %cst_29 = arith.constant dense<0.000000e+00> : vector<40x40xf32>
    %74 = tpu.matmul %69, %71, %cst_29 {dimension_numbers = #tpu.dot_dimension_numbers<[1], [1], [0], [0], [0, 0, 1, 0], [], []>} : vector<40x32xbf16>, vector<40x32xbf16>, vector<40x40xf32> -> vector<40x40xf32>
    %cst_30 = arith.constant 0.176776692 : f32
    %75 = vector.broadcast %cst_30 : f32 to vector<40x40xf32>
    %76 = arith.mulf %74, %75 : vector<40x40xf32>
    %77 = vector.shape_cast %38 : vector<40xf32> to vector<1x40xf32>
    %78 = vector.broadcast %77 : vector<1x40xf32> to vector<40x40xf32>
    %79 = arith.addf %76, %78 : vector<40x40xf32>
    %cst_31 = arith.constant dense<0xFF800000> : vector<40xf32>
    %80 = vector.multi_reduction <maximumf>, %79, %cst_31 [1] : vector<40x40xf32> to vector<40xf32>
    %81 = vector.shape_cast %80 : vector<40xf32> to vector<40x1xf32>
    %82 = vector.broadcast %81 : vector<40x1xf32> to vector<40x40xf32>
    %83 = arith.subf %79, %82 : vector<40x40xf32>
    %84 = math.exp %83 : vector<40x40xf32>
    %cst_32 = arith.constant dense<0.000000e+00> : vector<40xf32>
    %85 = vector.multi_reduction <add>, %84, %cst_32 [1] : vector<40x40xf32> to vector<40xf32>
    %86 = vector.shape_cast %85 : vector<40xf32> to vector<40x1xf32>
    %87 = tpu.reciprocal %86 {approx = true} : vector<40x1xf32> -> vector<40x1xf32>
    %88 = vector.broadcast %87 : vector<40x1xf32> to vector<40x40xf32>
    %89 = arith.mulf %84, %88 : vector<40x40xf32>
    %90 = arith.truncf %89 : vector<40x40xf32> to vector<40x40xbf16>
    %cst_33 = arith.constant dense<0.000000e+00> : vector<40x32xf32>
    %91 = tpu.matmul %90, %73, %cst_33 {dimension_numbers = #tpu.dot_dimension_numbers<[1], [0], [0], [1], [0, 0, 1, 1], [], []>} : vector<40x40xbf16>, vector<40x32xbf16>, vector<40x32xf32> -> vector<40x32xf32>
    %92 = arith.truncf %91 : vector<40x32xf32> to vector<40x32xbf16>
    %93 = vector.extract_strided_slice %35 {offsets = [32, 0], sizes = [32, 128], strides = [1, 1]} : vector<128x128xbf16> to vector<32x128xbf16>
    %cst_34 = arith.constant dense<0.000000e+00> : vector<40x128xf32>
    %94 = tpu.matmul %92, %93, %cst_34 {dimension_numbers = #tpu.dot_dimension_numbers<[1], [0], [0], [1], [0, 0, 1, 1], [], []>} : vector<40x32xbf16>, vector<32x128xbf16>, vector<40x128xf32> -> vector<40x128xf32>
    %95 = arith.addf %67, %94 : vector<40x128xf32>
    %96 = vector.extract_strided_slice %36 {offsets = [0, 64], sizes = [40, 32], strides = [1, 1]} : vector<40x384xf32> to vector<40x32xf32>
    %97 = arith.truncf %96 : vector<40x32xf32> to vector<40x32xbf16>
    %98 = vector.extract_strided_slice %36 {offsets = [0, 192], sizes = [40, 32], strides = [1, 1]} : vector<40x384xf32> to vector<40x32xf32>
    %99 = arith.truncf %98 : vector<40x32xf32> to vector<40x32xbf16>
    %100 = vector.extract_strided_slice %36 {offsets = [0, 320], sizes = [40, 32], strides = [1, 1]} : vector<40x384xf32> to vector<40x32xf32>
    %101 = arith.truncf %100 : vector<40x32xf32> to vector<40x32xbf16>
    %cst_35 = arith.constant dense<0.000000e+00> : vector<40x40xf32>
    %102 = tpu.matmul %97, %99, %cst_35 {dimension_numbers = #tpu.dot_dimension_numbers<[1], [1], [0], [0], [0, 0, 1, 0], [], []>} : vector<40x32xbf16>, vector<40x32xbf16>, vector<40x40xf32> -> vector<40x40xf32>
    %cst_36 = arith.constant 0.176776692 : f32
    %103 = vector.broadcast %cst_36 : f32 to vector<40x40xf32>
    %104 = arith.mulf %102, %103 : vector<40x40xf32>
    %105 = vector.shape_cast %38 : vector<40xf32> to vector<1x40xf32>
    %106 = vector.broadcast %105 : vector<1x40xf32> to vector<40x40xf32>
    %107 = arith.addf %104, %106 : vector<40x40xf32>
    %cst_37 = arith.constant dense<0xFF800000> : vector<40xf32>
    %108 = vector.multi_reduction <maximumf>, %107, %cst_37 [1] : vector<40x40xf32> to vector<40xf32>
    %109 = vector.shape_cast %108 : vector<40xf32> to vector<40x1xf32>
    %110 = vector.broadcast %109 : vector<40x1xf32> to vector<40x40xf32>
    %111 = arith.subf %107, %110 : vector<40x40xf32>
    %112 = math.exp %111 : vector<40x40xf32>
    %cst_38 = arith.constant dense<0.000000e+00> : vector<40xf32>
    %113 = vector.multi_reduction <add>, %112, %cst_38 [1] : vector<40x40xf32> to vector<40xf32>
    %114 = vector.shape_cast %113 : vector<40xf32> to vector<40x1xf32>
    %115 = tpu.reciprocal %114 {approx = true} : vector<40x1xf32> -> vector<40x1xf32>
    %116 = vector.broadcast %115 : vector<40x1xf32> to vector<40x40xf32>
    %117 = arith.mulf %112, %116 : vector<40x40xf32>
    %118 = arith.truncf %117 : vector<40x40xf32> to vector<40x40xbf16>
    %cst_39 = arith.constant dense<0.000000e+00> : vector<40x32xf32>
    %119 = tpu.matmul %118, %101, %cst_39 {dimension_numbers = #tpu.dot_dimension_numbers<[1], [0], [0], [1], [0, 0, 1, 1], [], []>} : vector<40x40xbf16>, vector<40x32xbf16>, vector<40x32xf32> -> vector<40x32xf32>
    %120 = arith.truncf %119 : vector<40x32xf32> to vector<40x32xbf16>
    %121 = vector.extract_strided_slice %35 {offsets = [64, 0], sizes = [32, 128], strides = [1, 1]} : vector<128x128xbf16> to vector<32x128xbf16>
    %cst_40 = arith.constant dense<0.000000e+00> : vector<40x128xf32>
    %122 = tpu.matmul %120, %121, %cst_40 {dimension_numbers = #tpu.dot_dimension_numbers<[1], [0], [0], [1], [0, 0, 1, 1], [], []>} : vector<40x32xbf16>, vector<32x128xbf16>, vector<40x128xf32> -> vector<40x128xf32>
    %123 = arith.addf %95, %122 : vector<40x128xf32>
    %124 = vector.extract_strided_slice %36 {offsets = [0, 96], sizes = [40, 32], strides = [1, 1]} : vector<40x384xf32> to vector<40x32xf32>
    %125 = arith.truncf %124 : vector<40x32xf32> to vector<40x32xbf16>
    %126 = vector.extract_strided_slice %36 {offsets = [0, 224], sizes = [40, 32], strides = [1, 1]} : vector<40x384xf32> to vector<40x32xf32>
    %127 = arith.truncf %126 : vector<40x32xf32> to vector<40x32xbf16>
    %128 = vector.extract_strided_slice %36 {offsets = [0, 352], sizes = [40, 32], strides = [1, 1]} : vector<40x384xf32> to vector<40x32xf32>
    %129 = arith.truncf %128 : vector<40x32xf32> to vector<40x32xbf16>
    %cst_41 = arith.constant dense<0.000000e+00> : vector<40x40xf32>
    %130 = tpu.matmul %125, %127, %cst_41 {dimension_numbers = #tpu.dot_dimension_numbers<[1], [1], [0], [0], [0, 0, 1, 0], [], []>} : vector<40x32xbf16>, vector<40x32xbf16>, vector<40x40xf32> -> vector<40x40xf32>
    %cst_42 = arith.constant 0.176776692 : f32
    %131 = vector.broadcast %cst_42 : f32 to vector<40x40xf32>
    %132 = arith.mulf %130, %131 : vector<40x40xf32>
    %133 = vector.shape_cast %38 : vector<40xf32> to vector<1x40xf32>
    %134 = vector.broadcast %133 : vector<1x40xf32> to vector<40x40xf32>
    %135 = arith.addf %132, %134 : vector<40x40xf32>
    %cst_43 = arith.constant dense<0xFF800000> : vector<40xf32>
    %136 = vector.multi_reduction <maximumf>, %135, %cst_43 [1] : vector<40x40xf32> to vector<40xf32>
    %137 = vector.shape_cast %136 : vector<40xf32> to vector<40x1xf32>
    %138 = vector.broadcast %137 : vector<40x1xf32> to vector<40x40xf32>
    %139 = arith.subf %135, %138 : vector<40x40xf32>
    %140 = math.exp %139 : vector<40x40xf32>
    %cst_44 = arith.constant dense<0.000000e+00> : vector<40xf32>
    %141 = vector.multi_reduction <add>, %140, %cst_44 [1] : vector<40x40xf32> to vector<40xf32>
    %142 = vector.shape_cast %141 : vector<40xf32> to vector<40x1xf32>
    %143 = tpu.reciprocal %142 {approx = true} : vector<40x1xf32> -> vector<40x1xf32>
    %144 = vector.broadcast %143 : vector<40x1xf32> to vector<40x40xf32>
    %145 = arith.mulf %140, %144 : vector<40x40xf32>
    %146 = arith.truncf %145 : vector<40x40xf32> to vector<40x40xbf16>
    %cst_45 = arith.constant dense<0.000000e+00> : vector<40x32xf32>
    %147 = tpu.matmul %146, %129, %cst_45 {dimension_numbers = #tpu.dot_dimension_numbers<[1], [0], [0], [1], [0, 0, 1, 1], [], []>} : vector<40x40xbf16>, vector<40x32xbf16>, vector<40x32xf32> -> vector<40x32xf32>
    %148 = arith.truncf %147 : vector<40x32xf32> to vector<40x32xbf16>
    %149 = vector.extract_strided_slice %35 {offsets = [96, 0], sizes = [32, 128], strides = [1, 1]} : vector<128x128xbf16> to vector<32x128xbf16>
    %cst_46 = arith.constant dense<0.000000e+00> : vector<40x128xf32>
    %150 = tpu.matmul %148, %149, %cst_46 {dimension_numbers = #tpu.dot_dimension_numbers<[1], [0], [0], [1], [0, 0, 1, 1], [], []>} : vector<40x32xbf16>, vector<32x128xbf16>, vector<40x128xf32> -> vector<40x128xf32>
    %151 = arith.addf %123, %150 : vector<40x128xf32>
    %152 = vector.extract_strided_slice %33 {offsets = [40, 0], sizes = [40, 384], strides = [1, 1]} : vector<80x384xf32> to vector<40x384xf32>
    %c1 = arith.constant 1 : index
    %c0_47 = arith.constant 0 : index
    %153 = vector.load %arg1[%c1, %c0_47] : memref<2x40xf32, #tpu.memory_space<vmem>>, vector<1x40xf32>
    %154 = vector.shape_cast %153 : vector<1x40xf32> to vector<40xf32>
    %cst_48 = arith.constant 0.000000e+00 : f32
    %155 = vector.broadcast %cst_48 : f32 to vector<40x128xf32>
    %156 = vector.extract_strided_slice %152 {offsets = [0, 0], sizes = [40, 32], strides = [1, 1]} : vector<40x384xf32> to vector<40x32xf32>
    %157 = arith.truncf %156 : vector<40x32xf32> to vector<40x32xbf16>
    %158 = vector.extract_strided_slice %152 {offsets = [0, 128], sizes = [40, 32], strides = [1, 1]} : vector<40x384xf32> to vector<40x32xf32>
    %159 = arith.truncf %158 : vector<40x32xf32> to vector<40x32xbf16>
    %160 = vector.extract_strided_slice %152 {offsets = [0, 256], sizes = [40, 32], strides = [1, 1]} : vector<40x384xf32> to vector<40x32xf32>
    %161 = arith.truncf %160 : vector<40x32xf32> to vector<40x32xbf16>
    %cst_49 = arith.constant dense<0.000000e+00> : vector<40x40xf32>
    %162 = tpu.matmul %157, %159, %cst_49 {dimension_numbers = #tpu.dot_dimension_numbers<[1], [1], [0], [0], [0, 0, 1, 0], [], []>} : vector<40x32xbf16>, vector<40x32xbf16>, vector<40x40xf32> -> vector<40x40xf32>
    %cst_50 = arith.constant 0.176776692 : f32
    %163 = vector.broadcast %cst_50 : f32 to vector<40x40xf32>
    %164 = arith.mulf %162, %163 : vector<40x40xf32>
    %165 = vector.shape_cast %154 : vector<40xf32> to vector<1x40xf32>
    %166 = vector.broadcast %165 : vector<1x40xf32> to vector<40x40xf32>
    %167 = arith.addf %164, %166 : vector<40x40xf32>
    %cst_51 = arith.constant dense<0xFF800000> : vector<40xf32>
    %168 = vector.multi_reduction <maximumf>, %167, %cst_51 [1] : vector<40x40xf32> to vector<40xf32>
    %169 = vector.shape_cast %168 : vector<40xf32> to vector<40x1xf32>
    %170 = vector.broadcast %169 : vector<40x1xf32> to vector<40x40xf32>
    %171 = arith.subf %167, %170 : vector<40x40xf32>
    %172 = math.exp %171 : vector<40x40xf32>
    %cst_52 = arith.constant dense<0.000000e+00> : vector<40xf32>
    %173 = vector.multi_reduction <add>, %172, %cst_52 [1] : vector<40x40xf32> to vector<40xf32>
    %174 = vector.shape_cast %173 : vector<40xf32> to vector<40x1xf32>
    %175 = tpu.reciprocal %174 {approx = true} : vector<40x1xf32> -> vector<40x1xf32>
    %176 = vector.broadcast %175 : vector<40x1xf32> to vector<40x40xf32>
    %177 = arith.mulf %172, %176 : vector<40x40xf32>
    %178 = arith.truncf %177 : vector<40x40xf32> to vector<40x40xbf16>
    %cst_53 = arith.constant dense<0.000000e+00> : vector<40x32xf32>
    %179 = tpu.matmul %178, %161, %cst_53 {dimension_numbers = #tpu.dot_dimension_numbers<[1], [0], [0], [1], [0, 0, 1, 1], [], []>} : vector<40x40xbf16>, vector<40x32xbf16>, vector<40x32xf32> -> vector<40x32xf32>
    %180 = arith.truncf %179 : vector<40x32xf32> to vector<40x32xbf16>
    %181 = vector.extract_strided_slice %35 {offsets = [0, 0], sizes = [32, 128], strides = [1, 1]} : vector<128x128xbf16> to vector<32x128xbf16>
    %cst_54 = arith.constant dense<0.000000e+00> : vector<40x128xf32>
    %182 = tpu.matmul %180, %181, %cst_54 {dimension_numbers = #tpu.dot_dimension_numbers<[1], [0], [0], [1], [0, 0, 1, 1], [], []>} : vector<40x32xbf16>, vector<32x128xbf16>, vector<40x128xf32> -> vector<40x128xf32>
    %183 = arith.addf %155, %182 : vector<40x128xf32>
    %184 = vector.extract_strided_slice %152 {offsets = [0, 32], sizes = [40, 32], strides = [1, 1]} : vector<40x384xf32> to vector<40x32xf32>
    %185 = arith.truncf %184 : vector<40x32xf32> to vector<40x32xbf16>
    %186 = vector.extract_strided_slice %152 {offsets = [0, 160], sizes = [40, 32], strides = [1, 1]} : vector<40x384xf32> to vector<40x32xf32>
    %187 = arith.truncf %186 : vector<40x32xf32> to vector<40x32xbf16>
    %188 = vector.extract_strided_slice %152 {offsets = [0, 288], sizes = [40, 32], strides = [1, 1]} : vector<40x384xf32> to vector<40x32xf32>
    %189 = arith.truncf %188 : vector<40x32xf32> to vector<40x32xbf16>
    %cst_55 = arith.constant dense<0.000000e+00> : vector<40x40xf32>
    %190 = tpu.matmul %185, %187, %cst_55 {dimension_numbers = #tpu.dot_dimension_numbers<[1], [1], [0], [0], [0, 0, 1, 0], [], []>} : vector<40x32xbf16>, vector<40x32xbf16>, vector<40x40xf32> -> vector<40x40xf32>
    %cst_56 = arith.constant 0.176776692 : f32
    %191 = vector.broadcast %cst_56 : f32 to vector<40x40xf32>
    %192 = arith.mulf %190, %191 : vector<40x40xf32>
    %193 = vector.shape_cast %154 : vector<40xf32> to vector<1x40xf32>
    %194 = vector.broadcast %193 : vector<1x40xf32> to vector<40x40xf32>
    %195 = arith.addf %192, %194 : vector<40x40xf32>
    %cst_57 = arith.constant dense<0xFF800000> : vector<40xf32>
    %196 = vector.multi_reduction <maximumf>, %195, %cst_57 [1] : vector<40x40xf32> to vector<40xf32>
    %197 = vector.shape_cast %196 : vector<40xf32> to vector<40x1xf32>
    %198 = vector.broadcast %197 : vector<40x1xf32> to vector<40x40xf32>
    %199 = arith.subf %195, %198 : vector<40x40xf32>
    %200 = math.exp %199 : vector<40x40xf32>
    %cst_58 = arith.constant dense<0.000000e+00> : vector<40xf32>
    %201 = vector.multi_reduction <add>, %200, %cst_58 [1] : vector<40x40xf32> to vector<40xf32>
    %202 = vector.shape_cast %201 : vector<40xf32> to vector<40x1xf32>
    %203 = tpu.reciprocal %202 {approx = true} : vector<40x1xf32> -> vector<40x1xf32>
    %204 = vector.broadcast %203 : vector<40x1xf32> to vector<40x40xf32>
    %205 = arith.mulf %200, %204 : vector<40x40xf32>
    %206 = arith.truncf %205 : vector<40x40xf32> to vector<40x40xbf16>
    %cst_59 = arith.constant dense<0.000000e+00> : vector<40x32xf32>
    %207 = tpu.matmul %206, %189, %cst_59 {dimension_numbers = #tpu.dot_dimension_numbers<[1], [0], [0], [1], [0, 0, 1, 1], [], []>} : vector<40x40xbf16>, vector<40x32xbf16>, vector<40x32xf32> -> vector<40x32xf32>
    %208 = arith.truncf %207 : vector<40x32xf32> to vector<40x32xbf16>
    %209 = vector.extract_strided_slice %35 {offsets = [32, 0], sizes = [32, 128], strides = [1, 1]} : vector<128x128xbf16> to vector<32x128xbf16>
    %cst_60 = arith.constant dense<0.000000e+00> : vector<40x128xf32>
    %210 = tpu.matmul %208, %209, %cst_60 {dimension_numbers = #tpu.dot_dimension_numbers<[1], [0], [0], [1], [0, 0, 1, 1], [], []>} : vector<40x32xbf16>, vector<32x128xbf16>, vector<40x128xf32> -> vector<40x128xf32>
    %211 = arith.addf %183, %210 : vector<40x128xf32>
    %212 = vector.extract_strided_slice %152 {offsets = [0, 64], sizes = [40, 32], strides = [1, 1]} : vector<40x384xf32> to vector<40x32xf32>
    %213 = arith.truncf %212 : vector<40x32xf32> to vector<40x32xbf16>
    %214 = vector.extract_strided_slice %152 {offsets = [0, 192], sizes = [40, 32], strides = [1, 1]} : vector<40x384xf32> to vector<40x32xf32>
    %215 = arith.truncf %214 : vector<40x32xf32> to vector<40x32xbf16>
    %216 = vector.extract_strided_slice %152 {offsets = [0, 320], sizes = [40, 32], strides = [1, 1]} : vector<40x384xf32> to vector<40x32xf32>
    %217 = arith.truncf %216 : vector<40x32xf32> to vector<40x32xbf16>
    %cst_61 = arith.constant dense<0.000000e+00> : vector<40x40xf32>
    %218 = tpu.matmul %213, %215, %cst_61 {dimension_numbers = #tpu.dot_dimension_numbers<[1], [1], [0], [0], [0, 0, 1, 0], [], []>} : vector<40x32xbf16>, vector<40x32xbf16>, vector<40x40xf32> -> vector<40x40xf32>
    %cst_62 = arith.constant 0.176776692 : f32
    %219 = vector.broadcast %cst_62 : f32 to vector<40x40xf32>
    %220 = arith.mulf %218, %219 : vector<40x40xf32>
    %221 = vector.shape_cast %154 : vector<40xf32> to vector<1x40xf32>
    %222 = vector.broadcast %221 : vector<1x40xf32> to vector<40x40xf32>
    %223 = arith.addf %220, %222 : vector<40x40xf32>
    %cst_63 = arith.constant dense<0xFF800000> : vector<40xf32>
    %224 = vector.multi_reduction <maximumf>, %223, %cst_63 [1] : vector<40x40xf32> to vector<40xf32>
    %225 = vector.shape_cast %224 : vector<40xf32> to vector<40x1xf32>
    %226 = vector.broadcast %225 : vector<40x1xf32> to vector<40x40xf32>
    %227 = arith.subf %223, %226 : vector<40x40xf32>
    %228 = math.exp %227 : vector<40x40xf32>
    %cst_64 = arith.constant dense<0.000000e+00> : vector<40xf32>
    %229 = vector.multi_reduction <add>, %228, %cst_64 [1] : vector<40x40xf32> to vector<40xf32>
    %230 = vector.shape_cast %229 : vector<40xf32> to vector<40x1xf32>
    %231 = tpu.reciprocal %230 {approx = true} : vector<40x1xf32> -> vector<40x1xf32>
    %232 = vector.broadcast %231 : vector<40x1xf32> to vector<40x40xf32>
    %233 = arith.mulf %228, %232 : vector<40x40xf32>
    %234 = arith.truncf %233 : vector<40x40xf32> to vector<40x40xbf16>
    %cst_65 = arith.constant dense<0.000000e+00> : vector<40x32xf32>
    %235 = tpu.matmul %234, %217, %cst_65 {dimension_numbers = #tpu.dot_dimension_numbers<[1], [0], [0], [1], [0, 0, 1, 1], [], []>} : vector<40x40xbf16>, vector<40x32xbf16>, vector<40x32xf32> -> vector<40x32xf32>
    %236 = arith.truncf %235 : vector<40x32xf32> to vector<40x32xbf16>
    %237 = vector.extract_strided_slice %35 {offsets = [64, 0], sizes = [32, 128], strides = [1, 1]} : vector<128x128xbf16> to vector<32x128xbf16>
    %cst_66 = arith.constant dense<0.000000e+00> : vector<40x128xf32>
    %238 = tpu.matmul %236, %237, %cst_66 {dimension_numbers = #tpu.dot_dimension_numbers<[1], [0], [0], [1], [0, 0, 1, 1], [], []>} : vector<40x32xbf16>, vector<32x128xbf16>, vector<40x128xf32> -> vector<40x128xf32>
    %239 = arith.addf %211, %238 : vector<40x128xf32>
    %240 = vector.extract_strided_slice %152 {offsets = [0, 96], sizes = [40, 32], strides = [1, 1]} : vector<40x384xf32> to vector<40x32xf32>
    %241 = arith.truncf %240 : vector<40x32xf32> to vector<40x32xbf16>
    %242 = vector.extract_strided_slice %152 {offsets = [0, 224], sizes = [40, 32], strides = [1, 1]} : vector<40x384xf32> to vector<40x32xf32>
    %243 = arith.truncf %242 : vector<40x32xf32> to vector<40x32xbf16>
    %244 = vector.extract_strided_slice %152 {offsets = [0, 352], sizes = [40, 32], strides = [1, 1]} : vector<40x384xf32> to vector<40x32xf32>
    %245 = arith.truncf %244 : vector<40x32xf32> to vector<40x32xbf16>
    %cst_67 = arith.constant dense<0.000000e+00> : vector<40x40xf32>
    %246 = tpu.matmul %241, %243, %cst_67 {dimension_numbers = #tpu.dot_dimension_numbers<[1], [1], [0], [0], [0, 0, 1, 0], [], []>} : vector<40x32xbf16>, vector<40x32xbf16>, vector<40x40xf32> -> vector<40x40xf32>
    %cst_68 = arith.constant 0.176776692 : f32
    %247 = vector.broadcast %cst_68 : f32 to vector<40x40xf32>
    %248 = arith.mulf %246, %247 : vector<40x40xf32>
    %249 = vector.shape_cast %154 : vector<40xf32> to vector<1x40xf32>
    %250 = vector.broadcast %249 : vector<1x40xf32> to vector<40x40xf32>
    %251 = arith.addf %248, %250 : vector<40x40xf32>
    %cst_69 = arith.constant dense<0xFF800000> : vector<40xf32>
    %252 = vector.multi_reduction <maximumf>, %251, %cst_69 [1] : vector<40x40xf32> to vector<40xf32>
    %253 = vector.shape_cast %252 : vector<40xf32> to vector<40x1xf32>
    %254 = vector.broadcast %253 : vector<40x1xf32> to vector<40x40xf32>
    %255 = arith.subf %251, %254 : vector<40x40xf32>
    %256 = math.exp %255 : vector<40x40xf32>
    %cst_70 = arith.constant dense<0.000000e+00> : vector<40xf32>
    %257 = vector.multi_reduction <add>, %256, %cst_70 [1] : vector<40x40xf32> to vector<40xf32>
    %258 = vector.shape_cast %257 : vector<40xf32> to vector<40x1xf32>
    %259 = tpu.reciprocal %258 {approx = true} : vector<40x1xf32> -> vector<40x1xf32>
    %260 = vector.broadcast %259 : vector<40x1xf32> to vector<40x40xf32>
    %261 = arith.mulf %256, %260 : vector<40x40xf32>
    %262 = arith.truncf %261 : vector<40x40xf32> to vector<40x40xbf16>
    %cst_71 = arith.constant dense<0.000000e+00> : vector<40x32xf32>
    %263 = tpu.matmul %262, %245, %cst_71 {dimension_numbers = #tpu.dot_dimension_numbers<[1], [0], [0], [1], [0, 0, 1, 1], [], []>} : vector<40x40xbf16>, vector<40x32xbf16>, vector<40x32xf32> -> vector<40x32xf32>
    %264 = arith.truncf %263 : vector<40x32xf32> to vector<40x32xbf16>
    %265 = vector.extract_strided_slice %35 {offsets = [96, 0], sizes = [32, 128], strides = [1, 1]} : vector<128x128xbf16> to vector<32x128xbf16>
    %cst_72 = arith.constant dense<0.000000e+00> : vector<40x128xf32>
    %266 = tpu.matmul %264, %265, %cst_72 {dimension_numbers = #tpu.dot_dimension_numbers<[1], [0], [0], [1], [0, 0, 1, 1], [], []>} : vector<40x32xbf16>, vector<32x128xbf16>, vector<40x128xf32> -> vector<40x128xf32>
    %267 = arith.addf %239, %266 : vector<40x128xf32>
    %268 = tpu.concatenate %151, %267 in 0 : vector<40x128xf32>, vector<40x128xf32> -> vector<80x128xf32>
    %c0_73 = arith.constant 0 : index
    %c0_74 = arith.constant 0 : index
    %c0_75 = arith.constant 0 : index
    %269 = vector.load %arg7[%c0_73, %c0_74, %c0_75] : memref<2x1x128xf32, #tpu.memory_space<vmem>>, vector<1x1x128xf32>
    %270 = vector.shape_cast %269 : vector<1x1x128xf32> to vector<1x128xf32>
    %271 = vector.broadcast %270 : vector<1x128xf32> to vector<80x128xf32>
    %272 = arith.addf %268, %271 : vector<80x128xf32>
    %273 = arith.addf %25, %272 : vector<80x128xf32>
    %c0_76 = arith.constant 0 : index
    %c0_77 = arith.constant 0 : index
    %c0_78 = arith.constant 0 : index
    %274 = vector.load %arg8[%c0_76, %c0_77, %c0_78] : memref<2x1x128xf32, #tpu.memory_space<vmem>>, vector<1x1x128xf32>
    %275 = vector.shape_cast %274 : vector<1x1x128xf32> to vector<1x128xf32>
    %c0_79 = arith.constant 0 : index
    %c0_80 = arith.constant 0 : index
    %c0_81 = arith.constant 0 : index
    %276 = vector.load %arg9[%c0_79, %c0_80, %c0_81] : memref<2x1x128xf32, #tpu.memory_space<vmem>>, vector<1x1x128xf32>
    %277 = vector.shape_cast %276 : vector<1x1x128xf32> to vector<1x128xf32>
    %cst_82 = arith.constant dense<0.000000e+00> : vector<80xf32>
    %278 = vector.multi_reduction <add>, %273, %cst_82 [1] : vector<80x128xf32> to vector<80xf32>
    %279 = vector.shape_cast %278 : vector<80xf32> to vector<80x1xf32>
    %cst_83 = arith.constant 1.280000e+02 : f32
    %280 = vector.broadcast %cst_83 : f32 to vector<80x1xf32>
    %281 = arith.divf %279, %280 : vector<80x1xf32>
    %282 = vector.broadcast %281 : vector<80x1xf32> to vector<80x128xf32>
    %283 = arith.subf %273, %282 : vector<80x128xf32>
    %284 = arith.mulf %283, %283 : vector<80x128xf32>
    %cst_84 = arith.constant dense<0.000000e+00> : vector<80xf32>
    %285 = vector.multi_reduction <add>, %284, %cst_84 [1] : vector<80x128xf32> to vector<80xf32>
    %286 = vector.shape_cast %285 : vector<80xf32> to vector<80x1xf32>
    %cst_85 = arith.constant 1.280000e+02 : f32
    %287 = vector.broadcast %cst_85 : f32 to vector<80x1xf32>
    %288 = arith.divf %286, %287 : vector<80x1xf32>
    %289 = vector.broadcast %281 : vector<80x1xf32> to vector<80x128xf32>
    %290 = arith.subf %273, %289 : vector<80x128xf32>
    %cst_86 = arith.constant 9.99999996E-13 : f32
    %291 = vector.broadcast %cst_86 : f32 to vector<80x1xf32>
    %292 = arith.addf %288, %291 : vector<80x1xf32>
    %293 = math.rsqrt %292 : vector<80x1xf32>
    %294 = vector.broadcast %293 : vector<80x1xf32> to vector<80x128xf32>
    %295 = arith.mulf %290, %294 : vector<80x128xf32>
    %296 = vector.broadcast %275 : vector<1x128xf32> to vector<80x128xf32>
    %297 = arith.mulf %295, %296 : vector<80x128xf32>
    %298 = vector.broadcast %277 : vector<1x128xf32> to vector<80x128xf32>
    %299 = arith.addf %297, %298 : vector<80x128xf32>
    %300 = arith.truncf %299 : vector<80x128xf32> to vector<80x128xbf16>
    %c0_87 = arith.constant 0 : index
    %c0_88 = arith.constant 0 : index
    %c0_89 = arith.constant 0 : index
    %301 = vector.load %arg10[%c0_87, %c0_88, %c0_89] : memref<2x128x256xbf16, #tpu.memory_space<vmem>>, vector<1x128x256xbf16>
    %302 = vector.shape_cast %301 : vector<1x128x256xbf16> to vector<128x256xbf16>
    %cst_90 = arith.constant dense<0.000000e+00> : vector<80x256xf32>
    %303 = tpu.matmul %300, %302, %cst_90 {dimension_numbers = #tpu.dot_dimension_numbers<[1], [0], [0], [1], [0, 0, 1, 1], [], []>} : vector<80x128xbf16>, vector<128x256xbf16>, vector<80x256xf32> -> vector<80x256xf32>
    %c0_91 = arith.constant 0 : index
    %c0_92 = arith.constant 0 : index
    %c0_93 = arith.constant 0 : index
    %304 = vector.load %arg11[%c0_91, %c0_92, %c0_93] : memref<2x1x256xf32, #tpu.memory_space<vmem>>, vector<1x1x256xf32>
    %305 = vector.shape_cast %304 : vector<1x1x256xf32> to vector<1x256xf32>
    %306 = vector.broadcast %305 : vector<1x256xf32> to vector<80x256xf32>
    %307 = arith.addf %303, %306 : vector<80x256xf32>
    %cst_94 = arith.constant 5.000000e-01 : f32
    %308 = vector.broadcast %cst_94 : f32 to vector<80x256xf32>
    %309 = arith.mulf %308, %307 : vector<80x256xf32>
    %cst_95 = arith.constant 4.471500e-02 : f32
    %310 = vector.broadcast %cst_95 : f32 to vector<80x256xf32>
    %311 = arith.mulf %310, %307 : vector<80x256xf32>
    %312 = arith.mulf %311, %307 : vector<80x256xf32>
    %313 = arith.mulf %312, %307 : vector<80x256xf32>
    %314 = arith.addf %307, %313 : vector<80x256xf32>
    %cst_96 = arith.constant 0.797884583 : f32
    %315 = vector.broadcast %cst_96 : f32 to vector<80x256xf32>
    %316 = arith.mulf %315, %314 : vector<80x256xf32>
    %317 = math.tanh %316 : vector<80x256xf32>
    %cst_97 = arith.constant 1.000000e+00 : f32
    %318 = vector.broadcast %cst_97 : f32 to vector<80x256xf32>
    %319 = arith.addf %318, %317 : vector<80x256xf32>
    %320 = arith.mulf %309, %319 : vector<80x256xf32>
    %321 = arith.truncf %320 : vector<80x256xf32> to vector<80x256xbf16>
    %c0_98 = arith.constant 0 : index
    %c0_99 = arith.constant 0 : index
    %c0_100 = arith.constant 0 : index
    %322 = vector.load %arg12[%c0_98, %c0_99, %c0_100] : memref<2x256x128xbf16, #tpu.memory_space<vmem>>, vector<1x256x128xbf16>
    %323 = vector.shape_cast %322 : vector<1x256x128xbf16> to vector<256x128xbf16>
    %cst_101 = arith.constant dense<0.000000e+00> : vector<80x128xf32>
    %324 = tpu.matmul %321, %323, %cst_101 {dimension_numbers = #tpu.dot_dimension_numbers<[1], [0], [0], [1], [0, 0, 1, 1], [], []>} : vector<80x256xbf16>, vector<256x128xbf16>, vector<80x128xf32> -> vector<80x128xf32>
    %c0_102 = arith.constant 0 : index
    %c0_103 = arith.constant 0 : index
    %c0_104 = arith.constant 0 : index
    %325 = vector.load %arg13[%c0_102, %c0_103, %c0_104] : memref<2x1x128xf32, #tpu.memory_space<vmem>>, vector<1x1x128xf32>
    %326 = vector.shape_cast %325 : vector<1x1x128xf32> to vector<1x128xf32>
    %327 = vector.broadcast %326 : vector<1x128xf32> to vector<80x128xf32>
    %328 = arith.addf %324, %327 : vector<80x128xf32>
    %329 = arith.addf %299, %328 : vector<80x128xf32>
    %c0_105 = arith.constant 0 : index
    %c0_106 = arith.constant 0 : index
    %c0_107 = arith.constant 0 : index
    %330 = vector.load %arg14[%c0_105, %c0_106, %c0_107] : memref<2x1x128xf32, #tpu.memory_space<vmem>>, vector<1x1x128xf32>
    %331 = vector.shape_cast %330 : vector<1x1x128xf32> to vector<1x128xf32>
    %c0_108 = arith.constant 0 : index
    %c0_109 = arith.constant 0 : index
    %c0_110 = arith.constant 0 : index
    %332 = vector.load %arg15[%c0_108, %c0_109, %c0_110] : memref<2x1x128xf32, #tpu.memory_space<vmem>>, vector<1x1x128xf32>
    %333 = vector.shape_cast %332 : vector<1x1x128xf32> to vector<1x128xf32>
    %cst_111 = arith.constant dense<0.000000e+00> : vector<80xf32>
    %334 = vector.multi_reduction <add>, %329, %cst_111 [1] : vector<80x128xf32> to vector<80xf32>
    %335 = vector.shape_cast %334 : vector<80xf32> to vector<80x1xf32>
    %cst_112 = arith.constant 1.280000e+02 : f32
    %336 = vector.broadcast %cst_112 : f32 to vector<80x1xf32>
    %337 = arith.divf %335, %336 : vector<80x1xf32>
    %338 = vector.broadcast %337 : vector<80x1xf32> to vector<80x128xf32>
    %339 = arith.subf %329, %338 : vector<80x128xf32>
    %340 = arith.mulf %339, %339 : vector<80x128xf32>
    %cst_113 = arith.constant dense<0.000000e+00> : vector<80xf32>
    %341 = vector.multi_reduction <add>, %340, %cst_113 [1] : vector<80x128xf32> to vector<80xf32>
    %342 = vector.shape_cast %341 : vector<80xf32> to vector<80x1xf32>
    %cst_114 = arith.constant 1.280000e+02 : f32
    %343 = vector.broadcast %cst_114 : f32 to vector<80x1xf32>
    %344 = arith.divf %342, %343 : vector<80x1xf32>
    %345 = vector.broadcast %337 : vector<80x1xf32> to vector<80x128xf32>
    %346 = arith.subf %329, %345 : vector<80x128xf32>
    %cst_115 = arith.constant 9.99999996E-13 : f32
    %347 = vector.broadcast %cst_115 : f32 to vector<80x1xf32>
    %348 = arith.addf %344, %347 : vector<80x1xf32>
    %349 = math.rsqrt %348 : vector<80x1xf32>
    %350 = vector.broadcast %349 : vector<80x1xf32> to vector<80x128xf32>
    %351 = arith.mulf %346, %350 : vector<80x128xf32>
    %352 = vector.broadcast %331 : vector<1x128xf32> to vector<80x128xf32>
    %353 = arith.mulf %351, %352 : vector<80x128xf32>
    %354 = vector.broadcast %333 : vector<1x128xf32> to vector<80x128xf32>
    %355 = arith.addf %353, %354 : vector<80x128xf32>
    %356 = arith.truncf %355 : vector<80x128xf32> to vector<80x128xbf16>
    %c1_116 = arith.constant 1 : index
    %c0_117 = arith.constant 0 : index
    %c0_118 = arith.constant 0 : index
    %357 = vector.load %arg4[%c1_116, %c0_117, %c0_118] : memref<2x128x384xbf16, #tpu.memory_space<vmem>>, vector<1x128x384xbf16>
    %358 = vector.shape_cast %357 : vector<1x128x384xbf16> to vector<128x384xbf16>
    %cst_119 = arith.constant dense<0.000000e+00> : vector<80x384xf32>
    %359 = tpu.matmul %356, %358, %cst_119 {dimension_numbers = #tpu.dot_dimension_numbers<[1], [0], [0], [1], [0, 0, 1, 1], [], []>} : vector<80x128xbf16>, vector<128x384xbf16>, vector<80x384xf32> -> vector<80x384xf32>
    %c1_120 = arith.constant 1 : index
    %c0_121 = arith.constant 0 : index
    %c0_122 = arith.constant 0 : index
    %360 = vector.load %arg5[%c1_120, %c0_121, %c0_122] : memref<2x1x384xf32, #tpu.memory_space<vmem>>, vector<1x1x384xf32>
    %361 = vector.shape_cast %360 : vector<1x1x384xf32> to vector<1x384xf32>
    %362 = vector.broadcast %361 : vector<1x384xf32> to vector<80x384xf32>
    %363 = arith.addf %359, %362 : vector<80x384xf32>
    %c1_123 = arith.constant 1 : index
    %c0_124 = arith.constant 0 : index
    %c0_125 = arith.constant 0 : index
    %364 = vector.load %arg6[%c1_123, %c0_124, %c0_125] : memref<2x128x128xbf16, #tpu.memory_space<vmem>>, vector<1x128x128xbf16>
    %365 = vector.shape_cast %364 : vector<1x128x128xbf16> to vector<128x128xbf16>
    %366 = vector.extract_strided_slice %363 {offsets = [0, 0], sizes = [40, 384], strides = [1, 1]} : vector<80x384xf32> to vector<40x384xf32>
    %c0_126 = arith.constant 0 : index
    %c0_127 = arith.constant 0 : index
    %367 = vector.load %arg1[%c0_126, %c0_127] : memref<2x40xf32, #tpu.memory_space<vmem>>, vector<1x40xf32>
    %368 = vector.shape_cast %367 : vector<1x40xf32> to vector<40xf32>
    %cst_128 = arith.constant 0.000000e+00 : f32
    %369 = vector.broadcast %cst_128 : f32 to vector<40x128xf32>
    %370 = vector.extract_strided_slice %366 {offsets = [0, 0], sizes = [40, 32], strides = [1, 1]} : vector<40x384xf32> to vector<40x32xf32>
    %371 = arith.truncf %370 : vector<40x32xf32> to vector<40x32xbf16>
    %372 = vector.extract_strided_slice %366 {offsets = [0, 128], sizes = [40, 32], strides = [1, 1]} : vector<40x384xf32> to vector<40x32xf32>
    %373 = arith.truncf %372 : vector<40x32xf32> to vector<40x32xbf16>
    %374 = vector.extract_strided_slice %366 {offsets = [0, 256], sizes = [40, 32], strides = [1, 1]} : vector<40x384xf32> to vector<40x32xf32>
    %375 = arith.truncf %374 : vector<40x32xf32> to vector<40x32xbf16>
    %cst_129 = arith.constant dense<0.000000e+00> : vector<40x40xf32>
    %376 = tpu.matmul %371, %373, %cst_129 {dimension_numbers = #tpu.dot_dimension_numbers<[1], [1], [0], [0], [0, 0, 1, 0], [], []>} : vector<40x32xbf16>, vector<40x32xbf16>, vector<40x40xf32> -> vector<40x40xf32>
    %cst_130 = arith.constant 0.176776692 : f32
    %377 = vector.broadcast %cst_130 : f32 to vector<40x40xf32>
    %378 = arith.mulf %376, %377 : vector<40x40xf32>
    %379 = vector.shape_cast %368 : vector<40xf32> to vector<1x40xf32>
    %380 = vector.broadcast %379 : vector<1x40xf32> to vector<40x40xf32>
    %381 = arith.addf %378, %380 : vector<40x40xf32>
    %cst_131 = arith.constant dense<0xFF800000> : vector<40xf32>
    %382 = vector.multi_reduction <maximumf>, %381, %cst_131 [1] : vector<40x40xf32> to vector<40xf32>
    %383 = vector.shape_cast %382 : vector<40xf32> to vector<40x1xf32>
    %384 = vector.broadcast %383 : vector<40x1xf32> to vector<40x40xf32>
    %385 = arith.subf %381, %384 : vector<40x40xf32>
    %386 = math.exp %385 : vector<40x40xf32>
    %cst_132 = arith.constant dense<0.000000e+00> : vector<40xf32>
    %387 = vector.multi_reduction <add>, %386, %cst_132 [1] : vector<40x40xf32> to vector<40xf32>
    %388 = vector.shape_cast %387 : vector<40xf32> to vector<40x1xf32>
    %389 = tpu.reciprocal %388 {approx = true} : vector<40x1xf32> -> vector<40x1xf32>
    %390 = vector.broadcast %389 : vector<40x1xf32> to vector<40x40xf32>
    %391 = arith.mulf %386, %390 : vector<40x40xf32>
    %392 = arith.truncf %391 : vector<40x40xf32> to vector<40x40xbf16>
    %cst_133 = arith.constant dense<0.000000e+00> : vector<40x32xf32>
    %393 = tpu.matmul %392, %375, %cst_133 {dimension_numbers = #tpu.dot_dimension_numbers<[1], [0], [0], [1], [0, 0, 1, 1], [], []>} : vector<40x40xbf16>, vector<40x32xbf16>, vector<40x32xf32> -> vector<40x32xf32>
    %394 = arith.truncf %393 : vector<40x32xf32> to vector<40x32xbf16>
    %395 = vector.extract_strided_slice %365 {offsets = [0, 0], sizes = [32, 128], strides = [1, 1]} : vector<128x128xbf16> to vector<32x128xbf16>
    %cst_134 = arith.constant dense<0.000000e+00> : vector<40x128xf32>
    %396 = tpu.matmul %394, %395, %cst_134 {dimension_numbers = #tpu.dot_dimension_numbers<[1], [0], [0], [1], [0, 0, 1, 1], [], []>} : vector<40x32xbf16>, vector<32x128xbf16>, vector<40x128xf32> -> vector<40x128xf32>
    %397 = arith.addf %369, %396 : vector<40x128xf32>
    %398 = vector.extract_strided_slice %366 {offsets = [0, 32], sizes = [40, 32], strides = [1, 1]} : vector<40x384xf32> to vector<40x32xf32>
    %399 = arith.truncf %398 : vector<40x32xf32> to vector<40x32xbf16>
    %400 = vector.extract_strided_slice %366 {offsets = [0, 160], sizes = [40, 32], strides = [1, 1]} : vector<40x384xf32> to vector<40x32xf32>
    %401 = arith.truncf %400 : vector<40x32xf32> to vector<40x32xbf16>
    %402 = vector.extract_strided_slice %366 {offsets = [0, 288], sizes = [40, 32], strides = [1, 1]} : vector<40x384xf32> to vector<40x32xf32>
    %403 = arith.truncf %402 : vector<40x32xf32> to vector<40x32xbf16>
    %cst_135 = arith.constant dense<0.000000e+00> : vector<40x40xf32>
    %404 = tpu.matmul %399, %401, %cst_135 {dimension_numbers = #tpu.dot_dimension_numbers<[1], [1], [0], [0], [0, 0, 1, 0], [], []>} : vector<40x32xbf16>, vector<40x32xbf16>, vector<40x40xf32> -> vector<40x40xf32>
    %cst_136 = arith.constant 0.176776692 : f32
    %405 = vector.broadcast %cst_136 : f32 to vector<40x40xf32>
    %406 = arith.mulf %404, %405 : vector<40x40xf32>
    %407 = vector.shape_cast %368 : vector<40xf32> to vector<1x40xf32>
    %408 = vector.broadcast %407 : vector<1x40xf32> to vector<40x40xf32>
    %409 = arith.addf %406, %408 : vector<40x40xf32>
    %cst_137 = arith.constant dense<0xFF800000> : vector<40xf32>
    %410 = vector.multi_reduction <maximumf>, %409, %cst_137 [1] : vector<40x40xf32> to vector<40xf32>
    %411 = vector.shape_cast %410 : vector<40xf32> to vector<40x1xf32>
    %412 = vector.broadcast %411 : vector<40x1xf32> to vector<40x40xf32>
    %413 = arith.subf %409, %412 : vector<40x40xf32>
    %414 = math.exp %413 : vector<40x40xf32>
    %cst_138 = arith.constant dense<0.000000e+00> : vector<40xf32>
    %415 = vector.multi_reduction <add>, %414, %cst_138 [1] : vector<40x40xf32> to vector<40xf32>
    %416 = vector.shape_cast %415 : vector<40xf32> to vector<40x1xf32>
    %417 = tpu.reciprocal %416 {approx = true} : vector<40x1xf32> -> vector<40x1xf32>
    %418 = vector.broadcast %417 : vector<40x1xf32> to vector<40x40xf32>
    %419 = arith.mulf %414, %418 : vector<40x40xf32>
    %420 = arith.truncf %419 : vector<40x40xf32> to vector<40x40xbf16>
    %cst_139 = arith.constant dense<0.000000e+00> : vector<40x32xf32>
    %421 = tpu.matmul %420, %403, %cst_139 {dimension_numbers = #tpu.dot_dimension_numbers<[1], [0], [0], [1], [0, 0, 1, 1], [], []>} : vector<40x40xbf16>, vector<40x32xbf16>, vector<40x32xf32> -> vector<40x32xf32>
    %422 = arith.truncf %421 : vector<40x32xf32> to vector<40x32xbf16>
    %423 = vector.extract_strided_slice %365 {offsets = [32, 0], sizes = [32, 128], strides = [1, 1]} : vector<128x128xbf16> to vector<32x128xbf16>
    %cst_140 = arith.constant dense<0.000000e+00> : vector<40x128xf32>
    %424 = tpu.matmul %422, %423, %cst_140 {dimension_numbers = #tpu.dot_dimension_numbers<[1], [0], [0], [1], [0, 0, 1, 1], [], []>} : vector<40x32xbf16>, vector<32x128xbf16>, vector<40x128xf32> -> vector<40x128xf32>
    %425 = arith.addf %397, %424 : vector<40x128xf32>
    %426 = vector.extract_strided_slice %366 {offsets = [0, 64], sizes = [40, 32], strides = [1, 1]} : vector<40x384xf32> to vector<40x32xf32>
    %427 = arith.truncf %426 : vector<40x32xf32> to vector<40x32xbf16>
    %428 = vector.extract_strided_slice %366 {offsets = [0, 192], sizes = [40, 32], strides = [1, 1]} : vector<40x384xf32> to vector<40x32xf32>
    %429 = arith.truncf %428 : vector<40x32xf32> to vector<40x32xbf16>
    %430 = vector.extract_strided_slice %366 {offsets = [0, 320], sizes = [40, 32], strides = [1, 1]} : vector<40x384xf32> to vector<40x32xf32>
    %431 = arith.truncf %430 : vector<40x32xf32> to vector<40x32xbf16>
    %cst_141 = arith.constant dense<0.000000e+00> : vector<40x40xf32>
    %432 = tpu.matmul %427, %429, %cst_141 {dimension_numbers = #tpu.dot_dimension_numbers<[1], [1], [0], [0], [0, 0, 1, 0], [], []>} : vector<40x32xbf16>, vector<40x32xbf16>, vector<40x40xf32> -> vector<40x40xf32>
    %cst_142 = arith.constant 0.176776692 : f32
    %433 = vector.broadcast %cst_142 : f32 to vector<40x40xf32>
    %434 = arith.mulf %432, %433 : vector<40x40xf32>
    %435 = vector.shape_cast %368 : vector<40xf32> to vector<1x40xf32>
    %436 = vector.broadcast %435 : vector<1x40xf32> to vector<40x40xf32>
    %437 = arith.addf %434, %436 : vector<40x40xf32>
    %cst_143 = arith.constant dense<0xFF800000> : vector<40xf32>
    %438 = vector.multi_reduction <maximumf>, %437, %cst_143 [1] : vector<40x40xf32> to vector<40xf32>
    %439 = vector.shape_cast %438 : vector<40xf32> to vector<40x1xf32>
    %440 = vector.broadcast %439 : vector<40x1xf32> to vector<40x40xf32>
    %441 = arith.subf %437, %440 : vector<40x40xf32>
    %442 = math.exp %441 : vector<40x40xf32>
    %cst_144 = arith.constant dense<0.000000e+00> : vector<40xf32>
    %443 = vector.multi_reduction <add>, %442, %cst_144 [1] : vector<40x40xf32> to vector<40xf32>
    %444 = vector.shape_cast %443 : vector<40xf32> to vector<40x1xf32>
    %445 = tpu.reciprocal %444 {approx = true} : vector<40x1xf32> -> vector<40x1xf32>
    %446 = vector.broadcast %445 : vector<40x1xf32> to vector<40x40xf32>
    %447 = arith.mulf %442, %446 : vector<40x40xf32>
    %448 = arith.truncf %447 : vector<40x40xf32> to vector<40x40xbf16>
    %cst_145 = arith.constant dense<0.000000e+00> : vector<40x32xf32>
    %449 = tpu.matmul %448, %431, %cst_145 {dimension_numbers = #tpu.dot_dimension_numbers<[1], [0], [0], [1], [0, 0, 1, 1], [], []>} : vector<40x40xbf16>, vector<40x32xbf16>, vector<40x32xf32> -> vector<40x32xf32>
    %450 = arith.truncf %449 : vector<40x32xf32> to vector<40x32xbf16>
    %451 = vector.extract_strided_slice %365 {offsets = [64, 0], sizes = [32, 128], strides = [1, 1]} : vector<128x128xbf16> to vector<32x128xbf16>
    %cst_146 = arith.constant dense<0.000000e+00> : vector<40x128xf32>
    %452 = tpu.matmul %450, %451, %cst_146 {dimension_numbers = #tpu.dot_dimension_numbers<[1], [0], [0], [1], [0, 0, 1, 1], [], []>} : vector<40x32xbf16>, vector<32x128xbf16>, vector<40x128xf32> -> vector<40x128xf32>
    %453 = arith.addf %425, %452 : vector<40x128xf32>
    %454 = vector.extract_strided_slice %366 {offsets = [0, 96], sizes = [40, 32], strides = [1, 1]} : vector<40x384xf32> to vector<40x32xf32>
    %455 = arith.truncf %454 : vector<40x32xf32> to vector<40x32xbf16>
    %456 = vector.extract_strided_slice %366 {offsets = [0, 224], sizes = [40, 32], strides = [1, 1]} : vector<40x384xf32> to vector<40x32xf32>
    %457 = arith.truncf %456 : vector<40x32xf32> to vector<40x32xbf16>
    %458 = vector.extract_strided_slice %366 {offsets = [0, 352], sizes = [40, 32], strides = [1, 1]} : vector<40x384xf32> to vector<40x32xf32>
    %459 = arith.truncf %458 : vector<40x32xf32> to vector<40x32xbf16>
    %cst_147 = arith.constant dense<0.000000e+00> : vector<40x40xf32>
    %460 = tpu.matmul %455, %457, %cst_147 {dimension_numbers = #tpu.dot_dimension_numbers<[1], [1], [0], [0], [0, 0, 1, 0], [], []>} : vector<40x32xbf16>, vector<40x32xbf16>, vector<40x40xf32> -> vector<40x40xf32>
    %cst_148 = arith.constant 0.176776692 : f32
    %461 = vector.broadcast %cst_148 : f32 to vector<40x40xf32>
    %462 = arith.mulf %460, %461 : vector<40x40xf32>
    %463 = vector.shape_cast %368 : vector<40xf32> to vector<1x40xf32>
    %464 = vector.broadcast %463 : vector<1x40xf32> to vector<40x40xf32>
    %465 = arith.addf %462, %464 : vector<40x40xf32>
    %cst_149 = arith.constant dense<0xFF800000> : vector<40xf32>
    %466 = vector.multi_reduction <maximumf>, %465, %cst_149 [1] : vector<40x40xf32> to vector<40xf32>
    %467 = vector.shape_cast %466 : vector<40xf32> to vector<40x1xf32>
    %468 = vector.broadcast %467 : vector<40x1xf32> to vector<40x40xf32>
    %469 = arith.subf %465, %468 : vector<40x40xf32>
    %470 = math.exp %469 : vector<40x40xf32>
    %cst_150 = arith.constant dense<0.000000e+00> : vector<40xf32>
    %471 = vector.multi_reduction <add>, %470, %cst_150 [1] : vector<40x40xf32> to vector<40xf32>
    %472 = vector.shape_cast %471 : vector<40xf32> to vector<40x1xf32>
    %473 = tpu.reciprocal %472 {approx = true} : vector<40x1xf32> -> vector<40x1xf32>
    %474 = vector.broadcast %473 : vector<40x1xf32> to vector<40x40xf32>
    %475 = arith.mulf %470, %474 : vector<40x40xf32>
    %476 = arith.truncf %475 : vector<40x40xf32> to vector<40x40xbf16>
    %cst_151 = arith.constant dense<0.000000e+00> : vector<40x32xf32>
    %477 = tpu.matmul %476, %459, %cst_151 {dimension_numbers = #tpu.dot_dimension_numbers<[1], [0], [0], [1], [0, 0, 1, 1], [], []>} : vector<40x40xbf16>, vector<40x32xbf16>, vector<40x32xf32> -> vector<40x32xf32>
    %478 = arith.truncf %477 : vector<40x32xf32> to vector<40x32xbf16>
    %479 = vector.extract_strided_slice %365 {offsets = [96, 0], sizes = [32, 128], strides = [1, 1]} : vector<128x128xbf16> to vector<32x128xbf16>
    %cst_152 = arith.constant dense<0.000000e+00> : vector<40x128xf32>
    %480 = tpu.matmul %478, %479, %cst_152 {dimension_numbers = #tpu.dot_dimension_numbers<[1], [0], [0], [1], [0, 0, 1, 1], [], []>} : vector<40x32xbf16>, vector<32x128xbf16>, vector<40x128xf32> -> vector<40x128xf32>
    %481 = arith.addf %453, %480 : vector<40x128xf32>
    %482 = vector.extract_strided_slice %363 {offsets = [40, 0], sizes = [40, 384], strides = [1, 1]} : vector<80x384xf32> to vector<40x384xf32>
    %c1_153 = arith.constant 1 : index
    %c0_154 = arith.constant 0 : index
    %483 = vector.load %arg1[%c1_153, %c0_154] : memref<2x40xf32, #tpu.memory_space<vmem>>, vector<1x40xf32>
    %484 = vector.shape_cast %483 : vector<1x40xf32> to vector<40xf32>
    %cst_155 = arith.constant 0.000000e+00 : f32
    %485 = vector.broadcast %cst_155 : f32 to vector<40x128xf32>
    %486 = vector.extract_strided_slice %482 {offsets = [0, 0], sizes = [40, 32], strides = [1, 1]} : vector<40x384xf32> to vector<40x32xf32>
    %487 = arith.truncf %486 : vector<40x32xf32> to vector<40x32xbf16>
    %488 = vector.extract_strided_slice %482 {offsets = [0, 128], sizes = [40, 32], strides = [1, 1]} : vector<40x384xf32> to vector<40x32xf32>
    %489 = arith.truncf %488 : vector<40x32xf32> to vector<40x32xbf16>
    %490 = vector.extract_strided_slice %482 {offsets = [0, 256], sizes = [40, 32], strides = [1, 1]} : vector<40x384xf32> to vector<40x32xf32>
    %491 = arith.truncf %490 : vector<40x32xf32> to vector<40x32xbf16>
    %cst_156 = arith.constant dense<0.000000e+00> : vector<40x40xf32>
    %492 = tpu.matmul %487, %489, %cst_156 {dimension_numbers = #tpu.dot_dimension_numbers<[1], [1], [0], [0], [0, 0, 1, 0], [], []>} : vector<40x32xbf16>, vector<40x32xbf16>, vector<40x40xf32> -> vector<40x40xf32>
    %cst_157 = arith.constant 0.176776692 : f32
    %493 = vector.broadcast %cst_157 : f32 to vector<40x40xf32>
    %494 = arith.mulf %492, %493 : vector<40x40xf32>
    %495 = vector.shape_cast %484 : vector<40xf32> to vector<1x40xf32>
    %496 = vector.broadcast %495 : vector<1x40xf32> to vector<40x40xf32>
    %497 = arith.addf %494, %496 : vector<40x40xf32>
    %cst_158 = arith.constant dense<0xFF800000> : vector<40xf32>
    %498 = vector.multi_reduction <maximumf>, %497, %cst_158 [1] : vector<40x40xf32> to vector<40xf32>
    %499 = vector.shape_cast %498 : vector<40xf32> to vector<40x1xf32>
    %500 = vector.broadcast %499 : vector<40x1xf32> to vector<40x40xf32>
    %501 = arith.subf %497, %500 : vector<40x40xf32>
    %502 = math.exp %501 : vector<40x40xf32>
    %cst_159 = arith.constant dense<0.000000e+00> : vector<40xf32>
    %503 = vector.multi_reduction <add>, %502, %cst_159 [1] : vector<40x40xf32> to vector<40xf32>
    %504 = vector.shape_cast %503 : vector<40xf32> to vector<40x1xf32>
    %505 = tpu.reciprocal %504 {approx = true} : vector<40x1xf32> -> vector<40x1xf32>
    %506 = vector.broadcast %505 : vector<40x1xf32> to vector<40x40xf32>
    %507 = arith.mulf %502, %506 : vector<40x40xf32>
    %508 = arith.truncf %507 : vector<40x40xf32> to vector<40x40xbf16>
    %cst_160 = arith.constant dense<0.000000e+00> : vector<40x32xf32>
    %509 = tpu.matmul %508, %491, %cst_160 {dimension_numbers = #tpu.dot_dimension_numbers<[1], [0], [0], [1], [0, 0, 1, 1], [], []>} : vector<40x40xbf16>, vector<40x32xbf16>, vector<40x32xf32> -> vector<40x32xf32>
    %510 = arith.truncf %509 : vector<40x32xf32> to vector<40x32xbf16>
    %511 = vector.extract_strided_slice %365 {offsets = [0, 0], sizes = [32, 128], strides = [1, 1]} : vector<128x128xbf16> to vector<32x128xbf16>
    %cst_161 = arith.constant dense<0.000000e+00> : vector<40x128xf32>
    %512 = tpu.matmul %510, %511, %cst_161 {dimension_numbers = #tpu.dot_dimension_numbers<[1], [0], [0], [1], [0, 0, 1, 1], [], []>} : vector<40x32xbf16>, vector<32x128xbf16>, vector<40x128xf32> -> vector<40x128xf32>
    %513 = arith.addf %485, %512 : vector<40x128xf32>
    %514 = vector.extract_strided_slice %482 {offsets = [0, 32], sizes = [40, 32], strides = [1, 1]} : vector<40x384xf32> to vector<40x32xf32>
    %515 = arith.truncf %514 : vector<40x32xf32> to vector<40x32xbf16>
    %516 = vector.extract_strided_slice %482 {offsets = [0, 160], sizes = [40, 32], strides = [1, 1]} : vector<40x384xf32> to vector<40x32xf32>
    %517 = arith.truncf %516 : vector<40x32xf32> to vector<40x32xbf16>
    %518 = vector.extract_strided_slice %482 {offsets = [0, 288], sizes = [40, 32], strides = [1, 1]} : vector<40x384xf32> to vector<40x32xf32>
    %519 = arith.truncf %518 : vector<40x32xf32> to vector<40x32xbf16>
    %cst_162 = arith.constant dense<0.000000e+00> : vector<40x40xf32>
    %520 = tpu.matmul %515, %517, %cst_162 {dimension_numbers = #tpu.dot_dimension_numbers<[1], [1], [0], [0], [0, 0, 1, 0], [], []>} : vector<40x32xbf16>, vector<40x32xbf16>, vector<40x40xf32> -> vector<40x40xf32>
    %cst_163 = arith.constant 0.176776692 : f32
    %521 = vector.broadcast %cst_163 : f32 to vector<40x40xf32>
    %522 = arith.mulf %520, %521 : vector<40x40xf32>
    %523 = vector.shape_cast %484 : vector<40xf32> to vector<1x40xf32>
    %524 = vector.broadcast %523 : vector<1x40xf32> to vector<40x40xf32>
    %525 = arith.addf %522, %524 : vector<40x40xf32>
    %cst_164 = arith.constant dense<0xFF800000> : vector<40xf32>
    %526 = vector.multi_reduction <maximumf>, %525, %cst_164 [1] : vector<40x40xf32> to vector<40xf32>
    %527 = vector.shape_cast %526 : vector<40xf32> to vector<40x1xf32>
    %528 = vector.broadcast %527 : vector<40x1xf32> to vector<40x40xf32>
    %529 = arith.subf %525, %528 : vector<40x40xf32>
    %530 = math.exp %529 : vector<40x40xf32>
    %cst_165 = arith.constant dense<0.000000e+00> : vector<40xf32>
    %531 = vector.multi_reduction <add>, %530, %cst_165 [1] : vector<40x40xf32> to vector<40xf32>
    %532 = vector.shape_cast %531 : vector<40xf32> to vector<40x1xf32>
    %533 = tpu.reciprocal %532 {approx = true} : vector<40x1xf32> -> vector<40x1xf32>
    %534 = vector.broadcast %533 : vector<40x1xf32> to vector<40x40xf32>
    %535 = arith.mulf %530, %534 : vector<40x40xf32>
    %536 = arith.truncf %535 : vector<40x40xf32> to vector<40x40xbf16>
    %cst_166 = arith.constant dense<0.000000e+00> : vector<40x32xf32>
    %537 = tpu.matmul %536, %519, %cst_166 {dimension_numbers = #tpu.dot_dimension_numbers<[1], [0], [0], [1], [0, 0, 1, 1], [], []>} : vector<40x40xbf16>, vector<40x32xbf16>, vector<40x32xf32> -> vector<40x32xf32>
    %538 = arith.truncf %537 : vector<40x32xf32> to vector<40x32xbf16>
    %539 = vector.extract_strided_slice %365 {offsets = [32, 0], sizes = [32, 128], strides = [1, 1]} : vector<128x128xbf16> to vector<32x128xbf16>
    %cst_167 = arith.constant dense<0.000000e+00> : vector<40x128xf32>
    %540 = tpu.matmul %538, %539, %cst_167 {dimension_numbers = #tpu.dot_dimension_numbers<[1], [0], [0], [1], [0, 0, 1, 1], [], []>} : vector<40x32xbf16>, vector<32x128xbf16>, vector<40x128xf32> -> vector<40x128xf32>
    %541 = arith.addf %513, %540 : vector<40x128xf32>
    %542 = vector.extract_strided_slice %482 {offsets = [0, 64], sizes = [40, 32], strides = [1, 1]} : vector<40x384xf32> to vector<40x32xf32>
    %543 = arith.truncf %542 : vector<40x32xf32> to vector<40x32xbf16>
    %544 = vector.extract_strided_slice %482 {offsets = [0, 192], sizes = [40, 32], strides = [1, 1]} : vector<40x384xf32> to vector<40x32xf32>
    %545 = arith.truncf %544 : vector<40x32xf32> to vector<40x32xbf16>
    %546 = vector.extract_strided_slice %482 {offsets = [0, 320], sizes = [40, 32], strides = [1, 1]} : vector<40x384xf32> to vector<40x32xf32>
    %547 = arith.truncf %546 : vector<40x32xf32> to vector<40x32xbf16>
    %cst_168 = arith.constant dense<0.000000e+00> : vector<40x40xf32>
    %548 = tpu.matmul %543, %545, %cst_168 {dimension_numbers = #tpu.dot_dimension_numbers<[1], [1], [0], [0], [0, 0, 1, 0], [], []>} : vector<40x32xbf16>, vector<40x32xbf16>, vector<40x40xf32> -> vector<40x40xf32>
    %cst_169 = arith.constant 0.176776692 : f32
    %549 = vector.broadcast %cst_169 : f32 to vector<40x40xf32>
    %550 = arith.mulf %548, %549 : vector<40x40xf32>
    %551 = vector.shape_cast %484 : vector<40xf32> to vector<1x40xf32>
    %552 = vector.broadcast %551 : vector<1x40xf32> to vector<40x40xf32>
    %553 = arith.addf %550, %552 : vector<40x40xf32>
    %cst_170 = arith.constant dense<0xFF800000> : vector<40xf32>
    %554 = vector.multi_reduction <maximumf>, %553, %cst_170 [1] : vector<40x40xf32> to vector<40xf32>
    %555 = vector.shape_cast %554 : vector<40xf32> to vector<40x1xf32>
    %556 = vector.broadcast %555 : vector<40x1xf32> to vector<40x40xf32>
    %557 = arith.subf %553, %556 : vector<40x40xf32>
    %558 = math.exp %557 : vector<40x40xf32>
    %cst_171 = arith.constant dense<0.000000e+00> : vector<40xf32>
    %559 = vector.multi_reduction <add>, %558, %cst_171 [1] : vector<40x40xf32> to vector<40xf32>
    %560 = vector.shape_cast %559 : vector<40xf32> to vector<40x1xf32>
    %561 = tpu.reciprocal %560 {approx = true} : vector<40x1xf32> -> vector<40x1xf32>
    %562 = vector.broadcast %561 : vector<40x1xf32> to vector<40x40xf32>
    %563 = arith.mulf %558, %562 : vector<40x40xf32>
    %564 = arith.truncf %563 : vector<40x40xf32> to vector<40x40xbf16>
    %cst_172 = arith.constant dense<0.000000e+00> : vector<40x32xf32>
    %565 = tpu.matmul %564, %547, %cst_172 {dimension_numbers = #tpu.dot_dimension_numbers<[1], [0], [0], [1], [0, 0, 1, 1], [], []>} : vector<40x40xbf16>, vector<40x32xbf16>, vector<40x32xf32> -> vector<40x32xf32>
    %566 = arith.truncf %565 : vector<40x32xf32> to vector<40x32xbf16>
    %567 = vector.extract_strided_slice %365 {offsets = [64, 0], sizes = [32, 128], strides = [1, 1]} : vector<128x128xbf16> to vector<32x128xbf16>
    %cst_173 = arith.constant dense<0.000000e+00> : vector<40x128xf32>
    %568 = tpu.matmul %566, %567, %cst_173 {dimension_numbers = #tpu.dot_dimension_numbers<[1], [0], [0], [1], [0, 0, 1, 1], [], []>} : vector<40x32xbf16>, vector<32x128xbf16>, vector<40x128xf32> -> vector<40x128xf32>
    %569 = arith.addf %541, %568 : vector<40x128xf32>
    %570 = vector.extract_strided_slice %482 {offsets = [0, 96], sizes = [40, 32], strides = [1, 1]} : vector<40x384xf32> to vector<40x32xf32>
    %571 = arith.truncf %570 : vector<40x32xf32> to vector<40x32xbf16>
    %572 = vector.extract_strided_slice %482 {offsets = [0, 224], sizes = [40, 32], strides = [1, 1]} : vector<40x384xf32> to vector<40x32xf32>
    %573 = arith.truncf %572 : vector<40x32xf32> to vector<40x32xbf16>
    %574 = vector.extract_strided_slice %482 {offsets = [0, 352], sizes = [40, 32], strides = [1, 1]} : vector<40x384xf32> to vector<40x32xf32>
    %575 = arith.truncf %574 : vector<40x32xf32> to vector<40x32xbf16>
    %cst_174 = arith.constant dense<0.000000e+00> : vector<40x40xf32>
    %576 = tpu.matmul %571, %573, %cst_174 {dimension_numbers = #tpu.dot_dimension_numbers<[1], [1], [0], [0], [0, 0, 1, 0], [], []>} : vector<40x32xbf16>, vector<40x32xbf16>, vector<40x40xf32> -> vector<40x40xf32>
    %cst_175 = arith.constant 0.176776692 : f32
    %577 = vector.broadcast %cst_175 : f32 to vector<40x40xf32>
    %578 = arith.mulf %576, %577 : vector<40x40xf32>
    %579 = vector.shape_cast %484 : vector<40xf32> to vector<1x40xf32>
    %580 = vector.broadcast %579 : vector<1x40xf32> to vector<40x40xf32>
    %581 = arith.addf %578, %580 : vector<40x40xf32>
    %cst_176 = arith.constant dense<0xFF800000> : vector<40xf32>
    %582 = vector.multi_reduction <maximumf>, %581, %cst_176 [1] : vector<40x40xf32> to vector<40xf32>
    %583 = vector.shape_cast %582 : vector<40xf32> to vector<40x1xf32>
    %584 = vector.broadcast %583 : vector<40x1xf32> to vector<40x40xf32>
    %585 = arith.subf %581, %584 : vector<40x40xf32>
    %586 = math.exp %585 : vector<40x40xf32>
    %cst_177 = arith.constant dense<0.000000e+00> : vector<40xf32>
    %587 = vector.multi_reduction <add>, %586, %cst_177 [1] : vector<40x40xf32> to vector<40xf32>
    %588 = vector.shape_cast %587 : vector<40xf32> to vector<40x1xf32>
    %589 = tpu.reciprocal %588 {approx = true} : vector<40x1xf32> -> vector<40x1xf32>
    %590 = vector.broadcast %589 : vector<40x1xf32> to vector<40x40xf32>
    %591 = arith.mulf %586, %590 : vector<40x40xf32>
    %592 = arith.truncf %591 : vector<40x40xf32> to vector<40x40xbf16>
    %cst_178 = arith.constant dense<0.000000e+00> : vector<40x32xf32>
    %593 = tpu.matmul %592, %575, %cst_178 {dimension_numbers = #tpu.dot_dimension_numbers<[1], [0], [0], [1], [0, 0, 1, 1], [], []>} : vector<40x40xbf16>, vector<40x32xbf16>, vector<40x32xf32> -> vector<40x32xf32>
    %594 = arith.truncf %593 : vector<40x32xf32> to vector<40x32xbf16>
    %595 = vector.extract_strided_slice %365 {offsets = [96, 0], sizes = [32, 128], strides = [1, 1]} : vector<128x128xbf16> to vector<32x128xbf16>
    %cst_179 = arith.constant dense<0.000000e+00> : vector<40x128xf32>
    %596 = tpu.matmul %594, %595, %cst_179 {dimension_numbers = #tpu.dot_dimension_numbers<[1], [0], [0], [1], [0, 0, 1, 1], [], []>} : vector<40x32xbf16>, vector<32x128xbf16>, vector<40x128xf32> -> vector<40x128xf32>
    %597 = arith.addf %569, %596 : vector<40x128xf32>
    %598 = tpu.concatenate %481, %597 in 0 : vector<40x128xf32>, vector<40x128xf32> -> vector<80x128xf32>
    %c1_180 = arith.constant 1 : index
    %c0_181 = arith.constant 0 : index
    %c0_182 = arith.constant 0 : index
    %599 = vector.load %arg7[%c1_180, %c0_181, %c0_182] : memref<2x1x128xf32, #tpu.memory_space<vmem>>, vector<1x1x128xf32>
    %600 = vector.shape_cast %599 : vector<1x1x128xf32> to vector<1x128xf32>
    %601 = vector.broadcast %600 : vector<1x128xf32> to vector<80x128xf32>
    %602 = arith.addf %598, %601 : vector<80x128xf32>
    %603 = arith.addf %355, %602 : vector<80x128xf32>
    %c1_183 = arith.constant 1 : index
    %c0_184 = arith.constant 0 : index
    %c0_185 = arith.constant 0 : index
    %604 = vector.load %arg8[%c1_183, %c0_184, %c0_185] : memref<2x1x128xf32, #tpu.memory_space<vmem>>, vector<1x1x128xf32>
    %605 = vector.shape_cast %604 : vector<1x1x128xf32> to vector<1x128xf32>
    %c1_186 = arith.constant 1 : index
    %c0_187 = arith.constant 0 : index
    %c0_188 = arith.constant 0 : index
    %606 = vector.load %arg9[%c1_186, %c0_187, %c0_188] : memref<2x1x128xf32, #tpu.memory_space<vmem>>, vector<1x1x128xf32>
    %607 = vector.shape_cast %606 : vector<1x1x128xf32> to vector<1x128xf32>
    %cst_189 = arith.constant dense<0.000000e+00> : vector<80xf32>
    %608 = vector.multi_reduction <add>, %603, %cst_189 [1] : vector<80x128xf32> to vector<80xf32>
    %609 = vector.shape_cast %608 : vector<80xf32> to vector<80x1xf32>
    %cst_190 = arith.constant 1.280000e+02 : f32
    %610 = vector.broadcast %cst_190 : f32 to vector<80x1xf32>
    %611 = arith.divf %609, %610 : vector<80x1xf32>
    %612 = vector.broadcast %611 : vector<80x1xf32> to vector<80x128xf32>
    %613 = arith.subf %603, %612 : vector<80x128xf32>
    %614 = arith.mulf %613, %613 : vector<80x128xf32>
    %cst_191 = arith.constant dense<0.000000e+00> : vector<80xf32>
    %615 = vector.multi_reduction <add>, %614, %cst_191 [1] : vector<80x128xf32> to vector<80xf32>
    %616 = vector.shape_cast %615 : vector<80xf32> to vector<80x1xf32>
    %cst_192 = arith.constant 1.280000e+02 : f32
    %617 = vector.broadcast %cst_192 : f32 to vector<80x1xf32>
    %618 = arith.divf %616, %617 : vector<80x1xf32>
    %619 = vector.broadcast %611 : vector<80x1xf32> to vector<80x128xf32>
    %620 = arith.subf %603, %619 : vector<80x128xf32>
    %cst_193 = arith.constant 9.99999996E-13 : f32
    %621 = vector.broadcast %cst_193 : f32 to vector<80x1xf32>
    %622 = arith.addf %618, %621 : vector<80x1xf32>
    %623 = math.rsqrt %622 : vector<80x1xf32>
    %624 = vector.broadcast %623 : vector<80x1xf32> to vector<80x128xf32>
    %625 = arith.mulf %620, %624 : vector<80x128xf32>
    %626 = vector.broadcast %605 : vector<1x128xf32> to vector<80x128xf32>
    %627 = arith.mulf %625, %626 : vector<80x128xf32>
    %628 = vector.broadcast %607 : vector<1x128xf32> to vector<80x128xf32>
    %629 = arith.addf %627, %628 : vector<80x128xf32>
    %630 = arith.truncf %629 : vector<80x128xf32> to vector<80x128xbf16>
    %c1_194 = arith.constant 1 : index
    %c0_195 = arith.constant 0 : index
    %c0_196 = arith.constant 0 : index
    %631 = vector.load %arg10[%c1_194, %c0_195, %c0_196] : memref<2x128x256xbf16, #tpu.memory_space<vmem>>, vector<1x128x256xbf16>
    %632 = vector.shape_cast %631 : vector<1x128x256xbf16> to vector<128x256xbf16>
    %cst_197 = arith.constant dense<0.000000e+00> : vector<80x256xf32>
    %633 = tpu.matmul %630, %632, %cst_197 {dimension_numbers = #tpu.dot_dimension_numbers<[1], [0], [0], [1], [0, 0, 1, 1], [], []>} : vector<80x128xbf16>, vector<128x256xbf16>, vector<80x256xf32> -> vector<80x256xf32>
    %c1_198 = arith.constant 1 : index
    %c0_199 = arith.constant 0 : index
    %c0_200 = arith.constant 0 : index
    %634 = vector.load %arg11[%c1_198, %c0_199, %c0_200] : memref<2x1x256xf32, #tpu.memory_space<vmem>>, vector<1x1x256xf32>
    %635 = vector.shape_cast %634 : vector<1x1x256xf32> to vector<1x256xf32>
    %636 = vector.broadcast %635 : vector<1x256xf32> to vector<80x256xf32>
    %637 = arith.addf %633, %636 : vector<80x256xf32>
    %cst_201 = arith.constant 5.000000e-01 : f32
    %638 = vector.broadcast %cst_201 : f32 to vector<80x256xf32>
    %639 = arith.mulf %638, %637 : vector<80x256xf32>
    %cst_202 = arith.constant 4.471500e-02 : f32
    %640 = vector.broadcast %cst_202 : f32 to vector<80x256xf32>
    %641 = arith.mulf %640, %637 : vector<80x256xf32>
    %642 = arith.mulf %641, %637 : vector<80x256xf32>
    %643 = arith.mulf %642, %637 : vector<80x256xf32>
    %644 = arith.addf %637, %643 : vector<80x256xf32>
    %cst_203 = arith.constant 0.797884583 : f32
    %645 = vector.broadcast %cst_203 : f32 to vector<80x256xf32>
    %646 = arith.mulf %645, %644 : vector<80x256xf32>
    %647 = math.tanh %646 : vector<80x256xf32>
    %cst_204 = arith.constant 1.000000e+00 : f32
    %648 = vector.broadcast %cst_204 : f32 to vector<80x256xf32>
    %649 = arith.addf %648, %647 : vector<80x256xf32>
    %650 = arith.mulf %639, %649 : vector<80x256xf32>
    %651 = arith.truncf %650 : vector<80x256xf32> to vector<80x256xbf16>
    %c1_205 = arith.constant 1 : index
    %c0_206 = arith.constant 0 : index
    %c0_207 = arith.constant 0 : index
    %652 = vector.load %arg12[%c1_205, %c0_206, %c0_207] : memref<2x256x128xbf16, #tpu.memory_space<vmem>>, vector<1x256x128xbf16>
    %653 = vector.shape_cast %652 : vector<1x256x128xbf16> to vector<256x128xbf16>
    %cst_208 = arith.constant dense<0.000000e+00> : vector<80x128xf32>
    %654 = tpu.matmul %651, %653, %cst_208 {dimension_numbers = #tpu.dot_dimension_numbers<[1], [0], [0], [1], [0, 0, 1, 1], [], []>} : vector<80x256xbf16>, vector<256x128xbf16>, vector<80x128xf32> -> vector<80x128xf32>
    %c1_209 = arith.constant 1 : index
    %c0_210 = arith.constant 0 : index
    %c0_211 = arith.constant 0 : index
    %655 = vector.load %arg13[%c1_209, %c0_210, %c0_211] : memref<2x1x128xf32, #tpu.memory_space<vmem>>, vector<1x1x128xf32>
    %656 = vector.shape_cast %655 : vector<1x1x128xf32> to vector<1x128xf32>
    %657 = vector.broadcast %656 : vector<1x128xf32> to vector<80x128xf32>
    %658 = arith.addf %654, %657 : vector<80x128xf32>
    %659 = arith.addf %629, %658 : vector<80x128xf32>
    %c1_212 = arith.constant 1 : index
    %c0_213 = arith.constant 0 : index
    %c0_214 = arith.constant 0 : index
    %660 = vector.load %arg14[%c1_212, %c0_213, %c0_214] : memref<2x1x128xf32, #tpu.memory_space<vmem>>, vector<1x1x128xf32>
    %661 = vector.shape_cast %660 : vector<1x1x128xf32> to vector<1x128xf32>
    %c1_215 = arith.constant 1 : index
    %c0_216 = arith.constant 0 : index
    %c0_217 = arith.constant 0 : index
    %662 = vector.load %arg15[%c1_215, %c0_216, %c0_217] : memref<2x1x128xf32, #tpu.memory_space<vmem>>, vector<1x1x128xf32>
    %663 = vector.shape_cast %662 : vector<1x1x128xf32> to vector<1x128xf32>
    %cst_218 = arith.constant dense<0.000000e+00> : vector<80xf32>
    %664 = vector.multi_reduction <add>, %659, %cst_218 [1] : vector<80x128xf32> to vector<80xf32>
    %665 = vector.shape_cast %664 : vector<80xf32> to vector<80x1xf32>
    %cst_219 = arith.constant 1.280000e+02 : f32
    %666 = vector.broadcast %cst_219 : f32 to vector<80x1xf32>
    %667 = arith.divf %665, %666 : vector<80x1xf32>
    %668 = vector.broadcast %667 : vector<80x1xf32> to vector<80x128xf32>
    %669 = arith.subf %659, %668 : vector<80x128xf32>
    %670 = arith.mulf %669, %669 : vector<80x128xf32>
    %cst_220 = arith.constant dense<0.000000e+00> : vector<80xf32>
    %671 = vector.multi_reduction <add>, %670, %cst_220 [1] : vector<80x128xf32> to vector<80xf32>
    %672 = vector.shape_cast %671 : vector<80xf32> to vector<80x1xf32>
    %cst_221 = arith.constant 1.280000e+02 : f32
    %673 = vector.broadcast %cst_221 : f32 to vector<80x1xf32>
    %674 = arith.divf %672, %673 : vector<80x1xf32>
    %675 = vector.broadcast %667 : vector<80x1xf32> to vector<80x128xf32>
    %676 = arith.subf %659, %675 : vector<80x128xf32>
    %cst_222 = arith.constant 9.99999996E-13 : f32
    %677 = vector.broadcast %cst_222 : f32 to vector<80x1xf32>
    %678 = arith.addf %674, %677 : vector<80x1xf32>
    %679 = math.rsqrt %678 : vector<80x1xf32>
    %680 = vector.broadcast %679 : vector<80x1xf32> to vector<80x128xf32>
    %681 = arith.mulf %676, %680 : vector<80x128xf32>
    %682 = vector.broadcast %661 : vector<1x128xf32> to vector<80x128xf32>
    %683 = arith.mulf %681, %682 : vector<80x128xf32>
    %684 = vector.broadcast %663 : vector<1x128xf32> to vector<80x128xf32>
    %685 = arith.addf %683, %684 : vector<80x128xf32>
    %c0_223 = arith.constant 0 : index
    %c0_224 = arith.constant 0 : index
    %686 = vector.load %arg18[%c0_223, %c0_224] : memref<40x14xf32, #tpu.memory_space<vmem>>, vector<40x14xf32>
    %687 = vector.extract_strided_slice %685 {offsets = [0, 0], sizes = [40, 128], strides = [1, 1]} : vector<80x128xf32> to vector<40x128xf32>
    %688 = arith.truncf %687 : vector<40x128xf32> to vector<40x128xbf16>
    %c0_225 = arith.constant 0 : index
    %c0_226 = arith.constant 0 : index
    %689 = vector.load %arg16[%c0_225, %c0_226] : memref<128x14xbf16, #tpu.memory_space<vmem>>, vector<128x14xbf16>
    %cst_227 = arith.constant dense<0.000000e+00> : vector<40x14xf32>
    %690 = tpu.matmul %688, %689, %cst_227 {dimension_numbers = #tpu.dot_dimension_numbers<[1], [0], [0], [1], [0, 0, 1, 1], [], []>} : vector<40x128xbf16>, vector<128x14xbf16>, vector<40x14xf32> -> vector<40x14xf32>
    %c0_228 = arith.constant 0 : index
    %c0_229 = arith.constant 0 : index
    %691 = vector.load %arg17[%c0_228, %c0_229] : memref<1x14xf32, #tpu.memory_space<vmem>>, vector<1x14xf32>
    %692 = vector.broadcast %691 : vector<1x14xf32> to vector<40x14xf32>
    %693 = arith.addf %690, %692 : vector<40x14xf32>
    %694 = arith.mulf %693, %686 : vector<40x14xf32>
    %cst_230 = arith.constant dense<0.000000e+00> : vector<14xf32>
    %695 = vector.multi_reduction <add>, %694, %cst_230 [0] : vector<40x14xf32> to vector<14xf32>
    %696 = vector.shape_cast %695 : vector<14xf32> to vector<1x14xf32>
    %697 = vector.extract_strided_slice %696 {offsets = [0, 0], sizes = [1, 7], strides = [1, 1]} : vector<1x14xf32> to vector<1x7xf32>
    %cst_231 = arith.constant dense<0xFF800000> : vector<1xf32>
    %698 = vector.multi_reduction <maximumf>, %697, %cst_231 [1] : vector<1x7xf32> to vector<1xf32>
    %699 = vector.shape_cast %698 : vector<1xf32> to vector<1x1xf32>
    %700 = vector.broadcast %699 : vector<1x1xf32> to vector<1x7xf32>
    %701 = arith.subf %697, %700 : vector<1x7xf32>
    %702 = math.exp %701 : vector<1x7xf32>
    %cst_232 = arith.constant dense<0.000000e+00> : vector<1xf32>
    %703 = vector.multi_reduction <add>, %702, %cst_232 [1] : vector<1x7xf32> to vector<1xf32>
    %704 = vector.shape_cast %703 : vector<1xf32> to vector<1x1xf32>
    %705 = math.log %704 : vector<1x1xf32>
    %706 = vector.broadcast %705 : vector<1x1xf32> to vector<1x7xf32>
    %707 = arith.subf %701, %706 : vector<1x7xf32>
    %708 = vector.extract_strided_slice %696 {offsets = [0, 7], sizes = [1, 7], strides = [1, 1]} : vector<1x14xf32> to vector<1x7xf32>
    %cst_233 = arith.constant dense<0xFF800000> : vector<1xf32>
    %709 = vector.multi_reduction <maximumf>, %708, %cst_233 [1] : vector<1x7xf32> to vector<1xf32>
    %710 = vector.shape_cast %709 : vector<1xf32> to vector<1x1xf32>
    %711 = vector.broadcast %710 : vector<1x1xf32> to vector<1x7xf32>
    %712 = arith.subf %708, %711 : vector<1x7xf32>
    %713 = math.exp %712 : vector<1x7xf32>
    %cst_234 = arith.constant dense<0.000000e+00> : vector<1xf32>
    %714 = vector.multi_reduction <add>, %713, %cst_234 [1] : vector<1x7xf32> to vector<1xf32>
    %715 = vector.shape_cast %714 : vector<1xf32> to vector<1x1xf32>
    %716 = math.log %715 : vector<1x1xf32>
    %717 = vector.broadcast %716 : vector<1x1xf32> to vector<1x7xf32>
    %718 = arith.subf %712, %717 : vector<1x7xf32>
    %719 = tpu.concatenate %707, %718 in 1 : vector<1x7xf32>, vector<1x7xf32> -> vector<1x14xf32>
    %720 = vector.extract_strided_slice %685 {offsets = [40, 0], sizes = [40, 128], strides = [1, 1]} : vector<80x128xf32> to vector<40x128xf32>
    %721 = arith.truncf %720 : vector<40x128xf32> to vector<40x128xbf16>
    %c0_235 = arith.constant 0 : index
    %c0_236 = arith.constant 0 : index
    %722 = vector.load %arg16[%c0_235, %c0_236] : memref<128x14xbf16, #tpu.memory_space<vmem>>, vector<128x14xbf16>
    %cst_237 = arith.constant dense<0.000000e+00> : vector<40x14xf32>
    %723 = tpu.matmul %721, %722, %cst_237 {dimension_numbers = #tpu.dot_dimension_numbers<[1], [0], [0], [1], [0, 0, 1, 1], [], []>} : vector<40x128xbf16>, vector<128x14xbf16>, vector<40x14xf32> -> vector<40x14xf32>
    %c0_238 = arith.constant 0 : index
    %c0_239 = arith.constant 0 : index
    %724 = vector.load %arg17[%c0_238, %c0_239] : memref<1x14xf32, #tpu.memory_space<vmem>>, vector<1x14xf32>
    %725 = vector.broadcast %724 : vector<1x14xf32> to vector<40x14xf32>
    %726 = arith.addf %723, %725 : vector<40x14xf32>
    %727 = arith.mulf %726, %686 : vector<40x14xf32>
    %cst_240 = arith.constant dense<0.000000e+00> : vector<14xf32>
    %728 = vector.multi_reduction <add>, %727, %cst_240 [0] : vector<40x14xf32> to vector<14xf32>
    %729 = vector.shape_cast %728 : vector<14xf32> to vector<1x14xf32>
    %730 = vector.extract_strided_slice %729 {offsets = [0, 0], sizes = [1, 7], strides = [1, 1]} : vector<1x14xf32> to vector<1x7xf32>
    %cst_241 = arith.constant dense<0xFF800000> : vector<1xf32>
    %731 = vector.multi_reduction <maximumf>, %730, %cst_241 [1] : vector<1x7xf32> to vector<1xf32>
    %732 = vector.shape_cast %731 : vector<1xf32> to vector<1x1xf32>
    %733 = vector.broadcast %732 : vector<1x1xf32> to vector<1x7xf32>
    %734 = arith.subf %730, %733 : vector<1x7xf32>
    %735 = math.exp %734 : vector<1x7xf32>
    %cst_242 = arith.constant dense<0.000000e+00> : vector<1xf32>
    %736 = vector.multi_reduction <add>, %735, %cst_242 [1] : vector<1x7xf32> to vector<1xf32>
    %737 = vector.shape_cast %736 : vector<1xf32> to vector<1x1xf32>
    %738 = math.log %737 : vector<1x1xf32>
    %739 = vector.broadcast %738 : vector<1x1xf32> to vector<1x7xf32>
    %740 = arith.subf %734, %739 : vector<1x7xf32>
    %741 = vector.extract_strided_slice %729 {offsets = [0, 7], sizes = [1, 7], strides = [1, 1]} : vector<1x14xf32> to vector<1x7xf32>
    %cst_243 = arith.constant dense<0xFF800000> : vector<1xf32>
    %742 = vector.multi_reduction <maximumf>, %741, %cst_243 [1] : vector<1x7xf32> to vector<1xf32>
    %743 = vector.shape_cast %742 : vector<1xf32> to vector<1x1xf32>
    %744 = vector.broadcast %743 : vector<1x1xf32> to vector<1x7xf32>
    %745 = arith.subf %741, %744 : vector<1x7xf32>
    %746 = math.exp %745 : vector<1x7xf32>
    %cst_244 = arith.constant dense<0.000000e+00> : vector<1xf32>
    %747 = vector.multi_reduction <add>, %746, %cst_244 [1] : vector<1x7xf32> to vector<1xf32>
    %748 = vector.shape_cast %747 : vector<1xf32> to vector<1x1xf32>
    %749 = math.log %748 : vector<1x1xf32>
    %750 = vector.broadcast %749 : vector<1x1xf32> to vector<1x7xf32>
    %751 = arith.subf %745, %750 : vector<1x7xf32>
    %752 = tpu.concatenate %740, %751 in 1 : vector<1x7xf32>, vector<1x7xf32> -> vector<1x14xf32>
    %753 = tpu.concatenate %719, %752 in 0 : vector<1x14xf32>, vector<1x14xf32> -> vector<2x14xf32>
    %c0_245 = arith.constant 0 : index
    %c0_246 = arith.constant 0 : index
    %754 = vector.load %arg19[%c0_245, %c0_246] : memref<2x14xf32, #tpu.memory_space<vmem>>, vector<2x14xf32>
    tpu.vector_store %arg19[%c0_245, %c0_246], %753 {strides = array<i32>} : memref<2x14xf32, #tpu.memory_space<vmem>>, vector<2x14xf32>,
    return
  }
}

</mosaic_0001>

<bundles_post_ra>
// kernel: bert_mrc_forward.1
= control target key start
LH: loop header
LB: loop body
LE: loop exit
PB: predicated region body
PF: predicated region fallthrough
CT: control target
= control target key end

     0   :  { %v13912_v7 = vmov 0.0   ;;  %v13910_v59 = vmov 0   ;;  %vm10472_vm0 = vmmov 0   ;;  %vm582_vm1 = vcmask 261120   ;;  %s10473_s25 = smov 96   ;;  %s10474_s27 = smov 64   ;;  %s13887_s0 = inlined_call_operand.vmem [shape: f32[2,40,128], index: 0, kind: input, shape index: {}]   ;;  %s13888_s4 = inlined_call_operand.vmem [shape: bf16[2,128,384], index: 4, kind: input, shape index: {}]   ;;  %s13889_s2 = inlined_call_operand.vmem [shape: f32[1,128], index: 2, kind: input, shape index: {}]   ;;  %s13890_s3 = inlined_call_operand.vmem [shape: f32[1,128], index: 3, kind: input, shape index: {}]   ;;  %s13891_s5 = inlined_call_operand.vmem [shape: f32[2,1,384], index: 5, kind: input, shape index: {}]   ;;  %s13892_s1 = inlined_call_operand.vmem [shape: f32[2,40], index: 1, kind: input, shape index: {}]   ;;  %s13893_s6 = inlined_call_operand.vmem [shape: bf16[2,128,128], index: 6, kind: input, shape index: {}]   ;;  %s13894_s7 = inlined_call_operand.vmem [shape: f32[2,1,128], index: 7, kind: input, shape index: {}]   ;;  %s13895_s10 = inlined_call_operand.vmem [shape: bf16[2,128,256], index: 10, kind: input, shape index: {}]   ;;  %s13896_s8 = inlined_call_operand.vmem [shape: f32[2,1,128], index: 8, kind: input, shape index: {}]   ;;  %s13897_s9 = inlined_call_operand.vmem [shape: f32[2,1,128], index: 9, kind: input, shape index: {}]   ;;  %s13898_s12 = inlined_call_operand.vmem [shape: bf16[2,256,128], index: 12, kind: input, shape index: {}]   ;;  %s13899_s11 = inlined_call_operand.vmem [shape: f32[2,1,256], index: 11, kind: input, shape index: {}]   ;;  %s13900_s13 = inlined_call_operand.vmem [shape: f32[2,1,128], index: 13, kind: input, shape index: {}]   ;;  %s13901_s14 = inlined_call_operand.vmem [shape: f32[2,1,128], index: 14, kind: input, shape index: {}]   ;;  %s13902_s15 = inlined_call_operand.vmem [shape: f32[2,1,128], index: 15, kind: input, shape index: {}]   ;;  %s13903_s16 = inlined_call_operand.vmem [shape: bf16[128,14], index: 16, kind: input, shape index: {}]   ;;  %s13904_s17 = inlined_call_operand.vmem [shape: f32[1,14], index: 17, kind: input, shape index: {}]   ;;  %s13905_s18 = inlined_call_operand.vmem [shape: f32[40,14], index: 18, kind: input, shape index: {}]   ;;  %s13906_s19 = inlined_call_operand.vmem [shape: f32[2,14], index: 19, kind: output, shape index: {}]  }
   0x1   :  { %13914 = sst [smem:[#allocation2_spill]] %s13887_s0  ;;  %8804 = vmatprep.subr.bf16.mxu1 %v13912_v7  ;;  %432 = vmatprep.mubr.bf16.mxu0 %v13910_v59  ;;  %vm739_vm2 = vcmask 1043456   ;;  %vm671_vm3 = vcmask 326656   ;;  %s10475_s23 = smov 32   ;;  %vm7825_vm4 = vcmask 113664   ;;  %vm7854_vm5 = vcmask 113720  }
   0x2   :  { %13915 = sst [smem:[#allocation3_spill]] %s13888_s4  ;;  %s13918_s20 = sld [smem:[#allocation2_spill]]  ;;  %8820 = vmatprep.mubr.msk.bf16.mxu1 %vm10472_vm0, %v13912_v7  ;;  %vm7841_vm6 = vcmask 56320   ;;  %vm7983_vm7 = vcmask 1040384   ;;  %vm7985_vm8 = vcmask 107520  }
   0x3   :  { %13916 = sst [smem:[#allocation4_spill]] %s13889_s2  ;;  %s13919_s0 = sld [smem:[#allocation3_spill]] }
   0x4   :  { %13917 = sst [smem:[#allocation5_spill]] %s13890_s3  ;;  %s13920_s21 = sld [smem:[#allocation4_spill]] }
   0x5   :  { %s13921_s2 = sld [smem:[#allocation5_spill]] }
   0x8   :  { %v63_v0 = vld [vmem:[%s13918_s20] sm:$0xff]  ;;  %v65_v1 = vld [vmem:[%s13918_s20 + $0x10] sm:$0xff]  ;;  %v64_v2 = vld [vmem:[%s13918_s20 + $0x8] sm:$0xff] }
   0x9   :  { %75 = vadd.xlane.f32.xlu0 %v63_v0  ;;  %79 = vadd.xlane.f32.xlu1 %v65_v1  ;;  %v66_v3 = vld [vmem:[%s13918_s20 + $0x18] sm:$0xff]  ;;  %v67_v4 = vld [vmem:[%s13918_s20 + $0x20] sm:$0xff]  ;;  %v68_v5 = vld [vmem:[%s13918_s20 + $0x28] sm:$0xff] }
   0xa   :  { %v9771_v6 = vld [vmem:[%s13919_s0 + $0x4] ss:$12 sps:$4 sm:$0xff]   ;;  %v9773_v8 = vld [vmem:[%s13919_s0] ss:$12 sps:$4 sm:$0xff]   ;;  %v9774_v9 = vld [vmem:[%s13919_s0 + $0x8] ss:$12 sps:$4 sm:$0xff]  }
   0xb   :  { %400 = vmatprep.subr.bf16.mxu0 %v9771_v6  ;;  %v9775_v10 = vld [vmem:[%s13919_s0 + $0x1c] ss:$12 sps:$4 sm:$0xff]   ;;  %8805 = vmatpush3.bf16.msra.mxu1 %v9774_v9  ;;  %v10636_v35 = vld [vmem:[%s13918_s20 + $0x30] sm:$0xff]  ;;  %v9777_v36 = vld [vmem:[%s13919_s0 + $0x18] ss:$12 sps:$4 sm:$0xff]  }
   0xc   :  { %401 = vmatpush1.bf16.msra.mxu0 %v9773_v8  ;;  %8806 = vmatprep.subr.bf16.mxu1 %v13912_v7  ;;  %v9778_v37 = vld [vmem:[%s13919_s0 + $0x20] ss:$12 sps:$4 sm:$0xff]   ;;  %v10648_v38 = vld [vmem:[%s13918_s20 + $0x38] sm:$0xff]  ;;  %v9785_v45 = vld [vmem:[%s13919_s0 + $0x48] ss:$12 sps:$4 sm:$0xff]  }
   0xd   :  { %77 = vadd.xlane.f32.xlu0 %v64_v2  ;;  %81 = vadd.xlane.f32.xlu1 %v66_v3  ;;  %v10653_v39 = vld [vmem:[%s13918_s20 + $0x40] sm:$0xff]  ;;  %v10664_v41 = vld [vmem:[%s13918_s20 + $0x48] sm:$0xff]  ;;  %v9781_v42 = vld [vmem:[%s13919_s0 + $0x30] ss:$12 sps:$4 sm:$0xff]  }
   0xe   :  { %402 = vmatprep.subr.bf16.mxu0 %v9775_v10  ;;  %v9779_v40 = vld [vmem:[%s13919_s0 + $0x34] ss:$12 sps:$4 sm:$0xff]   ;;  %v9782_v43 = vld [vmem:[%s13919_s0 + $0x38] ss:$12 sps:$4 sm:$0xff]   ;;  %v9786_v46 = vld [vmem:[%s13919_s0 + $0x50] ss:$12 sps:$4 sm:$0xff]  }
   0xf   :  { %8807 = vmatpush3.bf16.msra.mxu1 %v9778_v37  ;;  %v9783_v44 = vld [vmem:[%s13919_s0 + $0x4c] ss:$12 sps:$4 sm:$0xff]   ;;  %v9787_v47 = vld [vmem:[%s13919_s0 + $0x64] ss:$12 sps:$4 sm:$0xff]   ;;  %v9790_v49 = vld [vmem:[%s13919_s0 + $0x68] ss:$12 sps:$4 sm:$0xff]  }
  0x10   :  { %403 = vmatpush1.bf16.msra.mxu0 %v9777_v36  ;;  %8808 = vmatprep.subr.bf16.mxu1 %v13912_v7  ;;  %v9789_v48 = vld [vmem:[%s13919_s0 + $0x60] ss:$12 sps:$4 sm:$0xff]   ;;  %v9791_v50 = vld [vmem:[%s13919_s0 + $0x7c] ss:$12 sps:$4 sm:$0xff]   ;;  %v9793_v51 = vld [vmem:[%s13919_s0 + $0x78] ss:$12 sps:$4 sm:$0xff]  }
  0x11   :  { %83 = vadd.xlane.f32.xlu0 %v67_v4  ;;  %85 = vadd.xlane.f32.xlu1 %v68_v5  ;;  %v9794_v52 = vld [vmem:[%s13919_s0 + $0x80] ss:$12 sps:$4 sm:$0xff]   ;;  %v9797_v54 = vld [vmem:[%s13919_s0 + $0x90] ss:$12 sps:$4 sm:$0xff]   ;;  %v9798_v55 = vld [vmem:[%s13919_s0 + $0x98] ss:$12 sps:$4 sm:$0xff]  }
  0x12   :  { %404 = vmatprep.subr.bf16.mxu0 %v9779_v40  ;;  %v9795_v53 = vld [vmem:[%s13919_s0 + $0x94] ss:$12 sps:$4 sm:$0xff]   ;;  %v9799_v56 = vld [vmem:[%s13919_s0 + $0xac] ss:$12 sps:$4 sm:$0xff]   ;;  %v9802_v58 = vld [vmem:[%s13919_s0 + $0xb0] ss:$12 sps:$4 sm:$0xff]  }
  0x13   :  { %8809 = vmatpush3.bf16.msra.mxu1 %v9782_v43  ;;  %v9801_v57 = vld [vmem:[%s13919_s0 + $0xa8] ss:$12 sps:$4 sm:$0xff]   ;;  %v10752_v43 = vld [vmem:[%s13921_s2] ss:$0 sm:$0xff] }
  0x14   :  { %405 = vmatpush1.bf16.msra.mxu0 %v9781_v42  ;;  %8810 = vmatprep.subr.bf16.mxu1 %v13912_v7 }
  0x15   :  { %406 = vmatprep.subr.bf16.mxu0 %v9783_v44 }
  0x17   :  { %8811 = vmatpush3.bf16.msra.mxu1 %v9786_v46 }
  0x18   :  { %407 = vmatpush1.bf16.msra.mxu0 %v9785_v45  ;;  %8812 = vmatprep.subr.bf16.mxu1 %v13912_v7 }
  0x19   :  { %408 = vmatprep.subr.bf16.mxu0 %v9787_v47 }
  0x1b   :  { %8813 = vmatpush3.bf16.msra.mxu1 %v9790_v49 }
  0x1c   :  { %409 = vmatpush1.bf16.msra.mxu0 %v9789_v48  ;;  %8814 = vmatprep.subr.bf16.mxu1 %v13912_v7 }
  0x1d   :  { %410 = vmatprep.subr.bf16.mxu0 %v9791_v50 }
  0x1f   :  { %8815 = vmatpush3.bf16.msra.mxu1 %v9794_v52 }
  0x20   :  { %411 = vmatpush1.bf16.msra.mxu0 %v9793_v51  ;;  %8816 = vmatprep.subr.bf16.mxu1 %v13912_v7 }
  0x21   :  { %412 = vmatprep.subr.bf16.mxu0 %v9795_v53 }
  0x23   :  { %8817 = vmatpush3.bf16.msra.mxu1 %v9798_v55 }
  0x24   :  { %413 = vmatpush1.bf16.msra.mxu0 %v9797_v54  ;;  %8818 = vmatprep.subr.bf16.mxu1 %v13912_v7 }
  0x25   :  { %414 = vmatprep.subr.bf16.mxu0 %v9799_v56 }
  0x27   :  { %8819 = vmatpush3.bf16.msra.mxu1 %v9802_v58 }
  0x28   :  { %415 = vmatpush1.bf16.msra.mxu0 %v9801_v57  ;;  %8858 = vmatprep.subr.bf16.mxu1 %v13912_v7 }
  0x29   :  { %8840 = vmatprep.subr.bf16.mxu0 %v13912_v7 }
  0x96   :  { %v76_v11 = vpop.xlane.xlu0 %75  ;;  %v80_v12 = vpop.xlane.xlu1 %79 }
  0x97   :  { %v96_v13 = vmul.f32 0.0078125, %v76_v11  ;;  %v98_v14 = vmul.f32 0.0078125, %v80_v12 }
  0x99   :  { %v10609_v15 = vsub.f32 %v63_v0, %v96_v13  ;;  %v10611_v16 = vsub.f32 %v65_v1, %v98_v14 }
  0x9a   :  { %v78_v17 = vpop.xlane.xlu0 %77  ;;  %v82_v18 = vpop.xlane.xlu1 %81 }
  0x9b   :  { %v97_v19 = vmul.f32 0.0078125, %v78_v17  ;;  %v116_v20 = vmul.f32 %v10609_v15, %v10609_v15  ;;  %v99_v21 = vmul.f32 0.0078125, %v82_v18  ;;  %v118_v22 = vmul.f32 %v10611_v16, %v10611_v16 }
  0x9d   :  { %126 = vadd.xlane.f32.xlu0 %v116_v20  ;;  %v10617_v23 = vsub.f32 %v64_v2, %v97_v19  ;;  %v10619_v24 = vsub.f32 %v66_v3, %v99_v21 }
  0x9e   :  { %v84_v25 = vpop.xlane.xlu0 %83  ;;  %v86_v26 = vpop.xlane.xlu1 %85 }
  0x9f   :  { %v100_v27 = vmul.f32 0.0078125, %v84_v25  ;;  %v117_v28 = vmul.f32 %v10617_v23, %v10617_v23  ;;  %v101_v29 = vmul.f32 0.0078125, %v86_v26  ;;  %v119_v30 = vmul.f32 %v10619_v24, %v10619_v24 }
  0xa1   :  { %130 = vadd.xlane.f32.xlu0 %v118_v22  ;;  %128 = vadd.xlane.f32.xlu1 %v117_v28  ;;  %v10625_v31 = vsub.f32 %v67_v4, %v100_v27  ;;  %v10627_v32 = vsub.f32 %v68_v5, %v101_v29  ;;  %v10737_v29 = vld [vmem:[%s13920_s21] ss:$0 sm:$0xff] }
  0xa3   :  { %v120_v33 = vmul.f32 %v10625_v31, %v10625_v31  ;;  %v121_v34 = vmul.f32 %v10627_v32, %v10627_v32 }
  0xa5   :  { %132 = vadd.xlane.f32.xlu1 %v119_v30  ;;  %134 = vadd.xlane.f32.xlu0 %v120_v33 }
  0xa9   :  { %136 = vadd.xlane.f32.xlu1 %v121_v34  ;;  %87 = vadd.xlane.f32.xlu0 %v10636_v35 }
  0xad   :  { %89 = vadd.xlane.f32.xlu1 %v10648_v38  ;;  %91 = vadd.xlane.f32.xlu0 %v10653_v39 }
  0xb1   :  { %93 = vadd.xlane.f32.xlu1 %v10664_v41 }
 0x12a   :  { %v127_v60 = vpop.xlane.xlu0 %126 }
 0x12b   :  { %v146_v61 = vmul.f32 0.0078125, %v127_v60 }
 0x12d   :  { %v156_v62 = vadd.f32 1e-12, %v146_v61 }
 0x12e   :  { %v129_v63 = vpop.xlane.xlu1 %128  ;;  %v131_v0 = vpop.xlane.xlu0 %130 }
 0x12f   :  { %9939 = vrsqrt.f32 %v156_v62  ;;  %v147_v1 = vmul.f32 0.0078125, %v129_v63  ;;  %v148_v2 = vmul.f32 0.0078125, %v131_v0 }
 0x131   :  { %v157_v3 = vadd.f32 1e-12, %v147_v1  ;;  %v158_v4 = vadd.f32 1e-12, %v148_v2 }
 0x132   :  { %v133_v5 = vpop.xlane.xlu1 %132  ;;  %v135_v6 = vpop.xlane.xlu0 %134 }
 0x133   :  { %9941 = vrsqrt.f32 %v157_v3  ;;  %v149_v8 = vmul.f32 0.0078125, %v133_v5  ;;  %v150_v10 = vmul.f32 0.0078125, %v135_v6 }
 0x134   :  { %9943 = vrsqrt.f32 %v158_v4 }
 0x135   :  { %v159_v9 = vadd.f32 1e-12, %v149_v8  ;;  %v160_v18 = vadd.f32 1e-12, %v150_v10 }
 0x136   :  { %v137_v11 = vpop.xlane.xlu1 %136  ;;  %v88_v12 = vpop.xlane.xlu0 %87 }
 0x137   :  { %9945 = vrsqrt.f32 %v159_v9  ;;  %v151_v13 = vmul.f32 0.0078125, %v137_v11  ;;  %v102_v14 = vmul.f32 0.0078125, %v88_v12 }
 0x139   :  { %v9940_v17 = vpop.eup %9939  ;;  %v161_v19 = vadd.f32 1e-12, %v151_v13  ;;  %v10729_v20 = vsub.f32 %v10636_v35, %v102_v14 }
 0x13a   :  { %v90_v21 = vpop.xlane.xlu1 %89  ;;  %v92_v22 = vpop.xlane.xlu0 %91  ;;  %v176_v25 = vmul.f32 %v9940_v17, %v10609_v15 }
 0x13b   :  { %9947 = vrsqrt.f32 %v161_v19  ;;  %v103_v26 = vmul.f32 0.0078125, %v90_v21  ;;  %v122_v27 = vmul.f32 %v10729_v20, %v10729_v20  ;;  %v104_v28 = vmul.f32 0.0078125, %v92_v22 }
 0x13c   :  { %9949 = vrsqrt.f32 %v160_v18  ;;  %v192_v36 = vmul.f32 %v10737_v29, %v176_v25 }
 0x13d   :  { %v9942_v30 = vpop.eup %9941  ;;  %138 = vadd.xlane.f32.xlu0 %v122_v27  ;;  %v10740_v33 = vsub.f32 %v10648_v38, %v103_v26  ;;  %v10743_v34 = vsub.f32 %v10653_v39, %v104_v28 }
 0x13e   :  { %v94_v15 = vpop.xlane.xlu1 %93  ;;  %v177_v35 = vmul.f32 %v9942_v30, %v10617_v23  ;;  %v9944_v37 = vpop.eup %9943  ;;  %v10759_v45 = vadd.f32 %v10752_v43, %v192_v36 }
 0x13f   :  { %v123_v40 = vmul.f32 %v10740_v33, %v10740_v33  ;;  %v105_v42 = vmul.f32 0.0078125, %v94_v15  ;;  %v124_v38 = vmul.f32 %v10743_v34, %v10743_v34  ;;  %v178_v47 = vmul.f32 %v9944_v37, %v10611_v16  ;;  %v255_v37 = vld [vmem:[%s13891_s5] sm:$0x7] }
 0x140   :  { %v193_v39 = vmul.f32 %v10737_v29, %v177_v35 }
 0x141   :  { %v9946_v44 = vpop.eup %9945  ;;  %140 = vadd.xlane.f32.xlu1 %v123_v40  ;;  %v115_v23 = vsub.f32 %v10664_v41, %v105_v42  ;;  %142 = vadd.xlane.f32.xlu0 %v124_v38  ;;  %v194_v41 = vmul.f32 %v10737_v29, %v178_v47 }
 0x142   :  { %v10762_v46 = vadd.f32 %v10752_v43, %v193_v39  ;;  %v179_v48 = vmul.f32 %v9946_v44, %v10619_v24 }
 0x143   :  { %v125_v49 = vmul.f32 %v115_v23, %v115_v23  ;;  %v10778_v54 = vadd.f32 %v10752_v43, %v194_v41 }
 0x144   :  { %v218_v50 = vpack.c.bf16 %v10762_v46, %v10759_v45  ;;  %v195_v51 = vmul.f32 %v10737_v29, %v179_v48 }
 0x145   :  { %v9948_v52 = vpop.eup %9947  ;;  %144 = vadd.xlane.f32.xlu1 %v125_v49 }
 0x146   :  { %433 = vmatmul.mubr.bf16.vlgmr.msra.gmra.mrb[0].mxu0 %v218_v50  ;;  %8821 = vmatmul.mubr.bf16.vlgmr.msra.gmra.mrb[0].mxu1 %v218_v50  ;;  %v9950_v53 = vpop.eup %9949  ;;  %v10774_v16 = vadd.f32 %v10752_v43, %v195_v51  ;;  %v181_v24 = vmul.f32 %v9948_v52, %v10627_v32 }
 0x147   :  { %442 = vmatprep.mubr.bf16.mxu0 %v13910_v59  ;;  %8824 = vmatprep.mubr.msk.bf16.mxu1 %vm10472_vm0, %v13912_v7  ;;  %v180_v55 = vmul.f32 %v9950_v53, %v10625_v31 }
 0x148   :  { %v219_v56 = vpack.c.bf16 %v10774_v16, %v10778_v54  ;;  %v197_v57 = vmul.f32 %v10737_v29, %v181_v24 }
 0x149   :  { %v196_v58 = vmul.f32 %v10737_v29, %v180_v55 }
 0x14a   :  { %v10789_v32 = vadd.f32 %v10752_v43, %v197_v57 }
 0x14b   :  { %v10792_v60 = vadd.f32 %v10752_v43, %v196_v58 }
 0x14d   :  { %v220_v31 = vpack.c.bf16 %v10789_v32, %v10792_v60 }
 0x14e   :  { %443 = vmatmul.mubr.bf16.gmra.mrb[4].mxu0 %v219_v56  ;;  %8825 = vmatmul.mubr.bf16.gmra.mrb[4].mxu1 %v219_v56 }
 0x14f   :  { %452 = vmatprep.mubr.bf16.mxu0 %v13910_v59  ;;  %8828 = vmatprep.mubr.msk.bf16.mxu1 %vm10472_vm0, %v13912_v7 }
 0x156   :  { %453 = vmatmul.mubr.bf16.gmra.mrb[8].mxu0 %v220_v31  ;;  %8829 = vmatmul.mubr.bf16.gmra.mrb[8].mxu1 %v220_v31 }
 0x157   :  { %462 = vmatprep.mubr.bf16.mxu0 %v13910_v59  ;;  %8832 = vmatprep.mubr.msk.bf16.mxu1 %vm10472_vm0, %v13912_v7 }
 0x1ca   :  { %v139_v61 = vpop.xlane.xlu0 %138 }
 0x1cb   :  { %v152_v62 = vmul.f32 0.0078125, %v139_v61 }
 0x1cd   :  { %v162_v63 = vadd.f32 1e-12, %v152_v62 }
 0x1ce   :  { %v141_v0 = vpop.xlane.xlu1 %140  ;;  %v143_v1 = vpop.xlane.xlu0 %142 }
 0x1cf   :  { %9951 = vrsqrt.f32 %v162_v63  ;;  %v153_v2 = vmul.f32 0.0078125, %v141_v0  ;;  %v154_v3 = vmul.f32 0.0078125, %v143_v1 }
 0x1d1   :  { %v163_v4 = vadd.f32 1e-12, %v153_v2  ;;  %v164_v5 = vadd.f32 1e-12, %v154_v3 }
 0x1d2   :  { %v145_v6 = vpop.xlane.xlu1 %144 }
 0x1d3   :  { %9953 = vrsqrt.f32 %v163_v4  ;;  %v155_v8 = vmul.f32 0.0078125, %v145_v6 }
 0x1d4   :  { %9955 = vrsqrt.f32 %v164_v5 }
 0x1d5   :  { %v165_v9 = vadd.f32 1e-12, %v155_v8 }
 0x1d7   :  { %9957 = vrsqrt.f32 %v165_v9 }
 0x1d9   :  { %v9952_v10 = vpop.eup %9951 }
 0x1da   :  { %v182_v11 = vmul.f32 %v9952_v10, %v10729_v20 }
 0x1dc   :  { %v198_v12 = vmul.f32 %v10737_v29, %v182_v11 }
 0x1dd   :  { %v9954_v13 = vpop.eup %9953 }
 0x1de   :  { %v9956_v14 = vpop.eup %9955  ;;  %v183_v17 = vmul.f32 %v9954_v13, %v10740_v33  ;;  %v10805_v21 = vadd.f32 %v10752_v43, %v198_v12 }
 0x1df   :  { %v184_v18 = vmul.f32 %v9956_v14, %v10743_v34 }
 0x1e0   :  { %v199_v19 = vmul.f32 %v10737_v29, %v183_v17 }
 0x1e1   :  { %v9958_v22 = vpop.eup %9957  ;;  %v200_v20 = vmul.f32 %v10737_v29, %v184_v18 }
 0x1e2   :  { %v10808_v25 = vadd.f32 %v10752_v43, %v199_v19  ;;  %v185_v26 = vmul.f32 %v9958_v22, %v115_v23 }
 0x1e3   :  { %v10815_v30 = vadd.f32 %v10752_v43, %v200_v20 }
 0x1e4   :  { %v221_v27 = vpack.c.bf16 %v10808_v25, %v10805_v21  ;;  %v201_v28 = vmul.f32 %v10737_v29, %v185_v26  ;;  %v257_v29 = vlaneseq }
 0x1e6   :  { %463 = vmatmul.mubr.bf16.gmra.mrb[12].mxu0 %v221_v27  ;;  %8833 = vmatmul.mubr.bf16.gmra.mrb[12].mxu1 %v221_v27  ;;  %v10818_v33 = vadd.f32 %v10752_v43, %v201_v28  ;;  %v10829_v15 = vshrl.u32 %v257_v29, 7 }
 0x1e7   :  { %472 = vmatprep.mubr.bf16.mxu0 %v13910_v59  ;;  %8836 = vmatprep.mubr.msk.bf16.mxu1 %vm10472_vm0, %v13912_v7 }
 0x1e8   :  { %v222_v34 = vpack.c.bf16 %v10818_v33, %v10815_v30  ;;  %v10832_v35 = vsub.s32 0, %v10829_v15  ;;  %v13909_v36 = vsub.s32 2, %v10829_v15  ;;  %v10839_v40 = vsub.s32 1, %v10829_v15 }
 0x1ea   :  { %v10842_v42 = vrot.slane %v255_v37, %v10832_v35  ;;  %v10846_v43 = vrot.slane %v255_v37, %v13909_v36  ;;  %v10849_v44 = vrot.slane %v255_v37, %v10839_v40 }
 0x1ee   :  { %473 = vmatmul.mubr.bf16.gmra.mrb[16].mxu0 %v222_v34  ;;  %8837 = vmatmul.mubr.bf16.gmra.mrb[16].mxu1 %v222_v34 }
 0x1ef   :  { %8846 = vmatprep.mubr.msk.bf16.mxu0 %vm10472_vm0, %v13912_v7  ;;  %8864 = vmatprep.mubr.msk.bf16.mxu1 %vm10472_vm0, %v13912_v7 }
 0x219   :  { %v434_v38 = vpop.f32.mrb[0].mxu0  ;;  %v517_v39 = vpop.f32.mrb[0].mxu1 }
 0x21a   :  { %v436_v23 = vpop.f32.mrb[1].mxu0  ;;  %v8822_v47 = vpop.f32.mrb[1].mxu1  ;;  %v435_v50 = vadd.f32 %v434_v38, %v10842_v42  ;;  %v518_v51 = vadd.f32 %v517_v39, %v10846_v43 }
 0x21b   :  { %v438_v48 = vpop.f32.mrb[2].mxu0  ;;  %v520_v49 = vpop.f32.mrb[2].mxu1  ;;  %v437_v55 = vadd.f32 %v436_v23, %v10849_v44 }
 0x21c   :  { %v439_v52 = vadd.f32 %v438_v48, %v10842_v42  ;;  %v521_v41 = vadd.f32 %v520_v49, %v10846_v43  ;;  %v440_v53 = vpop.f32.mrb[3].mxu0  ;;  %v8823_v24 = vpop.f32.mrb[3].mxu1 }
 0x21d   :  { %v441_v56 = vadd.f32 %v440_v53, %v10849_v44 }
 0x21e   :  { %v10857_v57 = vpack.c.bf16 %v439_v52, %v435_v50  ;;  %v10859_v58 = vpack.c.bf16 %v521_v41, %v518_v51 }
 0x21f   :  { %v10861_v31 = vpack.c.bf16 %v441_v56, %v437_v55 }
 0x220   :  { %8859 = vmatpush3.bf16.msra.mxu1 %v10859_v58 }
 0x221   :  { %v444_v61 = vpop.f32.mrb[4].mxu0  ;;  %v525_v62 = vpop.f32.mrb[4].mxu1  ;;  %814 = vrot.lane.b32.xlu0 %v10861_v31, %s10473_s25  ;;  %v593_v63 = vsel %vm582_vm1, %v10861_v31, 0  ;;  %8860 = vmatprep.subr.bf16.mxu1 %v13912_v7 }
 0x222   :  { %v446_v0 = vpop.f32.mrb[5].mxu0  ;;  %v8826_v1 = vpop.f32.mrb[5].mxu1  ;;  %8841 = vmatpush3.bf16.xpose.msra.mxu0 %v593_v63  ;;  %v445_v4 = vadd.f32 %v444_v61, %v10842_v42  ;;  %v526_v5 = vadd.f32 %v525_v62, %v10846_v43 }
 0x223   :  { %v448_v2 = vpop.f32.mrb[6].mxu0  ;;  %v528_v3 = vpop.f32.mrb[6].mxu1  ;;  %8842 = vmatprep.subr.bf16.mxu0 %v13912_v7  ;;  %v447_v11 = vadd.f32 %v446_v0, %v10849_v44 }
 0x224   :  { %v449_v6 = vadd.f32 %v448_v2, %v10842_v42  ;;  %v529_v8 = vadd.f32 %v528_v3, %v10846_v43  ;;  %v450_v9 = vpop.f32.mrb[7].mxu0  ;;  %v8827_v10 = vpop.f32.mrb[7].mxu1 }
 0x225   :  { %v451_v12 = vadd.f32 %v450_v9, %v10849_v44 }
 0x226   :  { %v10876_v13 = vpack.c.bf16 %v449_v6, %v445_v4  ;;  %v10878_v14 = vpack.c.bf16 %v529_v8, %v526_v5 }
 0x227   :  { %v10880_v17 = vpack.c.bf16 %v451_v12, %v447_v11 }
 0x228   :  { %8861 = vmatpush3.bf16.msra.mxu1 %v10878_v14  ;;  %807 = vrot.lane.b32.xlu0 %v10876_v13, %s10473_s25 }
 0x229   :  { %816 = vrot.lane.b32.xlu1 %v10880_v17, %s10473_s25  ;;  %v454_v18 = vpop.f32.mrb[8].mxu0  ;;  %v533_v19 = vpop.f32.mrb[8].mxu1  ;;  %v596_v22 = vsel %vm582_vm1, %v10880_v17, 0  ;;  %8862 = vmatprep.subr.bf16.mxu1 %v13912_v7 }
 0x22a   :  { %v534_v26 = vadd.f32 %v533_v19, %v10846_v43  ;;  %v456_v20 = vpop.f32.mrb[9].mxu0  ;;  %v8830_v27 = vpop.f32.mrb[9].mxu1  ;;  %8843 = vmatpush3.bf16.xpose.msra.mxu0 %v596_v22  ;;  %v455_v48 = vadd.f32 %v454_v18, %v10842_v42 }
 0x22b   :  { %v457_v28 = vadd.f32 %v456_v20, %v10849_v44  ;;  %v458_v34 = vpop.f32.mrb[10].mxu0  ;;  %v536_v29 = vpop.f32.mrb[10].mxu1  ;;  %8844 = vmatprep.subr.bf16.mxu0 %v13912_v7 }
 0x22c   :  { %v10893_v37 = vpack.c.bf16 %v534_v26, %v534_v26  ;;  %v460_v38 = vpop.f32.mrb[11].mxu0  ;;  %v8831_v39 = vpop.f32.mrb[11].mxu1  ;;  %v10908_v50 = vpack.c.bf16 %v455_v48, %v455_v48  ;;  %v459_v1 = vadd.f32 %v458_v34, %v10842_v42  ;;  %v537_v2 = vadd.f32 %v536_v29, %v10846_v43 }
 0x22d   :  { %v10895_v23 = vpack.c.bf16 %v457_v28, %v457_v28  ;;  %v461_v8 = vadd.f32 %v460_v38, %v10849_v44 }
 0x22e   :  { %v741_v47 = vsel %vm739_vm2, %v10893_v37, 0 }
 0x22f   :  { %8863 = vmatpush3.bf16.msra.mxu1 %v741_v47  ;;  %818 = vrot.lane.b32.xlu1 %v10895_v23, %s10473_s25  ;;  %v599_v49 = vsel %vm582_vm1, %v10895_v23, 0 }
 0x230   :  { %8894 = vmatprep.subr.bf16.mxu1 %v13912_v7 }
 0x232   :  { %8845 = vmatpush3.bf16.xpose.msra.mxu0 %v599_v49 }
 0x233   :  { %805 = vrot.lane.b32.xlu1 %v10857_v57, %s10473_s25  ;;  %8876 = vmatprep.subr.bf16.mxu0 %v13912_v7 }
 0x237   :  { %809 = vrot.lane.b32.xlu1 %v10908_v50, %s10473_s25 }
 0x239   :  { %8847 = vmatmul.mubr.msk.bf16.vlgmr.msra.gmra.mrb[20].mxu0 %vm582_vm1, %v10857_v57 }
 0x23a   :  { %8850 = vmatprep.mubr.msk.bf16.mxu0 %vm10472_vm0, %v13912_v7 }
 0x241   :  { %8851 = vmatmul.mubr.msk.bf16.gmra.mrb[24].mxu0 %vm582_vm1, %v10876_v13 }
 0x242   :  { %8854 = vmatprep.mubr.msk.bf16.mxu0 %vm10472_vm0, %v13912_v7 }
 0x249   :  { %8855 = vmatmul.mubr.msk.bf16.gmra.mrb[28].mxu0 %vm582_vm1, %v10908_v50 }
 0x24a   :  { %8882 = vmatprep.mubr.msk.bf16.mxu0 %vm10472_vm0, %v13912_v7 }
 0x293   :  { %v815_v51 = vpop.permute.xlu0 %814 }
 0x294   :  { %v830_v52 = vsel %vm582_vm1, %v815_v51, 0 }
 0x295   :  { %8877 = vmatpush3.bf16.xpose.msra.mxu0 %v830_v52 }
 0x296   :  { %8878 = vmatprep.subr.bf16.mxu0 %v13912_v7 }
 0x29a   :  { %v808_v61 = vpop.permute.xlu0 %807 }
 0x29b   :  { %v817_v41 = vpop.permute.xlu1 %816 }
 0x29c   :  { %v833_v53 = vsel %vm582_vm1, %v817_v41, 0 }
 0x29d   :  { %8879 = vmatpush3.bf16.xpose.msra.mxu0 %v833_v53 }
 0x29e   :  { %8880 = vmatprep.subr.bf16.mxu0 %v13912_v7 }
 0x2a1   :  { %v819_v24 = vpop.permute.xlu1 %818 }
 0x2a2   :  { %v836_v55 = vsel %vm582_vm1, %v819_v24, 0 }
 0x2a5   :  { %8881 = vmatpush3.bf16.xpose.msra.mxu0 %v836_v55  ;;  %v806_v56 = vpop.permute.xlu1 %805 }
 0x2a6   :  { %8912 = vmatprep.subr.bf16.mxu0 %v13912_v7 }
 0x2a9   :  { %v810_v62 = vpop.permute.xlu1 %809 }
 0x2ac   :  { %8883 = vmatmul.mubr.msk.bf16.vlgmr.msra.gmra.mrb[32].mxu0 %vm582_vm1, %v806_v56 }
 0x2ad   :  { %8886 = vmatprep.mubr.msk.bf16.mxu0 %vm10472_vm0, %v13912_v7 }
 0x2b4   :  { %8887 = vmatmul.mubr.msk.bf16.gmra.mrb[36].mxu0 %vm582_vm1, %v808_v61 }
 0x2b5   :  { %8890 = vmatprep.mubr.msk.bf16.mxu0 %vm10472_vm0, %v13912_v7 }
 0x2b9   :  { %v464_v63 = vpop.f32.mrb[12].mxu0  ;;  %v541_v0 = vpop.f32.mrb[12].mxu1 }
 0x2ba   :  { %v465_v3 = vadd.f32 %v464_v63, %v10842_v42  ;;  %v542_v4 = vadd.f32 %v541_v0, %v10846_v43  ;;  %v466_v5 = vpop.f32.mrb[13].mxu0  ;;  %v8834_v6 = vpop.f32.mrb[13].mxu1 }
 0x2bb   :  { %v467_v9 = vadd.f32 %v466_v5, %v10849_v44  ;;  %v468_v10 = vpop.f32.mrb[14].mxu0  ;;  %v544_v11 = vpop.f32.mrb[14].mxu1 }
 0x2bc   :  { %v10942_v12 = vpack.c.bf16 %v465_v3, %v459_v1  ;;  %v10944_v18 = vpack.c.bf16 %v542_v4, %v537_v2  ;;  %v470_v19 = vpop.f32.mrb[15].mxu0  ;;  %v8835_v22 = vpop.f32.mrb[15].mxu1  ;;  %8891 = vmatmul.mubr.msk.bf16.gmra.mrb[40].mxu0 %vm582_vm1, %v810_v62  ;;  %v469_v28 = vadd.f32 %v468_v10, %v10842_v42  ;;  %v545_v34 = vadd.f32 %v544_v11, %v10846_v43  ;;  %v10972_v62 = vld [vmem:[%s13892_s1] ss:$0 sm:$0xff] }
 0x2bd   :  { %v10947_v26 = vpack.c.bf16 %v467_v9, %v461_v8  ;;  %8916 = vmatprep.mubr.msk.bf16.mxu0 %vm10472_vm0, %v13912_v7  ;;  %v471_v48 = vadd.f32 %v470_v19, %v10849_v44 }
 0x2c1   :  { %v474_v20 = vpop.f32.mrb[16].mxu0  ;;  %v549_v27 = vpop.f32.mrb[16].mxu1 }
 0x2c2   :  { %v475_v29 = vadd.f32 %v474_v20, %v10842_v42  ;;  %v550_v38 = vadd.f32 %v549_v27, %v10846_v43  ;;  %v476_v39 = vpop.f32.mrb[17].mxu0  ;;  %v8838_v47 = vpop.f32.mrb[17].mxu1 }
 0x2c3   :  { %v477_v49 = vadd.f32 %v476_v39, %v10849_v44  ;;  %v10957_v51 = vpop.f32.mrb[18].mxu0  ;;  %v10959_v52 = vpop.f32.mrb[18].mxu1 }
 0x2c4   :  { %v10961_v41 = vpack.c.bf16 %v475_v29, %v469_v28  ;;  %v10963_v53 = vpack.c.bf16 %v550_v38, %v545_v34  ;;  %v10965_v24 = vpop.f32.mrb[19].mxu0  ;;  %v8839_v55 = vpop.f32.mrb[19].mxu1 }
 0x2c5   :  { %v10967_v56 = vpack.c.bf16 %v477_v49, %v471_v48 }
 0x30c   :  { %v635_v61 = vpop.f32.mrb[20].mxu0 }
 0x30d   :  { %v657_v63 = vmul.f32 0.17677669, %v635_v61  ;;  %v8848_v0 = vpop.f32.mrb[21].mxu0 }
 0x30e   :  { %v638_v1 = vpop.f32.mrb[22].mxu0 }
 0x30f   :  { %v658_v2 = vmul.f32 0.17677669, %v638_v1  ;;  %v8849_v3 = vpop.f32.mrb[23].mxu0  ;;  %v666_v4 = vadd.f32 %v10972_v62, %v657_v63 }
 0x311   :  { %v672_v5 = vsel %vm671_vm3, %v666_v4, -inf  ;;  %v667_v6 = vadd.f32 %v10972_v62, %v658_v2 }
 0x312   :  { %673 = vmax.xlane.f32.xlu0 %v672_v5 }
 0x313   :  { %v675_v8 = vsel %vm671_vm3, %v667_v6, -inf }
 0x314   :  { %676 = vmax.xlane.f32.xlu1 %v675_v8  ;;  %v643_v9 = vpop.f32.mrb[24].mxu0 }
 0x315   :  { %v659_v10 = vmul.f32 0.17677669, %v643_v9  ;;  %v8852_v11 = vpop.f32.mrb[25].mxu0 }
 0x316   :  { %v646_v19 = vpop.f32.mrb[26].mxu0 }
 0x317   :  { %v660_v22 = vmul.f32 0.17677669, %v646_v19  ;;  %v8853_v20 = vpop.f32.mrb[27].mxu0  ;;  %v668_v27 = vadd.f32 %v10972_v62, %v659_v10 }
 0x319   :  { %v678_v28 = vsel %vm671_vm3, %v668_v27, -inf  ;;  %v669_v34 = vadd.f32 %v10972_v62, %v660_v22 }
 0x31a   :  { %679 = vmax.xlane.f32.xlu0 %v678_v28 }
 0x31b   :  { %v681_v47 = vsel %vm671_vm3, %v669_v34, -inf }
 0x31c   :  { %v651_v29 = vpop.f32.mrb[28].mxu0 }
 0x31d   :  { %v661_v38 = vmul.f32 0.17677669, %v651_v29  ;;  %v8856_v39 = vpop.f32.mrb[29].mxu0 }
 0x31e   :  { %682 = vmax.xlane.f32.xlu0 %v681_v47  ;;  %v654_v48 = vpop.f32.mrb[30].mxu0 }
 0x31f   :  { %v8857_v49 = vpop.f32.mrb[31].mxu0  ;;  %v670_v55 = vadd.f32 %v10972_v62, %v661_v38 }
 0x321   :  { %v684_v61 = vsel %vm671_vm3, %v670_v55, -inf }
 0x322   :  { %685 = vmax.xlane.f32.xlu0 %v684_v61 }
 0x37f   :  { %v872_v63 = vpop.f32.mrb[32].mxu0 }
 0x380   :  { %v894_v0 = vmul.f32 0.17677669, %v872_v63  ;;  %v8884_v1 = vpop.f32.mrb[33].mxu0 }
 0x381   :  { %v875_v2 = vpop.f32.mrb[34].mxu0 }
 0x382   :  { %v895_v3 = vmul.f32 0.17677669, %v875_v2  ;;  %v8885_v5 = vpop.f32.mrb[35].mxu0  ;;  %v10985_v8 = vadd.f32 %v10972_v62, %v894_v0 }
 0x384   :  { %v904_v9 = vsel %vm671_vm3, %v10985_v8, -inf  ;;  %v10990_v10 = vadd.f32 %v10972_v62, %v895_v3 }
 0x385   :  { %905 = vmax.xlane.f32.xlu1 %v904_v9 }
 0x386   :  { %v907_v11 = vsel %vm671_vm3, %v10990_v10, -inf }
 0x387   :  { %908 = vmax.xlane.f32.xlu0 %v907_v11  ;;  %v880_v19 = vpop.f32.mrb[36].mxu0 }
 0x388   :  { %v896_v22 = vmul.f32 0.17677669, %v880_v19  ;;  %v8888_v20 = vpop.f32.mrb[37].mxu0 }
 0x389   :  { %v883_v28 = vpop.f32.mrb[38].mxu0 }
 0x38a   :  { %v897_v29 = vmul.f32 0.17677669, %v883_v28  ;;  %v8889_v38 = vpop.f32.mrb[39].mxu0  ;;  %v901_v39 = vadd.f32 %v10972_v62, %v896_v22 }
 0x38c   :  { %v910_v47 = vsel %vm671_vm3, %v901_v39, -inf  ;;  %v902_v48 = vadd.f32 %v10972_v62, %v897_v29 }
 0x38d   :  { %911 = vmax.xlane.f32.xlu1 %v910_v47 }
 0x38e   :  { %v913_v49 = vsel %vm671_vm3, %v902_v48, -inf }
 0x38f   :  { %914 = vmax.xlane.f32.xlu0 %v913_v49  ;;  %v888_v61 = vpop.f32.mrb[40].mxu0 }
 0x390   :  { %v898_v63 = vmul.f32 0.17677669, %v888_v61  ;;  %v8892_v0 = vpop.f32.mrb[41].mxu0 }
 0x391   :  { %v891_v1 = vpop.f32.mrb[42].mxu0 }
 0x392   :  { %v8893_v2 = vpop.f32.mrb[43].mxu0  ;;  %v10999_v3 = vadd.f32 %v10972_v62, %v898_v63 }
 0x394   :  { %v916_v5 = vsel %vm671_vm3, %v10999_v3, -inf }
 0x395   :  { %917 = vmax.xlane.f32.xlu1 %v916_v5 }
 0x39f   :  { %v674_v9 = vpop.xlane.xlu0 %673 }
 0x3a0   :  { %v687_v11 = vsub.f32 %v666_v4, %v674_v9 }
 0x3a1   :  { %v677_v19 = vpop.xlane.xlu1 %676 }
 0x3a2   :  { %v692_v22 = vmul.f32 1.442695, %v687_v11  ;;  %v688_v20 = vsub.f32 %v667_v6, %v677_v19 }
 0x3a4   :  { %9959 = vpow2.f32 %v692_v22  ;;  %v694_v28 = vmul.f32 1.442695, %v688_v20 }
 0x3a6   :  { %9961 = vpow2.f32 %v694_v28 }
 0x3a7   :  { %v680_v29 = vpop.xlane.xlu0 %679 }
 0x3a8   :  { %v689_v38 = vsub.f32 %v668_v27, %v680_v29 }
 0x3aa   :  { %v696_v47 = vmul.f32 1.442695, %v689_v38 }
 0x3ab   :  { %v683_v49 = vpop.xlane.xlu0 %682 }
 0x3ac   :  { %9963 = vpow2.f32 %v696_v47  ;;  %v690_v61 = vsub.f32 %v669_v34, %v683_v49 }
 0x3ae   :  { %v11003_v63 = vpop.eup %9959  ;;  %v698_v0 = vmul.f32 1.442695, %v690_v61 }
 0x3af   :  { %v686_v1 = vpop.xlane.xlu0 %685  ;;  %v702_v2 = vsel %vm671_vm3, %v11003_v63, 0.0 }
 0x3b0   :  { %v9962_v4 = vpop.eup %9961  ;;  %9965 = vpow2.f32 %v698_v0  ;;  %v691_v5 = vsub.f32 %v670_v55, %v686_v1  ;;  %703 = vadd.xlane.f32.xlu0 %v702_v2 }
 0x3b1   :  { %v705_v6 = vsel %vm671_vm3, %v9962_v4, 0.0 }
 0x3b2   :  { %v700_v9 = vmul.f32 1.442695, %v691_v5  ;;  %706 = vadd.xlane.f32.xlu1 %v705_v6 }
 0x3b4   :  { %9967 = vpow2.f32 %v700_v9 }
 0x3b6   :  { %v11008_v27 = vpop.eup %9963 }
 0x3b7   :  { %v708_v34 = vsel %vm671_vm3, %v11008_v27, 0.0 }
 0x3b8   :  { %709 = vadd.xlane.f32.xlu0 %v708_v34 }
 0x3ba   :  { %v11012_v11 = vpop.eup %9965 }
 0x3bb   :  { %v711_v19 = vsel %vm671_vm3, %v11012_v11, 0.0 }
 0x3bc   :  { %712 = vadd.xlane.f32.xlu1 %v711_v19 }
 0x3be   :  { %v11016_v22 = vpop.eup %9967 }
 0x3bf   :  { %v714_v55 = vsel %vm671_vm3, %v11016_v22, 0.0 }
 0x3c0   :  { %715 = vadd.xlane.f32.xlu0 %v714_v55 }
 0x412   :  { %v906_v20 = vpop.xlane.xlu1 %905 }
 0x413   :  { %v919_v28 = vsub.f32 %v10985_v8, %v906_v20 }
 0x414   :  { %v909_v29 = vpop.xlane.xlu0 %908 }
 0x415   :  { %v924_v38 = vmul.f32 1.442695, %v919_v28  ;;  %v920_v47 = vsub.f32 %v10990_v10, %v909_v29 }
 0x417   :  { %9969 = vpow2.f32 %v924_v38  ;;  %v926_v49 = vmul.f32 1.442695, %v920_v47 }
 0x419   :  { %9971 = vpow2.f32 %v926_v49 }
 0x41a   :  { %v912_v61 = vpop.xlane.xlu1 %911 }
 0x41b   :  { %v921_v0 = vsub.f32 %v901_v39, %v912_v61 }
 0x41c   :  { %v915_v1 = vpop.xlane.xlu0 %914 }
 0x41d   :  { %v928_v2 = vmul.f32 1.442695, %v921_v0  ;;  %v922_v5 = vsub.f32 %v902_v48, %v915_v1 }
 0x41f   :  { %9973 = vpow2.f32 %v928_v2  ;;  %v930_v6 = vmul.f32 1.442695, %v922_v5 }
 0x421   :  { %v11022_v9 = vpop.eup %9969  ;;  %9975 = vpow2.f32 %v930_v6 }
 0x422   :  { %v934_v8 = vsel %vm671_vm3, %v11022_v9, 0.0  ;;  %v918_v20 = vpop.xlane.xlu1 %917 }
 0x423   :  { %v11026_v34 = vpop.eup %9971  ;;  %935 = vadd.xlane.f32.xlu1 %v934_v8  ;;  %v923_v0 = vsub.f32 %v10999_v3, %v918_v20 }
 0x424   :  { %v937_v10 = vsel %vm671_vm3, %v11026_v34, 0.0 }
 0x425   :  { %938 = vadd.xlane.f32.xlu0 %v937_v10  ;;  %v932_v8 = vmul.f32 1.442695, %v923_v0 }
 0x429   :  { %v11030_v19 = vpop.eup %9973 }
 0x42a   :  { %v940_v39 = vsel %vm671_vm3, %v11030_v19, 0.0 }
 0x42b   :  { %v11034_v48 = vpop.eup %9975  ;;  %941 = vadd.xlane.f32.xlu1 %v940_v39 }
 0x42c   :  { %v943_v55 = vsel %vm671_vm3, %v11034_v48, 0.0 }
 0x42d   :  { %944 = vadd.xlane.f32.xlu0 %v943_v55 }
 0x43c   :  { %967 = vrot.lane.b32.xlu1 %v10878_v14, %s10473_s25 }
 0x43d   :  { %v704_v28 = vpop.xlane.xlu0 %703 }
 0x43e   :  { %9977 = vrcp.f32 %v704_v28 }
 0x43f   :  { %v707_v29 = vpop.xlane.xlu1 %706 }
 0x440   :  { %9979 = vrcp.f32 %v707_v29 }
 0x443   :  { %965 = vrot.lane.b32.xlu0 %v10859_v58, %s10473_s25 }
 0x445   :  { %v710_v38 = vpop.xlane.xlu0 %709 }
 0x446   :  { %9981 = vrcp.f32 %v710_v38 }
 0x447   :  { %1206 = vrot.lane.b32.xlu0 %v10880_v17, %s10474_s27 }
 0x448   :  { %v9978_v47 = vpop.eup %9977 }
 0x449   :  { %v713_v49 = vpop.xlane.xlu1 %712  ;;  %v722_v1 = vmul.f32 %v9978_v47, %v11003_v63 }
 0x44a   :  { %v9980_v61 = vpop.eup %9979  ;;  %9983 = vrcp.f32 %v713_v49  ;;  %v11080_v49 = vld [vmem:[%s13893_s6 + $0x18] sm:$0xff]  }
 0x44b   :  { %v723_v2 = vmul.f32 %v9980_v61, %v9962_v4  ;;  %1198 = vrot.lane.b32.xlu0 %v10857_v57, %s10474_s27 }
 0x44d   :  { %v727_v5 = vpack.c.bf16 %v723_v2, %v722_v1  ;;  %v716_v6 = vpop.xlane.xlu0 %715 }
 0x44e   :  { %9985 = vrcp.f32 %v716_v6 }
 0x44f   :  { %1202 = vrot.lane.b32.xlu0 %v10908_v50, %s10474_s27  ;;  %8865 = vmatmul.mubr.msk.bf16.vlgmr.msra.gmra.mrb[20].mxu1 %vm671_vm3, %v727_v5  ;;  %9987 = vpow2.f32 %v932_v8 }
 0x450   :  { %8868 = vmatprep.mubr.msk.bf16.mxu1 %vm10472_vm0, %v13912_v7  ;;  %v9982_v3 = vpop.eup %9981 }
 0x451   :  { %v724_v63 = vmul.f32 %v9982_v3, %v11008_v27 }
 0x454   :  { %v9984_v10 = vpop.eup %9983 }
 0x455   :  { %v725_v4 = vmul.f32 %v9984_v10, %v11012_v11 }
 0x457   :  { %v728_v39 = vpack.c.bf16 %v725_v4, %v724_v63  ;;  %v9803_v4 = vld [vmem:[%s13893_s6] sm:$0xff]  }
 0x458   :  { %v9986_v55 = vpop.eup %9985 }
 0x459   :  { %8869 = vmatmul.mubr.msk.bf16.gmra.mrb[24].mxu1 %vm671_vm3, %v728_v39  ;;  %v726_v20 = vmul.f32 %v9986_v55, %v11016_v22  ;;  %v9988_v28 = vpop.eup %9987  ;;  %v11074_v22 = vld [vmem:[%s13893_s6 + $0x10] sm:$0xff]  }
 0x45a   :  { %8872 = vmatprep.mubr.msk.bf16.mxu1 %vm10472_vm0, %v13912_v7  ;;  %v946_v29 = vsel %vm671_vm3, %v9988_v28, 0.0  ;;  %8913 = vmatpush3.bf16.msra.mxu0 %v11074_v22 }
 0x45b   :  { %v729_v38 = vpack.c.bf16 %v726_v20, %v726_v20  ;;  %8914 = vmatprep.subr.bf16.mxu0 %v13912_v7 }
 0x45e   :  { %8915 = vmatpush3.bf16.msra.mxu0 %v11080_v49 }
 0x45f   :  { %8944 = vmatprep.subr.bf16.mxu0 %v13912_v7 }
 0x460   :  { %947 = vadd.xlane.f32.xlu1 %v946_v29 }
 0x461   :  { %8873 = vmatmul.mubr.msk.bf16.gmra.mrb[28].mxu1 %vm671_vm3, %v729_v38 }
 0x462   :  { %8900 = vmatprep.mubr.msk.bf16.mxu1 %vm10472_vm0, %v13912_v7 }
 0x471   :  { %969 = vrot.lane.b32.xlu1 %v10893_v37, %s10473_s25 }
 0x475   :  { %1204 = vrot.lane.b32.xlu1 %v10861_v31, %s10474_s27 }
 0x479   :  { %1208 = vrot.lane.b32.xlu1 %v10895_v23, %s10474_s27 }
 0x47d   :  { %1200 = vrot.lane.b32.xlu1 %v10876_v13, %s10474_s27 }
 0x4b0   :  { %v936_v11 = vpop.xlane.xlu1 %935 }
 0x4b2   :  { %v939_v27 = vpop.xlane.xlu0 %938 }
 0x4b3   :  { %9989 = vrcp.f32 %v939_v27 }
 0x4b4   :  { %9991 = vrcp.f32 %v936_v11 }
 0x4b8   :  { %v942_v61 = vpop.xlane.xlu1 %941 }
 0x4ba   :  { %v945_v47 = vpop.xlane.xlu0 %944 }
 0x4bb   :  { %9993 = vrcp.f32 %v945_v47 }
 0x4bc   :  { %v968_v1 = vpop.permute.xlu1 %967  ;;  %9995 = vrcp.f32 %v942_v61 }
 0x4bd   :  { %v9990_v2 = vpop.eup %9989 }
 0x4be   :  { %v966_v0 = vpop.permute.xlu0 %965  ;;  %v9992_v6 = vpop.eup %9991  ;;  %v955_v8 = vmul.f32 %v9990_v2, %v11026_v34 }
 0x4bf   :  { %8895 = vmatpush3.bf16.msra.mxu1 %v966_v0  ;;  %v954_v10 = vmul.f32 %v9992_v6, %v11022_v9  ;;  %v9804_v9 = vld [vmem:[%s13893_s6 + $0x8] sm:$0xff]  }
 0x4c0   :  { %8896 = vmatprep.subr.bf16.mxu1 %v13912_v7 }
 0x4c1   :  { %v959_v39 = vpack.c.bf16 %v955_v8, %v954_v10 }
 0x4c3   :  { %8897 = vmatpush3.bf16.msra.mxu1 %v968_v1 }
 0x4c4   :  { %8898 = vmatprep.subr.bf16.mxu1 %v13912_v7 }
 0x4c5   :  { %v9994_v55 = vpop.eup %9993 }
 0x4c6   :  { %v9996_v20 = vpop.eup %9995  ;;  %v957_v34 = vmul.f32 %v9994_v55, %v11034_v48 }
 0x4c7   :  { %v956_v29 = vmul.f32 %v9996_v20, %v11030_v19 }
 0x4c9   :  { %v960_v38 = vpack.c.bf16 %v957_v34, %v956_v29 }
 0x4ed   :  { %v948_v5 = vpop.xlane.xlu1 %947 }
 0x4ee   :  { %9997 = vrcp.f32 %v948_v5 }
 0x4f1   :  { %v970_v3 = vpop.permute.xlu1 %969 }
 0x4f2   :  { %v983_v63 = vsel %vm739_vm2, %v970_v3, 0 }
 0x4f3   :  { %8899 = vmatpush3.bf16.msra.mxu1 %v983_v63 }
 0x4f4   :  { %8928 = vmatprep.subr.bf16.mxu1 %v13912_v7 }
 0x4f6   :  { %8901 = vmatmul.mubr.msk.bf16.vlgmr.msra.gmra.mrb[32].mxu1 %vm671_vm3, %v959_v39 }
 0x4f7   :  { %8904 = vmatprep.mubr.msk.bf16.mxu1 %vm10472_vm0, %v13912_v7  ;;  %8929 = vmatpush3.bf16.msra.mxu1 %v9803_v4 }
 0x4f8   :  { %8930 = vmatprep.subr.bf16.mxu1 %v13912_v7  ;;  %v9998_v27 = vpop.eup %9997 }
 0x4f9   :  { %v958_v11 = vmul.f32 %v9998_v27, %v9988_v28 }
 0x4fb   :  { %8931 = vmatpush3.bf16.msra.mxu1 %v9804_v9  ;;  %v961_v47 = vpack.c.bf16 %v958_v11, %v958_v11  ;;  %v1205_v9 = vpop.permute.xlu1 %1204 }
 0x4fc   :  { %8962 = vmatprep.subr.bf16.mxu1 %v13912_v7  ;;  %v1220_v27 = vsel %vm582_vm1, %v1205_v9, 0 }
 0x4fe   :  { %8905 = vmatmul.mubr.msk.bf16.gmra.mrb[36].mxu1 %vm671_vm3, %v960_v38 }
 0x4ff   :  { %8908 = vmatprep.mubr.msk.bf16.mxu1 %vm10472_vm0, %v13912_v7 }
 0x506   :  { %8909 = vmatmul.mubr.msk.bf16.gmra.mrb[40].mxu1 %vm671_vm3, %v961_v47 }
 0x507   :  { %8932 = vmatprep.mubr.msk.bf16.mxu1 %vm10472_vm0, %v13912_v7 }
 0x522   :  { %v777_v48 = vpop.f32.mrb[20].mxu1 }
 0x523   :  { %v8866_v61 = vpop.f32.mrb[21].mxu1 }
 0x524   :  { %v780_v19 = vpop.f32.mrb[22].mxu1 }
 0x525   :  { %v799_v0 = vpack.c.bf16 %v780_v19, %v777_v48  ;;  %v8867_v1 = vpop.f32.mrb[23].mxu1  ;;  %v1207_v48 = vpop.permute.xlu0 %1206 }
 0x526   :  { %v1223_v1 = vsel %vm582_vm1, %v1207_v48, 0 }
 0x527   :  { %8933 = vmatmul.mubr.msk.bf16.vlgmr.msra.gmra.mrb[44].mxu1 %vm582_vm1, %v799_v0 }
 0x528   :  { %8936 = vmatprep.mubr.msk.bf16.mxu1 %vm10472_vm0, %v13912_v7 }
 0x52c   :  { %v785_v2 = vpop.f32.mrb[24].mxu1 }
 0x52d   :  { %v8870_v5 = vpop.f32.mrb[25].mxu1 }
 0x52e   :  { %v788_v6 = vpop.f32.mrb[26].mxu1 }
 0x52f   :  { %v800_v28 = vpack.c.bf16 %v788_v6, %v785_v2  ;;  %v8871_v8 = vpop.f32.mrb[27].mxu1  ;;  %v1209_v6 = vpop.permute.xlu1 %1208 }
 0x531   :  { %8937 = vmatmul.mubr.msk.bf16.gmra.mrb[48].mxu1 %vm582_vm1, %v800_v28 }
 0x532   :  { %8940 = vmatprep.mubr.msk.bf16.mxu1 %vm10472_vm0, %v13912_v7 }
 0x534   :  { %v793_v3 = vpop.f32.mrb[28].mxu1 }
 0x535   :  { %v8874_v10 = vpop.f32.mrb[29].mxu1  ;;  %v801_v4 = vpack.c.bf16 %v793_v3, %v793_v3 }
 0x536   :  { %v796_v63 = vpop.f32.mrb[30].mxu1  ;;  %v1226_v10 = vsel %vm582_vm1, %v1209_v6, 0 }
 0x537   :  { %v8875_v39 = vpop.f32.mrb[31].mxu1  ;;  %v1199_v63 = vpop.permute.xlu0 %1198 }
 0x539   :  { %8941 = vmatmul.mubr.msk.bf16.gmra.mrb[52].mxu1 %vm582_vm1, %v801_v4  ;;  %v1201_v4 = vpop.permute.xlu1 %1200 }
 0x53a   :  { %8968 = vmatprep.mubr.msk.bf16.mxu1 %vm10472_vm0, %v13912_v7 }
 0x53b   :  { %v1203_v39 = vpop.permute.xlu0 %1202 }
 0x5c9   :  { %v1019_v55 = vpop.f32.mrb[32].mxu1 }
 0x5ca   :  { %v8902_v20 = vpop.f32.mrb[33].mxu1 }
 0x5cb   :  { %v1022_v34 = vpop.f32.mrb[34].mxu1 }
 0x5cc   :  { %v1041_v29 = vpack.c.bf16 %v1022_v34, %v1019_v55  ;;  %v8903_v38 = vpop.f32.mrb[35].mxu1 }
 0x5ce   :  { %8917 = vmatmul.mubr.msk.bf16.vlgmr.msra.gmra.mrb[44].mxu0 %vm582_vm1, %v1041_v29 }
 0x5cf   :  { %8945 = vmatpush3.bf16.xpose.msra.mxu0 %v1220_v27  ;;  %8920 = vmatprep.mubr.msk.bf16.mxu0 %vm10472_vm0, %v13912_v7 }
 0x5d0   :  { %8946 = vmatprep.subr.bf16.mxu0 %v13912_v7 }
 0x5d1   :  { %v1027_v11 = vpop.f32.mrb[36].mxu1 }
 0x5d2   :  { %v8906_v47 = vpop.f32.mrb[37].mxu1 }
 0x5d3   :  { %v1030_v61 = vpop.f32.mrb[38].mxu1 }
 0x5d4   :  { %v1042_v19 = vpack.c.bf16 %v1030_v61, %v1027_v11  ;;  %v8907_v0 = vpop.f32.mrb[39].mxu1 }
 0x5d6   :  { %8921 = vmatmul.mubr.msk.bf16.gmra.mrb[48].mxu0 %vm582_vm1, %v1042_v19 }
 0x5d7   :  { %8947 = vmatpush3.bf16.xpose.msra.mxu0 %v1223_v1  ;;  %8924 = vmatprep.mubr.msk.bf16.mxu0 %vm10472_vm0, %v13912_v7 }
 0x5d8   :  { %8948 = vmatprep.subr.bf16.mxu0 %v13912_v7 }
 0x5d9   :  { %v1035_v2 = vpop.f32.mrb[40].mxu1 }
 0x5da   :  { %v8910_v5 = vpop.f32.mrb[41].mxu1  ;;  %v1043_v8 = vpack.c.bf16 %v1035_v2, %v1035_v2 }
 0x5db   :  { %v1038_v28 = vpop.f32.mrb[42].mxu1 }
 0x5dc   :  { %v8911_v3 = vpop.f32.mrb[43].mxu1 }
 0x5de   :  { %8925 = vmatmul.mubr.msk.bf16.gmra.mrb[52].mxu0 %vm582_vm1, %v1043_v8 }
 0x5df   :  { %8949 = vmatpush3.bf16.xpose.msra.mxu0 %v1226_v10  ;;  %8950 = vmatprep.mubr.msk.bf16.mxu0 %vm10472_vm0, %v13912_v7 }
 0x5e0   :  { %8980 = vmatprep.subr.bf16.mxu0 %v13912_v7 }
 0x5e6   :  { %8951 = vmatmul.mubr.msk.bf16.vlgmr.msra.gmra.mrb[56].mxu0 %vm582_vm1, %v1199_v63 }
 0x5e7   :  { %8954 = vmatprep.mubr.msk.bf16.mxu0 %vm10472_vm0, %v13912_v7 }
 0x5ee   :  { %8955 = vmatmul.mubr.msk.bf16.gmra.mrb[60].mxu0 %vm582_vm1, %v1201_v4 }
 0x5ef   :  { %8958 = vmatprep.mubr.msk.bf16.mxu0 %vm10472_vm0, %v13912_v7 }
 0x5f6   :  { %8959 = vmatmul.mubr.msk.bf16.gmra.mrb[64].mxu0 %vm582_vm1, %v1203_v39 }
 0x5f7   :  { %8984 = vmatprep.mubr.msk.bf16.mxu0 %vm10472_vm0, %v13912_v7 }
 0x5fa   :  { %v1176_v55 = vpop.f32.mrb[44].mxu1 }
 0x5fb   :  { %v8934_v20 = vpop.f32.mrb[45].mxu1 }
 0x5fc   :  { %v1179_v9 = vpop.f32.mrb[46].mxu1 }
 0x5fd   :  { %v8935_v34 = vpop.f32.mrb[47].mxu1 }
 0x604   :  { %v1184_v29 = vpop.f32.mrb[48].mxu1 }
 0x605   :  { %v8938_v38 = vpop.f32.mrb[49].mxu1 }
 0x606   :  { %v1187_v27 = vpop.f32.mrb[50].mxu1 }
 0x607   :  { %v8939_v11 = vpop.f32.mrb[51].mxu1 }
 0x60c   :  { %v1192_v47 = vpop.f32.mrb[52].mxu1 }
 0x60d   :  { %v8942_v48 = vpop.f32.mrb[53].mxu1 }
 0x60e   :  { %v1195_v61 = vpop.f32.mrb[54].mxu1 }
 0x60f   :  { %v8943_v19 = vpop.f32.mrb[55].mxu1 }
 0x6a1   :  { %v1099_v0 = vpop.f32.mrb[44].mxu0 }
 0x6a2   :  { %v11143_v1 = vadd.f32 %v1176_v55, %v1099_v0  ;;  %v8918_v2 = vpop.f32.mrb[45].mxu0 }
 0x6a3   :  { %v1102_v5 = vpop.f32.mrb[46].mxu0 }
 0x6a4   :  { %v11145_v6 = vadd.f32 %v1179_v9, %v1102_v5  ;;  %v8919_v28 = vpop.f32.mrb[47].mxu0 }
 0x6a9   :  { %v1107_v8 = vpop.f32.mrb[48].mxu0 }
 0x6aa   :  { %v11147_v3 = vadd.f32 %v1184_v29, %v1107_v8  ;;  %v8922_v10 = vpop.f32.mrb[49].mxu0 }
 0x6ab   :  { %v1110_v63 = vpop.f32.mrb[50].mxu0 }
 0x6ac   :  { %v11149_v4 = vadd.f32 %v1187_v27, %v1110_v63  ;;  %v8923_v39 = vpop.f32.mrb[51].mxu0 }
 0x6b1   :  { %v1115_v20 = vpop.f32.mrb[52].mxu0 }
 0x6b2   :  { %v11151_v34 = vadd.f32 %v1192_v47, %v1115_v20  ;;  %v8926_v38 = vpop.f32.mrb[53].mxu0 }
 0x6b3   :  { %v1118_v11 = vpop.f32.mrb[54].mxu0 }
 0x6b4   :  { %v8927_v55 = vpop.f32.mrb[55].mxu0 }
 0x6b9   :  { %v1262_v48 = vpop.f32.mrb[56].mxu0 }
 0x6ba   :  { %v1284_v61 = vmul.f32 0.17677669, %v1262_v48  ;;  %v8952_v19 = vpop.f32.mrb[57].mxu0 }
 0x6bb   :  { %v1265_v9 = vpop.f32.mrb[58].mxu0 }
 0x6bc   :  { %v1285_v0 = vmul.f32 0.17677669, %v1265_v9  ;;  %v8953_v2 = vpop.f32.mrb[59].mxu0  ;;  %v1289_v29 = vadd.f32 %v10972_v62, %v1284_v61 }
 0x6be   :  { %v1294_v5 = vsel %vm671_vm3, %v1289_v29, -inf  ;;  %v1290_v27 = vadd.f32 %v10972_v62, %v1285_v0 }
 0x6bf   :  { %1295 = vmax.xlane.f32.xlu1 %v1294_v5 }
 0x6c0   :  { %v1297_v28 = vsel %vm671_vm3, %v1290_v27, -inf }
 0x6c1   :  { %1298 = vmax.xlane.f32.xlu0 %v1297_v28  ;;  %v1270_v47 = vpop.f32.mrb[60].mxu0 }
 0x6c2   :  { %v1286_v8 = vmul.f32 0.17677669, %v1270_v47  ;;  %v8956_v10 = vpop.f32.mrb[61].mxu0 }
 0x6c3   :  { %v1273_v63 = vpop.f32.mrb[62].mxu0 }
 0x6c4   :  { %v1287_v39 = vmul.f32 0.17677669, %v1273_v63  ;;  %v8957_v20 = vpop.f32.mrb[63].mxu0  ;;  %v1291_v38 = vadd.f32 %v10972_v62, %v1286_v8 }
 0x6c6   :  { %v1300_v11 = vsel %vm671_vm3, %v1291_v38, -inf  ;;  %v1292_v55 = vadd.f32 %v10972_v62, %v1287_v39 }
 0x6c7   :  { %1301 = vmax.xlane.f32.xlu0 %v1300_v11 }
 0x6c8   :  { %v1303_v9 = vsel %vm671_vm3, %v1292_v55, -inf }
 0x6c9   :  { %v1278_v48 = vpop.f32.mrb[64].mxu0 }
 0x6ca   :  { %v1288_v61 = vmul.f32 0.17677669, %v1278_v48  ;;  %v8960_v19 = vpop.f32.mrb[65].mxu0 }
 0x6cb   :  { %1304 = vmax.xlane.f32.xlu0 %v1303_v9  ;;  %v1281_v0 = vpop.f32.mrb[66].mxu0 }
 0x6cc   :  { %v8961_v2 = vpop.f32.mrb[67].mxu0  ;;  %v1293_v5 = vadd.f32 %v10972_v62, %v1288_v61 }
 0x6ce   :  { %v1306_v28 = vsel %vm671_vm3, %v1293_v5, -inf }
 0x6cf   :  { %1307 = vmax.xlane.f32.xlu1 %v1306_v28 }
 0x6e0   :  { %1354 = vrot.lane.b32.xlu1 %v10878_v14, %s10474_s27 }
 0x6e1   :  { %1352 = vrot.lane.b32.xlu0 %v10859_v58, %s10474_s27 }
 0x6e4   :  { %1356 = vrot.lane.b32.xlu1 %v10893_v37, %s10474_s27 }
 0x74c   :  { %v1296_v47 = vpop.xlane.xlu1 %1295 }
 0x74d   :  { %v1309_v8 = vsub.f32 %v1289_v29, %v1296_v47 }
 0x74e   :  { %v1299_v10 = vpop.xlane.xlu0 %1298 }
 0x74f   :  { %v1314_v63 = vmul.f32 1.442695, %v1309_v8  ;;  %v1310_v39 = vsub.f32 %v1290_v27, %v1299_v10 }
 0x751   :  { %9999 = vpow2.f32 %v1314_v63  ;;  %v1316_v20 = vmul.f32 1.442695, %v1310_v39 }
 0x753   :  { %10001 = vpow2.f32 %v1316_v20 }
 0x754   :  { %v1302_v62 = vpop.xlane.xlu0 %1301 }
 0x755   :  { %v1311_v11 = vsub.f32 %v1291_v38, %v1302_v62  ;;  %v9807_v62 = vld [vmem:[%s13893_s6 + $0x20] sm:$0xff]  }
 0x756   :  { %8981 = vmatpush3.bf16.msra.mxu0 %v9807_v62  ;;  %v9808_v62 = vld [vmem:[%s13893_s6 + $0x28] sm:$0xff]  }
 0x757   :  { %v1318_v48 = vmul.f32 1.442695, %v1311_v11  ;;  %8982 = vmatprep.subr.bf16.mxu0 %v13912_v7 }
 0x758   :  { %v1305_v61 = vpop.xlane.xlu0 %1304 }
 0x759   :  { %10003 = vpow2.f32 %v1318_v48  ;;  %v1312_v19 = vsub.f32 %v1292_v55, %v1305_v61 }
 0x75a   :  { %8983 = vmatpush3.bf16.msra.mxu0 %v9808_v62 }
 0x75b   :  { %v10000_v9 = vpop.eup %9999  ;;  %v1320_v0 = vmul.f32 1.442695, %v1312_v19  ;;  %9014 = vmatprep.subr.bf16.mxu0 %v13912_v7 }
 0x75c   :  { %v1308_v2 = vpop.xlane.xlu1 %1307  ;;  %v1353_v28 = vpop.permute.xlu0 %1352  ;;  %v1324_v36 = vsel %vm671_vm3, %v10000_v9, 0.0 }
 0x75d   :  { %v10002_v59 = vpop.eup %10001  ;;  %10005 = vpow2.f32 %v1320_v0  ;;  %v1313_v29 = vsub.f32 %v1293_v5, %v1308_v2  ;;  %1325 = vadd.xlane.f32.xlu0 %v1324_v36  ;;  %8963 = vmatpush3.bf16.msra.mxu1 %v1353_v28 }
 0x75e   :  { %v1327_v27 = vsel %vm671_vm3, %v10002_v59, 0.0  ;;  %8964 = vmatprep.subr.bf16.mxu1 %v13912_v7 }
 0x75f   :  { %v1322_v38 = vmul.f32 1.442695, %v1313_v29  ;;  %1328 = vadd.xlane.f32.xlu1 %v1327_v27 }
 0x760   :  { %v1355_v47 = vpop.permute.xlu1 %1354 }
 0x761   :  { %10007 = vpow2.f32 %v1322_v38  ;;  %8965 = vmatpush3.bf16.msra.mxu1 %v1355_v47 }
 0x762   :  { %8966 = vmatprep.subr.bf16.mxu1 %v13912_v7 }
 0x763   :  { %v10004_v55 = vpop.eup %10003 }
 0x764   :  { %v1357_v8 = vpop.permute.xlu1 %1356  ;;  %v1330_v10 = vsel %vm671_vm3, %v10004_v55, 0.0 }
 0x765   :  { %v1370_v63 = vsel %vm739_vm2, %v1357_v8, 0  ;;  %1331 = vadd.xlane.f32.xlu0 %v1330_v10 }
 0x766   :  { %8967 = vmatpush3.bf16.msra.mxu1 %v1370_v63 }
 0x767   :  { %v10006_v36 = vpop.eup %10005  ;;  %8996 = vmatprep.subr.bf16.mxu1 %v13912_v7 }
 0x768   :  { %v1333_v5 = vsel %vm671_vm3, %v10006_v36, 0.0 }
 0x769   :  { %1334 = vadd.xlane.f32.xlu1 %v1333_v5 }
 0x76b   :  { %v10008_v39 = vpop.eup %10007 }
 0x76c   :  { %v1336_v20 = vsel %vm671_vm3, %v10008_v39, 0.0 }
 0x76d   :  { %1337 = vadd.xlane.f32.xlu1 %v1336_v20 }
 0x77b   :  { %1519 = vrot.lane.b32.xlu0 %v10861_v31, %s10475_s23 }
 0x77e   :  { %1521 = vrot.lane.b32.xlu1 %v10880_v17, %s10475_s23 }
 0x77f   :  { %1523 = vrot.lane.b32.xlu0 %v10895_v23, %s10475_s23 }
 0x782   :  { %1513 = vrot.lane.b32.xlu1 %v10857_v57, %s10475_s23 }
 0x783   :  { %1515 = vrot.lane.b32.xlu0 %v10876_v13, %s10475_s23 }
 0x786   :  { %1517 = vrot.lane.b32.xlu1 %v10908_v50, %s10475_s23 }
 0x7ea   :  { %v1326_v31 = vpop.xlane.xlu0 %1325 }
 0x7eb   :  { %10009 = vrcp.f32 %v1326_v31 }
 0x7ec   :  { %v1329_v17 = vpop.xlane.xlu1 %1328 }
 0x7ed   :  { %10011 = vrcp.f32 %v1329_v17 }
 0x7f2   :  { %v1332_v23 = vpop.xlane.xlu0 %1331 }
 0x7f3   :  { %10013 = vrcp.f32 %v1332_v23 }
 0x7f5   :  { %v10010_v11 = vpop.eup %10009 }
 0x7f6   :  { %v1335_v57 = vpop.xlane.xlu1 %1334  ;;  %v1344_v13 = vmul.f32 %v10010_v11, %v10000_v9  ;;  %v1520_v50 = vpop.permute.xlu0 %1519 }
 0x7f7   :  { %v10012_v48 = vpop.eup %10011  ;;  %10015 = vrcp.f32 %v1335_v57  ;;  %v1535_v2 = vsel %vm582_vm1, %v1520_v50, 0 }
 0x7f8   :  { %v1345_v61 = vmul.f32 %v10012_v48, %v10002_v59 }
 0x7fa   :  { %v1349_v19 = vpack.c.bf16 %v1345_v61, %v1344_v13  ;;  %v1338_v0 = vpop.xlane.xlu1 %1337  ;;  %v1524_v63 = vpop.permute.xlu0 %1523 }
 0x7fb   :  { %10017 = vrcp.f32 %v1338_v0  ;;  %v1541_v5 = vsel %vm582_vm1, %v1524_v63, 0  ;;  %v10455_v63 = vld [vmem:[%s13892_s1] ss:$0 sm:$0xff] }
 0x7fc   :  { %8969 = vmatmul.mubr.msk.bf16.vlgmr.msra.gmra.mrb[56].mxu1 %vm671_vm3, %v1349_v19 }
 0x7fd   :  { %8997 = vmatpush3.bf16.xpose.msra.mxu1 %v1535_v2  ;;  %8972 = vmatprep.mubr.msk.bf16.mxu1 %vm10472_vm0, %v13912_v7  ;;  %v10014_v28 = vpop.eup %10013 }
 0x7fe   :  { %8998 = vmatprep.subr.bf16.mxu1 %v13912_v7  ;;  %v1522_v27 = vpop.permute.xlu1 %1521  ;;  %v1346_v38 = vmul.f32 %v10014_v28, %v10004_v55 }
 0x7ff   :  { %v1538_v59 = vsel %vm582_vm1, %v1522_v27, 0 }
 0x801   :  { %v10016_v29 = vpop.eup %10015 }
 0x802   :  { %v1347_v9 = vmul.f32 %v10016_v29, %v10006_v36  ;;  %v1514_v55 = vpop.permute.xlu1 %1513  ;;  %v1516_v36 = vpop.permute.xlu0 %1515 }
 0x804   :  { %v1350_v47 = vpack.c.bf16 %v1347_v9, %v1346_v38 }
 0x805   :  { %v10018_v8 = vpop.eup %10017  ;;  %8999 = vmatpush3.bf16.xpose.msra.mxu1 %v1538_v59 }
 0x806   :  { %8973 = vmatmul.mubr.msk.bf16.gmra.mrb[60].mxu1 %vm671_vm3, %v1350_v47  ;;  %9000 = vmatprep.subr.bf16.mxu1 %v13912_v7  ;;  %v1348_v10 = vmul.f32 %v10018_v8, %v10008_v39  ;;  %v1518_v39 = vpop.permute.xlu1 %1517 }
 0x807   :  { %8976 = vmatprep.mubr.msk.bf16.mxu1 %vm10472_vm0, %v13912_v7 }
 0x808   :  { %v1351_v20 = vpack.c.bf16 %v1348_v10, %v1348_v10 }
 0x80d   :  { %9001 = vmatpush3.bf16.xpose.msra.mxu1 %v1541_v5 }
 0x80e   :  { %8977 = vmatmul.mubr.msk.bf16.gmra.mrb[64].mxu1 %vm671_vm3, %v1351_v20  ;;  %9032 = vmatprep.subr.bf16.mxu1 %v13912_v7 }
 0x80f   :  { %9002 = vmatprep.mubr.msk.bf16.mxu1 %vm10472_vm0, %v13912_v7 }
 0x816   :  { %9003 = vmatmul.mubr.msk.bf16.vlgmr.msra.gmra.mrb[68].mxu1 %vm582_vm1, %v1514_v55 }
 0x817   :  { %9006 = vmatprep.mubr.msk.bf16.mxu1 %vm10472_vm0, %v13912_v7 }
 0x81e   :  { %9007 = vmatmul.mubr.msk.bf16.gmra.mrb[72].mxu1 %vm582_vm1, %v1516_v36 }
 0x81f   :  { %9010 = vmatprep.mubr.msk.bf16.mxu1 %vm10472_vm0, %v13912_v7 }
 0x826   :  { %9011 = vmatmul.mubr.msk.bf16.gmra.mrb[76].mxu1 %vm582_vm1, %v1518_v39 }
 0x827   :  { %9036 = vmatprep.mubr.msk.bf16.mxu1 %vm10472_vm0, %v13912_v7 }
 0x8cf   :  { %v1406_v31 = vpop.f32.mrb[56].mxu1 }
 0x8d0   :  { %v8970_v17 = vpop.f32.mrb[57].mxu1 }
 0x8d1   :  { %v1409_v23 = vpop.f32.mrb[58].mxu1 }
 0x8d2   :  { %v1428_v11 = vpack.c.bf16 %v1409_v23, %v1406_v31  ;;  %v8971_v57 = vpop.f32.mrb[59].mxu1 }
 0x8d4   :  { %8985 = vmatmul.mubr.msk.bf16.vlgmr.msra.gmra.mrb[68].mxu0 %vm582_vm1, %v1428_v11 }
 0x8d5   :  { %8988 = vmatprep.mubr.msk.bf16.mxu0 %vm10472_vm0, %v13912_v7 }
 0x8d9   :  { %v1414_v48 = vpop.f32.mrb[60].mxu1 }
 0x8da   :  { %v8974_v13 = vpop.f32.mrb[61].mxu1 }
 0x8db   :  { %v1417_v61 = vpop.f32.mrb[62].mxu1 }
 0x8dc   :  { %v1429_v50 = vpack.c.bf16 %v1417_v61, %v1414_v48  ;;  %v8975_v19 = vpop.f32.mrb[63].mxu1 }
 0x8de   :  { %8989 = vmatmul.mubr.msk.bf16.gmra.mrb[72].mxu0 %vm582_vm1, %v1429_v50 }
 0x8df   :  { %8992 = vmatprep.mubr.msk.bf16.mxu0 %vm10472_vm0, %v13912_v7 }
 0x8e1   :  { %v1422_v0 = vpop.f32.mrb[64].mxu1 }
 0x8e2   :  { %v8978_v2 = vpop.f32.mrb[65].mxu1  ;;  %v1430_v29 = vpack.c.bf16 %v1422_v0, %v1422_v0 }
 0x8e3   :  { %v1425_v28 = vpop.f32.mrb[66].mxu1 }
 0x8e4   :  { %v8979_v27 = vpop.f32.mrb[67].mxu1 }
 0x8e6   :  { %8993 = vmatmul.mubr.msk.bf16.gmra.mrb[76].mxu0 %vm582_vm1, %v1430_v29 }
 0x8e7   :  { %9020 = vmatprep.mubr.msk.bf16.mxu0 %vm10472_vm0, %v13912_v7 }
 0x8e9   :  { %v1577_v38 = vpop.f32.mrb[68].mxu1 }
 0x8ea   :  { %v1599_v9 = vmul.f32 0.17677669, %v1577_v38  ;;  %v9004_v59 = vpop.f32.mrb[69].mxu1 }
 0x8eb   :  { %v1580_v47 = vpop.f32.mrb[70].mxu1 }
 0x8ec   :  { %v1600_v8 = vmul.f32 0.17677669, %v1580_v47  ;;  %v9005_v10 = vpop.f32.mrb[71].mxu1  ;;  %v1604_v5 = vadd.f32 %v10455_v63, %v1599_v9 }
 0x8ee   :  { %v1609_v20 = vsel %vm671_vm3, %v1604_v5, -inf  ;;  %v1605_v55 = vadd.f32 %v10455_v63, %v1600_v8 }
 0x8ef   :  { %1610 = vmax.xlane.f32.xlu0 %v1609_v20 }
 0x8f0   :  { %v1612_v36 = vsel %vm671_vm3, %v1605_v55, -inf }
 0x8f1   :  { %1613 = vmax.xlane.f32.xlu1 %v1612_v36  ;;  %v1585_v39 = vpop.f32.mrb[72].mxu1 }
 0x8f2   :  { %v1601_v62 = vmul.f32 0.17677669, %v1585_v39  ;;  %v9008_v31 = vpop.f32.mrb[73].mxu1 }
 0x8f3   :  { %v1588_v17 = vpop.f32.mrb[74].mxu1 }
 0x8f4   :  { %v1602_v23 = vmul.f32 0.17677669, %v1588_v17  ;;  %v9009_v11 = vpop.f32.mrb[75].mxu1  ;;  %v1606_v57 = vadd.f32 %v10455_v63, %v1601_v62 }
 0x8f6   :  { %v1615_v48 = vsel %vm671_vm3, %v1606_v57, -inf  ;;  %v1607_v13 = vadd.f32 %v10455_v63, %v1602_v23 }
 0x8f7   :  { %1616 = vmax.xlane.f32.xlu0 %v1615_v48 }
 0x8f8   :  { %v1618_v0 = vsel %vm671_vm3, %v1607_v13, -inf }
 0x8f9   :  { %v1593_v61 = vpop.f32.mrb[76].mxu1 }
 0x8fa   :  { %v1603_v50 = vmul.f32 0.17677669, %v1593_v61  ;;  %v9012_v19 = vpop.f32.mrb[77].mxu1 }
 0x8fb   :  { %1619 = vmax.xlane.f32.xlu0 %v1618_v0  ;;  %v1596_v2 = vpop.f32.mrb[78].mxu1 }
 0x8fc   :  { %v9013_v28 = vpop.f32.mrb[79].mxu1  ;;  %v1608_v29 = vadd.f32 %v10455_v63, %v1603_v50 }
 0x8fe   :  { %v1621_v27 = vsel %vm671_vm3, %v1608_v29, -inf }
 0x8ff   :  { %1622 = vmax.xlane.f32.xlu0 %v1621_v27 }
 0x902   :  { %1667 = vrot.lane.b32.xlu1 %v10859_v58, %s10475_s23 }
 0x97c   :  { %v1611_v38 = vpop.xlane.xlu0 %1610 }
 0x97d   :  { %v1624_v9 = vsub.f32 %v1604_v5, %v1611_v38 }
 0x97e   :  { %v1614_v59 = vpop.xlane.xlu1 %1613 }
 0x97f   :  { %v1629_v47 = vmul.f32 1.442695, %v1624_v9  ;;  %v1625_v8 = vsub.f32 %v1605_v55, %v1614_v59 }
 0x981   :  { %10019 = vpow2.f32 %v1629_v47  ;;  %v1631_v10 = vmul.f32 1.442695, %v1625_v8  ;;  %v481_v47 = vadd.f32 %v10965_v24, %v10849_v44  ;;  %v479_v24 = vadd.f32 %v10957_v51, %v10842_v42  ;;  %v9809_v42 = vld [vmem:[%s13893_s6 + $0x30] sm:$0xff]  }
 0x982   :  { %v1668_v20 = vpop.permute.xlu1 %1667  ;;  %9033 = vmatpush3.bf16.msra.mxu1 %v9809_v42 }
 0x983   :  { %10021 = vpow2.f32 %v1631_v10  ;;  %9015 = vmatpush3.bf16.msra.mxu0 %v1668_v20  ;;  %9034 = vmatprep.subr.bf16.mxu1 %v13912_v7 }
 0x984   :  { %v1617_v36 = vpop.xlane.xlu0 %1616  ;;  %9016 = vmatprep.subr.bf16.mxu0 %v13912_v7 }
 0x985   :  { %v1626_v63 = vsub.f32 %v1606_v57, %v1617_v36 }
 0x987   :  { %v1633_v39 = vmul.f32 1.442695, %v1626_v63 }
 0x988   :  { %v1620_v62 = vpop.xlane.xlu0 %1619 }
 0x989   :  { %10023 = vpow2.f32 %v1633_v39  ;;  %v1627_v31 = vsub.f32 %v1607_v13, %v1620_v62 }
 0x98b   :  { %v11242_v17 = vpop.eup %10019  ;;  %v1635_v58 = vmul.f32 1.442695, %v1627_v31 }
 0x98c   :  { %v1623_v5 = vpop.xlane.xlu0 %1622  ;;  %v1639_v55 = vsel %vm671_vm3, %v11242_v17, 0.0 }
 0x98d   :  { %v11246_v23 = vpop.eup %10021  ;;  %10025 = vpow2.f32 %v1635_v58  ;;  %v1628_v11 = vsub.f32 %v1608_v29, %v1623_v5  ;;  %1640 = vadd.xlane.f32.xlu1 %v1639_v55 }
 0x98e   :  { %v1642_v48 = vsel %vm671_vm3, %v11246_v23, 0.0 }
 0x98f   :  { %v1637_v57 = vmul.f32 1.442695, %v1628_v11  ;;  %1643 = vadd.xlane.f32.xlu0 %v1642_v48 }
 0x991   :  { %10027 = vpow2.f32 %v1637_v57 }
 0x993   :  { %v11250_v61 = vpop.eup %10023 }
 0x994   :  { %v1645_v13 = vsel %vm671_vm3, %v11250_v61, 0.0 }
 0x995   :  { %1646 = vadd.xlane.f32.xlu1 %v1645_v13 }
 0x997   :  { %v11254_v50 = vpop.eup %10025 }
 0x998   :  { %v1648_v19 = vsel %vm671_vm3, %v11254_v50, 0.0 }
 0x999   :  { %1649 = vadd.xlane.f32.xlu0 %v1648_v19 }
 0x99b   :  { %v11258_v0 = vpop.eup %10027 }
 0x99c   :  { %v1651_v2 = vsel %vm671_vm3, %v11258_v0, 0.0 }
 0x99d   :  { %1652 = vadd.xlane.f32.xlu0 %v1651_v2 }
 0x9a6   :  { %1671 = vrot.lane.b32.xlu1 %v10893_v37, %s10475_s23  ;;  %v11276_v37 = vpack.c.bf16 %v481_v47, %v481_v47 }
 0x9a7   :  { %v1486_v28 = vpop.f32.mrb[68].mxu0 }
 0x9a8   :  { %v11265_v29 = vadd.f32 %v1486_v28, %v11143_v1  ;;  %v8986_v27 = vpop.f32.mrb[69].mxu0 }
 0x9a9   :  { %v1489_v38 = vpop.f32.mrb[70].mxu0 }
 0x9aa   :  { %v11268_v9 = vadd.f32 %v1489_v38, %v11145_v6  ;;  %v8987_v59 = vpop.f32.mrb[71].mxu0  ;;  %2067 = vrot.lane.b32.xlu1 %v10947_v26, %s10473_s25 }
 0x9ae   :  { %2069 = vrot.lane.b32.xlu1 %v10967_v56, %s10473_s25 }
 0x9b1   :  { %v1494_v8 = vpop.f32.mrb[72].mxu0 }
 0x9b2   :  { %v11279_v1 = vadd.f32 %v1494_v8, %v11147_v3  ;;  %v8990_v10 = vpop.f32.mrb[73].mxu0  ;;  %2071 = vrot.lane.b32.xlu1 %v11276_v37, %s10473_s25  ;;  %v11294_v3 = vpack.c.bf16 %v479_v24, %v479_v24 }
 0x9b3   :  { %v1497_v6 = vpop.f32.mrb[74].mxu0  ;;  %1669 = vrot.lane.b32.xlu0 %v10878_v14, %s10475_s23  ;;  %v1854_v10 = vsel %vm582_vm1, %v11276_v37, 0 }
 0x9b4   :  { %v11286_v20 = vadd.f32 %v1497_v6, %v11149_v4  ;;  %v8991_v44 = vpop.f32.mrb[75].mxu0 }
 0x9b6   :  { %2060 = vrot.lane.b32.xlu1 %v10961_v41, %s10473_s25 }
 0x9b7   :  { %2058 = vrot.lane.b32.xlu0 %v10942_v12, %s10473_s25 }
 0x9b9   :  { %v1502_v36 = vpop.f32.mrb[76].mxu0 }
 0x9ba   :  { %v11297_v63 = vadd.f32 %v1502_v36, %v11151_v34  ;;  %v8994_v14 = vpop.f32.mrb[77].mxu0 }
 0x9bb   :  { %v1505_v39 = vpop.f32.mrb[78].mxu0  ;;  %2062 = vrot.lane.b32.xlu0 %v11294_v3, %s10473_s25 }
 0x9bc   :  { %v8995_v4 = vpop.f32.mrb[79].mxu0 }
 0xa1a   :  { %v1641_v62 = vpop.xlane.xlu1 %1640 }
 0xa1c   :  { %v1644_v51 = vpop.xlane.xlu0 %1643 }
 0xa1d   :  { %10029 = vrcp.f32 %v1644_v51 }
 0xa1e   :  { %10031 = vrcp.f32 %v1641_v62 }
 0xa22   :  { %v1647_v34 = vpop.xlane.xlu1 %1646 }
 0xa26   :  { %v1650_v31 = vpop.xlane.xlu0 %1649  ;;  %v1672_v48 = vpop.permute.xlu1 %1671 }
 0xa27   :  { %10033 = vrcp.f32 %v1650_v31  ;;  %v10030_v5 = vpop.eup %10029  ;;  %v1685_v19 = vsel %vm739_vm2, %v1672_v48, 0 }
 0xa28   :  { %10035 = vrcp.f32 %v1647_v34  ;;  %v10032_v11 = vpop.eup %10031  ;;  %v1660_v57 = vmul.f32 %v10030_v5, %v11246_v23 }
 0xa29   :  { %v1659_v13 = vmul.f32 %v10032_v11, %v11242_v17  ;;  %v1848_v17 = vsel %vm582_vm1, %v10947_v26, 0 }
 0xa2a   :  { %v1653_v58 = vpop.xlane.xlu0 %1652  ;;  %v2068_v6 = vpop.permute.xlu1 %2067 }
 0xa2b   :  { %10037 = vrcp.f32 %v1653_v58  ;;  %v1664_v2 = vpack.c.bf16 %v1660_v57, %v1659_v13  ;;  %v553_v58 = vadd.f32 %v10959_v52, %v10846_v43 }
 0xa2e   :  { %v1670_v55 = vpop.permute.xlu0 %1669  ;;  %v2070_v44 = vpop.permute.xlu1 %2069 }
 0xa2f   :  { %9017 = vmatpush3.bf16.msra.mxu0 %v1670_v55  ;;  %v2086_v24 = vsel %vm582_vm1, %v2070_v44, 0  ;;  %v11376_v55 = vpack.c.bf16 %v553_v58, %v553_v58 }
 0xa30   :  { %9018 = vmatprep.subr.bf16.mxu0 %v13912_v7 }
 0xa31   :  { %v10034_v28 = vpop.eup %10033  ;;  %v1994_v43 = vsel %vm739_vm2, %v11376_v55, 0 }
 0xa32   :  { %v10036_v27 = vpop.eup %10035  ;;  %v1662_v23 = vmul.f32 %v10034_v28, %v11254_v50  ;;  %v1851_v50 = vsel %vm582_vm1, %v10967_v56, 0  ;;  %v2072_v36 = vpop.permute.xlu1 %2071 }
 0xa33   :  { %9019 = vmatpush3.bf16.msra.mxu0 %v1685_v19  ;;  %v1661_v38 = vmul.f32 %v10036_v27, %v11250_v61  ;;  %v2089_v14 = vsel %vm582_vm1, %v2072_v36, 0  ;;  %v2059_v39 = vpop.permute.xlu0 %2058 }
 0xa34   :  { %9048 = vmatprep.subr.bf16.mxu0 %v13912_v7 }
 0xa35   :  { %v1665_v59 = vpack.c.bf16 %v1662_v23, %v1661_v38  ;;  %v10038_v47 = vpop.eup %10037  ;;  %v11392_v38 = vld [vmem:[%s13892_s1 + $0x1] ss:$0 sm:$0xff] }
 0xa36   :  { %9021 = vmatmul.mubr.msk.bf16.vlgmr.msra.gmra.mrb[80].mxu0 %vm671_vm3, %v1664_v2  ;;  %v1663_v8 = vmul.f32 %v10038_v47, %v11258_v0  ;;  %v2083_v0 = vsel %vm582_vm1, %v2068_v6, 0  ;;  %v2061_v4 = vpop.permute.xlu1 %2060 }
 0xa37   :  { %9024 = vmatprep.mubr.msk.bf16.mxu0 %vm10472_vm0, %v13912_v7  ;;  %v2063_v42 = vpop.permute.xlu0 %2062 }
 0xa38   :  { %v1666_v61 = vpack.c.bf16 %v1663_v8, %v1663_v8 }
 0xa3c   :  { %9049 = vmatpush3.bf16.xpose.msra.mxu0 %v1848_v17 }
 0xa3d   :  { %9050 = vmatprep.subr.bf16.mxu0 %v13912_v7 }
 0xa3e   :  { %9025 = vmatmul.mubr.msk.bf16.gmra.mrb[84].mxu0 %vm671_vm3, %v1665_v59 }
 0xa3f   :  { %9028 = vmatprep.mubr.msk.bf16.mxu0 %vm10472_vm0, %v13912_v7 }
 0xa44   :  { %9051 = vmatpush3.bf16.xpose.msra.mxu0 %v1851_v50 }
 0xa45   :  { %9052 = vmatprep.subr.bf16.mxu0 %v13912_v7 }
 0xa46   :  { %9029 = vmatmul.mubr.msk.bf16.gmra.mrb[88].mxu0 %vm671_vm3, %v1666_v61 }
 0xa47   :  { %9054 = vmatprep.mubr.msk.bf16.mxu0 %vm10472_vm0, %v13912_v7 }
 0xa4c   :  { %9053 = vmatpush3.bf16.xpose.msra.mxu0 %v1854_v10 }
 0xa4d   :  { %9084 = vmatprep.subr.bf16.mxu0 %v13912_v7 }
 0xa53   :  { %9055 = vmatmul.mubr.msk.bf16.vlgmr.msra.gmra.mrb[92].mxu0 %vm582_vm1, %v10942_v12 }
 0xa54   :  { %9085 = vmatpush3.bf16.xpose.msra.mxu0 %v2083_v0  ;;  %9058 = vmatprep.mubr.msk.bf16.mxu0 %vm10472_vm0, %v13912_v7 }
 0xa55   :  { %9086 = vmatprep.subr.bf16.mxu0 %v13912_v7 }
 0xa5b   :  { %9059 = vmatmul.mubr.msk.bf16.gmra.mrb[96].mxu0 %vm582_vm1, %v10961_v41 }
 0xa5c   :  { %9087 = vmatpush3.bf16.xpose.msra.mxu0 %v2086_v24  ;;  %9062 = vmatprep.mubr.msk.bf16.mxu0 %vm10472_vm0, %v13912_v7 }
 0xa5d   :  { %9088 = vmatprep.subr.bf16.mxu0 %v13912_v7 }
 0xa63   :  { %9063 = vmatmul.mubr.msk.bf16.gmra.mrb[100].mxu0 %vm582_vm1, %v11294_v3 }
 0xa64   :  { %9089 = vmatpush3.bf16.xpose.msra.mxu0 %v2089_v14  ;;  %9090 = vmatprep.mubr.msk.bf16.mxu0 %vm10472_vm0, %v13912_v7 }
 0xa65   :  { %9120 = vmatprep.subr.bf16.mxu0 %v13912_v7 }
 0xa6b   :  { %9091 = vmatmul.mubr.msk.bf16.vlgmr.msra.gmra.mrb[104].mxu0 %vm582_vm1, %v2059_v39 }
 0xa6c   :  { %9094 = vmatprep.mubr.msk.bf16.mxu0 %vm10472_vm0, %v13912_v7  ;;  %9121 = vmatpush3.bf16.msra.mxu0 %v11074_v22  ;;  %v11365_v22 = vld [vmem:[%s13893_s6 + $0x38] sm:$0xff]  }
 0xa6d   :  { %9122 = vmatprep.subr.bf16.mxu0 %v13912_v7  ;;  %9035 = vmatpush3.bf16.msra.mxu1 %v11365_v22 }
 0xa6e   :  { %9066 = vmatprep.subr.bf16.mxu1 %v13912_v7 }
 0xa70   :  { %9123 = vmatpush3.bf16.msra.mxu0 %v11080_v49 }
 0xa71   :  { %9152 = vmatprep.subr.bf16.mxu0 %v13912_v7 }
 0xa73   :  { %9095 = vmatmul.mubr.msk.bf16.gmra.mrb[108].mxu0 %vm582_vm1, %v2061_v4 }
 0xa74   :  { %9098 = vmatprep.mubr.msk.bf16.mxu0 %vm10472_vm0, %v13912_v7 }
 0xa7b   :  { %9099 = vmatmul.mubr.msk.bf16.gmra.mrb[112].mxu0 %vm582_vm1, %v2063_v42 }
 0xa7c   :  { %9124 = vmatprep.mubr.msk.bf16.mxu0 %vm10472_vm0, %v13912_v7 }
 0xb09   :  { %v1721_v49 = vpop.f32.mrb[80].mxu0 }
 0xb0a   :  { %v9022_v51 = vpop.f32.mrb[81].mxu0 }
 0xb0b   :  { %v1724_v62 = vpop.f32.mrb[82].mxu0 }
 0xb0c   :  { %v1743_v31 = vpack.c.bf16 %v1724_v62, %v1721_v49  ;;  %v9023_v34 = vpop.f32.mrb[83].mxu0 }
 0xb0e   :  { %9037 = vmatmul.mubr.msk.bf16.vlgmr.msra.gmra.mrb[80].mxu1 %vm582_vm1, %v1743_v31 }
 0xb0f   :  { %9067 = vmatpush3.bf16.msra.mxu1 %v10944_v18  ;;  %9040 = vmatprep.mubr.msk.bf16.mxu1 %vm10472_vm0, %v13912_v7 }
 0xb10   :  { %9068 = vmatprep.subr.bf16.mxu1 %v13912_v7 }
 0xb11   :  { %v1729_v5 = vpop.f32.mrb[84].mxu0 }
 0xb12   :  { %v9026_v11 = vpop.f32.mrb[85].mxu0 }
 0xb13   :  { %9069 = vmatpush3.bf16.msra.mxu1 %v10963_v53  ;;  %v1732_v48 = vpop.f32.mrb[86].mxu0 }
 0xb14   :  { %v1744_v57 = vpack.c.bf16 %v1732_v48, %v1729_v5  ;;  %v9027_v13 = vpop.f32.mrb[87].mxu0  ;;  %9070 = vmatprep.subr.bf16.mxu1 %v13912_v7 }
 0xb16   :  { %9041 = vmatmul.mubr.msk.bf16.gmra.mrb[84].mxu1 %vm582_vm1, %v1744_v57 }
 0xb17   :  { %9071 = vmatpush3.bf16.msra.mxu1 %v1994_v43  ;;  %9044 = vmatprep.mubr.msk.bf16.mxu1 %vm10472_vm0, %v13912_v7 }
 0xb18   :  { %9102 = vmatprep.subr.bf16.mxu1 %v13912_v7 }
 0xb19   :  { %v1737_v52 = vpop.f32.mrb[88].mxu0 }
 0xb1a   :  { %v9030_v19 = vpop.f32.mrb[89].mxu0  ;;  %v1745_v28 = vpack.c.bf16 %v1737_v52, %v1737_v52 }
 0xb1b   :  { %v1740_v2 = vpop.f32.mrb[90].mxu0 }
 0xb1c   :  { %v9031_v27 = vpop.f32.mrb[91].mxu0 }
 0xb1e   :  { %9045 = vmatmul.mubr.msk.bf16.gmra.mrb[88].mxu1 %vm582_vm1, %v1745_v28 }
 0xb1f   :  { %9072 = vmatprep.mubr.msk.bf16.mxu1 %vm10472_vm0, %v13912_v7 }
 0xb26   :  { %v1890_v23 = vpop.f32.mrb[92].mxu0 }
 0xb27   :  { %v1912_v17 = vmul.f32 0.17677669, %v1890_v23  ;;  %v9056_v59 = vpop.f32.mrb[93].mxu0 }
 0xb28   :  { %v1893_v47 = vpop.f32.mrb[94].mxu0 }
 0xb29   :  { %v1913_v8 = vmul.f32 0.17677669, %v1893_v47  ;;  %v9057_v50 = vpop.f32.mrb[95].mxu0  ;;  %v1921_v61 = vadd.f32 %v11392_v38, %v1912_v17 }
 0xb2b   :  { %v1926_v10 = vsel %vm671_vm3, %v1921_v61, -inf  ;;  %v11397_v6 = vadd.f32 %v11392_v38, %v1913_v8 }
 0xb2c   :  { %1927 = vmax.xlane.f32.xlu1 %v1926_v10 }
 0xb2d   :  { %v1929_v0 = vsel %vm671_vm3, %v11397_v6, -inf }
 0xb2e   :  { %1930 = vmax.xlane.f32.xlu0 %v1929_v0  ;;  %v1898_v44 = vpop.f32.mrb[96].mxu0 }
 0xb2f   :  { %v1914_v24 = vmul.f32 0.17677669, %v1898_v44  ;;  %v9060_v36 = vpop.f32.mrb[97].mxu0 }
 0xb30   :  { %v1901_v14 = vpop.f32.mrb[98].mxu0 }
 0xb31   :  { %v1915_v39 = vmul.f32 0.17677669, %v1901_v14  ;;  %v9061_v4 = vpop.f32.mrb[99].mxu0  ;;  %v1923_v42 = vadd.f32 %v11392_v38, %v1914_v24 }
 0xb33   :  { %v1932_v49 = vsel %vm671_vm3, %v1923_v42, -inf  ;;  %v1924_v51 = vadd.f32 %v11392_v38, %v1915_v39 }
 0xb34   :  { %1933 = vmax.xlane.f32.xlu0 %v1932_v49 }
 0xb35   :  { %v1935_v58 = vsel %vm671_vm3, %v1924_v51, -inf }
 0xb36   :  { %v1906_v62 = vpop.f32.mrb[100].mxu0 }
 0xb37   :  { %v1916_v31 = vmul.f32 0.17677669, %v1906_v62  ;;  %v9064_v34 = vpop.f32.mrb[101].mxu0 }
 0xb38   :  { %1936 = vmax.xlane.f32.xlu0 %v1935_v58  ;;  %v1909_v5 = vpop.f32.mrb[102].mxu0 }
 0xb39   :  { %v9065_v11 = vpop.f32.mrb[103].mxu0  ;;  %v1925_v48 = vadd.f32 %v11392_v38, %v1916_v31 }
 0xb3b   :  { %v1938_v57 = vsel %vm671_vm3, %v1925_v48, -inf }
 0xb3c   :  { %1939 = vmax.xlane.f32.xlu1 %v1938_v57 }
 0xb3e   :  { %v2125_v13 = vpop.f32.mrb[104].mxu0 }
 0xb3f   :  { %v2147_v43 = vmul.f32 0.17677669, %v2125_v13  ;;  %v9092_v52 = vpop.f32.mrb[105].mxu0 }
 0xb40   :  { %v2128_v19 = vpop.f32.mrb[106].mxu0 }
 0xb41   :  { %v2148_v2 = vmul.f32 0.17677669, %v2128_v19  ;;  %v9093_v28 = vpop.f32.mrb[107].mxu0  ;;  %v2152_v27 = vadd.f32 %v11392_v38, %v2147_v43 }
 0xb43   :  { %v2157_v23 = vsel %vm671_vm3, %v2152_v27, -inf  ;;  %v2153_v17 = vadd.f32 %v11392_v38, %v2148_v2 }
 0xb44   :  { %2158 = vmax.xlane.f32.xlu0 %v2157_v23 }
 0xb45   :  { %v2160_v59 = vsel %vm671_vm3, %v2153_v17, -inf }
 0xb46   :  { %2161 = vmax.xlane.f32.xlu1 %v2160_v59  ;;  %v2133_v47 = vpop.f32.mrb[108].mxu0 }
 0xb47   :  { %v2149_v8 = vmul.f32 0.17677669, %v2133_v47  ;;  %v9096_v50 = vpop.f32.mrb[109].mxu0 }
 0xb48   :  { %v2136_v10 = vpop.f32.mrb[110].mxu0 }
 0xb49   :  { %v2150_v0 = vmul.f32 0.17677669, %v2136_v10  ;;  %v9097_v44 = vpop.f32.mrb[111].mxu0  ;;  %v2154_v24 = vadd.f32 %v11392_v38, %v2149_v8 }
 0xb4b   :  { %v2163_v36 = vsel %vm671_vm3, %v2154_v24, -inf  ;;  %v2155_v14 = vadd.f32 %v11392_v38, %v2150_v0 }
 0xb4c   :  { %2164 = vmax.xlane.f32.xlu0 %v2163_v36 }
 0xb4d   :  { %v2166_v39 = vsel %vm671_vm3, %v2155_v14, -inf }
 0xb4e   :  { %2167 = vmax.xlane.f32.xlu1 %v2166_v39  ;;  %v2141_v4 = vpop.f32.mrb[112].mxu0 }
 0xb4f   :  { %v2151_v49 = vmul.f32 0.17677669, %v2141_v4  ;;  %v9100_v62 = vpop.f32.mrb[113].mxu0 }
 0xb50   :  { %v2144_v31 = vpop.f32.mrb[114].mxu0 }
 0xb51   :  { %v9101_v34 = vpop.f32.mrb[115].mxu0  ;;  %v11416_v58 = vadd.f32 %v11392_v38, %v2151_v49 }
 0xb53   :  { %v2169_v5 = vsel %vm671_vm3, %v11416_v58, -inf }
 0xb54   :  { %2170 = vmax.xlane.f32.xlu0 %v2169_v5 }
 0xb5f   :  { %2218 = vrot.lane.b32.xlu1 %v10944_v18, %s10473_s25 }
 0xbb9   :  { %v1928_v11 = vpop.xlane.xlu1 %1927 }
 0xbba   :  { %v1941_v57 = vsub.f32 %v1921_v61, %v1928_v11 }
 0xbbb   :  { %v1931_v13 = vpop.xlane.xlu0 %1930 }
 0xbbc   :  { %v1946_v43 = vmul.f32 1.442695, %v1941_v57  ;;  %v1942_v52 = vsub.f32 %v11397_v6, %v1931_v13 }
 0xbbe   :  { %10039 = vpow2.f32 %v1946_v43  ;;  %v1948_v19 = vmul.f32 1.442695, %v1942_v52 }
 0xbc0   :  { %10041 = vpow2.f32 %v1948_v19 }
 0xbc1   :  { %v1934_v2 = vpop.xlane.xlu0 %1933 }
 0xbc2   :  { %v1943_v28 = vsub.f32 %v1923_v42, %v1934_v2 }
 0xbc4   :  { %v1950_v23 = vmul.f32 1.442695, %v1943_v28 }
 0xbc5   :  { %v1937_v59 = vpop.xlane.xlu0 %1936 }
 0xbc6   :  { %10043 = vpow2.f32 %v1950_v23  ;;  %v1944_v47 = vsub.f32 %v1924_v51, %v1937_v59 }
 0xbc8   :  { %v11423_v8 = vpop.eup %10039  ;;  %v1952_v50 = vmul.f32 1.442695, %v1944_v47 }
 0xbc9   :  { %v1940_v10 = vpop.xlane.xlu1 %1939  ;;  %v1956_v61 = vsel %vm671_vm3, %v11423_v8, 0.0 }
 0xbca   :  { %v11427_v0 = vpop.eup %10041  ;;  %10045 = vpow2.f32 %v1952_v50  ;;  %v1945_v6 = vsub.f32 %v1925_v48, %v1940_v10  ;;  %1957 = vadd.xlane.f32.xlu1 %v1956_v61 }
 0xbcb   :  { %v1959_v44 = vsel %vm671_vm3, %v11427_v0, 0.0 }
 0xbcc   :  { %v1954_v42 = vmul.f32 1.442695, %v1945_v6  ;;  %1960 = vadd.xlane.f32.xlu0 %v1959_v44 }
 0xbce   :  { %10047 = vpow2.f32 %v1954_v42 }
 0xbd0   :  { %v11431_v36 = vpop.eup %10043 }
 0xbd1   :  { %v2159_v51 = vpop.xlane.xlu0 %2158  ;;  %v1962_v39 = vsel %vm671_vm3, %v11431_v36, 0.0 }
 0xbd2   :  { %v2172_v4 = vsub.f32 %v2152_v27, %v2159_v51  ;;  %1963 = vadd.xlane.f32.xlu1 %v1962_v39 }
 0xbd3   :  { %v2162_v49 = vpop.xlane.xlu1 %2161 }
 0xbd4   :  { %v11435_v62 = vpop.eup %10045  ;;  %v2177_v31 = vmul.f32 1.442695, %v2172_v4  ;;  %v2173_v48 = vsub.f32 %v2153_v17, %v2162_v49 }
 0xbd5   :  { %v1965_v34 = vsel %vm671_vm3, %v11435_v62, 0.0 }
 0xbd6   :  { %10049 = vpow2.f32 %v2177_v31  ;;  %v2179_v5 = vmul.f32 1.442695, %v2173_v48  ;;  %1966 = vadd.xlane.f32.xlu0 %v1965_v34 }
 0xbd8   :  { %v11439_v11 = vpop.eup %10047  ;;  %10051 = vpow2.f32 %v2179_v5 }
 0xbd9   :  { %v2165_v57 = vpop.xlane.xlu0 %2164  ;;  %v1968_v13 = vsel %vm671_vm3, %v11439_v11, 0.0 }
 0xbda   :  { %v2174_v27 = vsub.f32 %v2154_v24, %v2165_v57  ;;  %1969 = vadd.xlane.f32.xlu1 %v1968_v13 }
 0xbdb   :  { %v2168_v43 = vpop.xlane.xlu1 %2167 }
 0xbdc   :  { %v2181_v52 = vmul.f32 1.442695, %v2174_v27  ;;  %v2175_v19 = vsub.f32 %v2155_v14, %v2168_v43 }
 0xbde   :  { %10053 = vpow2.f32 %v2181_v52  ;;  %v2183_v17 = vmul.f32 1.442695, %v2175_v19 }
 0xbe0   :  { %v11443_v2 = vpop.eup %10049  ;;  %10055 = vpow2.f32 %v2183_v17 }
 0xbe1   :  { %v1801_v28 = vpop.f32.mrb[80].mxu1  ;;  %v2171_v23 = vpop.xlane.xlu0 %2170  ;;  %v2187_v59 = vsel %vm671_vm3, %v11443_v2, 0.0 }
 0xbe2   :  { %v11447_v47 = vpop.eup %10051  ;;  %v11450_v50 = vadd.f32 %v1801_v28, %v11265_v29  ;;  %v2176_v24 = vsub.f32 %v11416_v58, %v2171_v23  ;;  %v9038_v10 = vpop.f32.mrb[81].mxu1  ;;  %2188 = vadd.xlane.f32.xlu0 %v2187_v59 }
 0xbe3   :  { %v1804_v14 = vpop.f32.mrb[82].mxu1  ;;  %v2190_v61 = vsel %vm671_vm3, %v11447_v47, 0.0 }
 0xbe4   :  { %v2185_v6 = vmul.f32 1.442695, %v2176_v24  ;;  %v11456_v44 = vadd.f32 %v1804_v14, %v11268_v9  ;;  %v9039_v42 = vpop.f32.mrb[83].mxu1  ;;  %2191 = vadd.xlane.f32.xlu1 %v2190_v61 }
 0xbe6   :  { %10057 = vpow2.f32 %v2185_v6 }
 0xbe8   :  { %v11458_v51 = vpop.eup %10053 }
 0xbe9   :  { %v1809_v39 = vpop.f32.mrb[84].mxu1  ;;  %v2193_v29 = vsel %vm671_vm3, %v11458_v51, 0.0 }
 0xbea   :  { %v11462_v58 = vpop.eup %10055  ;;  %v11465_v4 = vadd.f32 %v1809_v39, %v11279_v1  ;;  %v9042_v49 = vpop.f32.mrb[85].mxu1  ;;  %2194 = vadd.xlane.f32.xlu0 %v2193_v29 }
 0xbeb   :  { %v1812_v31 = vpop.f32.mrb[86].mxu1  ;;  %v2196_v9 = vsel %vm671_vm3, %v11462_v58, 0.0 }
 0xbec   :  { %v11470_v48 = vadd.f32 %v1812_v31, %v11286_v20  ;;  %v9043_v34 = vpop.f32.mrb[87].mxu1  ;;  %2197 = vadd.xlane.f32.xlu1 %v2196_v9  ;;  %v2219_v20 = vpop.permute.xlu1 %2218 }
 0xbf0   :  { %v11472_v5 = vpop.eup %10057 }
 0xbf1   :  { %v1817_v57 = vpop.f32.mrb[88].mxu1  ;;  %v2199_v13 = vsel %vm671_vm3, %v11472_v5, 0.0 }
 0xbf2   :  { %v11477_v1 = vadd.f32 %v1817_v57, %v11297_v63  ;;  %v9046_v27 = vpop.f32.mrb[89].mxu1  ;;  %2200 = vadd.xlane.f32.xlu0 %v2199_v13 }
 0xbf3   :  { %v1820_v43 = vpop.f32.mrb[90].mxu1 }
 0xbf4   :  { %v9047_v52 = vpop.f32.mrb[91].mxu1 }
 0xbfd   :  { %2222 = vrot.lane.b32.xlu1 %v11376_v55, %s10473_s25 }
 0xc01   :  { %2433 = vrot.lane.b32.xlu1 %v10947_v26, %s10474_s27 }
 0xc05   :  { %2435 = vrot.lane.b32.xlu1 %v10967_v56, %s10474_s27 }
 0xc08   :  { %2220 = vrot.lane.b32.xlu0 %v10963_v53, %s10473_s25 }
 0xc09   :  { %2427 = vrot.lane.b32.xlu1 %v10942_v12, %s10474_s27 }
 0xc0c   :  { %2437 = vrot.lane.b32.xlu0 %v11276_v37, %s10474_s27 }
 0xc0d   :  { %2431 = vrot.lane.b32.xlu1 %v11294_v3, %s10474_s27 }
 0xc10   :  { %2429 = vrot.lane.b32.xlu0 %v10961_v41, %s10474_s27 }
 0xc57   :  { %v1958_v63 = vpop.xlane.xlu1 %1957 }
 0xc58   :  { %10059 = vrcp.f32 %v1958_v63 }
 0xc59   :  { %v1961_v19 = vpop.xlane.xlu0 %1960 }
 0xc5a   :  { %10061 = vrcp.f32 %v1961_v19 }
 0xc5f   :  { %v1964_v17 = vpop.xlane.xlu1 %1963 }
 0xc60   :  { %10063 = vrcp.f32 %v1964_v17 }
 0xc62   :  { %v10060_v28 = vpop.eup %10059 }
 0xc63   :  { %v1967_v23 = vpop.xlane.xlu0 %1966  ;;  %v1976_v24 = vmul.f32 %v10060_v28, %v11423_v8 }
 0xc64   :  { %v10062_v59 = vpop.eup %10061  ;;  %10065 = vrcp.f32 %v1967_v23 }
 0xc65   :  { %v1977_v10 = vmul.f32 %v10062_v59, %v11427_v0  ;;  %v10457_v59 = vld [vmem:[%s13893_s6 + $0x8] sm:$0xff]  }
 0xc67   :  { %v1981_v14 = vpack.c.bf16 %v1977_v10, %v1976_v24  ;;  %v1970_v61 = vpop.xlane.xlu1 %1969 }
 0xc68   :  { %10067 = vrcp.f32 %v1970_v61 }
 0xc69   :  { %9073 = vmatmul.mubr.msk.bf16.vlgmr.msra.gmra.mrb[92].mxu1 %vm671_vm3, %v1981_v14 }
 0xc6a   :  { %9103 = vmatpush3.bf16.msra.mxu1 %v2219_v20  ;;  %9076 = vmatprep.mubr.msk.bf16.mxu1 %vm10472_vm0, %v13912_v7  ;;  %v10064_v6 = vpop.eup %10063 }
 0xc6b   :  { %9104 = vmatprep.subr.bf16.mxu1 %v13912_v7  ;;  %v1978_v39 = vmul.f32 %v10064_v6, %v11431_v36 }
 0xc6e   :  { %v10066_v42 = vpop.eup %10065 }
 0xc6f   :  { %v1979_v29 = vmul.f32 %v10066_v42, %v11435_v62  ;;  %v2189_v9 = vpop.xlane.xlu0 %2188 }
 0xc71   :  { %v1982_v8 = vpack.c.bf16 %v1979_v29, %v1978_v39  ;;  %v2192_v0 = vpop.xlane.xlu1 %2191 }
 0xc72   :  { %v10068_v49 = vpop.eup %10067  ;;  %10069 = vrcp.f32 %v2192_v0 }
 0xc73   :  { %9077 = vmatmul.mubr.msk.bf16.gmra.mrb[96].mxu1 %vm671_vm3, %v1982_v8  ;;  %v1980_v31 = vmul.f32 %v10068_v49, %v11439_v11  ;;  %10071 = vrcp.f32 %v2189_v9 }
 0xc74   :  { %9080 = vmatprep.mubr.msk.bf16.mxu1 %vm10472_vm0, %v13912_v7 }
 0xc75   :  { %v1983_v34 = vpack.c.bf16 %v1980_v31, %v1980_v31 }
 0xc77   :  { %v2195_v57 = vpop.xlane.xlu0 %2194 }
 0xc79   :  { %v2198_v36 = vpop.xlane.xlu1 %2197 }
 0xc7a   :  { %10073 = vrcp.f32 %v2198_v36 }
 0xc7b   :  { %9081 = vmatmul.mubr.msk.bf16.gmra.mrb[100].mxu1 %vm671_vm3, %v1983_v34  ;;  %10075 = vrcp.f32 %v2195_v57 }
 0xc7c   :  { %9108 = vmatprep.mubr.msk.bf16.mxu1 %vm10472_vm0, %v13912_v7  ;;  %v10070_v13 = vpop.eup %10069 }
 0xc7d   :  { %v10072_v43 = vpop.eup %10071  ;;  %v2223_v52 = vpop.permute.xlu1 %2222  ;;  %v2208_v11 = vmul.f32 %v10070_v13, %v11447_v47  ;;  %v10456_v47 = vld [vmem:[%s13893_s6] sm:$0xff]  }
 0xc7e   :  { %v2207_v20 = vmul.f32 %v10072_v43, %v11443_v2  ;;  %v2236_v63 = vsel %vm739_vm2, %v2223_v52, 0 }
 0xc7f   :  { %v2201_v62 = vpop.xlane.xlu0 %2200 }
 0xc80   :  { %10077 = vrcp.f32 %v2201_v62  ;;  %v2212_v19 = vpack.c.bf16 %v2208_v11, %v2207_v20 }
 0xc83   :  { %v2221_v27 = vpop.permute.xlu0 %2220 }
 0xc84   :  { %9105 = vmatpush3.bf16.msra.mxu1 %v2221_v27  ;;  %v10074_v17 = vpop.eup %10073  ;;  %v2434_v27 = vpop.permute.xlu1 %2433 }
 0xc85   :  { %9106 = vmatprep.subr.bf16.mxu1 %v13912_v7  ;;  %v10076_v28 = vpop.eup %10075  ;;  %v2210_v2 = vmul.f32 %v10074_v17, %v11462_v58  ;;  %v2449_v20 = vsel %vm582_vm1, %v2434_v27, 0 }
 0xc86   :  { %v2209_v23 = vmul.f32 %v10076_v28, %v11458_v51 }
 0xc88   :  { %9107 = vmatpush3.bf16.msra.mxu1 %v2236_v63  ;;  %v2213_v24 = vpack.c.bf16 %v2210_v2, %v2209_v23  ;;  %v2436_v17 = vpop.permute.xlu1 %2435 }
 0xc89   :  { %9136 = vmatprep.subr.bf16.mxu1 %v13912_v7  ;;  %v2452_v23 = vsel %vm582_vm1, %v2436_v17, 0 }
 0xc8a   :  { %v10078_v10 = vpop.eup %10077 }
 0xc8b   :  { %9109 = vmatmul.mubr.msk.bf16.vlgmr.msra.gmra.mrb[104].mxu1 %vm671_vm3, %v2212_v19  ;;  %v2211_v58 = vmul.f32 %v10078_v10, %v11472_v5  ;;  %v2438_v10 = vpop.permute.xlu0 %2437 }
 0xc8c   :  { %9112 = vmatprep.mubr.msk.bf16.mxu1 %vm10472_vm0, %v13912_v7  ;;  %9137 = vmatpush3.bf16.msra.mxu1 %v10456_v47 }
 0xc8d   :  { %9138 = vmatprep.subr.bf16.mxu1 %v13912_v7  ;;  %v2214_v14 = vpack.c.bf16 %v2211_v58, %v2211_v58 }
 0xc90   :  { %9139 = vmatpush3.bf16.msra.mxu1 %v10457_v59 }
 0xc91   :  { %9170 = vmatprep.subr.bf16.mxu1 %v13912_v7 }
 0xc93   :  { %9113 = vmatmul.mubr.msk.bf16.gmra.mrb[108].mxu1 %vm671_vm3, %v2213_v24 }
 0xc94   :  { %9116 = vmatprep.mubr.msk.bf16.mxu1 %vm10472_vm0, %v13912_v7 }
 0xc9b   :  { %9117 = vmatmul.mubr.msk.bf16.gmra.mrb[112].mxu1 %vm671_vm3, %v2214_v14 }
 0xc9c   :  { %9140 = vmatprep.mubr.msk.bf16.mxu1 %vm10472_vm0, %v13912_v7 }
 0xd3c   :  { %v2030_v51 = vpop.f32.mrb[92].mxu1 }
 0xd3d   :  { %v9074_v61 = vpop.f32.mrb[93].mxu1 }
 0xd3e   :  { %v2033_v6 = vpop.f32.mrb[94].mxu1  ;;  %v2455_v61 = vsel %vm582_vm1, %v2438_v10, 0 }
 0xd3f   :  { %v2052_v42 = vpack.c.bf16 %v2033_v6, %v2030_v51  ;;  %v9075_v39 = vpop.f32.mrb[95].mxu1  ;;  %v2428_v6 = vpop.permute.xlu1 %2427 }
 0xd40   :  { %v10459_v39 = vld [vmem:[%s13893_s6 + $0x28] sm:$0xff]  }
 0xd41   :  { %9141 = vmatmul.mubr.msk.bf16.vlgmr.msra.gmra.mrb[116].mxu1 %vm582_vm1, %v2052_v42  ;;  %v10458_v42 = vld [vmem:[%s13893_s6 + $0x20] sm:$0xff]  }
 0xd42   :  { %9144 = vmatprep.mubr.msk.bf16.mxu1 %vm10472_vm0, %v13912_v7 }
 0xd46   :  { %v2038_v29 = vpop.f32.mrb[96].mxu1 }
 0xd47   :  { %v9078_v8 = vpop.f32.mrb[97].mxu1 }
 0xd48   :  { %v2041_v49 = vpop.f32.mrb[98].mxu1  ;;  %v2432_v8 = vpop.permute.xlu1 %2431 }
 0xd49   :  { %v2053_v5 = vpack.c.bf16 %v2041_v49, %v2038_v29  ;;  %v9079_v0 = vpop.f32.mrb[99].mxu1  ;;  %v2430_v29 = vpop.permute.xlu0 %2429 }
 0xd4b   :  { %9145 = vmatmul.mubr.msk.bf16.gmra.mrb[120].mxu1 %vm582_vm1, %v2053_v5 }
 0xd4c   :  { %9148 = vmatprep.mubr.msk.bf16.mxu1 %vm10472_vm0, %v13912_v7 }
 0xd4e   :  { %v2046_v31 = vpop.f32.mrb[100].mxu1 }
 0xd4f   :  { %v9082_v9 = vpop.f32.mrb[101].mxu1  ;;  %v2054_v57 = vpack.c.bf16 %v2046_v31, %v2046_v31 }
 0xd50   :  { %v2049_v34 = vpop.f32.mrb[102].mxu1 }
 0xd51   :  { %v9083_v36 = vpop.f32.mrb[103].mxu1 }
 0xd53   :  { %9149 = vmatmul.mubr.msk.bf16.gmra.mrb[124].mxu1 %vm582_vm1, %v2054_v57 }
 0xd54   :  { %9176 = vmatprep.mubr.msk.bf16.mxu1 %vm10472_vm0, %v13912_v7 }
 0xd5e   :  { %v2272_v62 = vpop.f32.mrb[104].mxu1 }
 0xd5f   :  { %v9110_v13 = vpop.f32.mrb[105].mxu1 }
 0xd60   :  { %v2275_v43 = vpop.f32.mrb[106].mxu1 }
 0xd61   :  { %v2294_v52 = vpack.c.bf16 %v2275_v43, %v2272_v62  ;;  %v9111_v11 = vpop.f32.mrb[107].mxu1 }
 0xd63   :  { %9125 = vmatmul.mubr.msk.bf16.vlgmr.msra.gmra.mrb[116].mxu0 %vm582_vm1, %v2294_v52 }
 0xd64   :  { %9153 = vmatpush3.bf16.xpose.msra.mxu0 %v2449_v20  ;;  %9128 = vmatprep.mubr.msk.bf16.mxu0 %vm10472_vm0, %v13912_v7 }
 0xd65   :  { %9154 = vmatprep.subr.bf16.mxu0 %v13912_v7 }
 0xd66   :  { %v2280_v63 = vpop.f32.mrb[108].mxu1 }
 0xd67   :  { %v9114_v19 = vpop.f32.mrb[109].mxu1 }
 0xd68   :  { %v2283_v28 = vpop.f32.mrb[110].mxu1 }
 0xd69   :  { %v2295_v47 = vpack.c.bf16 %v2283_v28, %v2280_v63  ;;  %v9115_v2 = vpop.f32.mrb[111].mxu1 }
 0xd6b   :  { %9129 = vmatmul.mubr.msk.bf16.gmra.mrb[120].mxu0 %vm582_vm1, %v2295_v47 }
 0xd6c   :  { %9155 = vmatpush3.bf16.xpose.msra.mxu0 %v2452_v23  ;;  %9132 = vmatprep.mubr.msk.bf16.mxu0 %vm10472_vm0, %v13912_v7 }
 0xd6d   :  { %9156 = vmatprep.subr.bf16.mxu0 %v13912_v7 }
 0xd6e   :  { %v2288_v59 = vpop.f32.mrb[112].mxu1 }
 0xd6f   :  { %v9118_v24 = vpop.f32.mrb[113].mxu1  ;;  %v2296_v14 = vpack.c.bf16 %v2288_v59, %v2288_v59 }
 0xd70   :  { %v2291_v58 = vpop.f32.mrb[114].mxu1 }
 0xd71   :  { %v9119_v51 = vpop.f32.mrb[115].mxu1 }
 0xd73   :  { %9133 = vmatmul.mubr.msk.bf16.gmra.mrb[124].mxu0 %vm582_vm1, %v2296_v14 }
 0xd74   :  { %9157 = vmatpush3.bf16.xpose.msra.mxu0 %v2455_v61  ;;  %9158 = vmatprep.mubr.msk.bf16.mxu0 %vm10472_vm0, %v13912_v7 }
 0xd75   :  { %9188 = vmatprep.subr.bf16.mxu0 %v13912_v7 }
 0xd7b   :  { %9159 = vmatmul.mubr.msk.bf16.vlgmr.msra.gmra.mrb[128].mxu0 %vm582_vm1, %v2428_v6 }
 0xd7c   :  { %9162 = vmatprep.mubr.msk.bf16.mxu0 %vm10472_vm0, %v13912_v7  ;;  %9189 = vmatpush3.bf16.msra.mxu0 %v10458_v42 }
 0xd7d   :  { %9190 = vmatprep.subr.bf16.mxu0 %v13912_v7 }
 0xd80   :  { %9191 = vmatpush3.bf16.msra.mxu0 %v10459_v39 }
 0xd81   :  { %9222 = vmatprep.subr.bf16.mxu0 %v13912_v7 }
 0xd83   :  { %9163 = vmatmul.mubr.msk.bf16.gmra.mrb[132].mxu0 %vm582_vm1, %v2430_v29 }
 0xd84   :  { %9166 = vmatprep.mubr.msk.bf16.mxu0 %vm10472_vm0, %v13912_v7 }
 0xd8b   :  { %9167 = vmatmul.mubr.msk.bf16.gmra.mrb[136].mxu0 %vm582_vm1, %v2432_v8 }
 0xd8c   :  { %9192 = vmatprep.mubr.msk.bf16.mxu0 %vm10472_vm0, %v13912_v7 }
 0xe14   :  { %v2405_v49 = vpop.f32.mrb[116].mxu1 }
 0xe15   :  { %v9142_v5 = vpop.f32.mrb[117].mxu1 }
 0xe16   :  { %v2408_v0 = vpop.f32.mrb[118].mxu1 }
 0xe17   :  { %v9143_v31 = vpop.f32.mrb[119].mxu1 }
 0xe1e   :  { %v2413_v9 = vpop.f32.mrb[120].mxu1 }
 0xe1f   :  { %v9146_v34 = vpop.f32.mrb[121].mxu1 }
 0xe20   :  { %v2416_v57 = vpop.f32.mrb[122].mxu1 }
 0xe21   :  { %v9147_v36 = vpop.f32.mrb[123].mxu1 }
 0xe26   :  { %v2421_v62 = vpop.f32.mrb[124].mxu1 }
 0xe27   :  { %v9150_v13 = vpop.f32.mrb[125].mxu1 }
 0xe28   :  { %v2424_v27 = vpop.f32.mrb[126].mxu1 }
 0xe29   :  { %v9151_v43 = vpop.f32.mrb[127].mxu1 }
 0xe36   :  { %v2340_v52 = vpop.f32.mrb[116].mxu0 }
 0xe37   :  { %v9126_v11 = vpop.f32.mrb[117].mxu0  ;;  %v11576_v20 = vadd.f32 %v2405_v49, %v2340_v52 }
 0xe38   :  { %v2343_v63 = vpop.f32.mrb[118].mxu0 }
 0xe39   :  { %v9127_v19 = vpop.f32.mrb[119].mxu0  ;;  %v11578_v17 = vadd.f32 %v2408_v0, %v2343_v63 }
 0xe3e   :  { %v2348_v28 = vpop.f32.mrb[120].mxu0 }
 0xe3f   :  { %v9130_v47 = vpop.f32.mrb[121].mxu0  ;;  %v11580_v2 = vadd.f32 %v2413_v9, %v2348_v28 }
 0xe40   :  { %v2351_v23 = vpop.f32.mrb[122].mxu0 }
 0xe41   :  { %v9131_v59 = vpop.f32.mrb[123].mxu0  ;;  %v11582_v24 = vadd.f32 %v2416_v57, %v2351_v23 }
 0xe46   :  { %v2356_v10 = vpop.f32.mrb[124].mxu0 }
 0xe47   :  { %v11584_v58 = vadd.f32 %v2421_v62, %v2356_v10  ;;  %v9134_v14 = vpop.f32.mrb[125].mxu0 }
 0xe48   :  { %v2359_v51 = vpop.f32.mrb[126].mxu0 }
 0xe49   :  { %v9135_v61 = vpop.f32.mrb[127].mxu0 }
 0xe4e   :  { %v2491_v6 = vpop.f32.mrb[128].mxu0 }
 0xe4f   :  { %v2513_v42 = vmul.f32 0.17677669, %v2491_v6  ;;  %v9160_v39 = vpop.f32.mrb[129].mxu0 }
 0xe50   :  { %v2494_v29 = vpop.f32.mrb[130].mxu0 }
 0xe51   :  { %v2518_v8 = vadd.f32 %v11392_v38, %v2513_v42  ;;  %v2514_v49 = vmul.f32 0.17677669, %v2494_v29  ;;  %v9161_v5 = vpop.f32.mrb[131].mxu0 }
 0xe53   :  { %v2519_v0 = vadd.f32 %v11392_v38, %v2514_v49  ;;  %v2523_v31 = vsel %vm671_vm3, %v2518_v8, -inf }
 0xe54   :  { %2524 = vmax.xlane.f32.xlu0 %v2523_v31 }
 0xe55   :  { %v2526_v9 = vsel %vm671_vm3, %v2519_v0, -inf }
 0xe56   :  { %2527 = vmax.xlane.f32.xlu1 %v2526_v9  ;;  %v2499_v34 = vpop.f32.mrb[132].mxu0 }
 0xe57   :  { %v2515_v57 = vmul.f32 0.17677669, %v2499_v34  ;;  %v9164_v36 = vpop.f32.mrb[133].mxu0 }
 0xe58   :  { %v2502_v62 = vpop.f32.mrb[134].mxu0 }
 0xe59   :  { %v2520_v13 = vadd.f32 %v11392_v38, %v2515_v57  ;;  %v2516_v27 = vmul.f32 0.17677669, %v2502_v62  ;;  %v9165_v43 = vpop.f32.mrb[135].mxu0 }
 0xe5b   :  { %v2521_v52 = vadd.f32 %v11392_v38, %v2516_v27  ;;  %v2529_v11 = vsel %vm671_vm3, %v2520_v13, -inf }
 0xe5c   :  { %2530 = vmax.xlane.f32.xlu0 %v2529_v11 }
 0xe5d   :  { %v2532_v47 = vsel %vm671_vm3, %v2521_v52, -inf }
 0xe5e   :  { %v2507_v63 = vpop.f32.mrb[136].mxu0 }
 0xe5f   :  { %v2517_v19 = vmul.f32 0.17677669, %v2507_v63  ;;  %v9168_v28 = vpop.f32.mrb[137].mxu0 }
 0xe60   :  { %2533 = vmax.xlane.f32.xlu0 %v2532_v47  ;;  %v2510_v23 = vpop.f32.mrb[138].mxu0 }
 0xe61   :  { %v2522_v59 = vadd.f32 %v11392_v38, %v2517_v19  ;;  %v9169_v10 = vpop.f32.mrb[139].mxu0 }
 0xe63   :  { %v2535_v14 = vsel %vm671_vm3, %v2522_v59, -inf }
 0xe64   :  { %2536 = vmax.xlane.f32.xlu0 %v2535_v14 }
 0xe67   :  { %2581 = vrot.lane.b32.xlu1 %v10944_v18, %s10474_s27 }
 0xee1   :  { %v2525_v51 = vpop.xlane.xlu0 %2524 }
 0xee2   :  { %v2538_v61 = vsub.f32 %v2518_v8, %v2525_v51 }
 0xee3   :  { %v2528_v6 = vpop.xlane.xlu1 %2527 }
 0xee4   :  { %v2543_v42 = vmul.f32 1.442695, %v2538_v61  ;;  %v2539_v39 = vsub.f32 %v2519_v0, %v2528_v6 }
 0xee6   :  { %10079 = vpow2.f32 %v2543_v42  ;;  %v2545_v29 = vmul.f32 1.442695, %v2539_v39 }
 0xee7   :  { %v2582_v49 = vpop.permute.xlu1 %2581 }
 0xee8   :  { %10081 = vpow2.f32 %v2545_v29  ;;  %9171 = vmatpush3.bf16.msra.mxu1 %v2582_v49 }
 0xee9   :  { %v2531_v5 = vpop.xlane.xlu0 %2530  ;;  %9172 = vmatprep.subr.bf16.mxu1 %v13912_v7 }
 0xeea   :  { %v2540_v31 = vsub.f32 %v2520_v13, %v2531_v5 }
 0xeec   :  { %v2547_v9 = vmul.f32 1.442695, %v2540_v31 }
 0xeed   :  { %v2534_v34 = vpop.xlane.xlu0 %2533 }
 0xeee   :  { %10083 = vpow2.f32 %v2547_v9  ;;  %v2541_v57 = vsub.f32 %v2521_v52, %v2534_v34 }
 0xef0   :  { %v10080_v36 = vpop.eup %10079  ;;  %v2549_v62 = vmul.f32 1.442695, %v2541_v57 }
 0xef1   :  { %v2537_v27 = vpop.xlane.xlu0 %2536  ;;  %v2553_v8 = vsel %vm671_vm3, %v10080_v36, 0.0 }
 0xef2   :  { %v10082_v43 = vpop.eup %10081  ;;  %10085 = vpow2.f32 %v2549_v62  ;;  %v2542_v0 = vsub.f32 %v2522_v59, %v2537_v27  ;;  %2554 = vadd.xlane.f32.xlu1 %v2553_v8 }
 0xef3   :  { %v2556_v11 = vsel %vm671_vm3, %v10082_v43, 0.0 }
 0xef4   :  { %v2551_v63 = vmul.f32 1.442695, %v2542_v0  ;;  %2557 = vadd.xlane.f32.xlu0 %v2556_v11 }
 0xef6   :  { %10087 = vpow2.f32 %v2551_v63  ;;  %v10460_v63 = vld [vmem:[%s13893_s6 + $0x30] sm:$0xff]  }
 0xef8   :  { %v10084_v19 = vpop.eup %10083 }
 0xef9   :  { %v2559_v13 = vsel %vm671_vm3, %v10084_v19, 0.0 }
 0xefa   :  { %2560 = vadd.xlane.f32.xlu1 %v2559_v13 }
 0xefc   :  { %v10086_v28 = vpop.eup %10085 }
 0xefd   :  { %v2562_v52 = vsel %vm671_vm3, %v10086_v28, 0.0 }
 0xefe   :  { %2563 = vadd.xlane.f32.xlu0 %v2562_v52 }
 0xf00   :  { %v10088_v47 = vpop.eup %10087 }
 0xf01   :  { %v2565_v23 = vsel %vm671_vm3, %v10088_v47, 0.0 }
 0xf02   :  { %2566 = vadd.xlane.f32.xlu0 %v2565_v23 }
 0xf0b   :  { %2585 = vrot.lane.b32.xlu1 %v11376_v55, %s10474_s27 }
 0xf0f   :  { %2736 = vrot.lane.b32.xlu1 %v10947_v26, %s10475_s23 }
 0xf13   :  { %2738 = vrot.lane.b32.xlu1 %v10967_v56, %s10475_s23 }
 0xf17   :  { %2740 = vrot.lane.b32.xlu1 %v11276_v37, %s10475_s23 }
 0xf18   :  { %2583 = vrot.lane.b32.xlu0 %v10963_v53, %s10474_s27 }
 0xf1b   :  { %2732 = vrot.lane.b32.xlu1 %v10961_v41, %s10475_s23 }
 0xf1c   :  { %2730 = vrot.lane.b32.xlu0 %v10942_v12, %s10475_s23 }
 0xf20   :  { %2734 = vrot.lane.b32.xlu0 %v11294_v3, %s10475_s23 }
 0xf7f   :  { %v2555_v26 = vpop.xlane.xlu1 %2554 }
 0xf81   :  { %v2558_v59 = vpop.xlane.xlu0 %2557 }
 0xf82   :  { %10089 = vrcp.f32 %v2558_v59 }
 0xf83   :  { %10091 = vrcp.f32 %v2555_v26 }
 0xf87   :  { %v2561_v10 = vpop.xlane.xlu1 %2560 }
 0xf8b   :  { %v2564_v56 = vpop.xlane.xlu0 %2563  ;;  %v2586_v6 = vpop.permute.xlu1 %2585 }
 0xf8c   :  { %10093 = vrcp.f32 %v2564_v56  ;;  %v10090_v37 = vpop.eup %10089  ;;  %v2599_v3 = vsel %vm739_vm2, %v2586_v6, 0 }
 0xf8d   :  { %10095 = vrcp.f32 %v2561_v10  ;;  %v10092_v61 = vpop.eup %10091  ;;  %v2574_v41 = vmul.f32 %v10090_v37, %v10082_v43 }
 0xf8e   :  { %v2573_v12 = vmul.f32 %v10092_v61, %v10080_v36 }
 0xf8f   :  { %v2567_v14 = vpop.xlane.xlu0 %2566  ;;  %v2737_v49 = vpop.permute.xlu1 %2736 }
 0xf90   :  { %10097 = vrcp.f32 %v2567_v14  ;;  %v2578_v42 = vpack.c.bf16 %v2574_v41, %v2573_v12  ;;  %v2752_v9 = vsel %vm582_vm1, %v2737_v49, 0 }
 0xf93   :  { %v2584_v51 = vpop.permute.xlu0 %2583  ;;  %v2739_v36 = vpop.permute.xlu1 %2738 }
 0xf94   :  { %9173 = vmatpush3.bf16.msra.mxu1 %v2584_v51  ;;  %v2755_v27 = vsel %vm582_vm1, %v2739_v36, 0 }
 0xf95   :  { %9174 = vmatprep.subr.bf16.mxu1 %v13912_v7 }
 0xf96   :  { %v10094_v39 = vpop.eup %10093 }
 0xf97   :  { %v10096_v29 = vpop.eup %10095  ;;  %v2576_v5 = vmul.f32 %v10094_v39, %v10086_v28  ;;  %v2741_v43 = vpop.permute.xlu1 %2740 }
 0xf98   :  { %9175 = vmatpush3.bf16.msra.mxu1 %v2599_v3  ;;  %v2575_v31 = vmul.f32 %v10096_v29, %v10084_v19  ;;  %v2758_v0 = vsel %vm582_vm1, %v2741_v43, 0  ;;  %v2731_v11 = vpop.permute.xlu0 %2730 }
 0xf99   :  { %9204 = vmatprep.subr.bf16.mxu1 %v13912_v7 }
 0xf9a   :  { %v2579_v34 = vpack.c.bf16 %v2576_v5, %v2575_v31  ;;  %v10098_v57 = vpop.eup %10097 }
 0xf9b   :  { %9177 = vmatmul.mubr.msk.bf16.vlgmr.msra.gmra.mrb[128].mxu1 %vm671_vm3, %v2578_v42  ;;  %v2577_v62 = vmul.f32 %v10098_v57, %v10088_v47  ;;  %v2733_v19 = vpop.permute.xlu1 %2732 }
 0xf9c   :  { %9180 = vmatprep.mubr.msk.bf16.mxu1 %vm10472_vm0, %v13912_v7  ;;  %v2735_v13 = vpop.permute.xlu0 %2734 }
 0xf9d   :  { %v2580_v8 = vpack.c.bf16 %v2577_v62, %v2577_v62 }
 0xfa1   :  { %9205 = vmatpush3.bf16.xpose.msra.mxu1 %v2752_v9 }
 0xfa2   :  { %9206 = vmatprep.subr.bf16.mxu1 %v13912_v7 }
 0xfa3   :  { %9181 = vmatmul.mubr.msk.bf16.gmra.mrb[132].mxu1 %vm671_vm3, %v2579_v34 }
 0xfa4   :  { %9184 = vmatprep.mubr.msk.bf16.mxu1 %vm10472_vm0, %v13912_v7 }
 0xfa9   :  { %9207 = vmatpush3.bf16.xpose.msra.mxu1 %v2755_v27 }
 0xfaa   :  { %9208 = vmatprep.subr.bf16.mxu1 %v13912_v7 }
 0xfab   :  { %9185 = vmatmul.mubr.msk.bf16.gmra.mrb[136].mxu1 %vm671_vm3, %v2580_v8 }
 0xfac   :  { %9210 = vmatprep.mubr.msk.bf16.mxu1 %vm10472_vm0, %v13912_v7 }
 0xfb1   :  { %9209 = vmatpush3.bf16.xpose.msra.mxu1 %v2758_v0 }
 0xfb2   :  { %9240 = vmatprep.subr.bf16.mxu1 %v13912_v7 }
 0xfb8   :  { %9211 = vmatmul.mubr.msk.bf16.vlgmr.msra.gmra.mrb[140].mxu1 %vm582_vm1, %v2731_v11 }
 0xfb9   :  { %9214 = vmatprep.mubr.msk.bf16.mxu1 %vm10472_vm0, %v13912_v7  ;;  %9241 = vmatpush3.bf16.msra.mxu1 %v10460_v63 }
 0xfba   :  { %9242 = vmatprep.subr.bf16.mxu1 %v13912_v7 }
 0xfbd   :  { %9243 = vmatpush3.bf16.msra.mxu1 %v11365_v22 }
 0xfc0   :  { %9215 = vmatmul.mubr.msk.bf16.gmra.mrb[144].mxu1 %vm582_vm1, %v2733_v19 }
 0xfc1   :  { %9218 = vmatprep.mubr.msk.bf16.mxu1 %vm10472_vm0, %v13912_v7 }
 0xfc8   :  { %9219 = vmatmul.mubr.msk.bf16.gmra.mrb[148].mxu1 %vm582_vm1, %v2735_v13 }
 0xfc9   :  { %9244 = vmatprep.mubr.msk.bf16.mxu1 %vm10472_vm0, %v13912_v7 }
0x106e   :  { %v2635_v28 = vpop.f32.mrb[128].mxu1 }
0x106f   :  { %v9178_v52 = vpop.f32.mrb[129].mxu1 }
0x1070   :  { %v2638_v47 = vpop.f32.mrb[130].mxu1 }
0x1071   :  { %v2657_v23 = vpack.c.bf16 %v2638_v47, %v2635_v28  ;;  %v9179_v59 = vpop.f32.mrb[131].mxu1 }
0x1073   :  { %9193 = vmatmul.mubr.msk.bf16.vlgmr.msra.gmra.mrb[140].mxu0 %vm582_vm1, %v2657_v23 }
0x1074   :  { %9196 = vmatprep.mubr.msk.bf16.mxu0 %vm10472_vm0, %v13912_v7 }
0x1076   :  { %v2643_v22 = vpop.f32.mrb[132].mxu1 }
0x1077   :  { %v9182_v26 = vpop.f32.mrb[133].mxu1 }
0x1078   :  { %v2646_v56 = vpop.f32.mrb[134].mxu1 }
0x1079   :  { %v2658_v10 = vpack.c.bf16 %v2646_v56, %v2643_v22  ;;  %v9183_v14 = vpop.f32.mrb[135].mxu1 }
0x107b   :  { %9197 = vmatmul.mubr.msk.bf16.gmra.mrb[144].mxu0 %vm582_vm1, %v2658_v10 }
0x107c   :  { %9200 = vmatprep.mubr.msk.bf16.mxu0 %vm10472_vm0, %v13912_v7 }
0x107e   :  { %v2651_v37 = vpop.f32.mrb[136].mxu1 }
0x107f   :  { %v9186_v51 = vpop.f32.mrb[137].mxu1  ;;  %v2659_v6 = vpack.c.bf16 %v2651_v37, %v2651_v37 }
0x1080   :  { %v2654_v61 = vpop.f32.mrb[138].mxu1 }
0x1081   :  { %v9187_v41 = vpop.f32.mrb[139].mxu1 }
0x1083   :  { %9201 = vmatmul.mubr.msk.bf16.gmra.mrb[148].mxu0 %vm582_vm1, %v2659_v6 }
0x1084   :  { %9228 = vmatprep.mubr.msk.bf16.mxu0 %vm10472_vm0, %v13912_v7 }
0x108b   :  { %v2794_v12 = vpop.f32.mrb[140].mxu1 }
0x108c   :  { %v2816_v3 = vmul.f32 0.17677669, %v2794_v12  ;;  %v9212_v42 = vpop.f32.mrb[141].mxu1 }
0x108d   :  { %v2797_v39 = vpop.f32.mrb[142].mxu1 }
0x108e   :  { %v2821_v29 = vadd.f32 %v11392_v38, %v2816_v3  ;;  %v2817_v49 = vmul.f32 0.17677669, %v2797_v39  ;;  %v9213_v5 = vpop.f32.mrb[143].mxu1 }
0x1090   :  { %v2822_v31 = vadd.f32 %v11392_v38, %v2817_v49  ;;  %v2826_v9 = vsel %vm671_vm3, %v2821_v29, -inf }
0x1091   :  { %2827 = vmax.xlane.f32.xlu1 %v2826_v9 }
0x1092   :  { %v2829_v34 = vsel %vm671_vm3, %v2822_v31, -inf }
0x1093   :  { %2830 = vmax.xlane.f32.xlu0 %v2829_v34  ;;  %v2802_v57 = vpop.f32.mrb[144].mxu1 }
0x1094   :  { %v9216_v36 = vpop.f32.mrb[145].mxu1  ;;  %v2818_v63 = vmul.f32 0.17677669, %v2802_v57 }
0x1095   :  { %v2805_v62 = vpop.f32.mrb[146].mxu1  ;;  %v10461_v36 = vld [vmem:[%s13892_s1 + $0x1] ss:$0 sm:$0xff] }
0x1096   :  { %v9217_v27 = vpop.f32.mrb[147].mxu1  ;;  %v2823_v19 = vadd.f32 %v11392_v38, %v2818_v63 }
0x1098   :  { %v2832_v13 = vsel %vm671_vm3, %v2823_v19, -inf }
0x109b   :  { %v2810_v8 = vpop.f32.mrb[148].mxu1 }
0x109c   :  { %v9220_v43 = vpop.f32.mrb[149].mxu1  ;;  %v2820_v27 = vmul.f32 0.17677669, %v2810_v8 }
0x109d   :  { %v2813_v0 = vpop.f32.mrb[150].mxu1 }
0x109e   :  { %v9221_v11 = vpop.f32.mrb[151].mxu1  ;;  %v2825_v0 = vadd.f32 %v10461_v36, %v2820_v27 }
0x10a0   :  { %v2838_v63 = vsel %vm671_vm3, %v2825_v0, -inf }
0x10a2   :  { %2884 = vrot.lane.b32.xlu1 %v10944_v18, %s10475_s23 }
0x10a6   :  { %2888 = vrot.lane.b32.xlu1 %v11376_v55, %s10475_s23 }
0x10ca   :  { %2833 = vmax.xlane.f32.xlu1 %v2832_v13 }
0x111e   :  { %v2828_v28 = vpop.xlane.xlu1 %2827 }
0x111f   :  { %v2841_v52 = vsub.f32 %v2821_v29, %v2828_v28 }
0x1120   :  { %v2831_v47 = vpop.xlane.xlu0 %2830 }
0x1121   :  { %v2846_v23 = vmul.f32 1.442695, %v2841_v52  ;;  %v2842_v59 = vsub.f32 %v2822_v31, %v2831_v47 }
0x1122   :  { %v2885_v22 = vpop.permute.xlu1 %2884 }
0x1123   :  { %10099 = vpow2.f32 %v2846_v23  ;;  %v2848_v26 = vmul.f32 1.442695, %v2842_v59  ;;  %9223 = vmatpush3.bf16.msra.mxu0 %v2885_v22 }
0x1124   :  { %9224 = vmatprep.subr.bf16.mxu0 %v13912_v7 }
0x1125   :  { %10101 = vpow2.f32 %v2848_v26 }
0x1126   :  { %v2889_v29 = vpop.permute.xlu1 %2888 }
0x1127   :  { %v2902_v8 = vsel %vm739_vm2, %v2889_v29, 0 }
0x112d   :  { %v10100_v18 = vpop.eup %10099 }
0x112e   :  { %v2856_v55 = vsel %vm671_vm3, %v10100_v18, 0.0 }
0x112f   :  { %v10102_v56 = vpop.eup %10101  ;;  %2857 = vadd.xlane.f32.xlu0 %v2856_v55 }
0x1130   :  { %v2859_v38 = vsel %vm671_vm3, %v10102_v56, 0.0 }
0x1133   :  { %2860 = vadd.xlane.f32.xlu0 %v2859_v38 }
0x1146   :  { %v2703_v10 = vpop.f32.mrb[140].mxu0 }
0x1147   :  { %v11675_v14 = vadd.f32 %v2703_v10, %v11576_v20  ;;  %v9194_v37 = vpop.f32.mrb[141].mxu0 }
0x1148   :  { %v2706_v51 = vpop.f32.mrb[142].mxu0 }
0x1149   :  { %v11678_v61 = vadd.f32 %v2706_v51, %v11578_v17  ;;  %v9195_v6 = vpop.f32.mrb[143].mxu0  ;;  %2886 = vrot.lane.b32.xlu0 %v10963_v53, %s10475_s23  ;;  %v11708_v51 = vld [vmem:[%s13894_s7] ss:$0 sm:$0xff] }
0x114e   :  { %v2711_v41 = vpop.f32.mrb[144].mxu0 }
0x114f   :  { %v11683_v12 = vadd.f32 %v2711_v41, %v11580_v2  ;;  %v9198_v3 = vpop.f32.mrb[145].mxu0  ;;  %v2819_v2 = vmul.f32 0.17677669, %v2805_v62 }
0x1150   :  { %v2714_v42 = vpop.f32.mrb[146].mxu0  ;;  %v3041_v3 = vadd.f32 %v11708_v51, %v11456_v44 }
0x1151   :  { %v11686_v39 = vadd.f32 %v2714_v42, %v11582_v24  ;;  %v9199_v20 = vpop.f32.mrb[147].mxu0  ;;  %v2824_v24 = vadd.f32 %v10461_v36, %v2819_v2  ;;  %v3042_v42 = vadd.f32 %v11708_v51, %v11465_v4 }
0x1153   :  { %v2835_v11 = vsel %vm671_vm3, %v2824_v24, -inf }
0x1156   :  { %v2719_v49 = vpop.f32.mrb[148].mxu0 }
0x1157   :  { %v11689_v5 = vadd.f32 %v2719_v49, %v11584_v58  ;;  %v9202_v17 = vpop.f32.mrb[149].mxu0  ;;  %v2834_v31 = vpop.xlane.xlu1 %2833  ;;  %v3043_v49 = vadd.f32 %v11708_v51, %v11470_v48 }
0x1158   :  { %v2843_v9 = vsub.f32 %v2823_v19, %v2834_v31  ;;  %v2722_v34 = vpop.f32.mrb[150].mxu0  ;;  %v3052_v17 = vadd.f32 %v3042_v42, %v10778_v54  ;;  %v11725_v31 = vadd.f32 %v3041_v3, %v10762_v46 }
0x1159   :  { %v9203_v53 = vpop.f32.mrb[151].mxu0  ;;  %v11730_v44 = vadd.f32 %v3043_v49, %v10774_v16 }
0x115a   :  { %v2850_v57 = vmul.f32 1.442695, %v2843_v9 }
0x115c   :  { %10103 = vpow2.f32 %v2850_v57 }
0x1166   :  { %v11694_v43 = vpop.eup %10103 }
0x1167   :  { %v2862_v58 = vsel %vm671_vm3, %v11694_v43, 0.0 }
0x1168   :  { %2863 = vadd.xlane.f32.xlu1 %v2862_v58  ;;  %2836 = vmax.xlane.f32.xlu0 %v2835_v11 }
0x116c   :  { %2839 = vmax.xlane.f32.xlu0 %v2838_v63 }
0x11bc   :  { %v2858_v62 = vpop.xlane.xlu0 %2857 }
0x11bd   :  { %10105 = vrcp.f32 %v2858_v62 }
0x11c0   :  { %v2861_v19 = vpop.xlane.xlu0 %2860 }
0x11c1   :  { %10107 = vrcp.f32 %v2861_v19 }
0x11c4   :  { %v2887_v13 = vpop.permute.xlu0 %2886 }
0x11c5   :  { %9225 = vmatpush3.bf16.msra.mxu0 %v2887_v13 }
0x11c6   :  { %9226 = vmatprep.subr.bf16.mxu0 %v13912_v7 }
0x11c7   :  { %v10106_v28 = vpop.eup %10105 }
0x11c8   :  { %v2876_v47 = vmul.f32 %v10106_v28, %v10100_v18 }
0x11c9   :  { %9227 = vmatpush3.bf16.msra.mxu0 %v2902_v8 }
0x11cb   :  { %v10108_v52 = vpop.eup %10107 }
0x11cc   :  { %v2877_v23 = vmul.f32 %v10108_v52, %v10102_v56  ;;  %v3040_v56 = vadd.f32 %v11708_v51, %v11450_v50  ;;  %v3044_v50 = vadd.f32 %v11708_v51, %v11477_v1 }
0x11ce   :  { %v2881_v59 = vpack.c.bf16 %v2877_v23, %v2876_v47  ;;  %v3050_v20 = vadd.f32 %v3040_v56, %v10759_v45  ;;  %v3054_v45 = vadd.f32 %v3044_v50, %v10792_v60 }
0x11d0   :  { %9229 = vmatmul.mubr.msk.bf16.vlgmr.msra.gmra.mrb[152].mxu0 %vm671_vm3, %v2881_v59  ;;  %v13922_v59 = vmov 0  }
0x11d1   :  { %9232 = vmatprep.mubr.msk.bf16.mxu0 %vm10472_vm0, %v13912_v7 }
0x11f5   :  { %v2837_v22 = vpop.xlane.xlu0 %2836  ;;  %v2864_v4 = vpop.xlane.xlu1 %2863 }
0x11f6   :  { %v2844_v26 = vsub.f32 %v2824_v24, %v2837_v22  ;;  %v9811_v22 = vld [vmem:[%s13895_s10] ss:$8 sps:$4 sm:$0xff]  }
0x11f8   :  { %v2852_v55 = vmul.f32 1.442695, %v2844_v26  ;;  %v9813_v26 = vld [vmem:[%s13895_s10 + $0x4] ss:$8 sps:$4 sm:$0xff]  }
0x11f9   :  { %v2840_v38 = vpop.xlane.xlu0 %2839  ;;  %3317 = vmatprep.subr.bf16.mxu0 %v9813_v26 }
0x11fa   :  { %10109 = vpow2.f32 %v2852_v55  ;;  %v2845_v10 = vsub.f32 %v2825_v0, %v2840_v38  ;;  %v9814_v55 = vld [vmem:[%s13895_s10 + $0x10] ss:$8 sps:$4 sm:$0xff]   ;;  %v9816_v38 = vld [vmem:[%s13895_s10 + $0x14] ss:$8 sps:$4 sm:$0xff]   ;;  %3318 = vmatpush1.bf16.msra.mxu0 %v9811_v22 }
0x11fb   :  { %3319 = vmatprep.subr.bf16.mxu0 %v9816_v38 }
0x11fc   :  { %v2854_v37 = vmul.f32 1.442695, %v2845_v10 }
0x11fe   :  { %10111 = vpow2.f32 %v2854_v37  ;;  %3320 = vmatpush1.bf16.msra.mxu0 %v9814_v55 }
0x11ff   :  { %10113 = vrcp.f32 %v2864_v4 }
0x1204   :  { %v10110_v18 = vpop.eup %10109 }
0x1205   :  { %v2865_v6 = vsel %vm671_vm3, %v10110_v18, 0.0 }
0x1206   :  { %2866 = vadd.xlane.f32.xlu0 %v2865_v6 }
0x1208   :  { %v10112_v41 = vpop.eup %10111 }
0x1209   :  { %v2868_v29 = vsel %vm671_vm3, %v10112_v41, 0.0  ;;  %v10114_v53 = vpop.eup %10113 }
0x120a   :  { %3062 = vadd.xlane.f32.xlu0 %v3050_v20  ;;  %2869 = vadd.xlane.f32.xlu1 %v2868_v29  ;;  %v2878_v24 = vmul.f32 %v10114_v53, %v11694_v43 }
0x120e   :  { %3066 = vadd.xlane.f32.xlu0 %v3052_v17  ;;  %3064 = vadd.xlane.f32.xlu1 %v11725_v31 }
0x1212   :  { %3070 = vadd.xlane.f32.xlu0 %v3054_v45  ;;  %3068 = vadd.xlane.f32.xlu1 %v11730_v44 }
0x1293   :  { %v2867_v48 = vpop.xlane.xlu0 %2866 }
0x1294   :  { %10115 = vrcp.f32 %v2867_v48 }
0x1297   :  { %v2870_v1 = vpop.xlane.xlu1 %2869  ;;  %v3063_v54 = vpop.xlane.xlu0 %3062 }
0x1298   :  { %10117 = vrcp.f32 %v2870_v1  ;;  %v3082_v46 = vmul.f32 0.0078125, %v3063_v54 }
0x129a   :  { %v11733_v9 = vsub.f32 %v3050_v20, %v3082_v46 }
0x129b   :  { %v3067_v34 = vpop.xlane.xlu0 %3066  ;;  %v3065_v37 = vpop.xlane.xlu1 %3064 }
0x129c   :  { %v3084_v57 = vmul.f32 0.0078125, %v3067_v34  ;;  %v3102_v16 = vmul.f32 %v11733_v9, %v11733_v9  ;;  %v3083_v42 = vmul.f32 0.0078125, %v3065_v37 }
0x129e   :  { %v10116_v60 = vpop.eup %10115  ;;  %v11737_v2 = vsub.f32 %v3052_v17, %v3084_v57  ;;  %3112 = vadd.xlane.f32.xlu0 %v3102_v16  ;;  %v11773_v54 = vsub.f32 %v11725_v31, %v3083_v42 }
0x129f   :  { %v3071_v36 = vpop.xlane.xlu0 %3070  ;;  %v2879_v27 = vmul.f32 %v10116_v60, %v10110_v18  ;;  %v3069_v49 = vpop.xlane.xlu1 %3068 }
0x12a0   :  { %v3086_v0 = vmul.f32 0.0078125, %v3071_v36  ;;  %v3104_v58 = vmul.f32 %v11737_v2, %v11737_v2  ;;  %v3085_v46 = vmul.f32 0.0078125, %v3069_v49  ;;  %v3103_v31 = vmul.f32 %v11773_v54, %v11773_v54  ;;  %v9817_v36 = vld [vmem:[%s13895_s10 + $0x20] ss:$8 sps:$4 sm:$0xff]  }
0x12a1   :  { %v2882_v11 = vpack.c.bf16 %v2879_v27, %v2878_v24  ;;  %v9820_v24 = vld [vmem:[%s13895_s10 + $0x30] ss:$8 sps:$4 sm:$0xff]   ;;  %v9825_v27 = vld [vmem:[%s13895_s10 + $0x44] ss:$8 sps:$4 sm:$0xff]  }
0x12a2   :  { %v10118_v63 = vpop.eup %10117  ;;  %v11742_v62 = vsub.f32 %v3054_v45, %v3086_v0  ;;  %3116 = vadd.xlane.f32.xlu0 %v3104_v58  ;;  %v9823_v0 = vld [vmem:[%s13895_s10 + $0x40] ss:$8 sps:$4 sm:$0xff]   ;;  %v9828_v58 = vld [vmem:[%s13895_s10 + $0x54] ss:$8 sps:$4 sm:$0xff]  }
0x12a3   :  { %v2938_v19 = vpop.f32.mrb[152].mxu0  ;;  %9233 = vmatmul.mubr.msk.bf16.gmra.mrb[156].mxu0 %vm671_vm3, %v2882_v11  ;;  %v2880_v28 = vmul.f32 %v10118_v63, %v10112_v41  ;;  %v9826_v11 = vld [vmem:[%s13895_s10 + $0x50] ss:$8 sps:$4 sm:$0xff]   ;;  %v9831_v63 = vld [vmem:[%s13895_s10 + $0x64] ss:$8 sps:$4 sm:$0xff]  }
0x12a4   :  { %v9230_v13 = vpop.f32.mrb[153].mxu0  ;;  %v3106_v8 = vmul.f32 %v11742_v62, %v11742_v62  ;;  %9236 = vmatprep.mubr.msk.bf16.mxu0 %vm10472_vm0, %v13912_v7 }
0x12a5   :  { %v2941_v43 = vpop.f32.mrb[154].mxu0  ;;  %v2883_v23 = vpack.c.bf16 %v2880_v28, %v2880_v28  ;;  %v9832_v13 = vld [vmem:[%s13895_s10 + $0x70] ss:$8 sps:$4 sm:$0xff]  }
0x12a6   :  { %v2960_v52 = vpack.c.bf16 %v2941_v43, %v2938_v19  ;;  %v9231_v47 = vpop.f32.mrb[155].mxu0  ;;  %3120 = vadd.xlane.f32.xlu0 %v3106_v8  ;;  %v9829_v19 = vld [vmem:[%s13895_s10 + $0x60] ss:$8 sps:$4 sm:$0xff]   ;;  %v9834_v8 = vld [vmem:[%s13895_s10 + $0x74] ss:$8 sps:$4 sm:$0xff]  }
0x12a8   :  { %9245 = vmatmul.mubr.msk.bf16.vlgmr.msra.gmra.mrb[152].mxu1 %vm582_vm1, %v2960_v52 }
0x12a9   :  { %9248 = vmatprep.mubr.msk.bf16.mxu1 %vm10472_vm0, %v13912_v7 }
0x12ab   :  { %9237 = vmatmul.mubr.msk.bf16.gmra.mrb[160].mxu0 %vm671_vm3, %v2883_v23 }
0x12ac   :  { %3349 = vmatprep.mubr.bf16.mxu0 %v13922_v59 }
0x132b   :  { %v3113_v43 = vpop.xlane.xlu0 %3112 }
0x132c   :  { %v3132_v28 = vmul.f32 0.0078125, %v3113_v43 }
0x132e   :  { %v3142_v52 = vadd.f32 1e-12, %v3132_v28 }
0x132f   :  { %v3117_v47 = vpop.xlane.xlu0 %3116 }
0x1330   :  { %10119 = vrsqrt.f32 %v3142_v52  ;;  %v3134_v26 = vmul.f32 0.0078125, %v3117_v47 }
0x133a   :  { %v10120_v42 = vpop.eup %10119 }
0x1376   :  { %v2946_v10 = vpop.f32.mrb[156].mxu0 }
0x1377   :  { %v9234_v18 = vpop.f32.mrb[157].mxu0 }
0x1378   :  { %v2949_v56 = vpop.f32.mrb[158].mxu0  ;;  %v3144_v18 = vadd.f32 1e-12, %v3134_v26  ;;  %v9841_v26 = vld [vmem:[%s13898_s12 + $0x58] sm:$0xff]  }
0x1379   :  { %v2961_v6 = vpack.c.bf16 %v2949_v56, %v2946_v10  ;;  %v9235_v41 = vpop.f32.mrb[159].mxu0 }
0x137b   :  { %v3006_v3 = vpop.f32.mrb[152].mxu1  ;;  %9249 = vmatmul.mubr.msk.bf16.gmra.mrb[156].mxu1 %vm582_vm1, %v2961_v6 }
0x137c   :  { %v3028_v20 = vadd.f32 %v3006_v3, %v11675_v14  ;;  %v9246_v29 = vpop.f32.mrb[153].mxu1  ;;  %9252 = vmatprep.mubr.msk.bf16.mxu1 %vm10472_vm0, %v13912_v7 }
0x137d   :  { %v3009_v50 = vpop.f32.mrb[154].mxu1  ;;  %v11833_v29 = vld [vmem:[%s13896_s8] ss:$0 sm:$0xff] }
0x137e   :  { %v3045_v17 = vadd.f32 %v11708_v51, %v3028_v20  ;;  %v3029_v45 = vadd.f32 %v3009_v50, %v11678_v61  ;;  %v2954_v4 = vpop.f32.mrb[160].mxu0  ;;  %v9247_v48 = vpop.f32.mrb[155].mxu1  ;;  %v11782_v61 = vsub.f32 %v11730_v44, %v3085_v46  ;;  %v9822_v44 = vld [vmem:[%s13895_s10 + $0x34] ss:$8 sps:$4 sm:$0xff]   ;;  %v3162_v20 = vmul.f32 %v10120_v42, %v11733_v9 }
0x137f   :  { %v9238_v1 = vpop.f32.mrb[161].mxu0  ;;  %v2962_v57 = vpack.c.bf16 %v2954_v4, %v2954_v4  ;;  %v11840_v4 = vld [vmem:[%s13897_s9] ss:$0 sm:$0xff] }
0x1380   :  { %v3046_v34 = vadd.f32 %v11708_v51, %v3029_v45  ;;  %v2957_v14 = vpop.f32.mrb[162].mxu0  ;;  %v3055_v53 = vadd.f32 %v3045_v17, %v10789_v32  ;;  %v3105_v32 = vmul.f32 %v11782_v61, %v11782_v61  ;;  %v3178_v50 = vmul.f32 %v11833_v29, %v3162_v20  ;;  %v9850_v20 = vld [vmem:[%s13898_s12 + $0x38] sm:$0xff]  }
0x1381   :  { %v9239_v16 = vpop.f32.mrb[163].mxu0 }
0x1382   :  { %3072 = vadd.xlane.f32.xlu1 %v3055_v53  ;;  %v11778_v60 = vadd.f32 %v3046_v34, %v10805_v21  ;;  %v9819_v21 = vld [vmem:[%s13895_s10 + $0x24] ss:$8 sps:$4 sm:$0xff]   ;;  %v11844_v9 = vadd.f32 %v11840_v4, %v3178_v50 }
0x1383   :  { %9253 = vmatmul.mubr.msk.bf16.gmra.mrb[160].mxu1 %vm582_vm1, %v2962_v57  ;;  %3321 = vmatprep.subr.bf16.mxu0 %v9819_v21 }
0x1384   :  { %3074 = vadd.xlane.f32.xlu0 %v11778_v60  ;;  %3322 = vmatpush1.bf16.msra.mxu0 %v9817_v36 }
0x1385   :  { %3323 = vmatprep.subr.bf16.mxu0 %v9822_v44 }
0x1386   :  { %3114 = vadd.xlane.f32.xlu1 %v3103_v31 }
0x1388   :  { %3324 = vmatpush1.bf16.msra.mxu0 %v9820_v24 }
0x1389   :  { %3325 = vmatprep.subr.bf16.mxu0 %v9825_v27 }
0x138a   :  { %3118 = vadd.xlane.f32.xlu1 %v3105_v32 }
0x138c   :  { %3326 = vmatpush1.bf16.msra.mxu0 %v9823_v0 }
0x138d   :  { %3327 = vmatprep.subr.bf16.mxu0 %v9828_v58 }
0x1390   :  { %3328 = vmatpush1.bf16.msra.mxu0 %v9826_v11 }
0x1391   :  { %3329 = vmatprep.subr.bf16.mxu0 %v9831_v63 }
0x1394   :  { %3330 = vmatpush1.bf16.msra.mxu0 %v9829_v19 }
0x1395   :  { %3331 = vmatprep.subr.bf16.mxu0 %v9834_v8 }
0x1398   :  { %3332 = vmatpush1.bf16.msra.mxu0 %v9832_v13 }
0x140f   :  { %v3073_v23 = vpop.xlane.xlu1 %3072 }
0x1410   :  { %v3087_v22 = vmul.f32 0.0078125, %v3073_v23  ;;  %v9839_v23 = vld [vmem:[%s13898_s12 + $0x50] sm:$0xff]  }
0x1412   :  { %v11825_v55 = vsub.f32 %v3055_v53, %v3087_v22  ;;  %v9840_v22 = vld [vmem:[%s13898_s12 + $0x10] sm:$0xff]  }
0x1413   :  { %v3115_v38 = vpop.xlane.xlu1 %3114 }
0x1414   :  { %v3133_v10 = vmul.f32 0.0078125, %v3115_v38  ;;  %v3107_v37 = vmul.f32 %v11825_v55, %v11825_v55  ;;  %v9842_v38 = vld [vmem:[%s13898_s12 + $0x18] sm:$0xff]  }
0x1416   :  { %v3143_v56 = vadd.f32 1e-12, %v3133_v10  ;;  %3122 = vadd.xlane.f32.xlu1 %v3107_v37  ;;  %v9843_v10 = vld [vmem:[%s13898_s12 + $0x60] sm:$0xff]  }
0x1417   :  { %v3119_v6 = vpop.xlane.xlu1 %3118  ;;  %v9844_v37 = vld [vmem:[%s13898_s12 + $0x20] sm:$0xff]  }
0x1418   :  { %10121 = vrsqrt.f32 %v3143_v56  ;;  %v3135_v41 = vmul.f32 0.0078125, %v3119_v6  ;;  %v9846_v56 = vld [vmem:[%s13898_s12 + $0x28] sm:$0xff]   ;;  %v9847_v6 = vld [vmem:[%s13898_s12 + $0x70] sm:$0xff]  }
0x1419   :  { %10123 = vrsqrt.f32 %v3144_v18  ;;  %v9845_v18 = vld [vmem:[%s13898_s12 + $0x68] sm:$0xff]  }
0x141a   :  { %v3145_v3 = vadd.f32 1e-12, %v3135_v41  ;;  %v9848_v41 = vld [vmem:[%s13898_s12 + $0x30] sm:$0xff]  }
0x141c   :  { %10125 = vrsqrt.f32 %v3145_v3  ;;  %v9849_v3 = vld [vmem:[%s13898_s12 + $0x78] sm:$0xff]  }
0x1422   :  { %v10122_v49 = vpop.eup %10121 }
0x1423   :  { %v3163_v17 = vmul.f32 %v10122_v49, %v11773_v54  ;;  %v10124_v45 = vpop.eup %10123 }
0x1424   :  { %v3164_v34 = vmul.f32 %v10124_v45, %v11737_v2 }
0x1425   :  { %v3179_v48 = vmul.f32 %v11833_v29, %v3163_v17 }
0x1426   :  { %v10126_v1 = vpop.eup %10125  ;;  %v3180_v57 = vmul.f32 %v11833_v29, %v3164_v34 }
0x1427   :  { %v11847_v46 = vadd.f32 %v11840_v4, %v3179_v48  ;;  %v3165_v14 = vmul.f32 %v10126_v1, %v11782_v61  ;;  %v3121_v61 = vpop.xlane.xlu0 %3120 }
0x1428   :  { %v11860_v31 = vadd.f32 %v11840_v4, %v3180_v57  ;;  %v3136_v42 = vmul.f32 0.0078125, %v3121_v61 }
0x1429   :  { %v3204_v54 = vpack.c.bf16 %v11847_v46, %v11844_v9  ;;  %v3181_v53 = vmul.f32 %v11833_v29, %v3165_v14 }
0x142a   :  { %v3146_v49 = vadd.f32 1e-12, %v3136_v42 }
0x142b   :  { %3350 = vmatmul.mubr.bf16.vlgmr.msra.gmra.mrb[164].mxu0 %v3204_v54  ;;  %v11857_v16 = vadd.f32 %v11840_v4, %v3181_v53  ;;  %v3075_v32 = vpop.xlane.xlu0 %3074 }
0x142c   :  { %3359 = vmatprep.mubr.bf16.mxu0 %v13922_v59  ;;  %v3088_v27 = vmul.f32 0.0078125, %v3075_v32  ;;  %10127 = vrsqrt.f32 %v3146_v49 }
0x142d   :  { %v3205_v2 = vpack.c.bf16 %v11857_v16, %v11860_v31 }
0x142e   :  { %v11873_v13 = vsub.f32 %v11778_v60, %v3088_v27 }
0x1433   :  { %3360 = vmatmul.mubr.bf16.gmra.mrb[168].mxu0 %v3205_v2 }
0x1434   :  { %3369 = vmatprep.mubr.bf16.mxu0 %v13922_v59 }
0x1436   :  { %v10128_v48 = vpop.eup %10127 }
0x1437   :  { %v3166_v1 = vmul.f32 %v10128_v48, %v11742_v62 }
0x1439   :  { %v3182_v54 = vmul.f32 %v11833_v29, %v3166_v1 }
0x143b   :  { %v11942_v57 = vadd.f32 %v11840_v4, %v3182_v54 }
0x144e   :  { %v3014_v21 = vpop.f32.mrb[156].mxu1 }
0x144f   :  { %v3030_v36 = vadd.f32 %v3014_v21, %v11683_v12  ;;  %v9250_v44 = vpop.f32.mrb[157].mxu1 }
0x1450   :  { %v3017_v24 = vpop.f32.mrb[158].mxu1 }
0x1451   :  { %v3047_v0 = vadd.f32 %v11708_v51, %v3030_v36  ;;  %v3031_v58 = vadd.f32 %v3017_v24, %v11686_v39  ;;  %v9251_v11 = vpop.f32.mrb[159].mxu1 }
0x1453   :  { %v3048_v63 = vadd.f32 %v11708_v51, %v3031_v58  ;;  %v11870_v19 = vadd.f32 %v3047_v0, %v10808_v25  ;;  %v3108_v25 = vmul.f32 %v11873_v13, %v11873_v13 }
0x1455   :  { %3076 = vadd.xlane.f32.xlu1 %v11870_v19  ;;  %v11877_v12 = vadd.f32 %v3048_v63, %v10815_v30  ;;  %v9835_v30 = vld [vmem:[%s13898_s12 + $0x40] sm:$0xff]  }
0x1456   :  { %v3022_v8 = vpop.f32.mrb[160].mxu1  ;;  %8541 = vmatprep.subr.bf16.mxu1 %v9835_v30 }
0x1457   :  { %v3032_v43 = vadd.f32 %v3022_v8, %v11689_v5  ;;  %v9254_v28 = vpop.f32.mrb[161].mxu1  ;;  %3078 = vadd.xlane.f32.xlu0 %v11877_v12  ;;  %v9836_v5 = vld [vmem:[%s13898_s12] sm:$0xff]  }
0x1458   :  { %v3025_v39 = vpop.f32.mrb[162].mxu1  ;;  %8542 = vmatpush3.bf16.msra.mxu1 %v9836_v5 }
0x1459   :  { %v3049_v52 = vadd.f32 %v11708_v51, %v3032_v43  ;;  %v9255_v47 = vpop.f32.mrb[163].mxu1  ;;  %v9837_v51 = vld [vmem:[%s13898_s12 + $0x48] sm:$0xff]  }
0x145a   :  { %8543 = vmatprep.subr.bf16.mxu1 %v9837_v51 }
0x145b   :  { %3124 = vadd.xlane.f32.xlu0 %v3108_v25  ;;  %v11885_v60 = vadd.f32 %v3049_v52, %v10818_v33  ;;  %v9838_v33 = vld [vmem:[%s13898_s12 + $0x8] sm:$0xff]  }
0x145c   :  { %8544 = vmatpush3.bf16.msra.mxu1 %v9838_v33 }
0x145d   :  { %3080 = vadd.xlane.f32.xlu1 %v11885_v60  ;;  %8545 = vmatprep.subr.bf16.mxu1 %v9839_v23 }
0x1460   :  { %8546 = vmatpush3.bf16.msra.mxu1 %v9840_v22 }
0x1461   :  { %8547 = vmatprep.subr.bf16.mxu1 %v9841_v26 }
0x1464   :  { %8548 = vmatpush3.bf16.msra.mxu1 %v9842_v38 }
0x1465   :  { %8549 = vmatprep.subr.bf16.mxu1 %v9843_v10 }
0x1468   :  { %8550 = vmatpush3.bf16.msra.mxu1 %v9844_v37 }
0x1469   :  { %8551 = vmatprep.subr.bf16.mxu1 %v9845_v18 }
0x146c   :  { %8552 = vmatpush3.bf16.msra.mxu1 %v9846_v56 }
0x146d   :  { %8553 = vmatprep.subr.bf16.mxu1 %v9847_v6 }
0x1470   :  { %8554 = vmatpush3.bf16.msra.mxu1 %v9848_v41 }
0x1471   :  { %8555 = vmatprep.subr.bf16.mxu1 %v9849_v3 }
0x1474   :  { %8556 = vmatpush3.bf16.msra.mxu1 %v9850_v20 }
0x1475   :  { %9256 = vmatprep.subr.bf16.mxu1 %v13912_v7 }
0x14a3   :  { %v3123_v50 = vpop.xlane.xlu1 %3122 }
0x14a4   :  { %v3137_v17 = vmul.f32 0.0078125, %v3123_v50 }
0x14a6   :  { %v3147_v45 = vadd.f32 1e-12, %v3137_v17 }
0x14a8   :  { %10129 = vrsqrt.f32 %v3147_v45 }
0x14b2   :  { %v10130_v34 = vpop.eup %10129 }
0x14b3   :  { %v3167_v14 = vmul.f32 %v10130_v34, %v11825_v55 }
0x14b5   :  { %v3183_v53 = vmul.f32 %v11833_v29, %v3167_v14 }
0x14b7   :  { %v11945_v2 = vadd.f32 %v11840_v4, %v3183_v53 }
0x14b9   :  { %v3206_v61 = vpack.c.bf16 %v11945_v2, %v11942_v57 }
0x14bb   :  { %3370 = vmatmul.mubr.bf16.gmra.mrb[172].mxu0 %v3206_v61 }
0x14bc   :  { %3379 = vmatprep.mubr.bf16.mxu0 %v13922_v59 }
0x14e2   :  { %v3077_v62 = vpop.xlane.xlu1 %3076 }
0x14e3   :  { %v3089_v32 = vmul.f32 0.0078125, %v3077_v62 }
0x14e4   :  { %v3079_v21 = vpop.xlane.xlu0 %3078 }
0x14e5   :  { %v11951_v55 = vsub.f32 %v11870_v19, %v3089_v32  ;;  %v3090_v36 = vmul.f32 0.0078125, %v3079_v21  ;;  %v3225_v19 = vld [vmem:[%s13899_s11] sm:$0x3] }
0x14e6   :  { %v11972_v8 = vrot.slane %v3225_v19, %v10839_v40 }
0x14e7   :  { %v11954_v44 = vsub.f32 %v11877_v12, %v3090_v36  ;;  %v3109_v24 = vmul.f32 %v11951_v55, %v11951_v55  ;;  %v11969_v12 = vrot.slane %v3225_v19, %v10832_v35 }
0x14e9   :  { %3126 = vadd.xlane.f32.xlu1 %v3109_v24  ;;  %v3110_v27 = vmul.f32 %v11954_v44, %v11954_v44 }
0x14ea   :  { %v3081_v0 = vpop.xlane.xlu1 %3080 }
0x14eb   :  { %v3091_v58 = vmul.f32 0.0078125, %v3081_v0  ;;  %3128 = vadd.xlane.f32.xlu0 %v3110_v27 }
0x14ed   :  { %v11961_v11 = vsub.f32 %v11885_v60, %v3091_v58 }
0x14ef   :  { %v3111_v63 = vmul.f32 %v11961_v11, %v11961_v11 }
0x14f1   :  { %3130 = vadd.xlane.f32.xlu1 %v3111_v63 }
0x14fe   :  { %v3351_v43 = vpop.f32.mrb[164].mxu0 }
0x14ff   :  { %v11975_v28 = vadd.f32 %v3351_v43, %v11969_v12  ;;  %v3353_v39 = vpop.f32.mrb[165].mxu0 }
0x1500   :  { %v11978_v52 = vadd.f32 %v3353_v39, %v11972_v8  ;;  %v3355_v47 = vpop.f32.mrb[166].mxu0 }
0x1501   :  { %v3420_v25 = vmul.f32 0.044715, %v11975_v28  ;;  %v11982_v60 = vadd.f32 %v3355_v47, %v11969_v12  ;;  %v3357_v30 = vpop.f32.mrb[167].mxu0 }
0x1502   :  { %v3421_v5 = vmul.f32 0.044715, %v11978_v52  ;;  %v11986_v51 = vadd.f32 %v3357_v30, %v11972_v8 }
0x1503   :  { %v3440_v33 = vmul.f32 %v3420_v25, %v11975_v28  ;;  %v3422_v23 = vmul.f32 0.044715, %v11982_v60 }
0x1504   :  { %v3441_v22 = vmul.f32 %v3421_v5, %v11978_v52  ;;  %v3423_v26 = vmul.f32 0.044715, %v11986_v51 }
0x1505   :  { %v3460_v38 = vmul.f32 %v3440_v33, %v11975_v28  ;;  %v3442_v10 = vmul.f32 %v3422_v23, %v11982_v60 }
0x1506   :  { %v3461_v37 = vmul.f32 %v3441_v22, %v11978_v52  ;;  %v3443_v18 = vmul.f32 %v3423_v26, %v11986_v51  ;;  %v3361_v56 = vpop.f32.mrb[168].mxu0 }
0x1507   :  { %v3480_v6 = vadd.f32 %v3460_v38, %v11975_v28  ;;  %v3462_v41 = vmul.f32 %v3442_v10, %v11982_v60  ;;  %v11999_v3 = vadd.f32 %v3361_v56, %v11969_v12  ;;  %v3363_v42 = vpop.f32.mrb[169].mxu0 }
0x1508   :  { %v3463_v20 = vmul.f32 %v3443_v18, %v11986_v51  ;;  %v12003_v49 = vadd.f32 %v3363_v42, %v11972_v8  ;;  %v3365_v50 = vpop.f32.mrb[170].mxu0  ;;  %v3481_v17 = vadd.f32 %v3461_v37, %v11978_v52  ;;  %v3400_v42 = vmul.f32 0.5, %v11975_v28 }
0x1509   :  { %v3500_v45 = vmul.f32 0.7978846, %v3480_v6  ;;  %v3482_v48 = vadd.f32 %v3462_v41, %v11982_v60  ;;  %v3424_v1 = vmul.f32 0.044715, %v11999_v3  ;;  %v3366_v34 = vadd.f32 %v3365_v50, %v11969_v12  ;;  %v3367_v14 = vpop.f32.mrb[171].mxu0 }
0x150a   :  { %v3425_v54 = vmul.f32 0.044715, %v12003_v49  ;;  %v3368_v53 = vadd.f32 %v3367_v14, %v11972_v8  ;;  %v3483_v61 = vadd.f32 %v3463_v20, %v11986_v51  ;;  %v3501_v62 = vmul.f32 0.7978846, %v3481_v17 }
0x150b   :  { %10131 = vtanh.f32 %v3500_v45  ;;  %v3502_v32 = vmul.f32 0.7978846, %v3482_v48  ;;  %v3444_v21 = vmul.f32 %v3424_v1, %v11999_v3  ;;  %v3426_v36 = vmul.f32 0.044715, %v3366_v34 }
0x150c   :  { %v3445_v24 = vmul.f32 %v3425_v54, %v12003_v49  ;;  %v3427_v27 = vmul.f32 0.044715, %v3368_v53  ;;  %v3503_v0 = vmul.f32 0.7978846, %v3483_v61  ;;  %10133 = vtanh.f32 %v3501_v62 }
0x150d   :  { %10135 = vtanh.f32 %v3502_v32  ;;  %v3464_v58 = vmul.f32 %v3444_v21, %v11999_v3  ;;  %v3446_v63 = vmul.f32 %v3426_v36, %v3366_v34  ;;  %v3402_v20 = vmul.f32 0.5, %v11982_v60 }
0x150e   :  { %v3465_v19 = vmul.f32 %v3445_v24, %v12003_v49  ;;  %v3447_v43 = vmul.f32 %v3427_v27, %v3368_v53  ;;  %10137 = vtanh.f32 %v3503_v0  ;;  %v3401_v17 = vmul.f32 0.5, %v11978_v52 }
0x150f   :  { %v3466_v39 = vmul.f32 %v3446_v63, %v3366_v34  ;;  %v3484_v47 = vadd.f32 %v3464_v58, %v11999_v3  ;;  %v3403_v45 = vmul.f32 0.5, %v11986_v51  ;;  %v3404_v60 = vmul.f32 0.5, %v11999_v3 }
0x1510   :  { %v3467_v25 = vmul.f32 %v3447_v43, %v3368_v53  ;;  %v3485_v30 = vadd.f32 %v3465_v19, %v12003_v49  ;;  %v3406_v52 = vmul.f32 0.5, %v3366_v34  ;;  %v3405_v51 = vmul.f32 0.5, %v12003_v49 }
0x1511   :  { %v3486_v5 = vadd.f32 %v3466_v39, %v3366_v34  ;;  %v3504_v33 = vmul.f32 0.7978846, %v3484_v47  ;;  %v3407_v63 = vmul.f32 0.5, %v3368_v53 }
0x1512   :  { %v3487_v23 = vadd.f32 %v3467_v25, %v3368_v53  ;;  %v3505_v22 = vmul.f32 0.7978846, %v3485_v30 }
0x1513   :  { %v3506_v26 = vmul.f32 0.7978846, %v3486_v5  ;;  %10139 = vtanh.f32 %v3504_v33  ;;  %v3125_v33 = vpop.xlane.xlu0 %3124 }
0x1514   :  { %v3507_v38 = vmul.f32 0.7978846, %v3487_v23  ;;  %10141 = vtanh.f32 %v3505_v22  ;;  %v3138_v23 = vmul.f32 0.0078125, %v3125_v33 }
0x1515   :  { %v10132_v10 = vpop.eup %10131  ;;  %10143 = vtanh.f32 %v3506_v26 }
0x1516   :  { %v10134_v37 = vpop.eup %10133  ;;  %v3540_v18 = vadd.f32 1.0, %v10132_v10  ;;  %10145 = vtanh.f32 %v3507_v38  ;;  %v3148_v22 = vadd.f32 1e-12, %v3138_v23 }
0x1517   :  { %v10136_v56 = vpop.eup %10135  ;;  %v3541_v6 = vadd.f32 1.0, %v10134_v37 }
0x1518   :  { %v10138_v41 = vpop.eup %10137  ;;  %v3542_v50 = vadd.f32 1.0, %v10136_v56  ;;  %v3560_v1 = vmul.f32 %v3540_v18, %v3400_v42  ;;  %10147 = vrsqrt.f32 %v3148_v22 }
0x1519   :  { %v3543_v48 = vadd.f32 1.0, %v10138_v41  ;;  %v3561_v54 = vmul.f32 %v3541_v6, %v3401_v17 }
0x151a   :  { %v3562_v14 = vmul.f32 %v3542_v50, %v3402_v20 }
0x151b   :  { %v3563_v61 = vmul.f32 %v3543_v48, %v3403_v45 }
0x151c   :  { %v3580_v62 = vpack.c.bf16 %v3562_v14, %v3560_v1 }
0x151d   :  { %v10140_v32 = vpop.eup %10139  ;;  %v3581_v21 = vpack.c.bf16 %v3563_v61, %v3561_v54 }
0x151e   :  { %v10142_v36 = vpop.eup %10141  ;;  %v3544_v24 = vadd.f32 1.0, %v10140_v32 }
0x151f   :  { %v10144_v27 = vpop.eup %10143  ;;  %3757 = vmatprep.mubr.bf16.mxu1 %v3581_v21  ;;  %v3545_v28 = vadd.f32 1.0, %v10142_v36 }
0x1520   :  { %v10146_v0 = vpop.eup %10145  ;;  %3758 = vmatmul.mubr.bf16.vlgmr.msra.gmra.mrb[164].mxu1 %v3580_v62  ;;  %v3546_v58 = vadd.f32 1.0, %v10144_v27  ;;  %v3564_v43 = vmul.f32 %v3544_v24, %v3404_v60 }
0x1521   :  { %v3547_v19 = vadd.f32 1.0, %v10146_v0  ;;  %v3565_v47 = vmul.f32 %v3545_v28, %v3405_v51 }
0x1522   :  { %v3566_v39 = vmul.f32 %v3546_v58, %v3406_v52  ;;  %v10148_v37 = vpop.eup %10147 }
0x1523   :  { %v3567_v25 = vmul.f32 %v3547_v19, %v3407_v63  ;;  %v3168_v6 = vmul.f32 %v10148_v37, %v11873_v13 }
0x1524   :  { %v3582_v30 = vpack.c.bf16 %v3566_v39, %v3564_v43 }
0x1525   :  { %v3583_v5 = vpack.c.bf16 %v3567_v25, %v3565_v47  ;;  %v3184_v20 = vmul.f32 %v11833_v29, %v3168_v6 }
0x1527   :  { %3765 = vmatprep.mubr.bf16.mxu1 %v3583_v5  ;;  %v12029_v45 = vadd.f32 %v11840_v4, %v3184_v20 }
0x1528   :  { %3766 = vmatmul.mubr.bf16.gmra.mrb[168].mxu1 %v3582_v30 }
0x1576   :  { %v3127_v26 = vpop.xlane.xlu1 %3126 }
0x1577   :  { %v3139_v3 = vmul.f32 0.0078125, %v3127_v26 }
0x1578   :  { %v3129_v34 = vpop.xlane.xlu0 %3128 }
0x1579   :  { %v3149_v38 = vadd.f32 1e-12, %v3139_v3  ;;  %v3140_v10 = vmul.f32 0.0078125, %v3129_v34 }
0x157b   :  { %10149 = vrsqrt.f32 %v3149_v38  ;;  %v3150_v49 = vadd.f32 1e-12, %v3140_v10 }
0x157d   :  { %10151 = vrsqrt.f32 %v3150_v49 }
0x157e   :  { %v3131_v53 = vpop.xlane.xlu1 %3130 }
0x157f   :  { %v3141_v18 = vmul.f32 0.0078125, %v3131_v53 }
0x1581   :  { %v3151_v56 = vadd.f32 1e-12, %v3141_v18 }
0x1583   :  { %10153 = vrsqrt.f32 %v3151_v56 }
0x1585   :  { %v10150_v41 = vpop.eup %10149 }
0x1586   :  { %v3169_v42 = vmul.f32 %v10150_v41, %v11951_v55 }
0x1587   :  { %v10152_v50 = vpop.eup %10151 }
0x1588   :  { %v3185_v17 = vmul.f32 %v11833_v29, %v3169_v42  ;;  %v3170_v1 = vmul.f32 %v10152_v50, %v11954_v44 }
0x158a   :  { %v12032_v48 = vadd.f32 %v11840_v4, %v3185_v17  ;;  %v3186_v61 = vmul.f32 %v11833_v29, %v3170_v1 }
0x158c   :  { %v3207_v13 = vpack.c.bf16 %v12032_v48, %v12029_v45 }
0x158d   :  { %v10154_v14 = vpop.eup %10153 }
0x158e   :  { %v3371_v54 = vpop.f32.mrb[172].mxu0  ;;  %3380 = vmatmul.mubr.bf16.gmra.mrb[176].mxu0 %v3207_v13  ;;  %v3171_v55 = vmul.f32 %v10154_v14, %v11961_v11  ;;  %v12046_v11 = vadd.f32 %v11840_v4, %v3186_v61 }
0x158f   :  { %v3372_v62 = vadd.f32 %v3371_v54, %v11969_v12  ;;  %v3373_v32 = vpop.f32.mrb[173].mxu0  ;;  %3389 = vmatprep.mubr.bf16.mxu0 %v13922_v59 }
0x1590   :  { %v3374_v21 = vadd.f32 %v3373_v32, %v11972_v8  ;;  %v3375_v36 = vpop.f32.mrb[174].mxu0  ;;  %v3187_v44 = vmul.f32 %v11833_v29, %v3171_v55 }
0x1591   :  { %v3428_v24 = vmul.f32 0.044715, %v3372_v62  ;;  %v3376_v27 = vadd.f32 %v3375_v36, %v11969_v12  ;;  %v3377_v28 = vpop.f32.mrb[175].mxu0  ;;  %v3408_v6 = vmul.f32 0.5, %v3372_v62  ;;  %v12057_v36 = vld [vmem:[%s13900_s13] ss:$0 sm:$0xff] }
0x1592   :  { %v3429_v0 = vmul.f32 0.044715, %v3374_v21  ;;  %v3378_v60 = vadd.f32 %v3377_v28, %v11972_v8  ;;  %v12049_v52 = vadd.f32 %v11840_v4, %v3187_v44  ;;  %v3409_v20 = vmul.f32 0.5, %v3374_v21 }
0x1593   :  { %v3448_v58 = vmul.f32 %v3428_v24, %v3372_v62  ;;  %v3430_v51 = vmul.f32 0.044715, %v3376_v27  ;;  %v3410_v41 = vmul.f32 0.5, %v3376_v27 }
0x1594   :  { %v3449_v63 = vmul.f32 %v3429_v0, %v3374_v21  ;;  %v3431_v19 = vmul.f32 0.044715, %v3378_v60  ;;  %v3208_v29 = vpack.c.bf16 %v12049_v52, %v12046_v11  ;;  %v3411_v50 = vmul.f32 0.5, %v3378_v60 }
0x1595   :  { %v3468_v43 = vmul.f32 %v3448_v58, %v3372_v62  ;;  %v3450_v39 = vmul.f32 %v3430_v51, %v3376_v27 }
0x1596   :  { %v3469_v47 = vmul.f32 %v3449_v63, %v3374_v21  ;;  %v3451_v25 = vmul.f32 %v3431_v19, %v3378_v60  ;;  %3390 = vmatmul.mubr.bf16.gmra.mrb[180].mxu0 %v3208_v29 }
0x1597   :  { %v3470_v30 = vmul.f32 %v3450_v39, %v3376_v27  ;;  %v3488_v5 = vadd.f32 %v3468_v43, %v3372_v62  ;;  %4168 = vmatprep.mubr.bf16.mxu0 %v13922_v59 }
0x1598   :  { %v3471_v33 = vmul.f32 %v3451_v25, %v3378_v60  ;;  %v3489_v23 = vadd.f32 %v3469_v47, %v3374_v21 }
0x1599   :  { %v3490_v4 = vadd.f32 %v3470_v30, %v3376_v27  ;;  %v3508_v22 = vmul.f32 0.7978846, %v3488_v5  ;;  %v9853_v5 = vld [vmem:[%s13919_s0 + $0xc4] ss:$12 sps:$4 sm:$0xff]  }
0x159a   :  { %v3491_v26 = vadd.f32 %v3471_v33, %v3378_v60  ;;  %v3509_v3 = vmul.f32 0.7978846, %v3489_v23  ;;  %4136 = vmatprep.subr.bf16.mxu0 %v9853_v5 }
0x159b   :  { %v3510_v34 = vmul.f32 0.7978846, %v3490_v4  ;;  %10155 = vtanh.f32 %v3508_v22 }
0x159c   :  { %v3511_v38 = vmul.f32 0.7978846, %v3491_v26  ;;  %10157 = vtanh.f32 %v3509_v3 }
0x159d   :  { %10159 = vtanh.f32 %v3510_v34 }
0x159e   :  { %10161 = vtanh.f32 %v3511_v38 }
0x15a5   :  { %v10156_v10 = vpop.eup %10155 }
0x15a6   :  { %v10158_v49 = vpop.eup %10157  ;;  %v3548_v53 = vadd.f32 1.0, %v10156_v10 }
0x15a7   :  { %v10160_v37 = vpop.eup %10159  ;;  %v3549_v18 = vadd.f32 1.0, %v10158_v49 }
0x15a8   :  { %v10162_v56 = vpop.eup %10161  ;;  %v3550_v42 = vadd.f32 1.0, %v10160_v37  ;;  %v3568_v1 = vmul.f32 %v3548_v53, %v3408_v6 }
0x15a9   :  { %v3551_v17 = vadd.f32 1.0, %v10162_v56  ;;  %v3569_v14 = vmul.f32 %v3549_v18, %v3409_v20 }
0x15aa   :  { %v3570_v13 = vmul.f32 %v3550_v42, %v3410_v41 }
0x15ab   :  { %v3571_v54 = vmul.f32 %v3551_v17, %v3411_v50 }
0x15ac   :  { %v3584_v55 = vpack.c.bf16 %v3570_v13, %v3568_v1 }
0x15ad   :  { %v3585_v61 = vpack.c.bf16 %v3571_v54, %v3569_v14 }
0x15af   :  { %3773 = vmatprep.mubr.bf16.mxu1 %v3585_v61 }
0x15b0   :  { %3774 = vmatmul.mubr.bf16.gmra.mrb[172].mxu1 %v3584_v55 }
0x15f3   :  { %v8557_v32 = vpop.f32.mrb[164].mxu1 }
0x15f4   :  { %v8558_v62 = vpop.f32.mrb[165].mxu1 }
0x15f5   :  { %v8559_v44 = vadd.f32 %v8558_v62, %v8557_v32  ;;  %v8560_v24 = vpop.f32.mrb[166].mxu1 }
0x15f6   :  { %v8561_v21 = vpop.f32.mrb[167].mxu1 }
0x15f7   :  { %v3760_v27 = vadd.f32 %v8559_v44, %v12057_v36  ;;  %v8562_v28 = vadd.f32 %v8561_v21, %v8560_v24 }
0x15f9   :  { %v3763_v0 = vadd.f32 %v8562_v28, %v12057_v36  ;;  %v12062_v60 = vadd.f32 %v3760_v27, %v11844_v9 }
0x15fb   :  { %v8563_v58 = vpop.f32.mrb[168].mxu1  ;;  %3810 = vadd.xlane.f32.xlu0 %v12062_v60  ;;  %v12066_v51 = vadd.f32 %v3763_v0, %v11847_v46  ;;  %v9851_v46 = vld [vmem:[%s13919_s0 + $0xc0] ss:$12 sps:$4 sm:$0xff]  }
0x15fc   :  { %v8564_v63 = vpop.f32.mrb[169].mxu1  ;;  %4137 = vmatpush1.bf16.msra.mxu0 %v9851_v46 }
0x15fd   :  { %v8565_v19 = vadd.f32 %v8564_v63, %v8563_v58  ;;  %3812 = vadd.xlane.f32.xlu1 %v12066_v51  ;;  %v8566_v29 = vpop.f32.mrb[170].mxu1 }
0x15fe   :  { %v8567_v43 = vpop.f32.mrb[171].mxu1 }
0x15ff   :  { %v3768_v39 = vadd.f32 %v8565_v19, %v12057_v36  ;;  %v8568_v47 = vadd.f32 %v8567_v43, %v8566_v29 }
0x1601   :  { %v3771_v25 = vadd.f32 %v8568_v47, %v12057_v36  ;;  %v12072_v9 = vadd.f32 %v3768_v39, %v11860_v31  ;;  %v9854_v31 = vld [vmem:[%s13919_s0 + $0xc8] ss:$12 sps:$4 sm:$0xff]  }
0x1602   :  { %9257 = vmatpush3.bf16.msra.mxu1 %v9854_v31 }
0x1603   :  { %3814 = vadd.xlane.f32.xlu0 %v12072_v9  ;;  %v12076_v30 = vadd.f32 %v3771_v25, %v11857_v16  ;;  %9258 = vmatprep.subr.bf16.mxu1 %v13912_v7 }
0x1605   :  { %3816 = vadd.xlane.f32.xlu1 %v12076_v30 }
0x1661   :  { %v3381_v16 = vpop.f32.mrb[176].mxu0 }
0x1662   :  { %v12090_v33 = vadd.f32 %v3381_v16, %v11969_v12  ;;  %v3383_v23 = vpop.f32.mrb[177].mxu0 }
0x1663   :  { %v12093_v4 = vadd.f32 %v3383_v23, %v11972_v8  ;;  %v3385_v22 = vpop.f32.mrb[178].mxu0 }
0x1664   :  { %v3432_v26 = vmul.f32 0.044715, %v12090_v33  ;;  %v12097_v3 = vadd.f32 %v3385_v22, %v11969_v12  ;;  %v3387_v34 = vpop.f32.mrb[179].mxu0 }
0x1665   :  { %v3433_v38 = vmul.f32 0.044715, %v12093_v4  ;;  %v12101_v10 = vadd.f32 %v3387_v34, %v11972_v8 }
0x1666   :  { %v3452_v49 = vmul.f32 %v3432_v26, %v12090_v33  ;;  %v3434_v53 = vmul.f32 0.044715, %v12097_v3 }
0x1667   :  { %v3453_v37 = vmul.f32 %v3433_v38, %v12093_v4  ;;  %v3435_v18 = vmul.f32 0.044715, %v12101_v10 }
0x1668   :  { %v3472_v56 = vmul.f32 %v3452_v49, %v12090_v33  ;;  %v3454_v6 = vmul.f32 %v3434_v53, %v12097_v3 }
0x1669   :  { %v3473_v41 = vmul.f32 %v3453_v37, %v12093_v4  ;;  %v3455_v42 = vmul.f32 %v3435_v18, %v12101_v10  ;;  %v3391_v20 = vpop.f32.mrb[180].mxu0 }
0x166a   :  { %v3474_v50 = vmul.f32 %v3454_v6, %v12097_v3  ;;  %v12113_v17 = vadd.f32 %v3391_v20, %v11969_v12  ;;  %v3393_v1 = vpop.f32.mrb[181].mxu0  ;;  %v3492_v13 = vadd.f32 %v3472_v56, %v12090_v33  ;;  %v3412_v20 = vmul.f32 0.5, %v12090_v33 }
0x166b   :  { %v3475_v14 = vmul.f32 %v3455_v42, %v12101_v10  ;;  %v12118_v54 = vadd.f32 %v3393_v1, %v11972_v8  ;;  %v3395_v55 = vpop.f32.mrb[182].mxu0  ;;  %v3493_v61 = vadd.f32 %v3473_v41, %v12093_v4 }
0x166c   :  { %v3436_v32 = vmul.f32 0.044715, %v12113_v17  ;;  %v12123_v62 = vadd.f32 %v3395_v55, %v11969_v12  ;;  %v3397_v44 = vpop.f32.mrb[183].mxu0  ;;  %v3494_v24 = vadd.f32 %v3474_v50, %v12097_v3  ;;  %v3512_v21 = vmul.f32 0.7978846, %v3492_v13 }
0x166d   :  { %v3437_v27 = vmul.f32 0.044715, %v12118_v54  ;;  %v3398_v28 = vadd.f32 %v3397_v44, %v11972_v8  ;;  %v3495_v0 = vadd.f32 %v3475_v14, %v12101_v10  ;;  %v3513_v58 = vmul.f32 0.7978846, %v3493_v61 }
0x166e   :  { %v3456_v63 = vmul.f32 %v3436_v32, %v12113_v17  ;;  %v3438_v19 = vmul.f32 0.044715, %v12123_v62  ;;  %v3514_v29 = vmul.f32 0.7978846, %v3494_v24  ;;  %10163 = vtanh.f32 %v3512_v21 }
0x166f   :  { %v3457_v12 = vmul.f32 %v3437_v27, %v12118_v54  ;;  %v3439_v43 = vmul.f32 0.044715, %v3398_v28  ;;  %v3515_v39 = vmul.f32 0.7978846, %v3495_v0  ;;  %10165 = vtanh.f32 %v3513_v58 }
0x1670   :  { %v3476_v47 = vmul.f32 %v3456_v63, %v12113_v17  ;;  %v3458_v25 = vmul.f32 %v3438_v19, %v12123_v62  ;;  %10167 = vtanh.f32 %v3514_v29  ;;  %v3414_v50 = vmul.f32 0.5, %v12097_v3 }
0x1671   :  { %v3477_v8 = vmul.f32 %v3457_v12, %v12118_v54  ;;  %v3459_v46 = vmul.f32 %v3439_v43, %v3398_v28  ;;  %10169 = vtanh.f32 %v3515_v39  ;;  %v3413_v13 = vmul.f32 0.5, %v12093_v4 }
0x1672   :  { %v3478_v5 = vmul.f32 %v3458_v25, %v12123_v62  ;;  %v3496_v31 = vadd.f32 %v3476_v47, %v12113_v17  ;;  %v3415_v14 = vmul.f32 0.5, %v12101_v10  ;;  %v3416_v4 = vmul.f32 0.5, %v12113_v17 }
0x1673   :  { %v3479_v16 = vmul.f32 %v3459_v46, %v3398_v28  ;;  %v3497_v23 = vadd.f32 %v3477_v8, %v12118_v54  ;;  %v3418_v10 = vmul.f32 0.5, %v12123_v62  ;;  %v3417_v39 = vmul.f32 0.5, %v12118_v54 }
0x1674   :  { %v3498_v22 = vadd.f32 %v3478_v5, %v12123_v62  ;;  %v3516_v26 = vmul.f32 0.7978846, %v3496_v31  ;;  %v3419_v47 = vmul.f32 0.5, %v3398_v28 }
0x1675   :  { %v3499_v34 = vadd.f32 %v3479_v16, %v3398_v28  ;;  %v3517_v38 = vmul.f32 0.7978846, %v3497_v23 }
0x1676   :  { %v3518_v49 = vmul.f32 0.7978846, %v3498_v22  ;;  %10171 = vtanh.f32 %v3516_v26 }
0x1677   :  { %v3519_v53 = vmul.f32 0.7978846, %v3499_v34  ;;  %10173 = vtanh.f32 %v3517_v38 }
0x1678   :  { %v10164_v37 = vpop.eup %10163  ;;  %10175 = vtanh.f32 %v3518_v49 }
0x1679   :  { %v10166_v18 = vpop.eup %10165  ;;  %v3552_v56 = vadd.f32 1.0, %v10164_v37  ;;  %10177 = vtanh.f32 %v3519_v53 }
0x167a   :  { %v10168_v6 = vpop.eup %10167  ;;  %v3553_v41 = vadd.f32 1.0, %v10166_v18 }
0x167b   :  { %v10170_v42 = vpop.eup %10169  ;;  %v3554_v1 = vadd.f32 1.0, %v10168_v6  ;;  %v3572_v61 = vmul.f32 %v3552_v56, %v3412_v20 }
0x167c   :  { %v3555_v55 = vadd.f32 1.0, %v10170_v42  ;;  %v3573_v44 = vmul.f32 %v3553_v41, %v3413_v13 }
0x167d   :  { %v3574_v32 = vmul.f32 %v3554_v1, %v3414_v50 }
0x167e   :  { %v3575_v24 = vmul.f32 %v3555_v55, %v3415_v14  ;;  %v9855_v14 = vld [vmem:[%s13919_s0 + $0xd8] ss:$12 sps:$4 sm:$0xff]   ;;  %v9861_v55 = vld [vmem:[%s13919_s0 + $0xf4] ss:$12 sps:$4 sm:$0xff]  }
0x167f   :  { %v3586_v21 = vpack.c.bf16 %v3574_v32, %v3572_v61  ;;  %v9859_v61 = vld [vmem:[%s13919_s0 + $0xf0] ss:$12 sps:$4 sm:$0xff]   ;;  %v9862_v32 = vld [vmem:[%s13919_s0 + $0xf8] ss:$12 sps:$4 sm:$0xff]  }
0x1680   :  { %v10172_v27 = vpop.eup %10171  ;;  %v3587_v0 = vpack.c.bf16 %v3575_v24, %v3573_v44  ;;  %v9865_v44 = vld [vmem:[%s13919_s0 + $0x10c] ss:$12 sps:$4 sm:$0xff]   ;;  %v9863_v24 = vld [vmem:[%s13919_s0 + $0x108] ss:$12 sps:$4 sm:$0xff]  }
0x1681   :  { %v10174_v58 = vpop.eup %10173  ;;  %v3556_v63 = vadd.f32 1.0, %v10172_v27  ;;  %v9869_v27 = vld [vmem:[%s13919_s0 + $0x124] ss:$12 sps:$4 sm:$0xff]  }
0x1682   :  { %v10176_v19 = vpop.eup %10175  ;;  %3781 = vmatprep.mubr.bf16.mxu1 %v3587_v0  ;;  %v3557_v33 = vadd.f32 1.0, %v10174_v58  ;;  %v9867_v0 = vld [vmem:[%s13919_s0 + $0x120] ss:$12 sps:$4 sm:$0xff]   ;;  %v9870_v58 = vld [vmem:[%s13919_s0 + $0x128] ss:$12 sps:$4 sm:$0xff]  }
0x1683   :  { %v10178_v29 = vpop.eup %10177  ;;  %v8569_v3 = vpop.f32.mrb[172].mxu1  ;;  %3782 = vmatmul.mubr.bf16.gmra.mrb[176].mxu1 %v3586_v21  ;;  %v3558_v12 = vadd.f32 1.0, %v10176_v19  ;;  %v3576_v5 = vmul.f32 %v3556_v63, %v3416_v4  ;;  %v9866_v21 = vld [vmem:[%s13919_s0 + $0x110] ss:$12 sps:$4 sm:$0xff]   ;;  %v9871_v19 = vld [vmem:[%s13919_s0 + $0x138] ss:$12 sps:$4 sm:$0xff]  }
0x1684   :  { %v8570_v43 = vpop.f32.mrb[173].mxu1  ;;  %v3559_v25 = vadd.f32 1.0, %v10178_v29  ;;  %v3577_v23 = vmul.f32 %v3557_v33, %v3417_v39  ;;  %v9873_v63 = vld [vmem:[%s13919_s0 + $0x13c] ss:$12 sps:$4 sm:$0xff]   ;;  %v9874_v33 = vld [vmem:[%s13919_s0 + $0x140] ss:$12 sps:$4 sm:$0xff]  }
0x1685   :  { %v8571_v8 = vadd.f32 %v8570_v43, %v8569_v3  ;;  %v8572_v46 = vpop.f32.mrb[174].mxu1  ;;  %v3578_v31 = vmul.f32 %v3558_v12, %v3418_v10  ;;  %v9877_v29 = vld [vmem:[%s13919_s0 + $0x154] ss:$12 sps:$4 sm:$0xff]   ;;  %v9875_v3 = vld [vmem:[%s13919_s0 + $0x150] ss:$12 sps:$4 sm:$0xff]  }
0x1686   :  { %v8573_v16 = vpop.f32.mrb[175].mxu1  ;;  %v3579_v22 = vmul.f32 %v3559_v25, %v3419_v47  ;;  %v9878_v4 = vld [vmem:[%s13919_s0 + $0x158] ss:$12 sps:$4 sm:$0xff]   ;;  %v9879_v12 = vld [vmem:[%s13919_s0 + $0x168] ss:$12 sps:$4 sm:$0xff]  }
0x1687   :  { %v3776_v26 = vadd.f32 %v8571_v8, %v12057_v36  ;;  %v8574_v34 = vadd.f32 %v8573_v16, %v8572_v46  ;;  %v3588_v38 = vpack.c.bf16 %v3578_v31, %v3576_v5  ;;  %v9881_v10 = vld [vmem:[%s13919_s0 + $0x16c] ss:$12 sps:$4 sm:$0xff]   ;;  %v9882_v43 = vld [vmem:[%s13919_s0 + $0x170] ss:$12 sps:$4 sm:$0xff]  }
0x1688   :  { %v3811_v17 = vpop.xlane.xlu0 %3810  ;;  %v3589_v49 = vpack.c.bf16 %v3579_v22, %v3577_v23 }
0x1689   :  { %v3779_v62 = vadd.f32 %v8574_v34, %v12057_v36  ;;  %v3830_v53 = vmul.f32 0.0078125, %v3811_v17  ;;  %v12149_v54 = vadd.f32 %v3776_v26, %v11942_v57 }
0x168a   :  { %v3813_v28 = vpop.xlane.xlu1 %3812  ;;  %3789 = vmatprep.mubr.bf16.mxu1 %v3589_v49 }
0x168b   :  { %v12152_v37 = vsub.f32 %v12062_v60, %v3830_v53  ;;  %v3831_v18 = vmul.f32 0.0078125, %v3813_v28  ;;  %3818 = vadd.xlane.f32.xlu0 %v12149_v54  ;;  %3790 = vmatmul.mubr.bf16.gmra.mrb[180].mxu1 %v3588_v38  ;;  %v12156_v56 = vadd.f32 %v3779_v62, %v11945_v2 }
0x168c   :  { %9272 = vmatprep.mubr.msk.bf16.mxu1 %vm10472_vm0, %v13912_v7 }
0x168d   :  { %v12161_v6 = vsub.f32 %v12066_v51, %v3831_v18  ;;  %3820 = vadd.xlane.f32.xlu1 %v12156_v56  ;;  %v3850_v57 = vmul.f32 %v12152_v37, %v12152_v37 }
0x168f   :  { %3860 = vadd.xlane.f32.xlu0 %v3850_v57  ;;  %v3851_v60 = vmul.f32 %v12161_v6, %v12161_v6  ;;  %v12262_v57 = vld [vmem:[%s13901_s14] ss:$0 sm:$0xff] }
0x1690   :  { %v3815_v41 = vpop.xlane.xlu0 %3814 }
0x1691   :  { %v3832_v42 = vmul.f32 0.0078125, %v3815_v41  ;;  %3862 = vadd.xlane.f32.xlu1 %v3851_v60 }
0x1692   :  { %v3817_v2 = vpop.xlane.xlu1 %3816 }
0x1693   :  { %v12169_v20 = vsub.f32 %v12072_v9, %v3832_v42  ;;  %v3833_v50 = vmul.f32 0.0078125, %v3817_v2  ;;  %v9857_v9 = vld [vmem:[%s13919_s0 + $0xdc] ss:$12 sps:$4 sm:$0xff]  }
0x1694   :  { %4138 = vmatprep.subr.bf16.mxu0 %v9857_v9 }
0x1695   :  { %v12172_v51 = vsub.f32 %v12076_v30, %v3833_v50  ;;  %v3852_v1 = vmul.f32 %v12169_v20, %v12169_v20  ;;  %v9858_v30 = vld [vmem:[%s13919_s0 + $0xe0] ss:$12 sps:$4 sm:$0xff]   ;;  %4139 = vmatpush1.bf16.msra.mxu0 %v9855_v14 }
0x1696   :  { %9259 = vmatpush3.bf16.msra.mxu1 %v9858_v30  ;;  %4140 = vmatprep.subr.bf16.mxu0 %v9861_v55  ;;  %v12270_v50 = vld [vmem:[%s13902_s15] ss:$0 sm:$0xff] }
0x1697   :  { %3864 = vadd.xlane.f32.xlu0 %v3852_v1  ;;  %v3853_v13 = vmul.f32 %v12172_v51, %v12172_v51  ;;  %9260 = vmatprep.subr.bf16.mxu1 %v13912_v7 }
0x1699   :  { %3866 = vadd.xlane.f32.xlu1 %v3853_v13  ;;  %4141 = vmatpush1.bf16.msra.mxu0 %v9859_v61 }
0x169a   :  { %9261 = vmatpush3.bf16.msra.mxu1 %v9862_v32  ;;  %4142 = vmatprep.subr.bf16.mxu0 %v9865_v44 }
0x169b   :  { %9262 = vmatprep.subr.bf16.mxu1 %v13912_v7 }
0x169d   :  { %4143 = vmatpush1.bf16.msra.mxu0 %v9863_v24 }
0x169e   :  { %9263 = vmatpush3.bf16.msra.mxu1 %v9866_v21  ;;  %4144 = vmatprep.subr.bf16.mxu0 %v9869_v27 }
0x169f   :  { %9264 = vmatprep.subr.bf16.mxu1 %v13912_v7 }
0x16a1   :  { %4145 = vmatpush1.bf16.msra.mxu0 %v9867_v0 }
0x16a2   :  { %9265 = vmatpush3.bf16.msra.mxu1 %v9870_v58  ;;  %4146 = vmatprep.subr.bf16.mxu0 %v9873_v63 }
0x16a3   :  { %9266 = vmatprep.subr.bf16.mxu1 %v13912_v7 }
0x16a5   :  { %4147 = vmatpush1.bf16.msra.mxu0 %v9871_v19 }
0x16a6   :  { %9267 = vmatpush3.bf16.msra.mxu1 %v9874_v33  ;;  %4148 = vmatprep.subr.bf16.mxu0 %v9877_v29 }
0x16a7   :  { %9268 = vmatprep.subr.bf16.mxu1 %v13912_v7 }
0x16a9   :  { %4149 = vmatpush1.bf16.msra.mxu0 %v9875_v3 }
0x16aa   :  { %9269 = vmatpush3.bf16.msra.mxu1 %v9878_v4  ;;  %4150 = vmatprep.subr.bf16.mxu0 %v9881_v10 }
0x16ab   :  { %9270 = vmatprep.subr.bf16.mxu1 %v13912_v7 }
0x16ad   :  { %4151 = vmatpush1.bf16.msra.mxu0 %v9879_v12 }
0x16ae   :  { %9271 = vmatpush3.bf16.msra.mxu1 %v9882_v43  ;;  %9292 = vmatprep.subr.bf16.mxu0 %v13912_v7 }
0x16af   :  { %9310 = vmatprep.subr.bf16.mxu1 %v13912_v7 }
0x1718   :  { %v3819_v39 = vpop.xlane.xlu0 %3818 }
0x1719   :  { %v3834_v47 = vmul.f32 0.0078125, %v3819_v39 }
0x171a   :  { %v3821_v25 = vpop.xlane.xlu1 %3820 }
0x171b   :  { %v12250_v8 = vsub.f32 %v12149_v54, %v3834_v47  ;;  %v3835_v46 = vmul.f32 0.0078125, %v3821_v25 }
0x171c   :  { %v3861_v5 = vpop.xlane.xlu0 %3860 }
0x171d   :  { %v12253_v31 = vsub.f32 %v12156_v56, %v3835_v46  ;;  %v3880_v16 = vmul.f32 0.0078125, %v3861_v5  ;;  %v3854_v23 = vmul.f32 %v12250_v8, %v12250_v8 }
0x171e   :  { %v3863_v22 = vpop.xlane.xlu1 %3862 }
0x171f   :  { %v3890_v26 = vadd.f32 1e-12, %v3880_v16  ;;  %v3881_v34 = vmul.f32 0.0078125, %v3863_v22  ;;  %3868 = vadd.xlane.f32.xlu0 %v3854_v23  ;;  %v3855_v38 = vmul.f32 %v12253_v31, %v12253_v31 }
0x1721   :  { %10179 = vrsqrt.f32 %v3890_v26  ;;  %v3891_v17 = vadd.f32 1e-12, %v3881_v34  ;;  %3870 = vadd.xlane.f32.xlu1 %v3855_v38 }
0x1723   :  { %10181 = vrsqrt.f32 %v3891_v17 }
0x1724   :  { %v3865_v49 = vpop.xlane.xlu0 %3864 }
0x1725   :  { %v3882_v62 = vmul.f32 0.0078125, %v3865_v49 }
0x1726   :  { %v3867_v53 = vpop.xlane.xlu1 %3866 }
0x1727   :  { %v3892_v54 = vadd.f32 1e-12, %v3882_v62  ;;  %v3883_v28 = vmul.f32 0.0078125, %v3867_v53 }
0x1729   :  { %10183 = vrsqrt.f32 %v3892_v54  ;;  %v3893_v18 = vadd.f32 1e-12, %v3883_v28 }
0x172b   :  { %v10180_v56 = vpop.eup %10179  ;;  %10185 = vrsqrt.f32 %v3893_v18 }
0x172c   :  { %v3910_v60 = vmul.f32 %v10180_v56, %v12152_v37 }
0x172d   :  { %v10182_v41 = vpop.eup %10181 }
0x172e   :  { %v3926_v42 = vmul.f32 %v12262_v57, %v3910_v60  ;;  %v3911_v2 = vmul.f32 %v10182_v41, %v12161_v6 }
0x1730   :  { %v3927_v1 = vmul.f32 %v12262_v57, %v3911_v2  ;;  %v12274_v13 = vadd.f32 %v12270_v50, %v3926_v42 }
0x1732   :  { %v12277_v14 = vadd.f32 %v12270_v50, %v3927_v1 }
0x1733   :  { %v10184_v9 = vpop.eup %10183 }
0x1734   :  { %v3952_v37 = vpack.c.bf16 %v12277_v14, %v12274_v13  ;;  %v3912_v30 = vmul.f32 %v10184_v9, %v12169_v20 }
0x1735   :  { %v10186_v6 = vpop.eup %10185 }
0x1736   :  { %4169 = vmatmul.mubr.bf16.vlgmr.msra.gmra.mrb[184].mxu0 %v3952_v37  ;;  %9273 = vmatmul.mubr.bf16.vlgmr.msra.gmra.mrb[184].mxu1 %v3952_v37  ;;  %v3913_v55 = vmul.f32 %v10186_v6, %v12172_v51  ;;  %v3928_v61 = vmul.f32 %v12262_v57, %v3912_v30 }
0x1737   :  { %4178 = vmatprep.mubr.bf16.mxu0 %v13922_v59  ;;  %9276 = vmatprep.mubr.msk.bf16.mxu1 %vm10472_vm0, %v13912_v7 }
0x1738   :  { %v3929_v32 = vmul.f32 %v12262_v57, %v3913_v55  ;;  %v12289_v44 = vadd.f32 %v12270_v50, %v3928_v61 }
0x173a   :  { %v12292_v24 = vadd.f32 %v12270_v50, %v3929_v32  ;;  %v8169_v32 = vld [vmem:[%s13891_s5 + $0x3] sm:$0x7] }
0x173c   :  { %v3953_v20 = vpack.c.bf16 %v12292_v24, %v12289_v44 }
0x173e   :  { %4179 = vmatmul.mubr.bf16.gmra.mrb[188].mxu0 %v3953_v20  ;;  %9277 = vmatmul.mubr.bf16.gmra.mrb[188].mxu1 %v3953_v20  ;;  %v12342_v20 = vrot.slane %v8169_v32, %v10832_v35 }
0x173f   :  { %4188 = vmatprep.mubr.bf16.mxu0 %v13922_v59  ;;  %9280 = vmatprep.mubr.msk.bf16.mxu1 %vm10472_vm0, %v13912_v7 }
0x1756   :  { %v8575_v51 = vpop.f32.mrb[176].mxu1 }
0x1757   :  { %v8576_v21 = vpop.f32.mrb[177].mxu1 }
0x1758   :  { %v8577_v27 = vadd.f32 %v8576_v21, %v8575_v51  ;;  %v8578_v0 = vpop.f32.mrb[178].mxu1  ;;  %v13923_v51 = vsub.s32 2, %v10829_v15 }
0x1759   :  { %v8579_v58 = vpop.f32.mrb[179].mxu1 }
0x175a   :  { %v3784_v63 = vadd.f32 %v8577_v27, %v12057_v36  ;;  %v8580_v19 = vadd.f32 %v8579_v58, %v8578_v0  ;;  %v12346_v21 = vrot.slane %v8169_v32, %v13923_v51  ;;  %v12349_v58 = vrot.slane %v8169_v32, %v10839_v40 }
0x175c   :  { %v3787_v33 = vadd.f32 %v8580_v19, %v12057_v36  ;;  %v3804_v29 = vadd.f32 %v3784_v63, %v12029_v45 }
0x175e   :  { %v8581_v3 = vpop.f32.mrb[180].mxu1  ;;  %3822 = vadd.xlane.f32.xlu0 %v3804_v29  ;;  %v3805_v4 = vadd.f32 %v3787_v33, %v12032_v48 }
0x175f   :  { %v8582_v10 = vpop.f32.mrb[181].mxu1 }
0x1760   :  { %v8583_v12 = vadd.f32 %v8582_v10, %v8581_v3  ;;  %3824 = vadd.xlane.f32.xlu1 %v3805_v4  ;;  %v8584_v43 = vpop.f32.mrb[182].mxu1 }
0x1761   :  { %v8585_v39 = vpop.f32.mrb[183].mxu1 }
0x1762   :  { %v3792_v47 = vadd.f32 %v8583_v12, %v12057_v36  ;;  %v8586_v25 = vadd.f32 %v8585_v39, %v8584_v43 }
0x1764   :  { %v3795_v46 = vadd.f32 %v8586_v25, %v12057_v36  ;;  %v3806_v5 = vadd.f32 %v3792_v47, %v12046_v11 }
0x1766   :  { %3826 = vadd.xlane.f32.xlu0 %v3806_v5  ;;  %v3807_v16 = vadd.f32 %v3795_v46, %v12049_v52 }
0x1768   :  { %3828 = vadd.xlane.f32.xlu1 %v3807_v16 }
0x17ac   :  { %v3869_v45 = vpop.xlane.xlu0 %3868 }
0x17ad   :  { %v3884_v23 = vmul.f32 0.0078125, %v3869_v45 }
0x17ae   :  { %v3871_v22 = vpop.xlane.xlu1 %3870 }
0x17af   :  { %v3894_v48 = vadd.f32 1e-12, %v3884_v23  ;;  %v3885_v26 = vmul.f32 0.0078125, %v3871_v22 }
0x17b1   :  { %10187 = vrsqrt.f32 %v3894_v48  ;;  %v3895_v34 = vadd.f32 1e-12, %v3885_v26 }
0x17b3   :  { %10189 = vrsqrt.f32 %v3895_v34 }
0x17bb   :  { %v10188_v38 = vpop.eup %10187 }
0x17bc   :  { %v3914_v17 = vmul.f32 %v10188_v38, %v12250_v8 }
0x17bd   :  { %v10190_v49 = vpop.eup %10189 }
0x17be   :  { %v3915_v36 = vmul.f32 %v10190_v49, %v12253_v31  ;;  %v3930_v11 = vmul.f32 %v12262_v57, %v3914_v17 }
0x17c0   :  { %v3931_v62 = vmul.f32 %v12262_v57, %v3915_v36  ;;  %v12312_v52 = vadd.f32 %v12270_v50, %v3930_v11 }
0x17c2   :  { %v12315_v53 = vadd.f32 %v12270_v50, %v3931_v62 }
0x17c4   :  { %v3954_v54 = vpack.c.bf16 %v12315_v53, %v12312_v52 }
0x17c6   :  { %4189 = vmatmul.mubr.bf16.gmra.mrb[192].mxu0 %v3954_v54  ;;  %9281 = vmatmul.mubr.bf16.gmra.mrb[192].mxu1 %v3954_v54 }
0x17c7   :  { %4198 = vmatprep.mubr.bf16.mxu0 %v13922_v59  ;;  %9284 = vmatprep.mubr.msk.bf16.mxu1 %vm10472_vm0, %v13912_v7 }
0x17eb   :  { %v3823_v8 = vpop.xlane.xlu0 %3822 }
0x17ec   :  { %v3836_v31 = vmul.f32 0.0078125, %v3823_v8 }
0x17ed   :  { %v3825_v28 = vpop.xlane.xlu1 %3824 }
0x17ee   :  { %v12322_v18 = vsub.f32 %v3804_v29, %v3836_v31  ;;  %v3837_v56 = vmul.f32 0.0078125, %v3825_v28 }
0x17f0   :  { %v12324_v60 = vsub.f32 %v3805_v4, %v3837_v56  ;;  %v3856_v41 = vmul.f32 %v12322_v18, %v12322_v18 }
0x17f2   :  { %3872 = vadd.xlane.f32.xlu0 %v3856_v41  ;;  %v3857_v42 = vmul.f32 %v12324_v60, %v12324_v60 }
0x17f3   :  { %v3827_v2 = vpop.xlane.xlu0 %3826 }
0x17f4   :  { %v3838_v1 = vmul.f32 0.0078125, %v3827_v2  ;;  %3874 = vadd.xlane.f32.xlu1 %v3857_v42 }
0x17f5   :  { %v3829_v9 = vpop.xlane.xlu1 %3828 }
0x17f6   :  { %v12330_v37 = vsub.f32 %v3806_v5, %v3838_v1  ;;  %v3839_v30 = vmul.f32 0.0078125, %v3829_v9 }
0x17f8   :  { %v12332_v6 = vsub.f32 %v3807_v16, %v3839_v30  ;;  %v3858_v55 = vmul.f32 %v12330_v37, %v12330_v37 }
0x17fa   :  { %3876 = vadd.xlane.f32.xlu0 %v3858_v55  ;;  %v3859_v61 = vmul.f32 %v12332_v6, %v12332_v6 }
0x17fc   :  { %3878 = vadd.xlane.f32.xlu1 %v3859_v61 }
0x1809   :  { %v4170_v27 = vpop.f32.mrb[184].mxu0  ;;  %v4253_v0 = vpop.f32.mrb[184].mxu1 }
0x180a   :  { %v4172_v63 = vpop.f32.mrb[185].mxu0  ;;  %v9274_v19 = vpop.f32.mrb[185].mxu1  ;;  %v4171_v3 = vadd.f32 %v4170_v27, %v12342_v20  ;;  %v4254_v4 = vadd.f32 %v4253_v0, %v12346_v21 }
0x180b   :  { %v4174_v33 = vpop.f32.mrb[186].mxu0  ;;  %v4256_v29 = vpop.f32.mrb[186].mxu1  ;;  %v4173_v39 = vadd.f32 %v4172_v63, %v12349_v58 }
0x180c   :  { %v4175_v10 = vadd.f32 %v4174_v33, %v12342_v20  ;;  %v4257_v12 = vadd.f32 %v4256_v29, %v12346_v21  ;;  %v4176_v15 = vpop.f32.mrb[187].mxu0  ;;  %v9275_v43 = vpop.f32.mrb[187].mxu1 }
0x180d   :  { %v4177_v47 = vadd.f32 %v4176_v15, %v12349_v58 }
0x180e   :  { %v12357_v25 = vpack.c.bf16 %v4175_v10, %v4171_v3  ;;  %v12359_v46 = vpack.c.bf16 %v4257_v12, %v4254_v4 }
0x180f   :  { %v12361_v5 = vpack.c.bf16 %v4177_v47, %v4173_v39 }
0x1810   :  { %9311 = vmatpush3.bf16.msra.mxu1 %v12359_v46 }
0x1811   :  { %v4180_v16 = vpop.f32.mrb[188].mxu0  ;;  %v4261_v45 = vpop.f32.mrb[188].mxu1  ;;  %4543 = vrot.lane.b32.xlu0 %v12361_v5, %s10473_s25  ;;  %v4328_v23 = vsel %vm582_vm1, %v12361_v5, 0  ;;  %9312 = vmatprep.subr.bf16.mxu1 %v13912_v7 }
0x1812   :  { %v4182_v22 = vpop.f32.mrb[189].mxu0  ;;  %v9278_v48 = vpop.f32.mrb[189].mxu1  ;;  %9293 = vmatpush3.bf16.xpose.msra.mxu0 %v4328_v23  ;;  %v4181_v38 = vadd.f32 %v4180_v16, %v12342_v20  ;;  %v4262_v17 = vadd.f32 %v4261_v45, %v12346_v21 }
0x1813   :  { %v4184_v26 = vpop.f32.mrb[190].mxu0  ;;  %v4264_v34 = vpop.f32.mrb[190].mxu1  ;;  %9294 = vmatprep.subr.bf16.mxu0 %v13912_v7  ;;  %v4183_v54 = vadd.f32 %v4182_v22, %v12349_v58 }
0x1814   :  { %v4185_v49 = vadd.f32 %v4184_v26, %v12342_v20  ;;  %v4265_v36 = vadd.f32 %v4264_v34, %v12346_v21  ;;  %v4186_v11 = vpop.f32.mrb[191].mxu0  ;;  %v9279_v62 = vpop.f32.mrb[191].mxu1 }
0x1815   :  { %v4187_v8 = vadd.f32 %v4186_v11, %v12349_v58 }
0x1816   :  { %v12376_v31 = vpack.c.bf16 %v4185_v49, %v4181_v38  ;;  %v12378_v28 = vpack.c.bf16 %v4265_v36, %v4262_v17 }
0x1817   :  { %v12380_v56 = vpack.c.bf16 %v4187_v8, %v4183_v54 }
0x1818   :  { %9313 = vmatpush3.bf16.msra.mxu1 %v12378_v28  ;;  %4536 = vrot.lane.b32.xlu0 %v12376_v31, %s10473_s25 }
0x1819   :  { %4545 = vrot.lane.b32.xlu1 %v12380_v56, %s10473_s25  ;;  %v4331_v41 = vsel %vm582_vm1, %v12380_v56, 0  ;;  %9314 = vmatprep.subr.bf16.mxu1 %v13912_v7 }
0x181a   :  { %9295 = vmatpush3.bf16.xpose.msra.mxu0 %v4331_v41 }
0x181b   :  { %9296 = vmatprep.subr.bf16.mxu0 %v13912_v7 }
0x187f   :  { %v3873_v42 = vpop.xlane.xlu0 %3872 }
0x1880   :  { %v3886_v2 = vmul.f32 0.0078125, %v3873_v42 }
0x1881   :  { %v3875_v1 = vpop.xlane.xlu1 %3874 }
0x1882   :  { %v3896_v9 = vadd.f32 1e-12, %v3886_v2  ;;  %v3887_v30 = vmul.f32 0.0078125, %v3875_v1 }
0x1884   :  { %10191 = vrsqrt.f32 %v3896_v9  ;;  %v3897_v55 = vadd.f32 1e-12, %v3887_v30 }
0x1886   :  { %10193 = vrsqrt.f32 %v3897_v55 }
0x1887   :  { %v3877_v61 = vpop.xlane.xlu0 %3876 }
0x1888   :  { %v3888_v32 = vmul.f32 0.0078125, %v3877_v61 }
0x1889   :  { %v3879_v51 = vpop.xlane.xlu1 %3878 }
0x188a   :  { %v3898_v27 = vadd.f32 1e-12, %v3888_v32  ;;  %v3889_v0 = vmul.f32 0.0078125, %v3879_v51 }
0x188b   :  { %v4544_v2 = vpop.permute.xlu0 %4543 }
0x188c   :  { %10195 = vrsqrt.f32 %v3898_v27  ;;  %v3899_v63 = vadd.f32 1e-12, %v3889_v0  ;;  %v4559_v1 = vsel %vm582_vm1, %v4544_v2, 0 }
0x188d   :  { %v4546_v9 = vpop.permute.xlu1 %4545 }
0x188e   :  { %v10192_v19 = vpop.eup %10191  ;;  %10197 = vrsqrt.f32 %v3899_v63  ;;  %v4562_v30 = vsel %vm582_vm1, %v4546_v9, 0 }
0x188f   :  { %v3916_v33 = vmul.f32 %v10192_v19, %v12322_v18  ;;  %v4537_v51 = vpop.permute.xlu0 %4536 }
0x1890   :  { %v10194_v29 = vpop.eup %10193 }
0x1891   :  { %v3917_v3 = vmul.f32 %v10194_v29, %v12324_v60  ;;  %v3932_v4 = vmul.f32 %v12262_v57, %v3916_v33 }
0x1893   :  { %v3933_v10 = vmul.f32 %v12262_v57, %v3917_v3  ;;  %v12396_v12 = vadd.f32 %v12270_v50, %v3932_v4 }
0x1895   :  { %v12399_v15 = vadd.f32 %v12270_v50, %v3933_v10 }
0x1896   :  { %v10196_v43 = vpop.eup %10195 }
0x1897   :  { %v3955_v39 = vpack.c.bf16 %v12399_v15, %v12396_v12  ;;  %v3918_v47 = vmul.f32 %v10196_v43, %v12330_v37 }
0x1898   :  { %v10198_v18 = vpop.eup %10197 }
0x1899   :  { %v4190_v16 = vpop.f32.mrb[192].mxu0  ;;  %4199 = vmatmul.mubr.bf16.gmra.mrb[196].mxu0 %v3955_v39  ;;  %v4269_v60 = vpop.f32.mrb[192].mxu1  ;;  %9285 = vmatmul.mubr.bf16.gmra.mrb[196].mxu1 %v3955_v39  ;;  %v3919_v45 = vmul.f32 %v10198_v18, %v12332_v6  ;;  %v3934_v23 = vmul.f32 %v12262_v57, %v3918_v47 }
0x189a   :  { %v4270_v22 = vadd.f32 %v4269_v60, %v12346_v21  ;;  %v4192_v48 = vpop.f32.mrb[193].mxu0  ;;  %v9282_v26 = vpop.f32.mrb[193].mxu1  ;;  %4208 = vmatprep.mubr.bf16.mxu0 %v13922_v59  ;;  %9288 = vmatprep.mubr.msk.bf16.mxu1 %vm10472_vm0, %v13912_v7  ;;  %v4191_v42 = vadd.f32 %v4190_v16, %v12342_v20 }
0x189b   :  { %v4193_v37 = vadd.f32 %v4192_v48, %v12349_v58  ;;  %v4194_v34 = vpop.f32.mrb[194].mxu0  ;;  %v4272_v38 = vpop.f32.mrb[194].mxu1  ;;  %v3935_v17 = vmul.f32 %v12262_v57, %v3919_v45  ;;  %v12417_v62 = vadd.f32 %v12270_v50, %v3934_v23 }
0x189c   :  { %v12412_v49 = vpack.c.bf16 %v4270_v22, %v4270_v22  ;;  %v4196_v6 = vpop.f32.mrb[195].mxu0  ;;  %v9283_v36 = vpop.f32.mrb[195].mxu1  ;;  %v4195_v19 = vadd.f32 %v4194_v34, %v12342_v20  ;;  %v4273_v33 = vadd.f32 %v4272_v38, %v12346_v21 }
0x189d   :  { %v12414_v11 = vpack.c.bf16 %v4193_v37, %v4193_v37  ;;  %v12420_v54 = vadd.f32 %v12270_v50, %v3935_v17  ;;  %v12439_v50 = vpack.c.bf16 %v4191_v42, %v4191_v42  ;;  %v4197_v43 = vadd.f32 %v4196_v6, %v12349_v58 }
0x189e   :  { %v4470_v8 = vsel %vm739_vm2, %v12412_v49, 0 }
0x189f   :  { %9315 = vmatpush3.bf16.msra.mxu1 %v4470_v8  ;;  %4547 = vrot.lane.b32.xlu1 %v12414_v11, %s10473_s25  ;;  %v4334_v57 = vsel %vm582_vm1, %v12414_v11, 0  ;;  %v3956_v41 = vpack.c.bf16 %v12420_v54, %v12417_v62 }
0x18a0   :  { %9297 = vmatpush3.bf16.xpose.msra.mxu0 %v4334_v57  ;;  %9346 = vmatprep.subr.bf16.mxu1 %v13912_v7 }
0x18a1   :  { %4209 = vmatmul.mubr.bf16.gmra.mrb[200].mxu0 %v3956_v41  ;;  %9289 = vmatmul.mubr.bf16.gmra.mrb[200].mxu1 %v3956_v41 }
0x18a2   :  { %9298 = vmatprep.mubr.msk.bf16.mxu0 %vm10472_vm0, %v13912_v7  ;;  %9328 = vmatprep.subr.bf16.mxu0 %v13912_v7 }
0x18a3   :  { %4534 = vrot.lane.b32.xlu1 %v12357_v25, %s10473_s25  ;;  %9316 = vmatprep.mubr.msk.bf16.mxu1 %vm10472_vm0, %v13912_v7 }
0x18a7   :  { %4538 = vrot.lane.b32.xlu1 %v12439_v50, %s10473_s25 }
0x18a9   :  { %9299 = vmatmul.mubr.msk.bf16.vlgmr.msra.gmra.mrb[204].mxu0 %vm582_vm1, %v12357_v25 }
0x18aa   :  { %9329 = vmatpush3.bf16.xpose.msra.mxu0 %v4559_v1  ;;  %9302 = vmatprep.mubr.msk.bf16.mxu0 %vm10472_vm0, %v13912_v7 }
0x18ab   :  { %9330 = vmatprep.subr.bf16.mxu0 %v13912_v7 }
0x18b1   :  { %9303 = vmatmul.mubr.msk.bf16.gmra.mrb[208].mxu0 %vm582_vm1, %v12376_v31 }
0x18b2   :  { %9331 = vmatpush3.bf16.xpose.msra.mxu0 %v4562_v30  ;;  %9306 = vmatprep.mubr.msk.bf16.mxu0 %vm10472_vm0, %v13912_v7 }
0x18b3   :  { %9332 = vmatprep.subr.bf16.mxu0 %v13912_v7 }
0x18b9   :  { %9307 = vmatmul.mubr.msk.bf16.gmra.mrb[212].mxu0 %vm582_vm1, %v12439_v50 }
0x18ba   :  { %9334 = vmatprep.mubr.msk.bf16.mxu0 %vm10472_vm0, %v13912_v7 }
0x1911   :  { %v4548_v55 = vpop.permute.xlu1 %4547 }
0x1912   :  { %v4565_v61 = vsel %vm582_vm1, %v4548_v55, 0 }
0x1913   :  { %9333 = vmatpush3.bf16.xpose.msra.mxu0 %v4565_v61 }
0x1914   :  { %9364 = vmatprep.subr.bf16.mxu0 %v13912_v7 }
0x1915   :  { %v4535_v32 = vpop.permute.xlu1 %4534 }
0x1919   :  { %v4539_v27 = vpop.permute.xlu1 %4538 }
0x191a   :  { %9335 = vmatmul.mubr.msk.bf16.vlgmr.msra.gmra.mrb[216].mxu0 %vm582_vm1, %v4535_v32 }
0x191b   :  { %9338 = vmatprep.mubr.msk.bf16.mxu0 %vm10472_vm0, %v13912_v7 }
0x1922   :  { %9339 = vmatmul.mubr.msk.bf16.gmra.mrb[220].mxu0 %vm582_vm1, %v4537_v51 }
0x1923   :  { %9342 = vmatprep.mubr.msk.bf16.mxu0 %vm10472_vm0, %v13912_v7 }
0x192a   :  { %9343 = vmatmul.mubr.msk.bf16.gmra.mrb[224].mxu0 %vm582_vm1, %v4539_v27 }
0x192b   :  { %9368 = vmatprep.mubr.msk.bf16.mxu0 %vm10472_vm0, %v13912_v7 }
0x196c   :  { %v4200_v0 = vpop.f32.mrb[196].mxu0  ;;  %v4277_v63 = vpop.f32.mrb[196].mxu1 }
0x196d   :  { %v4201_v29 = vadd.f32 %v4200_v0, %v12342_v20  ;;  %v4278_v3 = vadd.f32 %v4277_v63, %v12346_v21  ;;  %v4202_v4 = vpop.f32.mrb[197].mxu0  ;;  %v9286_v10 = vpop.f32.mrb[197].mxu1  ;;  %v12503_v0 = vld [vmem:[%s13892_s1] ss:$0 sm:$0xff] }
0x196e   :  { %v4203_v39 = vadd.f32 %v4202_v4, %v12349_v58  ;;  %v4204_v47 = vpop.f32.mrb[198].mxu0  ;;  %v4280_v18 = vpop.f32.mrb[198].mxu1 }
0x196f   :  { %v12476_v16 = vpack.c.bf16 %v4201_v29, %v4195_v19  ;;  %v12478_v60 = vpack.c.bf16 %v4278_v3, %v4273_v33  ;;  %v4206_v45 = vpop.f32.mrb[199].mxu0  ;;  %v9287_v23 = vpop.f32.mrb[199].mxu1  ;;  %v4205_v37 = vadd.f32 %v4204_v47, %v12342_v20  ;;  %v4281_v34 = vadd.f32 %v4280_v18, %v12346_v21 }
0x1970   :  { %v12480_v22 = vpack.c.bf16 %v4203_v39, %v4197_v43  ;;  %v4207_v8 = vadd.f32 %v4206_v45, %v12349_v58 }
0x1974   :  { %v4210_v48 = vpop.f32.mrb[200].mxu0  ;;  %v4285_v26 = vpop.f32.mrb[200].mxu1 }
0x1975   :  { %v4211_v38 = vadd.f32 %v4210_v48, %v12342_v20  ;;  %v4286_v17 = vadd.f32 %v4285_v26, %v12346_v21  ;;  %v4212_v6 = vpop.f32.mrb[201].mxu0  ;;  %v9290_v36 = vpop.f32.mrb[201].mxu1 }
0x1976   :  { %v4213_v57 = vadd.f32 %v4212_v6, %v12349_v58  ;;  %v12488_v41 = vpop.f32.mrb[202].mxu0  ;;  %v12490_v42 = vpop.f32.mrb[202].mxu1 }
0x1977   :  { %v12492_v2 = vpack.c.bf16 %v4211_v38, %v4205_v37  ;;  %v12494_v1 = vpack.c.bf16 %v4286_v17, %v4281_v34  ;;  %v12496_v9 = vpop.f32.mrb[203].mxu0  ;;  %v9291_v30 = vpop.f32.mrb[203].mxu1 }
0x1978   :  { %v12498_v55 = vpack.c.bf16 %v4213_v57, %v4207_v8 }
0x197c   :  { %v4370_v61 = vpop.f32.mrb[204].mxu0 }
0x197d   :  { %v4392_v32 = vmul.f32 0.17677669, %v4370_v61  ;;  %v9300_v51 = vpop.f32.mrb[205].mxu0 }
0x197e   :  { %v4373_v27 = vpop.f32.mrb[206].mxu0 }
0x197f   :  { %v12506_v63 = vadd.f32 %v12503_v0, %v4392_v32  ;;  %v4393_v19 = vmul.f32 0.17677669, %v4373_v27  ;;  %v9301_v33 = vpop.f32.mrb[207].mxu0 }
0x1981   :  { %v12509_v29 = vadd.f32 %v12503_v0, %v4393_v19  ;;  %v4402_v3 = vsel %vm671_vm3, %v12506_v63, -inf }
0x1982   :  { %4403 = vmax.xlane.f32.xlu0 %v4402_v3 }
0x1983   :  { %v4405_v4 = vsel %vm671_vm3, %v12509_v29, -inf }
0x1984   :  { %4406 = vmax.xlane.f32.xlu1 %v4405_v4  ;;  %v4378_v10 = vpop.f32.mrb[208].mxu0 }
0x1985   :  { %v4394_v43 = vmul.f32 0.17677669, %v4378_v10  ;;  %v9304_v39 = vpop.f32.mrb[209].mxu0 }
0x1986   :  { %v4381_v47 = vpop.f32.mrb[210].mxu0 }
0x1987   :  { %v4399_v18 = vadd.f32 %v12503_v0, %v4394_v43  ;;  %v4395_v45 = vmul.f32 0.17677669, %v4381_v47  ;;  %v9305_v23 = vpop.f32.mrb[211].mxu0 }
0x1989   :  { %v4400_v48 = vadd.f32 %v12503_v0, %v4395_v45  ;;  %v4408_v26 = vsel %vm671_vm3, %v4399_v18, -inf }
0x198a   :  { %4409 = vmax.xlane.f32.xlu0 %v4408_v26 }
0x198b   :  { %v4411_v17 = vsel %vm671_vm3, %v4400_v48, -inf }
0x198c   :  { %v4386_v37 = vpop.f32.mrb[212].mxu0 }
0x198d   :  { %v4396_v34 = vmul.f32 0.17677669, %v4386_v37  ;;  %v9308_v38 = vpop.f32.mrb[213].mxu0 }
0x198e   :  { %4412 = vmax.xlane.f32.xlu0 %v4411_v17  ;;  %v4389_v6 = vpop.f32.mrb[214].mxu0 }
0x198f   :  { %v4401_v36 = vadd.f32 %v12503_v0, %v4396_v34  ;;  %v9309_v8 = vpop.f32.mrb[215].mxu0 }
0x1991   :  { %v4414_v57 = vsel %vm671_vm3, %v4401_v36, -inf }
0x1992   :  { %4415 = vmax.xlane.f32.xlu0 %v4414_v57 }
0x19ed   :  { %v4601_v30 = vpop.f32.mrb[216].mxu0 }
0x19ee   :  { %v4623_v61 = vmul.f32 0.17677669, %v4601_v30  ;;  %v9336_v32 = vpop.f32.mrb[217].mxu0 }
0x19ef   :  { %v4604_v51 = vpop.f32.mrb[218].mxu0 }
0x19f0   :  { %v12522_v27 = vadd.f32 %v12503_v0, %v4623_v61  ;;  %v4624_v19 = vmul.f32 0.17677669, %v4604_v51  ;;  %v9337_v33 = vpop.f32.mrb[219].mxu0 }
0x19f2   :  { %v12525_v3 = vadd.f32 %v12503_v0, %v4624_v19  ;;  %v4633_v4 = vsel %vm671_vm3, %v12522_v27, -inf }
0x19f3   :  { %4634 = vmax.xlane.f32.xlu1 %v4633_v4 }
0x19f4   :  { %v4636_v10 = vsel %vm671_vm3, %v12525_v3, -inf }
0x19f5   :  { %4637 = vmax.xlane.f32.xlu0 %v4636_v10  ;;  %v4609_v43 = vpop.f32.mrb[220].mxu0 }
0x19f6   :  { %v4625_v39 = vmul.f32 0.17677669, %v4609_v43  ;;  %v9340_v47 = vpop.f32.mrb[221].mxu0 }
0x19f7   :  { %v4612_v45 = vpop.f32.mrb[222].mxu0 }
0x19f8   :  { %v4630_v23 = vadd.f32 %v12503_v0, %v4625_v39  ;;  %v4626_v26 = vmul.f32 0.17677669, %v4612_v45  ;;  %v9341_v37 = vpop.f32.mrb[223].mxu0 }
0x19fa   :  { %v4631_v34 = vadd.f32 %v12503_v0, %v4626_v26  ;;  %v4639_v38 = vsel %vm671_vm3, %v4630_v23, -inf }
0x19fb   :  { %4640 = vmax.xlane.f32.xlu1 %v4639_v38 }
0x19fc   :  { %v4642_v17 = vsel %vm671_vm3, %v4631_v34, -inf }
0x19fd   :  { %4643 = vmax.xlane.f32.xlu0 %v4642_v17  ;;  %v4617_v6 = vpop.f32.mrb[224].mxu0 }
0x19fe   :  { %v4627_v8 = vmul.f32 0.17677669, %v4617_v6  ;;  %v9344_v57 = vpop.f32.mrb[225].mxu0 }
0x19ff   :  { %v4620_v30 = vpop.f32.mrb[226].mxu0 }
0x1a00   :  { %v12536_v61 = vadd.f32 %v12503_v0, %v4627_v8  ;;  %v9345_v32 = vpop.f32.mrb[227].mxu0 }
0x1a02   :  { %v4645_v51 = vsel %vm671_vm3, %v12536_v61, -inf }
0x1a03   :  { %4646 = vmax.xlane.f32.xlu1 %v4645_v51 }
0x1a0f   :  { %v4404_v19 = vpop.xlane.xlu0 %4403 }
0x1a10   :  { %v4417_v33 = vsub.f32 %v12506_v63, %v4404_v19 }
0x1a11   :  { %v4407_v4 = vpop.xlane.xlu1 %4406 }
0x1a12   :  { %v4422_v10 = vmul.f32 1.442695, %v4417_v33  ;;  %v4418_v43 = vsub.f32 %v12509_v29, %v4407_v4 }
0x1a14   :  { %10199 = vpow2.f32 %v4422_v10  ;;  %v4424_v39 = vmul.f32 1.442695, %v4418_v43 }
0x1a16   :  { %10201 = vpow2.f32 %v4424_v39 }
0x1a17   :  { %v4410_v47 = vpop.xlane.xlu0 %4409 }
0x1a18   :  { %v4419_v45 = vsub.f32 %v4399_v18, %v4410_v47 }
0x1a1a   :  { %v4426_v26 = vmul.f32 1.442695, %v4419_v45 }
0x1a1b   :  { %v4413_v37 = vpop.xlane.xlu0 %4412 }
0x1a1c   :  { %10203 = vpow2.f32 %v4426_v26  ;;  %v4420_v38 = vsub.f32 %v4400_v48, %v4413_v37 }
0x1a1e   :  { %v12542_v17 = vpop.eup %10199  ;;  %v4428_v6 = vmul.f32 1.442695, %v4420_v38 }
0x1a1f   :  { %v4416_v8 = vpop.xlane.xlu0 %4415  ;;  %v4432_v63 = vsel %vm671_vm3, %v12542_v17, 0.0 }
0x1a20   :  { %v10202_v57 = vpop.eup %10201  ;;  %10205 = vpow2.f32 %v4428_v6  ;;  %v4421_v30 = vsub.f32 %v4401_v36, %v4416_v8  ;;  %4433 = vadd.xlane.f32.xlu0 %v4432_v63 }
0x1a21   :  { %v4435_v29 = vsel %vm671_vm3, %v10202_v57, 0.0 }
0x1a22   :  { %v4430_v32 = vmul.f32 1.442695, %v4421_v30  ;;  %4436 = vadd.xlane.f32.xlu1 %v4435_v29 }
0x1a24   :  { %10207 = vpow2.f32 %v4430_v32 }
0x1a26   :  { %v12547_v18 = vpop.eup %10203 }
0x1a27   :  { %v4438_v48 = vsel %vm671_vm3, %v12547_v18, 0.0 }
0x1a28   :  { %4439 = vadd.xlane.f32.xlu0 %v4438_v48 }
0x1a2a   :  { %v12551_v51 = vpop.eup %10205 }
0x1a2b   :  { %v4441_v19 = vsel %vm671_vm3, %v12551_v51, 0.0 }
0x1a2c   :  { %4442 = vadd.xlane.f32.xlu1 %v4441_v19 }
0x1a2e   :  { %v12555_v33 = vpop.eup %10207 }
0x1a2f   :  { %v4444_v36 = vsel %vm671_vm3, %v12555_v33, 0.0 }
0x1a30   :  { %4445 = vadd.xlane.f32.xlu0 %v4444_v36 }
0x1a80   :  { %v4635_v4 = vpop.xlane.xlu1 %4634 }
0x1a81   :  { %v4648_v10 = vsub.f32 %v12522_v27, %v4635_v4 }
0x1a82   :  { %v4638_v43 = vpop.xlane.xlu0 %4637 }
0x1a83   :  { %v4653_v39 = vmul.f32 1.442695, %v4648_v10  ;;  %v4649_v47 = vsub.f32 %v12525_v3, %v4638_v43 }
0x1a85   :  { %10209 = vpow2.f32 %v4653_v39  ;;  %v4655_v45 = vmul.f32 1.442695, %v4649_v47 }
0x1a87   :  { %10211 = vpow2.f32 %v4655_v45 }
0x1a88   :  { %v4641_v26 = vpop.xlane.xlu1 %4640 }
0x1a89   :  { %v4650_v37 = vsub.f32 %v4630_v23, %v4641_v26 }
0x1a8a   :  { %v4644_v38 = vpop.xlane.xlu0 %4643 }
0x1a8b   :  { %v4657_v6 = vmul.f32 1.442695, %v4650_v37  ;;  %v4651_v8 = vsub.f32 %v4631_v34, %v4644_v38 }
0x1a8d   :  { %10213 = vpow2.f32 %v4657_v6  ;;  %v4659_v63 = vmul.f32 1.442695, %v4651_v8 }
0x1a8f   :  { %v12561_v30 = vpop.eup %10209  ;;  %10215 = vpow2.f32 %v4659_v63 }
0x1a90   :  { %v4663_v27 = vsel %vm671_vm3, %v12561_v30, 0.0  ;;  %v4647_v19 = vpop.xlane.xlu1 %4646 }
0x1a91   :  { %v12565_v29 = vpop.eup %10211  ;;  %4664 = vadd.xlane.f32.xlu1 %v4663_v27  ;;  %v4652_v39 = vsub.f32 %v12536_v61, %v4647_v19 }
0x1a92   :  { %v4666_v3 = vsel %vm671_vm3, %v12565_v29, 0.0 }
0x1a93   :  { %4667 = vadd.xlane.f32.xlu0 %v4666_v3  ;;  %v4661_v38 = vmul.f32 1.442695, %v4652_v39 }
0x1a97   :  { %v12569_v32 = vpop.eup %10213 }
0x1a98   :  { %v4669_v23 = vsel %vm671_vm3, %v12569_v32, 0.0 }
0x1a99   :  { %v12573_v34 = vpop.eup %10215  ;;  %4670 = vadd.xlane.f32.xlu1 %v4669_v23 }
0x1a9a   :  { %v4672_v48 = vsel %vm671_vm3, %v12573_v34, 0.0 }
0x1a9b   :  { %4673 = vadd.xlane.f32.xlu0 %v4672_v48 }
0x1aaa   :  { %4696 = vrot.lane.b32.xlu1 %v12378_v28, %s10473_s25 }
0x1aad   :  { %v4434_v36 = vpop.xlane.xlu0 %4433 }
0x1aae   :  { %10217 = vrcp.f32 %v4434_v36 }
0x1aaf   :  { %v4437_v4 = vpop.xlane.xlu1 %4436 }
0x1ab0   :  { %10219 = vrcp.f32 %v4437_v4  ;;  %v12613_v4 = vld [vmem:[%s13893_s6 + $0x50] sm:$0xff]  }
0x1ab1   :  { %4694 = vrot.lane.b32.xlu0 %v12359_v46, %s10473_s25  ;;  %9365 = vmatpush3.bf16.msra.mxu0 %v12613_v4 }
0x1ab2   :  { %9366 = vmatprep.subr.bf16.mxu0 %v13912_v7 }
0x1ab5   :  { %4935 = vrot.lane.b32.xlu0 %v12380_v56, %s10474_s27  ;;  %v4440_v10 = vpop.xlane.xlu0 %4439 }
0x1ab6   :  { %10221 = vrcp.f32 %v4440_v10 }
0x1ab8   :  { %v10218_v43 = vpop.eup %10217 }
0x1ab9   :  { %v4443_v47 = vpop.xlane.xlu1 %4442  ;;  %4927 = vrot.lane.b32.xlu0 %v12357_v25, %s10474_s27  ;;  %v4452_v26 = vmul.f32 %v10218_v43, %v12542_v17  ;;  %v12619_v43 = vld [vmem:[%s13893_s6 + $0x58] sm:$0xff]  }
0x1aba   :  { %v10220_v45 = vpop.eup %10219  ;;  %10223 = vrcp.f32 %v4443_v47  ;;  %9367 = vmatpush3.bf16.msra.mxu0 %v12619_v43 }
0x1abb   :  { %v4453_v37 = vmul.f32 %v10220_v45, %v10202_v57  ;;  %9396 = vmatprep.subr.bf16.mxu0 %v13912_v7 }
0x1abd   :  { %v4457_v6 = vpack.c.bf16 %v4453_v37, %v4452_v26  ;;  %4931 = vrot.lane.b32.xlu0 %v12439_v50, %s10474_s27  ;;  %v4446_v8 = vpop.xlane.xlu0 %4445 }
0x1abe   :  { %10225 = vrcp.f32 %v4446_v8 }
0x1abf   :  { %9317 = vmatmul.mubr.msk.bf16.vlgmr.msra.gmra.mrb[204].mxu1 %vm671_vm3, %v4457_v6  ;;  %10227 = vpow2.f32 %v4661_v38 }
0x1ac0   :  { %9320 = vmatprep.mubr.msk.bf16.mxu1 %vm10472_vm0, %v13912_v7  ;;  %v10222_v61 = vpop.eup %10221 }
0x1ac1   :  { %v4454_v27 = vmul.f32 %v10222_v61, %v12547_v18 }
0x1ac4   :  { %v10224_v63 = vpop.eup %10223 }
0x1ac5   :  { %v4455_v17 = vmul.f32 %v10224_v63, %v12551_v51  ;;  %v9883_v63 = vld [vmem:[%s13893_s6 + $0x40] sm:$0xff]  }
0x1ac7   :  { %v4458_v57 = vpack.c.bf16 %v4455_v17, %v4454_v27 }
0x1ac8   :  { %v10226_v3 = vpop.eup %10225 }
0x1ac9   :  { %9321 = vmatmul.mubr.msk.bf16.gmra.mrb[208].mxu1 %vm671_vm3, %v4458_v57  ;;  %v10228_v23 = vpop.eup %10227  ;;  %v4456_v48 = vmul.f32 %v10226_v3, %v12555_v33 }
0x1aca   :  { %9324 = vmatprep.mubr.msk.bf16.mxu1 %vm10472_vm0, %v13912_v7  ;;  %v4675_v19 = vsel %vm671_vm3, %v10228_v23, 0.0 }
0x1acb   :  { %v4459_v36 = vpack.c.bf16 %v4456_v48, %v4456_v48 }
0x1ace   :  { %4676 = vadd.xlane.f32.xlu1 %v4675_v19 }
0x1ad1   :  { %9325 = vmatmul.mubr.msk.bf16.gmra.mrb[212].mxu1 %vm671_vm3, %v4459_v36 }
0x1ad2   :  { %9352 = vmatprep.mubr.msk.bf16.mxu1 %vm10472_vm0, %v13912_v7 }
0x1adf   :  { %4698 = vrot.lane.b32.xlu1 %v12412_v49, %s10473_s25 }
0x1ae3   :  { %4933 = vrot.lane.b32.xlu1 %v12361_v5, %s10474_s27 }
0x1ae7   :  { %4937 = vrot.lane.b32.xlu1 %v12414_v11, %s10474_s27 }
0x1aeb   :  { %4929 = vrot.lane.b32.xlu1 %v12376_v31, %s10474_s27 }
0x1b1e   :  { %v4665_v51 = vpop.xlane.xlu1 %4664 }
0x1b20   :  { %v4668_v18 = vpop.xlane.xlu0 %4667 }
0x1b21   :  { %10229 = vrcp.f32 %v4668_v18 }
0x1b22   :  { %10231 = vrcp.f32 %v4665_v51 }
0x1b26   :  { %v4671_v10 = vpop.xlane.xlu1 %4670 }
0x1b28   :  { %v4674_v33 = vpop.xlane.xlu0 %4673 }
0x1b29   :  { %10233 = vrcp.f32 %v4674_v33 }
0x1b2a   :  { %v4697_v47 = vpop.permute.xlu1 %4696  ;;  %10235 = vrcp.f32 %v4671_v10 }
0x1b2b   :  { %v10230_v45 = vpop.eup %10229 }
0x1b2c   :  { %v4695_v39 = vpop.permute.xlu0 %4694  ;;  %v10232_v37 = vpop.eup %10231  ;;  %v4684_v38 = vmul.f32 %v10230_v45, %v12565_v29 }
0x1b2d   :  { %9347 = vmatpush3.bf16.msra.mxu1 %v4695_v39  ;;  %v4683_v8 = vmul.f32 %v10232_v37, %v12561_v30  ;;  %v9884_v30 = vld [vmem:[%s13893_s6 + $0x48] sm:$0xff]  }
0x1b2e   :  { %9348 = vmatprep.subr.bf16.mxu1 %v13912_v7 }
0x1b2f   :  { %v4688_v27 = vpack.c.bf16 %v4684_v38, %v4683_v8 }
0x1b31   :  { %9349 = vmatpush3.bf16.msra.mxu1 %v4697_v47 }
0x1b32   :  { %9350 = vmatprep.subr.bf16.mxu1 %v13912_v7 }
0x1b33   :  { %v10234_v17 = vpop.eup %10233 }
0x1b34   :  { %v10236_v57 = vpop.eup %10235  ;;  %v4686_v29 = vmul.f32 %v10234_v17, %v12573_v34 }
0x1b35   :  { %v4685_v3 = vmul.f32 %v10236_v57, %v12569_v32 }
0x1b37   :  { %v4689_v48 = vpack.c.bf16 %v4686_v29, %v4685_v3 }
0x1b5b   :  { %v4677_v26 = vpop.xlane.xlu1 %4676 }
0x1b5c   :  { %10237 = vrcp.f32 %v4677_v26 }
0x1b5f   :  { %v4699_v6 = vpop.permute.xlu1 %4698 }
0x1b60   :  { %v4712_v61 = vsel %vm739_vm2, %v4699_v6, 0 }
0x1b61   :  { %9351 = vmatpush3.bf16.msra.mxu1 %v4712_v61 }
0x1b62   :  { %9380 = vmatprep.subr.bf16.mxu1 %v13912_v7 }
0x1b63   :  { %v4934_v17 = vpop.permute.xlu1 %4933 }
0x1b64   :  { %9353 = vmatmul.mubr.msk.bf16.vlgmr.msra.gmra.mrb[216].mxu1 %vm671_vm3, %v4688_v27  ;;  %v4949_v3 = vsel %vm582_vm1, %v4934_v17, 0 }
0x1b65   :  { %9356 = vmatprep.mubr.msk.bf16.mxu1 %vm10472_vm0, %v13912_v7  ;;  %9381 = vmatpush3.bf16.msra.mxu1 %v9883_v63 }
0x1b66   :  { %9382 = vmatprep.subr.bf16.mxu1 %v13912_v7  ;;  %v10238_v19 = vpop.eup %10237 }
0x1b67   :  { %v4687_v36 = vmul.f32 %v10238_v19, %v10228_v23 }
0x1b69   :  { %9383 = vmatpush3.bf16.msra.mxu1 %v9884_v30  ;;  %v4690_v18 = vpack.c.bf16 %v4687_v36, %v4687_v36  ;;  %v4936_v36 = vpop.permute.xlu0 %4935 }
0x1b6a   :  { %9414 = vmatprep.subr.bf16.mxu1 %v13912_v7 }
0x1b6c   :  { %9357 = vmatmul.mubr.msk.bf16.gmra.mrb[220].mxu1 %vm671_vm3, %v4689_v48 }
0x1b6d   :  { %9360 = vmatprep.mubr.msk.bf16.mxu1 %vm10472_vm0, %v13912_v7 }
0x1b74   :  { %9361 = vmatmul.mubr.msk.bf16.gmra.mrb[224].mxu1 %vm671_vm3, %v4690_v18 }
0x1b75   :  { %9384 = vmatprep.mubr.msk.bf16.mxu1 %vm10472_vm0, %v13912_v7 }
0x1b92   :  { %v4506_v34 = vpop.f32.mrb[204].mxu1 }
0x1b93   :  { %v9318_v51 = vpop.f32.mrb[205].mxu1 }
0x1b94   :  { %v4509_v32 = vpop.f32.mrb[206].mxu1 }
0x1b95   :  { %v4528_v33 = vpack.c.bf16 %v4509_v32, %v4506_v34  ;;  %v9319_v10 = vpop.f32.mrb[207].mxu1  ;;  %v4952_v32 = vsel %vm582_vm1, %v4936_v36, 0 }
0x1b97   :  { %9385 = vmatmul.mubr.msk.bf16.vlgmr.msra.gmra.mrb[228].mxu1 %vm582_vm1, %v4528_v33 }
0x1b98   :  { %9388 = vmatprep.mubr.msk.bf16.mxu1 %vm10472_vm0, %v13912_v7 }
0x1b9c   :  { %v4514_v39 = vpop.f32.mrb[208].mxu1 }
0x1b9d   :  { %v9322_v47 = vpop.f32.mrb[209].mxu1 }
0x1b9e   :  { %v4517_v45 = vpop.f32.mrb[210].mxu1 }
0x1b9f   :  { %v4529_v23 = vpack.c.bf16 %v4517_v45, %v4514_v39  ;;  %v9323_v26 = vpop.f32.mrb[211].mxu1  ;;  %v4938_v39 = vpop.permute.xlu1 %4937 }
0x1ba0   :  { %v4955_v26 = vsel %vm582_vm1, %v4938_v39, 0 }
0x1ba1   :  { %9389 = vmatmul.mubr.msk.bf16.gmra.mrb[232].mxu1 %vm582_vm1, %v4529_v23 }
0x1ba2   :  { %9392 = vmatprep.mubr.msk.bf16.mxu1 %vm10472_vm0, %v13912_v7 }
0x1ba4   :  { %v4522_v37 = vpop.f32.mrb[212].mxu1 }
0x1ba5   :  { %v9326_v38 = vpop.f32.mrb[213].mxu1  ;;  %v4530_v8 = vpack.c.bf16 %v4522_v37, %v4522_v37  ;;  %v4928_v37 = vpop.permute.xlu0 %4927 }
0x1ba6   :  { %v4525_v6 = vpop.f32.mrb[214].mxu1  ;;  %v4930_v38 = vpop.permute.xlu1 %4929 }
0x1ba7   :  { %v9327_v61 = vpop.f32.mrb[215].mxu1 }
0x1ba9   :  { %9393 = vmatmul.mubr.msk.bf16.gmra.mrb[236].mxu1 %vm582_vm1, %v4530_v8  ;;  %v4932_v6 = vpop.permute.xlu0 %4931 }
0x1baa   :  { %9420 = vmatprep.mubr.msk.bf16.mxu1 %vm10472_vm0, %v13912_v7 }
0x1c37   :  { %v4748_v63 = vpop.f32.mrb[216].mxu1 }
0x1c38   :  { %v9354_v27 = vpop.f32.mrb[217].mxu1 }
0x1c39   :  { %v4751_v57 = vpop.f32.mrb[218].mxu1 }
0x1c3a   :  { %v4770_v30 = vpack.c.bf16 %v4751_v57, %v4748_v63  ;;  %v9355_v29 = vpop.f32.mrb[219].mxu1 }
0x1c3c   :  { %9369 = vmatmul.mubr.msk.bf16.vlgmr.msra.gmra.mrb[228].mxu0 %vm582_vm1, %v4770_v30 }
0x1c3d   :  { %9397 = vmatpush3.bf16.xpose.msra.mxu0 %v4949_v3  ;;  %9372 = vmatprep.mubr.msk.bf16.mxu0 %vm10472_vm0, %v13912_v7 }
0x1c3e   :  { %9398 = vmatprep.subr.bf16.mxu0 %v13912_v7 }
0x1c3f   :  { %v4756_v48 = vpop.f32.mrb[220].mxu1 }
0x1c40   :  { %v9358_v19 = vpop.f32.mrb[221].mxu1 }
0x1c41   :  { %v4759_v18 = vpop.f32.mrb[222].mxu1 }
0x1c42   :  { %v4771_v34 = vpack.c.bf16 %v4759_v18, %v4756_v48  ;;  %v9359_v51 = vpop.f32.mrb[223].mxu1 }
0x1c44   :  { %9373 = vmatmul.mubr.msk.bf16.gmra.mrb[232].mxu0 %vm582_vm1, %v4771_v34 }
0x1c45   :  { %9399 = vmatpush3.bf16.xpose.msra.mxu0 %v4952_v32  ;;  %9376 = vmatprep.mubr.msk.bf16.mxu0 %vm10472_vm0, %v13912_v7 }
0x1c46   :  { %9400 = vmatprep.subr.bf16.mxu0 %v13912_v7 }
0x1c47   :  { %v4764_v33 = vpop.f32.mrb[224].mxu1 }
0x1c48   :  { %v9362_v10 = vpop.f32.mrb[225].mxu1  ;;  %v4772_v45 = vpack.c.bf16 %v4764_v33, %v4764_v33 }
0x1c49   :  { %v4767_v47 = vpop.f32.mrb[226].mxu1 }
0x1c4a   :  { %v9363_v23 = vpop.f32.mrb[227].mxu1 }
0x1c4c   :  { %9377 = vmatmul.mubr.msk.bf16.gmra.mrb[236].mxu0 %vm582_vm1, %v4772_v45 }
0x1c4d   :  { %9401 = vmatpush3.bf16.xpose.msra.mxu0 %v4955_v26  ;;  %9402 = vmatprep.mubr.msk.bf16.mxu0 %vm10472_vm0, %v13912_v7 }
0x1c4e   :  { %9432 = vmatprep.subr.bf16.mxu0 %v13912_v7 }
0x1c54   :  { %9403 = vmatmul.mubr.msk.bf16.vlgmr.msra.gmra.mrb[240].mxu0 %vm582_vm1, %v4928_v37 }
0x1c55   :  { %9406 = vmatprep.mubr.msk.bf16.mxu0 %vm10472_vm0, %v13912_v7 }
0x1c5c   :  { %9407 = vmatmul.mubr.msk.bf16.gmra.mrb[244].mxu0 %vm582_vm1, %v4930_v38 }
0x1c5d   :  { %9410 = vmatprep.mubr.msk.bf16.mxu0 %vm10472_vm0, %v13912_v7 }
0x1c64   :  { %9411 = vmatmul.mubr.msk.bf16.gmra.mrb[248].mxu0 %vm582_vm1, %v4932_v6 }
0x1c65   :  { %9436 = vmatprep.mubr.msk.bf16.mxu0 %vm10472_vm0, %v13912_v7 }
0x1c6a   :  { %v4905_v8 = vpop.f32.mrb[228].mxu1 }
0x1c6b   :  { %v9386_v61 = vpop.f32.mrb[229].mxu1 }
0x1c6c   :  { %v4908_v63 = vpop.f32.mrb[230].mxu1 }
0x1c6d   :  { %v9387_v27 = vpop.f32.mrb[231].mxu1 }
0x1c74   :  { %v4913_v17 = vpop.f32.mrb[232].mxu1 }
0x1c75   :  { %v9390_v57 = vpop.f32.mrb[233].mxu1 }
0x1c76   :  { %v4916_v30 = vpop.f32.mrb[234].mxu1 }
0x1c77   :  { %v9391_v29 = vpop.f32.mrb[235].mxu1 }
0x1c7c   :  { %v4921_v3 = vpop.f32.mrb[236].mxu1 }
0x1c7d   :  { %v9394_v48 = vpop.f32.mrb[237].mxu1 }
0x1c7e   :  { %v4924_v19 = vpop.f32.mrb[238].mxu1 }
0x1c7f   :  { %v9395_v36 = vpop.f32.mrb[239].mxu1 }
0x1d0f   :  { %v4828_v18 = vpop.f32.mrb[228].mxu0 }
0x1d10   :  { %v12682_v34 = vadd.f32 %v4905_v8, %v4828_v18  ;;  %v9370_v51 = vpop.f32.mrb[229].mxu0 }
0x1d11   :  { %v4831_v32 = vpop.f32.mrb[230].mxu0 }
0x1d12   :  { %v12684_v33 = vadd.f32 %v4908_v63, %v4831_v32  ;;  %v9371_v10 = vpop.f32.mrb[231].mxu0 }
0x1d17   :  { %v4836_v39 = vpop.f32.mrb[232].mxu0 }
0x1d18   :  { %v12686_v47 = vadd.f32 %v4913_v17, %v4836_v39  ;;  %v9374_v45 = vpop.f32.mrb[233].mxu0 }
0x1d19   :  { %v4839_v23 = vpop.f32.mrb[234].mxu0 }
0x1d1a   :  { %v12688_v26 = vadd.f32 %v4916_v30, %v4839_v23  ;;  %v9375_v37 = vpop.f32.mrb[235].mxu0 }
0x1d1f   :  { %v4844_v38 = vpop.f32.mrb[236].mxu0 }
0x1d20   :  { %v12690_v6 = vadd.f32 %v4921_v3, %v4844_v38  ;;  %v9378_v61 = vpop.f32.mrb[237].mxu0 }
0x1d21   :  { %v4847_v27 = vpop.f32.mrb[238].mxu0 }
0x1d22   :  { %v9379_v8 = vpop.f32.mrb[239].mxu0 }
0x1d27   :  { %v4991_v57 = vpop.f32.mrb[240].mxu0 }
0x1d28   :  { %v5013_v29 = vmul.f32 0.17677669, %v4991_v57  ;;  %v9404_v48 = vpop.f32.mrb[241].mxu0 }
0x1d29   :  { %v4994_v63 = vpop.f32.mrb[242].mxu0 }
0x1d2a   :  { %v5018_v19 = vadd.f32 %v12503_v0, %v5013_v29  ;;  %v5014_v36 = vmul.f32 0.17677669, %v4994_v63  ;;  %v9405_v17 = vpop.f32.mrb[243].mxu0 }
0x1d2c   :  { %v5019_v18 = vadd.f32 %v12503_v0, %v5014_v36  ;;  %v5023_v30 = vsel %vm671_vm3, %v5018_v19, -inf }
0x1d2d   :  { %5024 = vmax.xlane.f32.xlu1 %v5023_v30 }
0x1d2e   :  { %v5026_v51 = vsel %vm671_vm3, %v5019_v18, -inf }
0x1d2f   :  { %5027 = vmax.xlane.f32.xlu0 %v5026_v51  ;;  %v4999_v3 = vpop.f32.mrb[244].mxu0 }
0x1d30   :  { %v5015_v32 = vmul.f32 0.17677669, %v4999_v3  ;;  %v9408_v10 = vpop.f32.mrb[245].mxu0 }
0x1d31   :  { %v5002_v39 = vpop.f32.mrb[246].mxu0 }
0x1d32   :  { %v5020_v45 = vadd.f32 %v12503_v0, %v5015_v32  ;;  %v5016_v23 = vmul.f32 0.17677669, %v5002_v39  ;;  %v9409_v37 = vpop.f32.mrb[247].mxu0 }
0x1d34   :  { %v5021_v38 = vadd.f32 %v12503_v0, %v5016_v23  ;;  %v5029_v61 = vsel %vm671_vm3, %v5020_v45, -inf }
0x1d35   :  { %5030 = vmax.xlane.f32.xlu0 %v5029_v61 }
0x1d36   :  { %v5032_v29 = vsel %vm671_vm3, %v5021_v38, -inf }
0x1d37   :  { %v5007_v27 = vpop.f32.mrb[248].mxu0 }
0x1d38   :  { %v5017_v8 = vmul.f32 0.17677669, %v5007_v27  ;;  %v9412_v57 = vpop.f32.mrb[249].mxu0 }
0x1d39   :  { %5033 = vmax.xlane.f32.xlu0 %v5032_v29  ;;  %v5010_v48 = vpop.f32.mrb[250].mxu0 }
0x1d3a   :  { %v5022_v63 = vadd.f32 %v12503_v0, %v5017_v8  ;;  %v9413_v36 = vpop.f32.mrb[251].mxu0 }
0x1d3c   :  { %v5035_v17 = vsel %vm671_vm3, %v5022_v63, -inf }
0x1d3d   :  { %5036 = vmax.xlane.f32.xlu1 %v5035_v17 }
0x1d4e   :  { %5083 = vrot.lane.b32.xlu1 %v12378_v28, %s10474_s27 }
0x1d4f   :  { %5081 = vrot.lane.b32.xlu0 %v12359_v46, %s10474_s27 }
0x1d52   :  { %5085 = vrot.lane.b32.xlu1 %v12412_v49, %s10474_s27 }
0x1dba   :  { %v5025_v30 = vpop.xlane.xlu1 %5024 }
0x1dbb   :  { %v5038_v51 = vsub.f32 %v5018_v19, %v5025_v30  ;;  %v13924_v30 = vmov 0.0  }
0x1dbc   :  { %v5028_v3 = vpop.xlane.xlu0 %5027 }
0x1dbd   :  { %v5043_v32 = vmul.f32 1.442695, %v5038_v51  ;;  %v5039_v10 = vsub.f32 %v5019_v18, %v5028_v3 }
0x1dbf   :  { %10239 = vpow2.f32 %v5043_v32  ;;  %v5045_v39 = vmul.f32 1.442695, %v5039_v10 }
0x1dc1   :  { %10241 = vpow2.f32 %v5045_v39 }
0x1dc2   :  { %v5031_v23 = vpop.xlane.xlu0 %5030 }
0x1dc3   :  { %v5040_v37 = vsub.f32 %v5020_v45, %v5031_v23 }
0x1dc5   :  { %v5047_v61 = vmul.f32 1.442695, %v5040_v37 }
0x1dc6   :  { %v5034_v27 = vpop.xlane.xlu0 %5033 }
0x1dc7   :  { %10243 = vpow2.f32 %v5047_v61  ;;  %v5041_v8 = vsub.f32 %v5021_v38, %v5034_v27  ;;  %v9887_v61 = vld [vmem:[%s13893_s6 + $0x60] sm:$0xff]  }
0x1dc8   :  { %9433 = vmatpush3.bf16.msra.mxu0 %v9887_v61 }
0x1dc9   :  { %v10240_v57 = vpop.eup %10239  ;;  %v5049_v29 = vmul.f32 1.442695, %v5041_v8  ;;  %9434 = vmatprep.subr.bf16.mxu0 %v13924_v30 }
0x1dca   :  { %v5037_v48 = vpop.xlane.xlu1 %5036  ;;  %v5082_v36 = vpop.permute.xlu0 %5081  ;;  %v5053_v17 = vsel %vm671_vm3, %v10240_v57, 0.0 }
0x1dcb   :  { %v10242_v7 = vpop.eup %10241  ;;  %10245 = vpow2.f32 %v5049_v29  ;;  %v5042_v19 = vsub.f32 %v5022_v63, %v5037_v48  ;;  %5054 = vadd.xlane.f32.xlu0 %v5053_v17  ;;  %9415 = vmatpush3.bf16.msra.mxu1 %v5082_v36 }
0x1dcc   :  { %v5056_v18 = vsel %vm671_vm3, %v10242_v7, 0.0  ;;  %9416 = vmatprep.subr.bf16.mxu1 %v13924_v30 }
0x1dcd   :  { %v5051_v45 = vmul.f32 1.442695, %v5042_v19  ;;  %5057 = vadd.xlane.f32.xlu1 %v5056_v18 }
0x1dce   :  { %v5084_v51 = vpop.permute.xlu1 %5083 }
0x1dcf   :  { %10247 = vpow2.f32 %v5051_v45  ;;  %9417 = vmatpush3.bf16.msra.mxu1 %v5084_v51 }
0x1dd0   :  { %9418 = vmatprep.subr.bf16.mxu1 %v13924_v30 }
0x1dd1   :  { %v10244_v38 = vpop.eup %10243 }
0x1dd2   :  { %v5086_v3 = vpop.permute.xlu1 %5085  ;;  %v5059_v32 = vsel %vm671_vm3, %v10244_v38, 0.0 }
0x1dd3   :  { %v5099_v10 = vsel %vm739_vm2, %v5086_v3, 0  ;;  %5060 = vadd.xlane.f32.xlu0 %v5059_v32 }
0x1dd4   :  { %9419 = vmatpush3.bf16.msra.mxu1 %v5099_v10 }
0x1dd5   :  { %v10246_v63 = vpop.eup %10245  ;;  %9448 = vmatprep.subr.bf16.mxu1 %v13924_v30 }
0x1dd6   :  { %v5062_v39 = vsel %vm671_vm3, %v10246_v63, 0.0 }
0x1dd7   :  { %5063 = vadd.xlane.f32.xlu1 %v5062_v39 }
0x1dd9   :  { %v10248_v23 = vpop.eup %10247 }
0x1dda   :  { %v5065_v37 = vsel %vm671_vm3, %v10248_v23, 0.0 }
0x1ddb   :  { %5066 = vadd.xlane.f32.xlu1 %v5065_v37 }
0x1de9   :  { %5248 = vrot.lane.b32.xlu0 %v12361_v5, %s10475_s23 }
0x1dec   :  { %5250 = vrot.lane.b32.xlu1 %v12380_v56, %s10475_s23 }
0x1ded   :  { %5252 = vrot.lane.b32.xlu0 %v12414_v11, %s10475_s23 }
0x1df0   :  { %5242 = vrot.lane.b32.xlu1 %v12357_v25, %s10475_s23 }
0x1df1   :  { %5244 = vrot.lane.b32.xlu0 %v12376_v31, %s10475_s23 }
0x1df4   :  { %5246 = vrot.lane.b32.xlu1 %v12439_v50, %s10475_s23 }
0x1e58   :  { %v5055_v5 = vpop.xlane.xlu0 %5054 }
0x1e59   :  { %10249 = vrcp.f32 %v5055_v5  ;;  %v9888_v5 = vld [vmem:[%s13893_s6 + $0x68] sm:$0xff]  }
0x1e5a   :  { %v5058_v56 = vpop.xlane.xlu1 %5057  ;;  %9435 = vmatpush3.bf16.msra.mxu0 %v9888_v5 }
0x1e5b   :  { %10251 = vrcp.f32 %v5058_v56  ;;  %9466 = vmatprep.subr.bf16.mxu0 %v13924_v30 }
0x1e60   :  { %v5061_v11 = vpop.xlane.xlu0 %5060 }
0x1e61   :  { %10253 = vrcp.f32 %v5061_v11 }
0x1e63   :  { %v10250_v27 = vpop.eup %10249 }
0x1e64   :  { %v5064_v25 = vpop.xlane.xlu1 %5063  ;;  %v5073_v31 = vmul.f32 %v10250_v27, %v10240_v57  ;;  %v5249_v50 = vpop.permute.xlu0 %5248 }
0x1e65   :  { %v10252_v8 = vpop.eup %10251  ;;  %10255 = vrcp.f32 %v5064_v25  ;;  %v5264_v17 = vsel %vm582_vm1, %v5249_v50, 0 }
0x1e66   :  { %v5074_v29 = vmul.f32 %v10252_v8, %v10242_v7 }
0x1e68   :  { %v5078_v48 = vpack.c.bf16 %v5074_v29, %v5073_v31  ;;  %v5067_v36 = vpop.xlane.xlu1 %5066  ;;  %v5253_v39 = vpop.permute.xlu0 %5252 }
0x1e69   :  { %10257 = vrcp.f32 %v5067_v36  ;;  %v5270_v37 = vsel %vm582_vm1, %v5253_v39, 0 }
0x1e6a   :  { %9421 = vmatmul.mubr.msk.bf16.vlgmr.msra.gmra.mrb[240].mxu1 %vm671_vm3, %v5078_v48 }
0x1e6b   :  { %9449 = vmatpush3.bf16.xpose.msra.mxu1 %v5264_v17  ;;  %9424 = vmatprep.mubr.msk.bf16.mxu1 %vm10472_vm0, %v13924_v30  ;;  %v10254_v19 = vpop.eup %10253 }
0x1e6c   :  { %9450 = vmatprep.subr.bf16.mxu1 %v13924_v30  ;;  %v5251_v45 = vpop.permute.xlu1 %5250  ;;  %v5075_v51 = vmul.f32 %v10254_v19, %v10244_v38 }
0x1e6d   :  { %v5267_v7 = vsel %vm582_vm1, %v5251_v45, 0 }
0x1e6f   :  { %v10256_v18 = vpop.eup %10255 }
0x1e70   :  { %v5076_v57 = vmul.f32 %v10256_v18, %v10246_v63  ;;  %v5243_v38 = vpop.permute.xlu1 %5242  ;;  %v5245_v63 = vpop.permute.xlu0 %5244 }
0x1e72   :  { %v5079_v3 = vpack.c.bf16 %v5076_v57, %v5075_v51 }
0x1e73   :  { %v10258_v32 = vpop.eup %10257  ;;  %9451 = vmatpush3.bf16.xpose.msra.mxu1 %v5267_v7 }
0x1e74   :  { %9425 = vmatmul.mubr.msk.bf16.gmra.mrb[244].mxu1 %vm671_vm3, %v5079_v3  ;;  %9452 = vmatprep.subr.bf16.mxu1 %v13924_v30  ;;  %v5077_v10 = vmul.f32 %v10258_v32, %v10248_v23  ;;  %v5247_v23 = vpop.permute.xlu1 %5246 }
0x1e75   :  { %9428 = vmatprep.mubr.msk.bf16.mxu1 %vm10472_vm0, %v13924_v30 }
0x1e76   :  { %v5080_v61 = vpack.c.bf16 %v5077_v10, %v5077_v10 }
0x1e7b   :  { %9453 = vmatpush3.bf16.xpose.msra.mxu1 %v5270_v37 }
0x1e7c   :  { %9429 = vmatmul.mubr.msk.bf16.gmra.mrb[248].mxu1 %vm671_vm3, %v5080_v61  ;;  %9484 = vmatprep.subr.bf16.mxu1 %v13924_v30 }
0x1e7d   :  { %9454 = vmatprep.mubr.msk.bf16.mxu1 %vm10472_vm0, %v13924_v30 }
0x1e84   :  { %9455 = vmatmul.mubr.msk.bf16.vlgmr.msra.gmra.mrb[252].mxu1 %vm582_vm1, %v5243_v38 }
0x1e85   :  { %9458 = vmatprep.mubr.msk.bf16.mxu1 %vm10472_vm0, %v13924_v30 }
0x1e8c   :  { %9459 = vmatmul.mubr.msk.bf16.gmra.mrb[0].mxu1 %vm582_vm1, %v5245_v63 }
0x1e8d   :  { %9462 = vmatprep.mubr.msk.bf16.mxu1 %vm10472_vm0, %v13924_v30 }
0x1e94   :  { %9463 = vmatmul.mubr.msk.bf16.gmra.mrb[4].mxu1 %vm582_vm1, %v5247_v23 }
0x1e95   :  { %9488 = vmatprep.mubr.msk.bf16.mxu1 %vm10472_vm0, %v13924_v30 }
0x1f3d   :  { %v5135_v56 = vpop.f32.mrb[240].mxu1 }
0x1f3e   :  { %v9422_v11 = vpop.f32.mrb[241].mxu1 }
0x1f3f   :  { %v5138_v27 = vpop.f32.mrb[242].mxu1 }
0x1f40   :  { %v5157_v25 = vpack.c.bf16 %v5138_v27, %v5135_v56  ;;  %v9423_v8 = vpop.f32.mrb[243].mxu1 }
0x1f42   :  { %9437 = vmatmul.mubr.msk.bf16.vlgmr.msra.gmra.mrb[252].mxu0 %vm582_vm1, %v5157_v25 }
0x1f43   :  { %9440 = vmatprep.mubr.msk.bf16.mxu0 %vm10472_vm0, %v13924_v30 }
0x1f47   :  { %v5143_v31 = vpop.f32.mrb[244].mxu1 }
0x1f48   :  { %v9426_v29 = vpop.f32.mrb[245].mxu1 }
0x1f49   :  { %v5146_v50 = vpop.f32.mrb[246].mxu1 }
0x1f4a   :  { %v5158_v48 = vpack.c.bf16 %v5146_v50, %v5143_v31  ;;  %v9427_v36 = vpop.f32.mrb[247].mxu1 }
0x1f4c   :  { %9441 = vmatmul.mubr.msk.bf16.gmra.mrb[0].mxu0 %vm582_vm1, %v5158_v48 }
0x1f4d   :  { %9444 = vmatprep.mubr.msk.bf16.mxu0 %vm10472_vm0, %v13924_v30 }
0x1f4f   :  { %v5151_v17 = vpop.f32.mrb[248].mxu1 }
0x1f50   :  { %v9430_v19 = vpop.f32.mrb[249].mxu1  ;;  %v5159_v45 = vpack.c.bf16 %v5151_v17, %v5151_v17 }
0x1f51   :  { %v5154_v18 = vpop.f32.mrb[250].mxu1 }
0x1f52   :  { %v9431_v51 = vpop.f32.mrb[251].mxu1 }
0x1f54   :  { %9445 = vmatmul.mubr.msk.bf16.gmra.mrb[4].mxu0 %vm582_vm1, %v5159_v45 }
0x1f55   :  { %9472 = vmatprep.mubr.msk.bf16.mxu0 %vm10472_vm0, %v13924_v30 }
0x1f57   :  { %v5306_v57 = vpop.f32.mrb[252].mxu1 }
0x1f58   :  { %v5328_v7 = vmul.f32 0.17677669, %v5306_v57  ;;  %v9456_v3 = vpop.f32.mrb[253].mxu1 }
0x1f59   :  { %v5309_v32 = vpop.f32.mrb[254].mxu1 }
0x1f5a   :  { %v5333_v10 = vadd.f32 %v12503_v0, %v5328_v7  ;;  %v5329_v39 = vmul.f32 0.17677669, %v5309_v32  ;;  %v9457_v37 = vpop.f32.mrb[255].mxu1 }
0x1f5c   :  { %v5334_v61 = vadd.f32 %v12503_v0, %v5329_v39  ;;  %v5338_v38 = vsel %vm671_vm3, %v5333_v10, -inf }
0x1f5d   :  { %5339 = vmax.xlane.f32.xlu0 %v5338_v38 }
0x1f5e   :  { %v5341_v63 = vsel %vm671_vm3, %v5334_v61, -inf }
0x1f5f   :  { %5342 = vmax.xlane.f32.xlu1 %v5341_v63  ;;  %v5314_v23 = vpop.f32.mrb[0].mxu1 }
0x1f60   :  { %v5330_v5 = vmul.f32 0.17677669, %v5314_v23  ;;  %v9460_v56 = vpop.f32.mrb[1].mxu1 }
0x1f61   :  { %v5317_v11 = vpop.f32.mrb[2].mxu1 }
0x1f62   :  { %v5335_v27 = vadd.f32 %v12503_v0, %v5330_v5  ;;  %v5331_v25 = vmul.f32 0.17677669, %v5317_v11  ;;  %v9461_v8 = vpop.f32.mrb[3].mxu1 }
0x1f64   :  { %v5336_v31 = vadd.f32 %v12503_v0, %v5331_v25  ;;  %v5344_v29 = vsel %vm671_vm3, %v5335_v27, -inf }
0x1f65   :  { %5345 = vmax.xlane.f32.xlu0 %v5344_v29 }
0x1f66   :  { %v5347_v17 = vsel %vm671_vm3, %v5336_v31, -inf }
0x1f67   :  { %v5322_v50 = vpop.f32.mrb[4].mxu1 }
0x1f68   :  { %v5332_v48 = vmul.f32 0.17677669, %v5322_v50  ;;  %v9464_v36 = vpop.f32.mrb[5].mxu1 }
0x1f69   :  { %5348 = vmax.xlane.f32.xlu0 %v5347_v17  ;;  %v5325_v19 = vpop.f32.mrb[6].mxu1 }
0x1f6a   :  { %v5337_v18 = vadd.f32 %v12503_v0, %v5332_v48  ;;  %v9465_v45 = vpop.f32.mrb[7].mxu1 }
0x1f6c   :  { %v5350_v51 = vsel %vm671_vm3, %v5337_v18, -inf }
0x1f6d   :  { %5351 = vmax.xlane.f32.xlu0 %v5350_v51 }
0x1f70   :  { %5396 = vrot.lane.b32.xlu1 %v12359_v46, %s10475_s23 }
0x1fea   :  { %v5340_v57 = vpop.xlane.xlu0 %5339 }
0x1feb   :  { %v5353_v7 = vsub.f32 %v5333_v10, %v5340_v57 }
0x1fec   :  { %v5343_v3 = vpop.xlane.xlu1 %5342 }
0x1fed   :  { %v5358_v32 = vmul.f32 1.442695, %v5353_v7  ;;  %v5354_v39 = vsub.f32 %v5334_v61, %v5343_v3 }
0x1fef   :  { %10259 = vpow2.f32 %v5358_v32  ;;  %v5360_v37 = vmul.f32 1.442695, %v5354_v39  ;;  %v4217_v32 = vadd.f32 %v12496_v9, %v12349_v58  ;;  %v4215_v9 = vadd.f32 %v12488_v41, %v12342_v20  ;;  %v9889_v20 = vld [vmem:[%s13893_s6 + $0x70] sm:$0xff]  }
0x1ff0   :  { %v5397_v38 = vpop.permute.xlu1 %5396  ;;  %9485 = vmatpush3.bf16.msra.mxu1 %v9889_v20 }
0x1ff1   :  { %10261 = vpow2.f32 %v5360_v37  ;;  %9467 = vmatpush3.bf16.msra.mxu0 %v5397_v38  ;;  %9486 = vmatprep.subr.bf16.mxu1 %v13924_v30 }
0x1ff2   :  { %v5346_v63 = vpop.xlane.xlu0 %5345  ;;  %9468 = vmatprep.subr.bf16.mxu0 %v13924_v30 }
0x1ff3   :  { %v5355_v0 = vsub.f32 %v5335_v27, %v5346_v63 }
0x1ff5   :  { %v5362_v23 = vmul.f32 1.442695, %v5355_v0 }
0x1ff6   :  { %v5349_v5 = vpop.xlane.xlu0 %5348 }
0x1ff7   :  { %10263 = vpow2.f32 %v5362_v23  ;;  %v5356_v56 = vsub.f32 %v5336_v31, %v5349_v5 }
0x1ff9   :  { %v12783_v11 = vpop.eup %10259  ;;  %v5364_v46 = vmul.f32 1.442695, %v5356_v56 }
0x1ffa   :  { %v5352_v10 = vpop.xlane.xlu0 %5351  ;;  %v5368_v61 = vsel %vm671_vm3, %v12783_v11, 0.0 }
0x1ffb   :  { %v12787_v25 = vpop.eup %10261  ;;  %10265 = vpow2.f32 %v5364_v46  ;;  %v5357_v8 = vsub.f32 %v5337_v18, %v5352_v10  ;;  %5369 = vadd.xlane.f32.xlu1 %v5368_v61 }
0x1ffc   :  { %v5371_v29 = vsel %vm671_vm3, %v12787_v25, 0.0 }
0x1ffd   :  { %v5366_v27 = vmul.f32 1.442695, %v5357_v8  ;;  %5372 = vadd.xlane.f32.xlu0 %v5371_v29 }
0x1fff   :  { %10267 = vpow2.f32 %v5366_v27 }
0x2001   :  { %v12791_v50 = vpop.eup %10263 }
0x2002   :  { %v5374_v31 = vsel %vm671_vm3, %v12791_v50, 0.0 }
0x2003   :  { %5375 = vadd.xlane.f32.xlu1 %v5374_v31 }
0x2005   :  { %v12795_v48 = vpop.eup %10265 }
0x2006   :  { %v5377_v36 = vsel %vm671_vm3, %v12795_v48, 0.0 }
0x2007   :  { %5378 = vadd.xlane.f32.xlu0 %v5377_v36 }
0x2009   :  { %v12799_v17 = vpop.eup %10267 }
0x200a   :  { %v5380_v19 = vsel %vm671_vm3, %v12799_v17, 0.0 }
0x200b   :  { %5381 = vadd.xlane.f32.xlu0 %v5380_v19 }
0x2014   :  { %5400 = vrot.lane.b32.xlu1 %v12412_v49, %s10475_s23  ;;  %v12817_v49 = vpack.c.bf16 %v4217_v32, %v4217_v32 }
0x2015   :  { %v5215_v18 = vpop.f32.mrb[252].mxu0 }
0x2016   :  { %v12806_v45 = vadd.f32 %v5215_v18, %v12682_v34  ;;  %v9438_v51 = vpop.f32.mrb[253].mxu0 }
0x2017   :  { %v5218_v57 = vpop.f32.mrb[254].mxu0 }
0x2018   :  { %v12809_v7 = vadd.f32 %v5218_v57, %v12684_v33  ;;  %v9439_v3 = vpop.f32.mrb[255].mxu0  ;;  %5791 = vrot.lane.b32.xlu1 %v12480_v22, %s10473_s25 }
0x201c   :  { %5793 = vrot.lane.b32.xlu1 %v12498_v55, %s10473_s25 }
0x201f   :  { %v5223_v39 = vpop.f32.mrb[0].mxu0 }
0x2020   :  { %v12820_v34 = vadd.f32 %v5223_v39, %v12686_v47  ;;  %v9442_v37 = vpop.f32.mrb[1].mxu0  ;;  %5795 = vrot.lane.b32.xlu1 %v12817_v49, %s10473_s25  ;;  %v12835_v47 = vpack.c.bf16 %v4215_v9, %v4215_v9 }
0x2021   :  { %v5226_v33 = vpop.f32.mrb[2].mxu0  ;;  %5398 = vrot.lane.b32.xlu0 %v12378_v28, %s10475_s23 }
0x2022   :  { %v12827_v38 = vadd.f32 %v5226_v33, %v12688_v26  ;;  %v9443_v58 = vpop.f32.mrb[3].mxu0 }
0x2024   :  { %5784 = vrot.lane.b32.xlu1 %v12492_v2, %s10473_s25 }
0x2025   :  { %5782 = vrot.lane.b32.xlu0 %v12476_v16, %s10473_s25 }
0x2027   :  { %v5231_v63 = vpop.f32.mrb[4].mxu0 }
0x2028   :  { %v12838_v0 = vadd.f32 %v5231_v63, %v12690_v6  ;;  %v9446_v28 = vpop.f32.mrb[5].mxu0 }
0x2029   :  { %v5234_v23 = vpop.f32.mrb[6].mxu0  ;;  %5786 = vrot.lane.b32.xlu0 %v12835_v47, %s10473_s25 }
0x202a   :  { %v9447_v26 = vpop.f32.mrb[7].mxu0 }
0x2088   :  { %v5370_v5 = vpop.xlane.xlu1 %5369 }
0x208a   :  { %v5373_v41 = vpop.xlane.xlu0 %5372 }
0x208b   :  { %10269 = vrcp.f32 %v5373_v41 }
0x208c   :  { %10271 = vrcp.f32 %v5370_v5 }
0x2090   :  { %v5376_v6 = vpop.xlane.xlu1 %5375 }
0x2094   :  { %v5379_v56 = vpop.xlane.xlu0 %5378  ;;  %v5401_v29 = vpop.permute.xlu1 %5400 }
0x2095   :  { %10273 = vrcp.f32 %v5379_v56  ;;  %v10270_v10 = vpop.eup %10269  ;;  %v5414_v36 = vsel %vm739_vm2, %v5401_v29, 0 }
0x2096   :  { %10275 = vrcp.f32 %v5376_v6  ;;  %v10272_v8 = vpop.eup %10271  ;;  %v5389_v27 = vmul.f32 %v10270_v10, %v12787_v25 }
0x2097   :  { %v5388_v31 = vmul.f32 %v10272_v8, %v12783_v11  ;;  %v5576_v11 = vsel %vm582_vm1, %v12480_v22, 0 }
0x2098   :  { %v5382_v46 = vpop.xlane.xlu0 %5381  ;;  %v5792_v33 = vpop.permute.xlu1 %5791 }
0x2099   :  { %10277 = vrcp.f32 %v5382_v46  ;;  %v5393_v19 = vpack.c.bf16 %v5389_v27, %v5388_v31  ;;  %v4289_v46 = vadd.f32 %v12490_v42, %v12346_v21 }
0x209c   :  { %v5399_v61 = vpop.permute.xlu0 %5398  ;;  %v5794_v58 = vpop.permute.xlu1 %5793 }
0x209d   :  { %9469 = vmatpush3.bf16.msra.mxu0 %v5399_v61  ;;  %v5810_v9 = vsel %vm582_vm1, %v5794_v58, 0  ;;  %v12917_v61 = vpack.c.bf16 %v4289_v46, %v4289_v46 }
0x209e   :  { %9470 = vmatprep.subr.bf16.mxu0 %v13924_v30 }
0x209f   :  { %v10274_v18 = vpop.eup %10273  ;;  %v5718_v21 = vsel %vm739_vm2, %v12917_v61, 0 }
0x20a0   :  { %v10276_v51 = vpop.eup %10275  ;;  %v5391_v25 = vmul.f32 %v10274_v18, %v12795_v48  ;;  %v5579_v48 = vsel %vm582_vm1, %v12498_v55, 0  ;;  %v5796_v63 = vpop.permute.xlu1 %5795 }
0x20a1   :  { %9471 = vmatpush3.bf16.msra.mxu0 %v5414_v36  ;;  %v5390_v57 = vmul.f32 %v10276_v51, %v12791_v50  ;;  %v5582_v50 = vsel %vm582_vm1, %v12817_v49, 0  ;;  %v5813_v28 = vsel %vm582_vm1, %v5796_v63, 0  ;;  %v5783_v23 = vpop.permute.xlu0 %5782 }
0x20a2   :  { %9500 = vmatprep.subr.bf16.mxu0 %v13924_v30 }
0x20a3   :  { %v5394_v3 = vpack.c.bf16 %v5391_v25, %v5390_v57  ;;  %v10278_v32 = vpop.eup %10277 }
0x20a4   :  { %9473 = vmatmul.mubr.msk.bf16.vlgmr.msra.gmra.mrb[8].mxu0 %vm671_vm3, %v5393_v19  ;;  %v5392_v39 = vmul.f32 %v10278_v32, %v12799_v17  ;;  %v5807_v17 = vsel %vm582_vm1, %v5792_v33, 0  ;;  %v5785_v26 = vpop.permute.xlu1 %5784  ;;  %v12933_v32 = vld [vmem:[%s13892_s1 + $0x1] ss:$0 sm:$0xff] }
0x20a5   :  { %9476 = vmatprep.mubr.msk.bf16.mxu0 %vm10472_vm0, %v13924_v30  ;;  %v5787_v20 = vpop.permute.xlu0 %5786 }
0x20a6   :  { %v5395_v37 = vpack.c.bf16 %v5392_v39, %v5392_v39 }
0x20aa   :  { %9501 = vmatpush3.bf16.xpose.msra.mxu0 %v5576_v11 }
0x20ab   :  { %9502 = vmatprep.subr.bf16.mxu0 %v13924_v30 }
0x20ac   :  { %9477 = vmatmul.mubr.msk.bf16.gmra.mrb[12].mxu0 %vm671_vm3, %v5394_v3 }
0x20ad   :  { %9480 = vmatprep.mubr.msk.bf16.mxu0 %vm10472_vm0, %v13924_v30 }
0x20b2   :  { %9503 = vmatpush3.bf16.xpose.msra.mxu0 %v5579_v48 }
0x20b3   :  { %9504 = vmatprep.subr.bf16.mxu0 %v13924_v30 }
0x20b4   :  { %9481 = vmatmul.mubr.msk.bf16.gmra.mrb[16].mxu0 %vm671_vm3, %v5395_v37 }
0x20b5   :  { %9506 = vmatprep.mubr.msk.bf16.mxu0 %vm10472_vm0, %v13924_v30 }
0x20ba   :  { %9505 = vmatpush3.bf16.xpose.msra.mxu0 %v5582_v50 }
0x20bb   :  { %9536 = vmatprep.subr.bf16.mxu0 %v13924_v30 }
0x20c1   :  { %9507 = vmatmul.mubr.msk.bf16.vlgmr.msra.gmra.mrb[20].mxu0 %vm582_vm1, %v12476_v16 }
0x20c2   :  { %9537 = vmatpush3.bf16.xpose.msra.mxu0 %v5807_v17  ;;  %9510 = vmatprep.mubr.msk.bf16.mxu0 %vm10472_vm0, %v13924_v30 }
0x20c3   :  { %9538 = vmatprep.subr.bf16.mxu0 %v13924_v30 }
0x20c9   :  { %9511 = vmatmul.mubr.msk.bf16.gmra.mrb[24].mxu0 %vm582_vm1, %v12492_v2 }
0x20ca   :  { %9539 = vmatpush3.bf16.xpose.msra.mxu0 %v5810_v9  ;;  %9514 = vmatprep.mubr.msk.bf16.mxu0 %vm10472_vm0, %v13924_v30 }
0x20cb   :  { %9540 = vmatprep.subr.bf16.mxu0 %v13924_v30 }
0x20d1   :  { %9515 = vmatmul.mubr.msk.bf16.gmra.mrb[28].mxu0 %vm582_vm1, %v12835_v47 }
0x20d2   :  { %9541 = vmatpush3.bf16.xpose.msra.mxu0 %v5813_v28  ;;  %9542 = vmatprep.mubr.msk.bf16.mxu0 %vm10472_vm0, %v13924_v30 }
0x20d3   :  { %9572 = vmatprep.subr.bf16.mxu0 %v13924_v30 }
0x20d9   :  { %9543 = vmatmul.mubr.msk.bf16.vlgmr.msra.gmra.mrb[32].mxu0 %vm582_vm1, %v5783_v23 }
0x20da   :  { %9546 = vmatprep.mubr.msk.bf16.mxu0 %vm10472_vm0, %v13924_v30  ;;  %9573 = vmatpush3.bf16.msra.mxu0 %v12613_v4  ;;  %v12906_v4 = vld [vmem:[%s13893_s6 + $0x78] sm:$0xff]  }
0x20db   :  { %9574 = vmatprep.subr.bf16.mxu0 %v13924_v30  ;;  %9487 = vmatpush3.bf16.msra.mxu1 %v12906_v4 }
0x20dc   :  { %9518 = vmatprep.subr.bf16.mxu1 %v13924_v30 }
0x20de   :  { %9575 = vmatpush3.bf16.msra.mxu0 %v12619_v43 }
0x20df   :  { %9604 = vmatprep.subr.bf16.mxu0 %v13924_v30 }
0x20e1   :  { %9547 = vmatmul.mubr.msk.bf16.gmra.mrb[36].mxu0 %vm582_vm1, %v5785_v26 }
0x20e2   :  { %9550 = vmatprep.mubr.msk.bf16.mxu0 %vm10472_vm0, %v13924_v30 }
0x20e9   :  { %9551 = vmatmul.mubr.msk.bf16.gmra.mrb[40].mxu0 %vm582_vm1, %v5787_v20 }
0x20ea   :  { %9576 = vmatprep.mubr.msk.bf16.mxu0 %vm10472_vm0, %v13924_v30 }
0x2177   :  { %v5450_v43 = vpop.f32.mrb[8].mxu0 }
0x2178   :  { %v9474_v41 = vpop.f32.mrb[9].mxu0 }
0x2179   :  { %v5453_v5 = vpop.f32.mrb[10].mxu0 }
0x217a   :  { %v5472_v56 = vpack.c.bf16 %v5453_v5, %v5450_v43  ;;  %v9475_v6 = vpop.f32.mrb[11].mxu0 }
0x217c   :  { %9489 = vmatmul.mubr.msk.bf16.vlgmr.msra.gmra.mrb[8].mxu1 %vm582_vm1, %v5472_v56 }
0x217d   :  { %9519 = vmatpush3.bf16.msra.mxu1 %v12478_v60  ;;  %9492 = vmatprep.mubr.msk.bf16.mxu1 %vm10472_vm0, %v13924_v30 }
0x217e   :  { %9520 = vmatprep.subr.bf16.mxu1 %v13924_v30 }
0x217f   :  { %v5458_v10 = vpop.f32.mrb[12].mxu0 }
0x2180   :  { %v9478_v8 = vpop.f32.mrb[13].mxu0 }
0x2181   :  { %9521 = vmatpush3.bf16.msra.mxu1 %v12494_v1  ;;  %v5461_v29 = vpop.f32.mrb[14].mxu0 }
0x2182   :  { %v5473_v27 = vpack.c.bf16 %v5461_v29, %v5458_v10  ;;  %v9479_v31 = vpop.f32.mrb[15].mxu0  ;;  %9522 = vmatprep.subr.bf16.mxu1 %v13924_v30 }
0x2184   :  { %9493 = vmatmul.mubr.msk.bf16.gmra.mrb[12].mxu1 %vm582_vm1, %v5473_v27 }
0x2185   :  { %9523 = vmatpush3.bf16.msra.mxu1 %v5718_v21  ;;  %9496 = vmatprep.mubr.msk.bf16.mxu1 %vm10472_vm0, %v13924_v30 }
0x2186   :  { %9554 = vmatprep.subr.bf16.mxu1 %v13924_v30 }
0x2187   :  { %v5466_v42 = vpop.f32.mrb[16].mxu0 }
0x2188   :  { %v9482_v36 = vpop.f32.mrb[17].mxu0  ;;  %v5474_v18 = vpack.c.bf16 %v5466_v42, %v5466_v42 }
0x2189   :  { %v5469_v19 = vpop.f32.mrb[18].mxu0 }
0x218a   :  { %v9483_v51 = vpop.f32.mrb[19].mxu0 }
0x218c   :  { %9497 = vmatmul.mubr.msk.bf16.gmra.mrb[16].mxu1 %vm582_vm1, %v5474_v18 }
0x218d   :  { %9524 = vmatprep.mubr.msk.bf16.mxu1 %vm10472_vm0, %v13924_v30 }
0x2194   :  { %v5618_v25 = vpop.f32.mrb[20].mxu0 }
0x2195   :  { %v5640_v57 = vmul.f32 0.17677669, %v5618_v25  ;;  %v9508_v11 = vpop.f32.mrb[21].mxu0 }
0x2196   :  { %v5621_v3 = vpop.f32.mrb[22].mxu0 }
0x2197   :  { %v12936_v39 = vadd.f32 %v12933_v32, %v5640_v57  ;;  %v5641_v48 = vmul.f32 0.17677669, %v5621_v3  ;;  %v9509_v37 = vpop.f32.mrb[23].mxu0 }
0x2199   :  { %v12939_v50 = vadd.f32 %v12933_v32, %v5641_v48  ;;  %v5650_v33 = vsel %vm671_vm3, %v12936_v39, -inf }
0x219a   :  { %5651 = vmax.xlane.f32.xlu1 %v5650_v33 }
0x219b   :  { %v5653_v17 = vsel %vm671_vm3, %v12939_v50, -inf }
0x219c   :  { %5654 = vmax.xlane.f32.xlu0 %v5653_v17  ;;  %v5626_v58 = vpop.f32.mrb[24].mxu0 }
0x219d   :  { %v5642_v9 = vmul.f32 0.17677669, %v5626_v58  ;;  %v9512_v63 = vpop.f32.mrb[25].mxu0 }
0x219e   :  { %v5629_v28 = vpop.f32.mrb[26].mxu0 }
0x219f   :  { %v5647_v23 = vadd.f32 %v12933_v32, %v5642_v9  ;;  %v5643_v26 = vmul.f32 0.17677669, %v5629_v28  ;;  %v9513_v20 = vpop.f32.mrb[27].mxu0 }
0x21a1   :  { %v5648_v43 = vadd.f32 %v12933_v32, %v5643_v26  ;;  %v5656_v41 = vsel %vm671_vm3, %v5647_v23, -inf }
0x21a2   :  { %5657 = vmax.xlane.f32.xlu0 %v5656_v41 }
0x21a3   :  { %v5659_v46 = vsel %vm671_vm3, %v5648_v43, -inf }
0x21a4   :  { %v5634_v5 = vpop.f32.mrb[28].mxu0 }
0x21a5   :  { %v5644_v56 = vmul.f32 0.17677669, %v5634_v5  ;;  %v9516_v6 = vpop.f32.mrb[29].mxu0 }
0x21a6   :  { %5660 = vmax.xlane.f32.xlu0 %v5659_v46  ;;  %v5637_v10 = vpop.f32.mrb[30].mxu0 }
0x21a7   :  { %v5649_v8 = vadd.f32 %v12933_v32, %v5644_v56  ;;  %v9517_v29 = vpop.f32.mrb[31].mxu0 }
0x21a9   :  { %v5662_v27 = vsel %vm671_vm3, %v5649_v8, -inf }
0x21aa   :  { %5663 = vmax.xlane.f32.xlu1 %v5662_v27 }
0x21ac   :  { %v5849_v31 = vpop.f32.mrb[32].mxu0 }
0x21ad   :  { %v5871_v21 = vmul.f32 0.17677669, %v5849_v31  ;;  %v9544_v42 = vpop.f32.mrb[33].mxu0 }
0x21ae   :  { %v5852_v36 = vpop.f32.mrb[34].mxu0 }
0x21af   :  { %v5876_v19 = vadd.f32 %v12933_v32, %v5871_v21  ;;  %v5872_v18 = vmul.f32 0.17677669, %v5852_v36  ;;  %v9545_v51 = vpop.f32.mrb[35].mxu0 }
0x21b1   :  { %v12953_v25 = vadd.f32 %v12933_v32, %v5872_v18  ;;  %v5881_v57 = vsel %vm671_vm3, %v5876_v19, -inf }
0x21b2   :  { %5882 = vmax.xlane.f32.xlu0 %v5881_v57 }
0x21b3   :  { %v5884_v11 = vsel %vm671_vm3, %v12953_v25, -inf }
0x21b4   :  { %5885 = vmax.xlane.f32.xlu1 %v5884_v11  ;;  %v5857_v3 = vpop.f32.mrb[36].mxu0 }
0x21b5   :  { %v5873_v48 = vmul.f32 0.17677669, %v5857_v3  ;;  %v9548_v37 = vpop.f32.mrb[37].mxu0 }
0x21b6   :  { %v5860_v33 = vpop.f32.mrb[38].mxu0 }
0x21b7   :  { %v12959_v17 = vadd.f32 %v12933_v32, %v5873_v48  ;;  %v5874_v58 = vmul.f32 0.17677669, %v5860_v33  ;;  %v9549_v9 = vpop.f32.mrb[39].mxu0 }
0x21b9   :  { %v12962_v63 = vadd.f32 %v12933_v32, %v5874_v58  ;;  %v5887_v28 = vsel %vm671_vm3, %v12959_v17, -inf }
0x21ba   :  { %5888 = vmax.xlane.f32.xlu0 %v5887_v28 }
0x21bb   :  { %v5890_v26 = vsel %vm671_vm3, %v12962_v63, -inf }
0x21bc   :  { %5891 = vmax.xlane.f32.xlu1 %v5890_v26  ;;  %v5865_v20 = vpop.f32.mrb[40].mxu0 }
0x21bd   :  { %v5875_v41 = vmul.f32 0.17677669, %v5865_v20  ;;  %v9552_v5 = vpop.f32.mrb[41].mxu0 }
0x21be   :  { %v5868_v56 = vpop.f32.mrb[42].mxu0 }
0x21bf   :  { %v12969_v6 = vadd.f32 %v12933_v32, %v5875_v41  ;;  %v9553_v46 = vpop.f32.mrb[43].mxu0 }
0x21c1   :  { %v5893_v10 = vsel %vm671_vm3, %v12969_v6, -inf }
0x21c2   :  { %5894 = vmax.xlane.f32.xlu0 %v5893_v10 }
0x21cd   :  { %5942 = vrot.lane.b32.xlu1 %v12478_v60, %s10473_s25 }
0x2227   :  { %v5652_v29 = vpop.xlane.xlu1 %5651 }
0x2228   :  { %v5665_v27 = vsub.f32 %v12936_v39, %v5652_v29 }
0x2229   :  { %v5655_v31 = vpop.xlane.xlu0 %5654 }
0x222a   :  { %v5670_v21 = vmul.f32 1.442695, %v5665_v27  ;;  %v5666_v42 = vsub.f32 %v12939_v50, %v5655_v31 }
0x222c   :  { %10279 = vpow2.f32 %v5670_v21  ;;  %v5672_v36 = vmul.f32 1.442695, %v5666_v42 }
0x222e   :  { %10281 = vpow2.f32 %v5672_v36 }
0x222f   :  { %v5658_v18 = vpop.xlane.xlu0 %5657 }
0x2230   :  { %v5667_v51 = vsub.f32 %v5647_v23, %v5658_v18 }
0x2232   :  { %v5674_v57 = vmul.f32 1.442695, %v5667_v51 }
0x2233   :  { %v5661_v11 = vpop.xlane.xlu0 %5660 }
0x2234   :  { %10283 = vpow2.f32 %v5674_v57  ;;  %v5668_v3 = vsub.f32 %v5648_v43, %v5661_v11 }
0x2236   :  { %v12977_v48 = vpop.eup %10279  ;;  %v5676_v37 = vmul.f32 1.442695, %v5668_v3 }
0x2237   :  { %v5664_v33 = vpop.xlane.xlu1 %5663  ;;  %v5680_v39 = vsel %vm671_vm3, %v12977_v48, 0.0 }
0x2238   :  { %v12981_v58 = vpop.eup %10281  ;;  %10285 = vpow2.f32 %v5676_v37  ;;  %v5669_v50 = vsub.f32 %v5649_v8, %v5664_v33  ;;  %5681 = vadd.xlane.f32.xlu1 %v5680_v39 }
0x2239   :  { %v5683_v9 = vsel %vm671_vm3, %v12981_v58, 0.0 }
0x223a   :  { %v5678_v23 = vmul.f32 1.442695, %v5669_v50  ;;  %5684 = vadd.xlane.f32.xlu0 %v5683_v9 }
0x223c   :  { %10287 = vpow2.f32 %v5678_v23 }
0x223e   :  { %v12985_v28 = vpop.eup %10283 }
0x223f   :  { %v5883_v43 = vpop.xlane.xlu0 %5882  ;;  %v5686_v26 = vsel %vm671_vm3, %v12985_v28, 0.0 }
0x2240   :  { %v5896_v20 = vsub.f32 %v5876_v19, %v5883_v43  ;;  %5687 = vadd.xlane.f32.xlu1 %v5686_v26 }
0x2241   :  { %v5886_v41 = vpop.xlane.xlu1 %5885 }
0x2242   :  { %v12989_v5 = vpop.eup %10285  ;;  %v5901_v56 = vmul.f32 1.442695, %v5896_v20  ;;  %v5897_v8 = vsub.f32 %v12953_v25, %v5886_v41 }
0x2243   :  { %v5689_v46 = vsel %vm671_vm3, %v12989_v5, 0.0 }
0x2244   :  { %10289 = vpow2.f32 %v5901_v56  ;;  %v5903_v10 = vmul.f32 1.442695, %v5897_v8  ;;  %5690 = vadd.xlane.f32.xlu0 %v5689_v46 }
0x2246   :  { %v12994_v29 = vpop.eup %10287  ;;  %10291 = vpow2.f32 %v5903_v10 }
0x2247   :  { %v5889_v27 = vpop.xlane.xlu0 %5888  ;;  %v5692_v19 = vsel %vm671_vm3, %v12994_v29, 0.0 }
0x2248   :  { %v5898_v31 = vsub.f32 %v12959_v17, %v5889_v27  ;;  %5693 = vadd.xlane.f32.xlu1 %v5692_v19 }
0x2249   :  { %v5892_v21 = vpop.xlane.xlu1 %5891 }
0x224a   :  { %v5905_v42 = vmul.f32 1.442695, %v5898_v31  ;;  %v5899_v25 = vsub.f32 %v12962_v63, %v5892_v21 }
0x224c   :  { %10293 = vpow2.f32 %v5905_v42  ;;  %v5907_v36 = vmul.f32 1.442695, %v5899_v25 }
0x224e   :  { %v13000_v18 = vpop.eup %10289  ;;  %10295 = vpow2.f32 %v5907_v36 }
0x224f   :  { %v5530_v51 = vpop.f32.mrb[8].mxu1  ;;  %v5895_v57 = vpop.xlane.xlu0 %5894  ;;  %v5911_v11 = vsel %vm671_vm3, %v13000_v18, 0.0 }
0x2250   :  { %v13004_v3 = vpop.eup %10291  ;;  %v13007_v37 = vadd.f32 %v5530_v51, %v12806_v45  ;;  %v5900_v17 = vsub.f32 %v12969_v6, %v5895_v57  ;;  %v9490_v33 = vpop.f32.mrb[9].mxu1  ;;  %5912 = vadd.xlane.f32.xlu0 %v5911_v11 }
0x2251   :  { %v5533_v63 = vpop.f32.mrb[10].mxu1  ;;  %v5914_v39 = vsel %vm671_vm3, %v13004_v3, 0.0 }
0x2252   :  { %v5909_v50 = vmul.f32 1.442695, %v5900_v17  ;;  %v13013_v9 = vadd.f32 %v5533_v63, %v12809_v7  ;;  %v9491_v23 = vpop.f32.mrb[11].mxu1  ;;  %5915 = vadd.xlane.f32.xlu1 %v5914_v39 }
0x2254   :  { %10297 = vpow2.f32 %v5909_v50 }
0x2256   :  { %v13015_v43 = vpop.eup %10293 }
0x2257   :  { %v5538_v26 = vpop.f32.mrb[12].mxu1  ;;  %v5917_v45 = vsel %vm671_vm3, %v13015_v43, 0.0 }
0x2258   :  { %v13019_v6 = vpop.eup %10295  ;;  %v13022_v20 = vadd.f32 %v5538_v26, %v12820_v34  ;;  %v9494_v41 = vpop.f32.mrb[13].mxu1  ;;  %5918 = vadd.xlane.f32.xlu0 %v5917_v45 }
0x2259   :  { %v5541_v56 = vpop.f32.mrb[14].mxu1  ;;  %v5920_v7 = vsel %vm671_vm3, %v13019_v6, 0.0 }
0x225a   :  { %v13027_v8 = vadd.f32 %v5541_v56, %v12827_v38  ;;  %v9495_v46 = vpop.f32.mrb[15].mxu1  ;;  %5921 = vadd.xlane.f32.xlu1 %v5920_v7  ;;  %v5943_v38 = vpop.permute.xlu1 %5942 }
0x225e   :  { %v13029_v10 = vpop.eup %10297 }
0x225f   :  { %v5546_v27 = vpop.f32.mrb[16].mxu1  ;;  %v5923_v19 = vsel %vm671_vm3, %v13029_v10, 0.0 }
0x2260   :  { %v13034_v34 = vadd.f32 %v5546_v27, %v12838_v0  ;;  %v9498_v31 = vpop.f32.mrb[17].mxu1  ;;  %5924 = vadd.xlane.f32.xlu0 %v5923_v19 }
0x2261   :  { %v5549_v21 = vpop.f32.mrb[18].mxu1 }
0x2262   :  { %v9499_v42 = vpop.f32.mrb[19].mxu1 }
0x226b   :  { %5946 = vrot.lane.b32.xlu1 %v12917_v61, %s10473_s25 }
0x226f   :  { %6157 = vrot.lane.b32.xlu1 %v12480_v22, %s10474_s27 }
0x2273   :  { %6159 = vrot.lane.b32.xlu1 %v12498_v55, %s10474_s27 }
0x2276   :  { %5944 = vrot.lane.b32.xlu0 %v12494_v1, %s10473_s25 }
0x2277   :  { %6151 = vrot.lane.b32.xlu1 %v12476_v16, %s10474_s27 }
0x227a   :  { %6161 = vrot.lane.b32.xlu0 %v12817_v49, %s10474_s27 }
0x227b   :  { %6155 = vrot.lane.b32.xlu1 %v12835_v47, %s10474_s27 }
0x227e   :  { %6153 = vrot.lane.b32.xlu0 %v12492_v2, %s10474_s27 }
0x22c5   :  { %v5682_v0 = vpop.xlane.xlu1 %5681 }
0x22c6   :  { %10299 = vrcp.f32 %v5682_v0 }
0x22c7   :  { %v5685_v25 = vpop.xlane.xlu0 %5684 }
0x22c8   :  { %10301 = vrcp.f32 %v5685_v25 }
0x22cd   :  { %v5688_v36 = vpop.xlane.xlu1 %5687 }
0x22ce   :  { %10303 = vrcp.f32 %v5688_v36 }
0x22d0   :  { %v10300_v51 = vpop.eup %10299 }
0x22d1   :  { %v5691_v57 = vpop.xlane.xlu0 %5690  ;;  %v5700_v17 = vmul.f32 %v10300_v51, %v12977_v48 }
0x22d2   :  { %v10302_v11 = vpop.eup %10301  ;;  %10305 = vrcp.f32 %v5691_v57 }
0x22d3   :  { %v5701_v33 = vmul.f32 %v10302_v11, %v12981_v58  ;;  %v10465_v11 = vld [vmem:[%s13893_s6 + $0x48] sm:$0xff]  }
0x22d5   :  { %v5705_v63 = vpack.c.bf16 %v5701_v33, %v5700_v17  ;;  %v5694_v39 = vpop.xlane.xlu1 %5693 }
0x22d6   :  { %10307 = vrcp.f32 %v5694_v39 }
0x22d7   :  { %9525 = vmatmul.mubr.msk.bf16.vlgmr.msra.gmra.mrb[20].mxu1 %vm671_vm3, %v5705_v63 }
0x22d8   :  { %9555 = vmatpush3.bf16.msra.mxu1 %v5943_v38  ;;  %9528 = vmatprep.mubr.msk.bf16.mxu1 %vm10472_vm0, %v13924_v30  ;;  %v10304_v50 = vpop.eup %10303 }
0x22d9   :  { %9556 = vmatprep.subr.bf16.mxu1 %v13924_v30  ;;  %v5702_v26 = vmul.f32 %v10304_v50, %v12985_v28 }
0x22dc   :  { %v10306_v23 = vpop.eup %10305 }
0x22dd   :  { %v5703_v45 = vmul.f32 %v10306_v23, %v12989_v5  ;;  %v5913_v7 = vpop.xlane.xlu0 %5912 }
0x22df   :  { %v5706_v48 = vpack.c.bf16 %v5703_v45, %v5702_v26  ;;  %v5916_v56 = vpop.xlane.xlu1 %5915 }
0x22e0   :  { %v10308_v41 = vpop.eup %10307  ;;  %10309 = vrcp.f32 %v5916_v56 }
0x22e1   :  { %9529 = vmatmul.mubr.msk.bf16.gmra.mrb[24].mxu1 %vm671_vm3, %v5706_v48  ;;  %v5704_v58 = vmul.f32 %v10308_v41, %v12994_v29  ;;  %10311 = vrcp.f32 %v5913_v7 }
0x22e2   :  { %9532 = vmatprep.mubr.msk.bf16.mxu1 %vm10472_vm0, %v13924_v30 }
0x22e3   :  { %v5707_v46 = vpack.c.bf16 %v5704_v58, %v5704_v58 }
0x22e5   :  { %v5919_v27 = vpop.xlane.xlu0 %5918 }
0x22e7   :  { %v5922_v28 = vpop.xlane.xlu1 %5921 }
0x22e8   :  { %10313 = vrcp.f32 %v5922_v28 }
0x22e9   :  { %9533 = vmatmul.mubr.msk.bf16.gmra.mrb[28].mxu1 %vm671_vm3, %v5707_v46  ;;  %10315 = vrcp.f32 %v5919_v27 }
0x22ea   :  { %9560 = vmatprep.mubr.msk.bf16.mxu1 %vm10472_vm0, %v13924_v30  ;;  %v10310_v19 = vpop.eup %10309 }
0x22eb   :  { %v10312_v21 = vpop.eup %10311  ;;  %v5947_v42 = vpop.permute.xlu1 %5946  ;;  %v5932_v29 = vmul.f32 %v10310_v19, %v13004_v3  ;;  %v10464_v3 = vld [vmem:[%s13893_s6 + $0x40] sm:$0xff]  }
0x22ec   :  { %v5931_v38 = vmul.f32 %v10312_v21, %v13000_v18  ;;  %v5960_v0 = vsel %vm739_vm2, %v5947_v42, 0 }
0x22ed   :  { %v5925_v5 = vpop.xlane.xlu0 %5924 }
0x22ee   :  { %10317 = vrcp.f32 %v5925_v5  ;;  %v5936_v25 = vpack.c.bf16 %v5932_v29, %v5931_v38 }
0x22f1   :  { %v5945_v31 = vpop.permute.xlu0 %5944 }
0x22f2   :  { %9557 = vmatpush3.bf16.msra.mxu1 %v5945_v31  ;;  %v10314_v36 = vpop.eup %10313  ;;  %v6158_v31 = vpop.permute.xlu1 %6157 }
0x22f3   :  { %9558 = vmatprep.subr.bf16.mxu1 %v13924_v30  ;;  %v10316_v51 = vpop.eup %10315  ;;  %v5934_v18 = vmul.f32 %v10314_v36, %v13019_v6  ;;  %v6173_v38 = vsel %vm582_vm1, %v6158_v31, 0 }
0x22f4   :  { %v5933_v57 = vmul.f32 %v10316_v51, %v13015_v43 }
0x22f6   :  { %9559 = vmatpush3.bf16.msra.mxu1 %v5960_v0  ;;  %v5937_v17 = vpack.c.bf16 %v5934_v18, %v5933_v57  ;;  %v6160_v36 = vpop.permute.xlu1 %6159 }
0x22f7   :  { %9588 = vmatprep.subr.bf16.mxu1 %v13924_v30  ;;  %v6176_v57 = vsel %vm582_vm1, %v6160_v36, 0 }
0x22f8   :  { %v10318_v33 = vpop.eup %10317 }
0x22f9   :  { %9561 = vmatmul.mubr.msk.bf16.vlgmr.msra.gmra.mrb[32].mxu1 %vm671_vm3, %v5936_v25  ;;  %v5935_v6 = vmul.f32 %v10318_v33, %v13029_v10  ;;  %v6162_v33 = vpop.permute.xlu0 %6161 }
0x22fa   :  { %9564 = vmatprep.mubr.msk.bf16.mxu1 %vm10472_vm0, %v13924_v30  ;;  %9589 = vmatpush3.bf16.msra.mxu1 %v10464_v3 }
0x22fb   :  { %9590 = vmatprep.subr.bf16.mxu1 %v13924_v30  ;;  %v5938_v63 = vpack.c.bf16 %v5935_v6, %v5935_v6 }
0x22fe   :  { %9591 = vmatpush3.bf16.msra.mxu1 %v10465_v11 }
0x22ff   :  { %9622 = vmatprep.subr.bf16.mxu1 %v13924_v30 }
0x2301   :  { %9565 = vmatmul.mubr.msk.bf16.gmra.mrb[36].mxu1 %vm671_vm3, %v5937_v17 }
0x2302   :  { %9568 = vmatprep.mubr.msk.bf16.mxu1 %vm10472_vm0, %v13924_v30 }
0x2309   :  { %9569 = vmatmul.mubr.msk.bf16.gmra.mrb[40].mxu1 %vm671_vm3, %v5938_v63 }
0x230a   :  { %9592 = vmatprep.mubr.msk.bf16.mxu1 %vm10472_vm0, %v13924_v30 }
0x23aa   :  { %v5754_v43 = vpop.f32.mrb[20].mxu1 }
0x23ab   :  { %v9526_v39 = vpop.f32.mrb[21].mxu1 }
0x23ac   :  { %v5757_v50 = vpop.f32.mrb[22].mxu1  ;;  %v6179_v39 = vsel %vm582_vm1, %v6162_v33, 0 }
0x23ad   :  { %v5776_v23 = vpack.c.bf16 %v5757_v50, %v5754_v43  ;;  %v9527_v26 = vpop.f32.mrb[23].mxu1  ;;  %v6152_v50 = vpop.permute.xlu1 %6151 }
0x23ae   :  { %v10467_v26 = vld [vmem:[%s13893_s6 + $0x68] sm:$0xff]  }
0x23af   :  { %9593 = vmatmul.mubr.msk.bf16.vlgmr.msra.gmra.mrb[44].mxu1 %vm582_vm1, %v5776_v23  ;;  %v10466_v23 = vld [vmem:[%s13893_s6 + $0x60] sm:$0xff]  }
0x23b0   :  { %9596 = vmatprep.mubr.msk.bf16.mxu1 %vm10472_vm0, %v13924_v30 }
0x23b4   :  { %v5762_v45 = vpop.f32.mrb[24].mxu1 }
0x23b5   :  { %v9530_v48 = vpop.f32.mrb[25].mxu1 }
0x23b6   :  { %v5765_v41 = vpop.f32.mrb[26].mxu1  ;;  %v6156_v48 = vpop.permute.xlu1 %6155 }
0x23b7   :  { %v5777_v10 = vpack.c.bf16 %v5765_v41, %v5762_v45  ;;  %v9531_v58 = vpop.f32.mrb[27].mxu1  ;;  %v6154_v45 = vpop.permute.xlu0 %6153 }
0x23b9   :  { %9597 = vmatmul.mubr.msk.bf16.gmra.mrb[48].mxu1 %vm582_vm1, %v5777_v10 }
0x23ba   :  { %9600 = vmatprep.mubr.msk.bf16.mxu1 %vm10472_vm0, %v13924_v30 }
0x23bc   :  { %v5770_v56 = vpop.f32.mrb[28].mxu1 }
0x23bd   :  { %v9534_v7 = vpop.f32.mrb[29].mxu1  ;;  %v5778_v27 = vpack.c.bf16 %v5770_v56, %v5770_v56 }
0x23be   :  { %v5773_v46 = vpop.f32.mrb[30].mxu1 }
0x23bf   :  { %v9535_v28 = vpop.f32.mrb[31].mxu1 }
0x23c1   :  { %9601 = vmatmul.mubr.msk.bf16.gmra.mrb[52].mxu1 %vm582_vm1, %v5778_v27 }
0x23c2   :  { %9628 = vmatprep.mubr.msk.bf16.mxu1 %vm10472_vm0, %v13924_v30 }
0x23cc   :  { %v5996_v5 = vpop.f32.mrb[32].mxu1 }
0x23cd   :  { %v9562_v19 = vpop.f32.mrb[33].mxu1 }
0x23ce   :  { %v5999_v21 = vpop.f32.mrb[34].mxu1 }
0x23cf   :  { %v6018_v42 = vpack.c.bf16 %v5999_v21, %v5996_v5  ;;  %v9563_v29 = vpop.f32.mrb[35].mxu1 }
0x23d1   :  { %9577 = vmatmul.mubr.msk.bf16.vlgmr.msra.gmra.mrb[44].mxu0 %vm582_vm1, %v6018_v42 }
0x23d2   :  { %9605 = vmatpush3.bf16.xpose.msra.mxu0 %v6173_v38  ;;  %9580 = vmatprep.mubr.msk.bf16.mxu0 %vm10472_vm0, %v13924_v30 }
0x23d3   :  { %9606 = vmatprep.subr.bf16.mxu0 %v13924_v30 }
0x23d4   :  { %v6004_v0 = vpop.f32.mrb[36].mxu1 }
0x23d5   :  { %v9566_v25 = vpop.f32.mrb[37].mxu1 }
0x23d6   :  { %v6007_v51 = vpop.f32.mrb[38].mxu1 }
0x23d7   :  { %v6019_v3 = vpack.c.bf16 %v6007_v51, %v6004_v0  ;;  %v9567_v18 = vpop.f32.mrb[39].mxu1 }
0x23d9   :  { %9581 = vmatmul.mubr.msk.bf16.gmra.mrb[48].mxu0 %vm582_vm1, %v6019_v3 }
0x23da   :  { %9607 = vmatpush3.bf16.xpose.msra.mxu0 %v6176_v57  ;;  %9584 = vmatprep.mubr.msk.bf16.mxu0 %vm10472_vm0, %v13924_v30 }
0x23db   :  { %9608 = vmatprep.subr.bf16.mxu0 %v13924_v30 }
0x23dc   :  { %v6012_v11 = vpop.f32.mrb[40].mxu1 }
0x23dd   :  { %v9570_v17 = vpop.f32.mrb[41].mxu1  ;;  %v6020_v63 = vpack.c.bf16 %v6012_v11, %v6012_v11 }
0x23de   :  { %v6015_v6 = vpop.f32.mrb[42].mxu1 }
0x23df   :  { %v9571_v43 = vpop.f32.mrb[43].mxu1 }
0x23e1   :  { %9585 = vmatmul.mubr.msk.bf16.gmra.mrb[52].mxu0 %vm582_vm1, %v6020_v63 }
0x23e2   :  { %9609 = vmatpush3.bf16.xpose.msra.mxu0 %v6179_v39  ;;  %9610 = vmatprep.mubr.msk.bf16.mxu0 %vm10472_vm0, %v13924_v30 }
0x23e3   :  { %9640 = vmatprep.subr.bf16.mxu0 %v13924_v30 }
0x23e9   :  { %9611 = vmatmul.mubr.msk.bf16.vlgmr.msra.gmra.mrb[56].mxu0 %vm582_vm1, %v6152_v50 }
0x23ea   :  { %9614 = vmatprep.mubr.msk.bf16.mxu0 %vm10472_vm0, %v13924_v30  ;;  %9641 = vmatpush3.bf16.msra.mxu0 %v10466_v23 }
0x23eb   :  { %9642 = vmatprep.subr.bf16.mxu0 %v13924_v30 }
0x23ee   :  { %9643 = vmatpush3.bf16.msra.mxu0 %v10467_v26 }
0x23ef   :  { %9674 = vmatprep.subr.bf16.mxu0 %v13924_v30 }
0x23f1   :  { %9615 = vmatmul.mubr.msk.bf16.gmra.mrb[60].mxu0 %vm582_vm1, %v6154_v45 }
0x23f2   :  { %9618 = vmatprep.mubr.msk.bf16.mxu0 %vm10472_vm0, %v13924_v30 }
0x23f9   :  { %9619 = vmatmul.mubr.msk.bf16.gmra.mrb[64].mxu0 %vm582_vm1, %v6156_v48 }
0x23fa   :  { %9644 = vmatprep.mubr.msk.bf16.mxu0 %vm10472_vm0, %v13924_v30 }
0x2482   :  { %v6129_v41 = vpop.f32.mrb[44].mxu1 }
0x2483   :  { %v9594_v10 = vpop.f32.mrb[45].mxu1 }
0x2484   :  { %v6132_v58 = vpop.f32.mrb[46].mxu1 }
0x2485   :  { %v9595_v56 = vpop.f32.mrb[47].mxu1 }
0x248c   :  { %v6137_v7 = vpop.f32.mrb[48].mxu1 }
0x248d   :  { %v9598_v46 = vpop.f32.mrb[49].mxu1 }
0x248e   :  { %v6140_v27 = vpop.f32.mrb[50].mxu1 }
0x248f   :  { %v9599_v28 = vpop.f32.mrb[51].mxu1 }
0x2494   :  { %v6145_v5 = vpop.f32.mrb[52].mxu1 }
0x2495   :  { %v9602_v19 = vpop.f32.mrb[53].mxu1 }
0x2496   :  { %v6148_v31 = vpop.f32.mrb[54].mxu1 }
0x2497   :  { %v9603_v21 = vpop.f32.mrb[55].mxu1 }
0x24a4   :  { %v6064_v42 = vpop.f32.mrb[44].mxu0 }
0x24a5   :  { %v13133_v29 = vadd.f32 %v6129_v41, %v6064_v42  ;;  %v9578_v38 = vpop.f32.mrb[45].mxu0 }
0x24a6   :  { %v6067_v0 = vpop.f32.mrb[46].mxu0 }
0x24a7   :  { %v13135_v25 = vadd.f32 %v6132_v58, %v6067_v0  ;;  %v9579_v36 = vpop.f32.mrb[47].mxu0 }
0x24ac   :  { %v6072_v51 = vpop.f32.mrb[48].mxu0 }
0x24ad   :  { %v13137_v3 = vadd.f32 %v6137_v7, %v6072_v51  ;;  %v9582_v18 = vpop.f32.mrb[49].mxu0 }
0x24ae   :  { %v6075_v57 = vpop.f32.mrb[50].mxu0 }
0x24af   :  { %v13139_v11 = vadd.f32 %v6140_v27, %v6075_v57  ;;  %v9583_v17 = vpop.f32.mrb[51].mxu0 }
0x24b4   :  { %v6080_v33 = vpop.f32.mrb[52].mxu0 }
0x24b5   :  { %v13141_v6 = vadd.f32 %v6145_v5, %v6080_v33  ;;  %v9586_v63 = vpop.f32.mrb[53].mxu0 }
0x24b6   :  { %v6083_v43 = vpop.f32.mrb[54].mxu0 }
0x24b7   :  { %v9587_v39 = vpop.f32.mrb[55].mxu0 }
0x24bc   :  { %v6215_v50 = vpop.f32.mrb[56].mxu0 }
0x24bd   :  { %v6237_v23 = vmul.f32 0.17677669, %v6215_v50  ;;  %v9612_v26 = vpop.f32.mrb[57].mxu0 }
0x24be   :  { %v6218_v45 = vpop.f32.mrb[58].mxu0 }
0x24bf   :  { %v6242_v48 = vadd.f32 %v12933_v32, %v6237_v23  ;;  %v6238_v41 = vmul.f32 0.17677669, %v6218_v45  ;;  %v9613_v10 = vpop.f32.mrb[59].mxu0 }
0x24c1   :  { %v6243_v58 = vadd.f32 %v12933_v32, %v6238_v41  ;;  %v6247_v56 = vsel %vm671_vm3, %v6242_v48, -inf }
0x24c2   :  { %6248 = vmax.xlane.f32.xlu0 %v6247_v56 }
0x24c3   :  { %v6250_v7 = vsel %vm671_vm3, %v6243_v58, -inf }
0x24c4   :  { %6251 = vmax.xlane.f32.xlu1 %v6250_v7  ;;  %v6223_v46 = vpop.f32.mrb[60].mxu0 }
0x24c5   :  { %v6239_v27 = vmul.f32 0.17677669, %v6223_v46  ;;  %v9616_v28 = vpop.f32.mrb[61].mxu0 }
0x24c6   :  { %v6226_v5 = vpop.f32.mrb[62].mxu0 }
0x24c7   :  { %v6244_v19 = vadd.f32 %v12933_v32, %v6239_v27  ;;  %v6240_v31 = vmul.f32 0.17677669, %v6226_v5  ;;  %v9617_v21 = vpop.f32.mrb[63].mxu0 }
0x24c9   :  { %v6245_v42 = vadd.f32 %v12933_v32, %v6240_v31  ;;  %v6253_v38 = vsel %vm671_vm3, %v6244_v19, -inf }
0x24ca   :  { %6254 = vmax.xlane.f32.xlu0 %v6253_v38 }
0x24cb   :  { %v6256_v18 = vsel %vm671_vm3, %v6245_v42, -inf }
0x24cc   :  { %v6231_v0 = vpop.f32.mrb[64].mxu0 }
0x24cd   :  { %v6241_v36 = vmul.f32 0.17677669, %v6231_v0  ;;  %v9620_v51 = vpop.f32.mrb[65].mxu0 }
0x24ce   :  { %6257 = vmax.xlane.f32.xlu0 %v6256_v18  ;;  %v6234_v57 = vpop.f32.mrb[66].mxu0 }
0x24cf   :  { %v6246_v17 = vadd.f32 %v12933_v32, %v6241_v36  ;;  %v9621_v33 = vpop.f32.mrb[67].mxu0 }
0x24d1   :  { %v6259_v63 = vsel %vm671_vm3, %v6246_v17, -inf }
0x24d2   :  { %6260 = vmax.xlane.f32.xlu0 %v6259_v63 }
0x24d5   :  { %6305 = vrot.lane.b32.xlu1 %v12478_v60, %s10474_s27 }
0x254f   :  { %v6249_v43 = vpop.xlane.xlu0 %6248 }
0x2550   :  { %v6262_v39 = vsub.f32 %v6242_v48, %v6249_v43 }
0x2551   :  { %v6252_v50 = vpop.xlane.xlu1 %6251 }
0x2552   :  { %v6267_v23 = vmul.f32 1.442695, %v6262_v39  ;;  %v6263_v26 = vsub.f32 %v6243_v58, %v6252_v50 }
0x2554   :  { %10319 = vpow2.f32 %v6267_v23  ;;  %v6269_v45 = vmul.f32 1.442695, %v6263_v26 }
0x2555   :  { %v6306_v41 = vpop.permute.xlu1 %6305 }
0x2556   :  { %10321 = vpow2.f32 %v6269_v45  ;;  %9623 = vmatpush3.bf16.msra.mxu1 %v6306_v41 }
0x2557   :  { %v6255_v10 = vpop.xlane.xlu0 %6254  ;;  %9624 = vmatprep.subr.bf16.mxu1 %v13924_v30 }
0x2558   :  { %v6264_v56 = vsub.f32 %v6244_v19, %v6255_v10 }
0x255a   :  { %v6271_v7 = vmul.f32 1.442695, %v6264_v56 }
0x255b   :  { %v6258_v46 = vpop.xlane.xlu0 %6257 }
0x255c   :  { %10323 = vpow2.f32 %v6271_v7  ;;  %v6265_v27 = vsub.f32 %v6245_v42, %v6258_v46 }
0x255e   :  { %v10320_v28 = vpop.eup %10319  ;;  %v6273_v5 = vmul.f32 1.442695, %v6265_v27 }
0x255f   :  { %v6261_v31 = vpop.xlane.xlu0 %6260  ;;  %v6277_v48 = vsel %vm671_vm3, %v10320_v28, 0.0 }
0x2560   :  { %v10322_v21 = vpop.eup %10321  ;;  %10325 = vpow2.f32 %v6273_v5  ;;  %v6266_v58 = vsub.f32 %v6246_v17, %v6261_v31  ;;  %6278 = vadd.xlane.f32.xlu1 %v6277_v48 }
0x2561   :  { %v6280_v38 = vsel %vm671_vm3, %v10322_v21, 0.0 }
0x2562   :  { %v6275_v0 = vmul.f32 1.442695, %v6266_v58  ;;  %6281 = vadd.xlane.f32.xlu0 %v6280_v38 }
0x2564   :  { %10327 = vpow2.f32 %v6275_v0  ;;  %v10468_v0 = vld [vmem:[%s13893_s6 + $0x70] sm:$0xff]  }
0x2566   :  { %v10324_v36 = vpop.eup %10323 }
0x2567   :  { %v6283_v19 = vsel %vm671_vm3, %v10324_v36, 0.0 }
0x2568   :  { %6284 = vadd.xlane.f32.xlu1 %v6283_v19 }
0x256a   :  { %v10326_v51 = vpop.eup %10325 }
0x256b   :  { %v6286_v42 = vsel %vm671_vm3, %v10326_v51, 0.0 }
0x256c   :  { %6287 = vadd.xlane.f32.xlu0 %v6286_v42 }
0x256e   :  { %v10328_v18 = vpop.eup %10327 }
0x256f   :  { %v6289_v57 = vsel %vm671_vm3, %v10328_v18, 0.0 }
0x2570   :  { %6290 = vadd.xlane.f32.xlu0 %v6289_v57 }
0x2579   :  { %6309 = vrot.lane.b32.xlu1 %v12917_v61, %s10474_s27 }
0x257d   :  { %6460 = vrot.lane.b32.xlu1 %v12480_v22, %s10475_s23 }
0x2581   :  { %6462 = vrot.lane.b32.xlu1 %v12498_v55, %s10475_s23 }
0x2585   :  { %6464 = vrot.lane.b32.xlu1 %v12817_v49, %s10475_s23 }
0x2586   :  { %6307 = vrot.lane.b32.xlu0 %v12494_v1, %s10474_s27 }
0x2589   :  { %6456 = vrot.lane.b32.xlu1 %v12492_v2, %s10475_s23 }
0x258a   :  { %6454 = vrot.lane.b32.xlu0 %v12476_v16, %s10475_s23 }
0x258e   :  { %6458 = vrot.lane.b32.xlu0 %v12835_v47, %s10475_s23 }
0x25ed   :  { %v6279_v22 = vpop.xlane.xlu1 %6278 }
0x25ef   :  { %v6282_v17 = vpop.xlane.xlu0 %6281 }
0x25f0   :  { %10329 = vrcp.f32 %v6282_v17 }
0x25f1   :  { %10331 = vrcp.f32 %v6279_v22 }
0x25f5   :  { %v6285_v33 = vpop.xlane.xlu1 %6284 }
0x25f9   :  { %v6288_v55 = vpop.xlane.xlu0 %6287  ;;  %v6310_v50 = vpop.permute.xlu1 %6309 }
0x25fa   :  { %10333 = vrcp.f32 %v6288_v55  ;;  %v10330_v49 = vpop.eup %10329  ;;  %v6323_v47 = vsel %vm739_vm2, %v6310_v50, 0 }
0x25fb   :  { %10335 = vrcp.f32 %v6285_v33  ;;  %v10332_v39 = vpop.eup %10331  ;;  %v6298_v2 = vmul.f32 %v10330_v49, %v10322_v21 }
0x25fc   :  { %v6297_v16 = vmul.f32 %v10332_v39, %v10320_v28 }
0x25fd   :  { %v6291_v63 = vpop.xlane.xlu0 %6290  ;;  %v6461_v10 = vpop.permute.xlu1 %6460 }
0x25fe   :  { %10337 = vrcp.f32 %v6291_v63  ;;  %v6302_v23 = vpack.c.bf16 %v6298_v2, %v6297_v16  ;;  %v6476_v7 = vsel %vm582_vm1, %v6461_v10, 0 }
0x2601   :  { %v6308_v43 = vpop.permute.xlu0 %6307  ;;  %v6463_v5 = vpop.permute.xlu1 %6462 }
0x2602   :  { %9625 = vmatpush3.bf16.msra.mxu1 %v6308_v43  ;;  %v6479_v31 = vsel %vm582_vm1, %v6463_v5, 0 }
0x2603   :  { %9626 = vmatprep.subr.bf16.mxu1 %v13924_v30 }
0x2604   :  { %v10334_v26 = vpop.eup %10333 }
0x2605   :  { %v10336_v45 = vpop.eup %10335  ;;  %v6300_v41 = vmul.f32 %v10334_v26, %v10326_v51  ;;  %v6465_v21 = vpop.permute.xlu1 %6464 }
0x2606   :  { %9627 = vmatpush3.bf16.msra.mxu1 %v6323_v47  ;;  %v6299_v56 = vmul.f32 %v10336_v45, %v10324_v36  ;;  %v6482_v58 = vsel %vm582_vm1, %v6465_v21, 0  ;;  %v6455_v38 = vpop.permute.xlu0 %6454 }
0x2607   :  { %9656 = vmatprep.subr.bf16.mxu1 %v13924_v30 }
0x2608   :  { %v6303_v46 = vpack.c.bf16 %v6300_v41, %v6299_v56  ;;  %v10338_v27 = vpop.eup %10337 }
0x2609   :  { %9629 = vmatmul.mubr.msk.bf16.vlgmr.msra.gmra.mrb[56].mxu1 %vm671_vm3, %v6302_v23  ;;  %v6301_v28 = vmul.f32 %v10338_v27, %v10328_v18  ;;  %v6457_v36 = vpop.permute.xlu1 %6456 }
0x260a   :  { %9632 = vmatprep.mubr.msk.bf16.mxu1 %vm10472_vm0, %v13924_v30  ;;  %v6459_v19 = vpop.permute.xlu0 %6458 }
0x260b   :  { %v6304_v48 = vpack.c.bf16 %v6301_v28, %v6301_v28 }
0x260f   :  { %9657 = vmatpush3.bf16.xpose.msra.mxu1 %v6476_v7 }
0x2610   :  { %9658 = vmatprep.subr.bf16.mxu1 %v13924_v30 }
0x2611   :  { %9633 = vmatmul.mubr.msk.bf16.gmra.mrb[60].mxu1 %vm671_vm3, %v6303_v46 }
0x2612   :  { %9636 = vmatprep.mubr.msk.bf16.mxu1 %vm10472_vm0, %v13924_v30 }
0x2617   :  { %9659 = vmatpush3.bf16.xpose.msra.mxu1 %v6479_v31 }
0x2618   :  { %9660 = vmatprep.subr.bf16.mxu1 %v13924_v30 }
0x2619   :  { %9637 = vmatmul.mubr.msk.bf16.gmra.mrb[64].mxu1 %vm671_vm3, %v6304_v48 }
0x261a   :  { %9662 = vmatprep.mubr.msk.bf16.mxu1 %vm10472_vm0, %v13924_v30 }
0x261f   :  { %9661 = vmatpush3.bf16.xpose.msra.mxu1 %v6482_v58 }
0x2620   :  { %9692 = vmatprep.subr.bf16.mxu1 %v13924_v30 }
0x2626   :  { %9663 = vmatmul.mubr.msk.bf16.vlgmr.msra.gmra.mrb[68].mxu1 %vm582_vm1, %v6455_v38 }
0x2627   :  { %9666 = vmatprep.mubr.msk.bf16.mxu1 %vm10472_vm0, %v13924_v30  ;;  %9693 = vmatpush3.bf16.msra.mxu1 %v10468_v0 }
0x2628   :  { %9694 = vmatprep.subr.bf16.mxu1 %v13924_v30 }
0x262b   :  { %9695 = vmatpush3.bf16.msra.mxu1 %v12906_v4 }
0x262e   :  { %9667 = vmatmul.mubr.msk.bf16.gmra.mrb[72].mxu1 %vm582_vm1, %v6457_v36 }
0x262f   :  { %9670 = vmatprep.mubr.msk.bf16.mxu1 %vm10472_vm0, %v13924_v30 }
0x2636   :  { %9671 = vmatmul.mubr.msk.bf16.gmra.mrb[76].mxu1 %vm582_vm1, %v6459_v19 }
0x2637   :  { %9696 = vmatprep.mubr.msk.bf16.mxu1 %vm10472_vm0, %v13924_v30 }
0x26dc   :  { %v6359_v51 = vpop.f32.mrb[56].mxu1 }
0x26dd   :  { %v9630_v42 = vpop.f32.mrb[57].mxu1 }
0x26de   :  { %v6362_v18 = vpop.f32.mrb[58].mxu1 }
0x26df   :  { %v6381_v57 = vpack.c.bf16 %v6362_v18, %v6359_v51  ;;  %v9631_v17 = vpop.f32.mrb[59].mxu1 }
0x26e1   :  { %9645 = vmatmul.mubr.msk.bf16.vlgmr.msra.gmra.mrb[68].mxu0 %vm582_vm1, %v6381_v57  ;;  %v10469_v57 = vld [vmem:[%s13892_s1 + $0x1] ss:$0 sm:$0xff] }
0x26e2   :  { %9648 = vmatprep.mubr.msk.bf16.mxu0 %vm10472_vm0, %v13924_v30 }
0x26e4   :  { %v6367_v4 = vpop.f32.mrb[60].mxu1 }
0x26e5   :  { %v9634_v22 = vpop.f32.mrb[61].mxu1 }
0x26e6   :  { %v6370_v55 = vpop.f32.mrb[62].mxu1 }
0x26e7   :  { %v6382_v33 = vpack.c.bf16 %v6370_v55, %v6367_v4  ;;  %v9635_v63 = vpop.f32.mrb[63].mxu1 }
0x26e9   :  { %9649 = vmatmul.mubr.msk.bf16.gmra.mrb[72].mxu0 %vm582_vm1, %v6382_v33 }
0x26ea   :  { %9652 = vmatprep.mubr.msk.bf16.mxu0 %vm10472_vm0, %v13924_v30 }
0x26ec   :  { %v6375_v49 = vpop.f32.mrb[64].mxu1 }
0x26ed   :  { %v9638_v43 = vpop.f32.mrb[65].mxu1  ;;  %v6383_v50 = vpack.c.bf16 %v6375_v49, %v6375_v49 }
0x26ee   :  { %v6378_v39 = vpop.f32.mrb[66].mxu1 }
0x26ef   :  { %v9639_v2 = vpop.f32.mrb[67].mxu1 }
0x26f1   :  { %9653 = vmatmul.mubr.msk.bf16.gmra.mrb[76].mxu0 %vm582_vm1, %v6383_v50 }
0x26f2   :  { %9680 = vmatprep.mubr.msk.bf16.mxu0 %vm10472_vm0, %v13924_v30 }
0x26f9   :  { %v6518_v16 = vpop.f32.mrb[68].mxu1 }
0x26fa   :  { %v6540_v47 = vmul.f32 0.17677669, %v6518_v16  ;;  %v9664_v23 = vpop.f32.mrb[69].mxu1 }
0x26fb   :  { %v6521_v26 = vpop.f32.mrb[70].mxu1 }
0x26fc   :  { %v6545_v45 = vadd.f32 %v12933_v32, %v6540_v47  ;;  %v6541_v41 = vmul.f32 0.17677669, %v6521_v26  ;;  %v9665_v10 = vpop.f32.mrb[71].mxu1 }
0x26fe   :  { %v6546_v56 = vadd.f32 %v12933_v32, %v6541_v41  ;;  %v6550_v7 = vsel %vm671_vm3, %v6545_v45, -inf }
0x26ff   :  { %6551 = vmax.xlane.f32.xlu1 %v6550_v7 }
0x2700   :  { %v6553_v46 = vsel %vm671_vm3, %v6546_v56, -inf }
0x2701   :  { %6554 = vmax.xlane.f32.xlu0 %v6553_v46  ;;  %v6526_v27 = vpop.f32.mrb[72].mxu1 }
0x2702   :  { %v6542_v28 = vmul.f32 0.17677669, %v6526_v27  ;;  %v9668_v5 = vpop.f32.mrb[73].mxu1 }
0x2703   :  { %v6529_v31 = vpop.f32.mrb[74].mxu1 }
0x2704   :  { %v6547_v48 = vadd.f32 %v12933_v32, %v6542_v28  ;;  %v6543_v21 = vmul.f32 0.17677669, %v6529_v31  ;;  %v9669_v58 = vpop.f32.mrb[75].mxu1 }
0x2706   :  { %v6548_v38 = vadd.f32 %v12933_v32, %v6543_v21  ;;  %v6556_v0 = vsel %vm671_vm3, %v6547_v48, -inf }
0x2707   :  { %6557 = vmax.xlane.f32.xlu0 %v6556_v0 }
0x2708   :  { %v6559_v42 = vsel %vm671_vm3, %v6548_v38, -inf }
0x2709   :  { %v6534_v36 = vpop.f32.mrb[76].mxu1 }
0x270a   :  { %v6544_v19 = vmul.f32 0.17677669, %v6534_v36  ;;  %v9672_v51 = vpop.f32.mrb[77].mxu1 }
0x270b   :  { %6560 = vmax.xlane.f32.xlu0 %v6559_v42  ;;  %v6537_v18 = vpop.f32.mrb[78].mxu1 }
0x270c   :  { %v6549_v17 = vadd.f32 %v10469_v57, %v6544_v19  ;;  %v9673_v4 = vpop.f32.mrb[79].mxu1 }
0x270e   :  { %v6562_v22 = vsel %vm671_vm3, %v6549_v17, -inf }
0x270f   :  { %6563 = vmax.xlane.f32.xlu1 %v6562_v22 }
0x2720   :  { %6608 = vrot.lane.b32.xlu1 %v12478_v60, %s10475_s23 }
0x278c   :  { %v6552_v32 = vpop.xlane.xlu1 %6551 }
0x278d   :  { %v6565_v55 = vsub.f32 %v6545_v45, %v6552_v32 }
0x278e   :  { %v6555_v33 = vpop.xlane.xlu0 %6554 }
0x278f   :  { %v6570_v63 = vmul.f32 1.442695, %v6565_v55  ;;  %v6566_v49 = vsub.f32 %v6546_v56, %v6555_v33 }
0x2791   :  { %10339 = vpow2.f32 %v6570_v63  ;;  %v6572_v43 = vmul.f32 1.442695, %v6566_v49 }
0x2793   :  { %10341 = vpow2.f32 %v6572_v43 }
0x2794   :  { %v6558_v39 = vpop.xlane.xlu0 %6557 }
0x2795   :  { %v6567_v50 = vsub.f32 %v6547_v48, %v6558_v39 }
0x2797   :  { %v6574_v2 = vmul.f32 1.442695, %v6567_v50 }
0x2798   :  { %v6561_v16 = vpop.xlane.xlu0 %6560 }
0x2799   :  { %10343 = vpow2.f32 %v6574_v2  ;;  %v6568_v47 = vsub.f32 %v6548_v38, %v6561_v16 }
0x279b   :  { %v13232_v23 = vpop.eup %10339  ;;  %v6576_v26 = vmul.f32 1.442695, %v6568_v47 }
0x279c   :  { %v6564_v41 = vpop.xlane.xlu1 %6563  ;;  %v6580_v60 = vsel %vm671_vm3, %v13232_v23, 0.0 }
0x279d   :  { %v13236_v45 = vpop.eup %10341  ;;  %10345 = vpow2.f32 %v6576_v26  ;;  %v6569_v10 = vsub.f32 %v6549_v17, %v6564_v41  ;;  %6581 = vadd.xlane.f32.xlu0 %v6580_v60 }
0x279e   :  { %v6583_v56 = vsel %vm671_vm3, %v13236_v45, 0.0 }
0x279f   :  { %v6578_v7 = vmul.f32 1.442695, %v6569_v10  ;;  %6584 = vadd.xlane.f32.xlu1 %v6583_v56 }
0x27a0   :  { %v6609_v46 = vpop.permute.xlu1 %6608 }
0x27a1   :  { %10347 = vpow2.f32 %v6578_v7  ;;  %9675 = vmatpush3.bf16.msra.mxu0 %v6609_v46 }
0x27a2   :  { %9676 = vmatprep.subr.bf16.mxu0 %v13924_v30 }
0x27a3   :  { %v13241_v27 = vpop.eup %10343 }
0x27a4   :  { %v6586_v28 = vsel %vm671_vm3, %v13241_v27, 0.0 }
0x27a5   :  { %6587 = vadd.xlane.f32.xlu0 %v6586_v28 }
0x27a7   :  { %v13245_v5 = vpop.eup %10345 }
0x27a8   :  { %v6589_v31 = vsel %vm671_vm3, %v13245_v5, 0.0 }
0x27a9   :  { %6590 = vadd.xlane.f32.xlu1 %v6589_v31 }
0x27ab   :  { %v13249_v48 = vpop.eup %10347 }
0x27ac   :  { %v6592_v21 = vsel %vm671_vm3, %v13249_v48, 0.0 }
0x27ad   :  { %6593 = vadd.xlane.f32.xlu0 %v6592_v21 }
0x27b4   :  { %v6427_v58 = vpop.f32.mrb[68].mxu0 }
0x27b5   :  { %v13254_v38 = vadd.f32 %v6427_v58, %v13133_v29  ;;  %v9646_v0 = vpop.f32.mrb[69].mxu0 }
0x27b6   :  { %v6430_v36 = vpop.f32.mrb[70].mxu0 }
0x27b7   :  { %v13257_v19 = vadd.f32 %v6430_v36, %v13135_v25  ;;  %v9647_v51 = vpop.f32.mrb[71].mxu0 }
0x27ba   :  { %6612 = vrot.lane.b32.xlu1 %v12917_v61, %s10475_s23 }
0x27bc   :  { %v6435_v42 = vpop.f32.mrb[72].mxu0 }
0x27bd   :  { %v13262_v18 = vadd.f32 %v6435_v42, %v13137_v3  ;;  %v9650_v57 = vpop.f32.mrb[73].mxu0  ;;  %v13275_v3 = vld [vmem:[%s13894_s7 + $0x1] ss:$0 sm:$0xff] }
0x27be   :  { %v6438_v17 = vpop.f32.mrb[74].mxu0  ;;  %v6766_v33 = vadd.f32 %v13275_v3, %v13013_v9  ;;  %v6767_v63 = vadd.f32 %v13275_v3, %v13022_v20 }
0x27bf   :  { %v13265_v4 = vadd.f32 %v6438_v17, %v13139_v11  ;;  %v9651_v29 = vpop.f32.mrb[75].mxu0  ;;  %v6765_v11 = vadd.f32 %v13275_v3, %v13007_v37  ;;  %v6769_v37 = vadd.f32 %v13275_v3, %v13034_v34 }
0x27c0   :  { %v13290_v49 = vadd.f32 %v6766_v33, %v12277_v14 }
0x27c1   :  { %v13304_v9 = vadd.f32 %v6769_v37, %v12312_v52 }
0x27c3   :  { %6610 = vrot.lane.b32.xlu0 %v12494_v1, %s10475_s23  ;;  %v6768_v1 = vadd.f32 %v13275_v3, %v13027_v8 }
0x27c4   :  { %v6443_v22 = vpop.f32.mrb[76].mxu0 }
0x27c5   :  { %v13270_v25 = vadd.f32 %v6443_v22, %v13141_v6  ;;  %v9654_v32 = vpop.f32.mrb[77].mxu0  ;;  %v13284_v6 = vadd.f32 %v6765_v11, %v12274_v13  ;;  %v13293_v43 = vadd.f32 %v6768_v1, %v12292_v24  ;;  %v13300_v13 = vadd.f32 %v6767_v63, %v12289_v44 }
0x27c6   :  { %v6446_v55 = vpop.f32.mrb[78].mxu0 }
0x27c7   :  { %v9655_v61 = vpop.f32.mrb[79].mxu0 }
0x27de   :  { %6789 = vadd.xlane.f32.xlu1 %v13284_v6 }
0x27e2   :  { %6791 = vadd.xlane.f32.xlu0 %v13290_v49  ;;  %6795 = vadd.xlane.f32.xlu1 %v13293_v43 }
0x27e6   :  { %6793 = vadd.xlane.f32.xlu0 %v13300_v13 }
0x27ea   :  { %6797 = vadd.xlane.f32.xlu0 %v13304_v9 }
0x282a   :  { %v6582_v24 = vpop.xlane.xlu0 %6581 }
0x282c   :  { %v6585_v14 = vpop.xlane.xlu1 %6584 }
0x282d   :  { %10349 = vrcp.f32 %v6585_v14 }
0x282e   :  { %10351 = vrcp.f32 %v6582_v24 }
0x2832   :  { %v6588_v20 = vpop.xlane.xlu0 %6587 }
0x2836   :  { %v6591_v8 = vpop.xlane.xlu1 %6590 }
0x2837   :  { %10353 = vrcp.f32 %v6591_v8  ;;  %v10350_v50 = vpop.eup %10349 }
0x2838   :  { %10355 = vrcp.f32 %v6588_v20  ;;  %v10352_v44 = vpop.eup %10351  ;;  %v6601_v16 = vmul.f32 %v10350_v50, %v13236_v45 }
0x2839   :  { %v6600_v52 = vmul.f32 %v10352_v44, %v13232_v23 }
0x283a   :  { %v6594_v39 = vpop.xlane.xlu0 %6593  ;;  %v6613_v2 = vpop.permute.xlu1 %6612 }
0x283b   :  { %v6626_v47 = vsel %vm739_vm2, %v6613_v2, 0  ;;  %10357 = vrcp.f32 %v6594_v39  ;;  %v6605_v26 = vpack.c.bf16 %v6601_v16, %v6600_v52 }
0x283e   :  { %v6611_v34 = vpop.permute.xlu0 %6610 }
0x283f   :  { %9677 = vmatpush3.bf16.msra.mxu0 %v6611_v34 }
0x2840   :  { %9678 = vmatprep.subr.bf16.mxu0 %v13924_v30 }
0x2841   :  { %v10354_v41 = vpop.eup %10353 }
0x2842   :  { %v10356_v60 = vpop.eup %10355  ;;  %v6603_v10 = vmul.f32 %v10354_v41, %v13245_v5 }
0x2843   :  { %9679 = vmatpush3.bf16.msra.mxu0 %v6626_v47  ;;  %v6602_v45 = vmul.f32 %v10356_v60, %v13241_v27 }
0x2845   :  { %v6606_v56 = vpack.c.bf16 %v6603_v10, %v6602_v45  ;;  %v10358_v7 = vpop.eup %10357 }
0x2846   :  { %9681 = vmatmul.mubr.msk.bf16.vlgmr.msra.gmra.mrb[80].mxu0 %vm671_vm3, %v6605_v26  ;;  %v6604_v23 = vmul.f32 %v10358_v7, %v13249_v48 }
0x2847   :  { %9684 = vmatprep.mubr.msk.bf16.mxu0 %vm10472_vm0, %v13924_v30 }
0x2848   :  { %v6607_v46 = vpack.c.bf16 %v6604_v23, %v6604_v23 }
0x284e   :  { %9685 = vmatmul.mubr.msk.bf16.gmra.mrb[84].mxu0 %vm671_vm3, %v6606_v56 }
0x284f   :  { %9688 = vmatprep.mubr.msk.bf16.mxu0 %vm10472_vm0, %v13924_v30 }
0x2856   :  { %9689 = vmatmul.mubr.msk.bf16.gmra.mrb[88].mxu0 %vm671_vm3, %v6607_v46 }
0x2857   :  { %7078 = vmatprep.mubr.bf16.mxu0 %v13922_v59 }
0x286b   :  { %v6790_v8 = vpop.xlane.xlu1 %6789 }
0x286c   :  { %v6809_v44 = vmul.f32 0.0078125, %v6790_v8 }
0x286e   :  { %v13349_v47 = vsub.f32 %v13284_v6, %v6809_v44 }
0x286f   :  { %v6792_v37 = vpop.xlane.xlu0 %6791  ;;  %v6796_v56 = vpop.xlane.xlu1 %6795 }
0x2870   :  { %v6810_v10 = vmul.f32 0.0078125, %v6792_v37 }
0x2919   :  { %v6662_v28 = vpop.f32.mrb[80].mxu0 }
0x291a   :  { %v9682_v31 = vpop.f32.mrb[81].mxu0 }
0x291b   :  { %v6665_v21 = vpop.f32.mrb[82].mxu0  ;;  %v13364_v31 = vsub.f32 %v13290_v49, %v6810_v10 }
0x291c   :  { %v6684_v5 = vpack.c.bf16 %v6665_v21, %v6662_v28  ;;  %v9683_v58 = vpop.f32.mrb[83].mxu0  ;;  %v6812_v28 = vmul.f32 0.0078125, %v6796_v56 }
0x291d   :  { %v6830_v49 = vmul.f32 %v13364_v31, %v13364_v31  ;;  %v9896_v58 = vld [vmem:[%s13895_s10 + $0x94] ss:$8 sps:$4 sm:$0xff]  }
0x291e   :  { %9697 = vmatmul.mubr.msk.bf16.vlgmr.msra.gmra.mrb[80].mxu1 %vm582_vm1, %v6684_v5  ;;  %v9891_v5 = vld [vmem:[%s13895_s10 + $0x80] ss:$8 sps:$4 sm:$0xff]  }
0x291f   :  { %9700 = vmatprep.mubr.msk.bf16.mxu1 %vm10472_vm0, %v13924_v30 }
0x2921   :  { %v6670_v27 = vpop.f32.mrb[84].mxu0 }
0x2922   :  { %v9686_v0 = vpop.f32.mrb[85].mxu0 }
0x2923   :  { %v6673_v36 = vpop.f32.mrb[86].mxu0  ;;  %v9899_v0 = vld [vmem:[%s13895_s10 + $0xa4] ss:$8 sps:$4 sm:$0xff]  }
0x2924   :  { %v6685_v51 = vpack.c.bf16 %v6673_v36, %v6670_v27  ;;  %v9687_v48 = vpop.f32.mrb[87].mxu0  ;;  %v9894_v27 = vld [vmem:[%s13895_s10 + $0x90] ss:$8 sps:$4 sm:$0xff]   ;;  %v9897_v36 = vld [vmem:[%s13895_s10 + $0xa0] ss:$8 sps:$4 sm:$0xff]  }
0x2925   :  { %v9900_v48 = vld [vmem:[%s13895_s10 + $0xb0] ss:$8 sps:$4 sm:$0xff]  }
0x2926   :  { %9701 = vmatmul.mubr.msk.bf16.gmra.mrb[84].mxu1 %vm582_vm1, %v6685_v51  ;;  %v9902_v51 = vld [vmem:[%s13895_s10 + $0xb4] ss:$8 sps:$4 sm:$0xff]  }
0x2927   :  { %9704 = vmatprep.mubr.msk.bf16.mxu1 %vm10472_vm0, %v13924_v30 }
0x2929   :  { %v6678_v42 = vpop.f32.mrb[88].mxu0 }
0x292a   :  { %v9690_v57 = vpop.f32.mrb[89].mxu0  ;;  %v6686_v29 = vpack.c.bf16 %v6678_v42, %v6678_v42  ;;  %v9905_v42 = vld [vmem:[%s13895_s10 + $0xc4] ss:$8 sps:$4 sm:$0xff]  }
0x292b   :  { %v6681_v17 = vpop.f32.mrb[90].mxu0  ;;  %v9903_v57 = vld [vmem:[%s13895_s10 + $0xc0] ss:$8 sps:$4 sm:$0xff]  }
0x292c   :  { %v9691_v22 = vpop.f32.mrb[91].mxu0  ;;  %v9908_v17 = vld [vmem:[%s13895_s10 + $0xd4] ss:$8 sps:$4 sm:$0xff]  }
0x292d   :  { %v9911_v22 = vld [vmem:[%s13895_s10 + $0xe4] ss:$8 sps:$4 sm:$0xff]  }
0x292e   :  { %9705 = vmatmul.mubr.msk.bf16.gmra.mrb[88].mxu1 %vm582_vm1, %v6686_v29  ;;  %v9906_v29 = vld [vmem:[%s13895_s10 + $0xd0] ss:$8 sps:$4 sm:$0xff]  }
0x29f1   :  { %v6730_v32 = vpop.f32.mrb[80].mxu1 }
0x29f2   :  { %v6752_v55 = vadd.f32 %v6730_v32, %v13254_v38  ;;  %v9698_v61 = vpop.f32.mrb[81].mxu1  ;;  %v9909_v32 = vld [vmem:[%s13895_s10 + $0xe0] ss:$8 sps:$4 sm:$0xff]  }
0x29f3   :  { %v6733_v11 = vpop.f32.mrb[82].mxu1  ;;  %v9912_v61 = vld [vmem:[%s13895_s10 + $0xf0] ss:$8 sps:$4 sm:$0xff]  }
0x29f4   :  { %v6770_v33 = vadd.f32 %v13275_v3, %v6752_v55  ;;  %v6753_v1 = vadd.f32 %v6733_v11, %v13257_v19  ;;  %v9699_v63 = vpop.f32.mrb[83].mxu1  ;;  %v6794_v19 = vpop.xlane.xlu0 %6793  ;;  %v9914_v55 = vld [vmem:[%s13895_s10 + $0xf4] ss:$8 sps:$4 sm:$0xff]  }
0x29f6   :  { %v6771_v14 = vadd.f32 %v13275_v3, %v6753_v1  ;;  %v13334_v24 = vadd.f32 %v6770_v33, %v12315_v53 }
0x29f8   :  { %6799 = vadd.xlane.f32.xlu1 %v13334_v24  ;;  %v13338_v20 = vadd.f32 %v6771_v14, %v12396_v12  ;;  %v6798_v41 = vpop.xlane.xlu0 %6797 }
0x29f9   :  { %v6738_v38 = vpop.f32.mrb[84].mxu1  ;;  %v6813_v6 = vmul.f32 0.0078125, %v6798_v41 }
0x29fa   :  { %v6754_v39 = vadd.f32 %v6738_v38, %v13262_v18  ;;  %6801 = vadd.xlane.f32.xlu0 %v13338_v20  ;;  %v9702_v50 = vpop.f32.mrb[85].mxu1  ;;  %v6811_v18 = vmul.f32 0.0078125, %v6794_v19 }
0x29fb   :  { %v6741_v34 = vpop.f32.mrb[86].mxu1  ;;  %v13370_v21 = vsub.f32 %v13304_v9, %v6813_v6 }
0x29fc   :  { %v6772_v2 = vadd.f32 %v13275_v3, %v6754_v39  ;;  %v6755_v53 = vadd.f32 %v6741_v34, %v13265_v4  ;;  %v9703_v16 = vpop.f32.mrb[87].mxu1  ;;  %v13358_v7 = vsub.f32 %v13300_v13, %v6811_v18  ;;  %v13376_v13 = vsub.f32 %v13293_v43, %v6812_v28  ;;  %v9893_v43 = vld [vmem:[%s13895_s10 + $0x84] ss:$8 sps:$4 sm:$0xff]  }
0x29fd   :  { %7046 = vmatprep.subr.bf16.mxu0 %v9893_v43 }
0x29fe   :  { %v6773_v52 = vadd.f32 %v13275_v3, %v6755_v53  ;;  %v13346_v12 = vadd.f32 %v6772_v2, %v12399_v15  ;;  %v6832_v9 = vmul.f32 %v13376_v13, %v13376_v13  ;;  %7047 = vmatpush1.bf16.msra.mxu0 %v9891_v5  ;;  %v13469_v5 = vld [vmem:[%s13897_s9 + $0x1] ss:$0 sm:$0xff] }
0x29ff   :  { %7048 = vmatprep.subr.bf16.mxu0 %v9896_v58 }
0x2a00   :  { %6803 = vadd.xlane.f32.xlu1 %v13346_v12  ;;  %v13353_v26 = vadd.f32 %v6773_v52, %v12417_v62  ;;  %v6829_v62 = vmul.f32 %v13349_v47, %v13349_v47 }
0x2a01   :  { %v6746_v60 = vpop.f32.mrb[88].mxu1 }
0x2a02   :  { %v6756_v4 = vadd.f32 %v6746_v60, %v13270_v25  ;;  %6805 = vadd.xlane.f32.xlu0 %v13353_v26  ;;  %v9706_v45 = vpop.f32.mrb[89].mxu1  ;;  %7049 = vmatpush1.bf16.msra.mxu0 %v9894_v27 }
0x2a03   :  { %v6749_v15 = vpop.f32.mrb[90].mxu1  ;;  %7050 = vmatprep.subr.bf16.mxu0 %v9899_v0 }
0x2a04   :  { %v6774_v23 = vadd.f32 %v13275_v3, %v6756_v4  ;;  %v9707_v46 = vpop.f32.mrb[91].mxu1  ;;  %v6831_v3 = vmul.f32 %v13358_v7, %v13358_v7 }
0x2a06   :  { %6839 = vadd.xlane.f32.xlu0 %v6829_v62  ;;  %v13367_v25 = vadd.f32 %v6774_v23, %v12420_v54  ;;  %v6833_v54 = vmul.f32 %v13370_v21, %v13370_v21  ;;  %7051 = vmatpush1.bf16.msra.mxu0 %v9897_v36 }
0x2a07   :  { %7052 = vmatprep.subr.bf16.mxu0 %v9902_v51 }
0x2a08   :  { %6807 = vadd.xlane.f32.xlu1 %v13367_v25 }
0x2a0a   :  { %6843 = vadd.xlane.f32.xlu0 %v6831_v3  ;;  %7053 = vmatpush1.bf16.msra.mxu0 %v9900_v48 }
0x2a0b   :  { %7054 = vmatprep.subr.bf16.mxu0 %v9905_v42 }
0x2a0c   :  { %6841 = vadd.xlane.f32.xlu1 %v6830_v49 }
0x2a0e   :  { %6847 = vadd.xlane.f32.xlu0 %v6833_v54  ;;  %7055 = vmatpush1.bf16.msra.mxu0 %v9903_v57 }
0x2a0f   :  { %7056 = vmatprep.subr.bf16.mxu0 %v9908_v17  ;;  %v9916_v17 = vld [vmem:[%s13898_s12 + $0x80] sm:$0xff]  }
0x2a10   :  { %6845 = vadd.xlane.f32.xlu1 %v6832_v9 }
0x2a12   :  { %7057 = vmatpush1.bf16.msra.mxu0 %v9906_v29 }
0x2a13   :  { %7058 = vmatprep.subr.bf16.mxu0 %v9911_v22  ;;  %v9917_v22 = vld [vmem:[%s13898_s12 + $0xc8] sm:$0xff]  }
0x2a16   :  { %7059 = vmatpush1.bf16.msra.mxu0 %v9909_v32  ;;  %v9918_v32 = vld [vmem:[%s13898_s12 + $0x88] sm:$0xff]  }
0x2a17   :  { %7060 = vmatprep.subr.bf16.mxu0 %v9914_v55 }
0x2a1a   :  { %7061 = vmatpush1.bf16.msra.mxu0 %v9912_v61  ;;  %v9919_v61 = vld [vmem:[%s13898_s12 + $0xd0] sm:$0xff]  }
0x2a1b   :  { %9708 = vmatprep.subr.bf16.mxu0 %v13924_v30 }
0x2a85   :  { %v6800_v11 = vpop.xlane.xlu1 %6799 }
0x2a86   :  { %v6814_v33 = vmul.f32 0.0078125, %v6800_v11  ;;  %v9920_v11 = vld [vmem:[%s13898_s12 + $0x90] sm:$0xff]  }
0x2a87   :  { %v6802_v1 = vpop.xlane.xlu0 %6801 }
0x2a88   :  { %v13434_v63 = vsub.f32 %v13334_v24, %v6814_v33  ;;  %v6815_v37 = vmul.f32 0.0078125, %v6802_v1  ;;  %v9921_v1 = vld [vmem:[%s13898_s12 + $0xd8] sm:$0xff]  }
0x2a8a   :  { %v13437_v14 = vsub.f32 %v13338_v20, %v6815_v37  ;;  %v6834_v8 = vmul.f32 %v13434_v63, %v13434_v63  ;;  %v9922_v37 = vld [vmem:[%s13898_s12 + $0x98] sm:$0xff]  }
0x2a8c   :  { %6849 = vadd.xlane.f32.xlu1 %v6834_v8  ;;  %v6835_v38 = vmul.f32 %v13437_v14, %v13437_v14 }
0x2a8d   :  { %v6804_v39 = vpop.xlane.xlu1 %6803 }
0x2a8e   :  { %v6816_v50 = vmul.f32 0.0078125, %v6804_v39  ;;  %6851 = vadd.xlane.f32.xlu0 %v6835_v38  ;;  %v9923_v39 = vld [vmem:[%s13898_s12 + $0xe0] sm:$0xff]  }
0x2a8f   :  { %v6806_v19 = vpop.xlane.xlu0 %6805 }
0x2a90   :  { %v13444_v34 = vsub.f32 %v13346_v12, %v6816_v50  ;;  %v6817_v24 = vmul.f32 0.0078125, %v6806_v19  ;;  %v9924_v19 = vld [vmem:[%s13898_s12 + $0xa0] sm:$0xff]  }
0x2a92   :  { %v13447_v44 = vsub.f32 %v13353_v26, %v6817_v24  ;;  %v6836_v20 = vmul.f32 %v13444_v34, %v13444_v34 }
0x2a93   :  { %v6840_v2 = vpop.xlane.xlu0 %6839 }
0x2a94   :  { %v6859_v53 = vmul.f32 0.0078125, %v6840_v2  ;;  %6853 = vadd.xlane.f32.xlu1 %v6836_v20  ;;  %v6837_v16 = vmul.f32 %v13447_v44, %v13447_v44 }
0x2a95   :  { %v6808_v52 = vpop.xlane.xlu1 %6807 }
0x2a96   :  { %v6869_v18 = vadd.f32 1e-12, %v6859_v53  ;;  %v6818_v41 = vmul.f32 0.0078125, %v6808_v52  ;;  %6855 = vadd.xlane.f32.xlu0 %v6837_v16  ;;  %v9925_v53 = vld [vmem:[%s13898_s12 + $0xe8] sm:$0xff]  }
0x2a97   :  { %v6844_v60 = vpop.xlane.xlu0 %6843  ;;  %v9926_v16 = vld [vmem:[%s13898_s12 + $0xa8] sm:$0xff]  }
0x2a98   :  { %10359 = vrsqrt.f32 %v6869_v18  ;;  %v13454_v12 = vsub.f32 %v13367_v25, %v6818_v41  ;;  %v6861_v26 = vmul.f32 0.0078125, %v6844_v60  ;;  %v13462_v25 = vld [vmem:[%s13896_s8 + $0x1] ss:$0 sm:$0xff]  ;;  %v9927_v60 = vld [vmem:[%s13898_s12 + $0xf0] sm:$0xff]  }
0x2a99   :  { %v6842_v10 = vpop.xlane.xlu1 %6841 }
0x2a9a   :  { %v6860_v4 = vmul.f32 0.0078125, %v6842_v10  ;;  %v6838_v45 = vmul.f32 %v13454_v12, %v13454_v12  ;;  %v6871_v56 = vadd.f32 1e-12, %v6861_v26  ;;  %v9928_v10 = vld [vmem:[%s13898_s12 + $0xb0] sm:$0xff]  }
0x2a9b   :  { %v6848_v29 = vpop.xlane.xlu0 %6847 }
0x2a9c   :  { %v6870_v15 = vadd.f32 1e-12, %v6860_v4  ;;  %6857 = vadd.xlane.f32.xlu1 %v6838_v45  ;;  %v6863_v55 = vmul.f32 0.0078125, %v6848_v29 }
0x2a9d   :  { %v6846_v6 = vpop.xlane.xlu1 %6845 }
0x2a9e   :  { %10361 = vrsqrt.f32 %v6870_v15  ;;  %v6862_v23 = vmul.f32 0.0078125, %v6846_v6  ;;  %v6873_v33 = vadd.f32 1e-12, %v6863_v55  ;;  %v9929_v6 = vld [vmem:[%s13898_s12 + $0xf8] sm:$0xff]  }
0x2a9f   :  { %10363 = vrsqrt.f32 %v6871_v56 }
0x2aa0   :  { %v6872_v46 = vadd.f32 1e-12, %v6862_v23  ;;  %v9930_v23 = vld [vmem:[%s13898_s12 + $0xb8] sm:$0xff]  }
0x2aa2   :  { %v10360_v62 = vpop.eup %10359  ;;  %10365 = vrsqrt.f32 %v6872_v46 }
0x2aa3   :  { %v6889_v28 = vmul.f32 %v10360_v62, %v13349_v47  ;;  %10367 = vrsqrt.f32 %v6873_v33 }
0x2aa5   :  { %v6905_v49 = vmul.f32 %v13462_v25, %v6889_v28 }
0x2aa7   :  { %v13473_v47 = vadd.f32 %v13469_v5, %v6905_v49 }
0x2aa8   :  { %v10362_v3 = vpop.eup %10361 }
0x2aa9   :  { %v6890_v54 = vmul.f32 %v10362_v3, %v13364_v31  ;;  %v10364_v9 = vpop.eup %10363 }
0x2aaa   :  { %v6891_v27 = vmul.f32 %v10364_v9, %v13358_v7 }
0x2aab   :  { %v6906_v43 = vmul.f32 %v13462_v25, %v6890_v54 }
0x2aac   :  { %v10366_v58 = vpop.eup %10365  ;;  %v6907_v48 = vmul.f32 %v13462_v25, %v6891_v27 }
0x2aad   :  { %v13477_v0 = vadd.f32 %v13469_v5, %v6906_v43  ;;  %v6892_v36 = vmul.f32 %v10366_v58, %v13376_v13  ;;  %v9915_v13 = vld [vmem:[%s13898_s12 + $0xc0] sm:$0xff]   ;;  %v10368_v18 = vpop.eup %10367 }
0x2aae   :  { %v13489_v7 = vadd.f32 %v13469_v5, %v6907_v48  ;;  %8736 = vmatprep.subr.bf16.mxu1 %v9915_v13  ;;  %v6893_v56 = vmul.f32 %v10368_v18, %v13370_v21 }
0x2aaf   :  { %v6931_v31 = vpack.c.bf16 %v13477_v0, %v13473_v47  ;;  %v6908_v51 = vmul.f32 %v13462_v25, %v6892_v36  ;;  %8737 = vmatpush3.bf16.msra.mxu1 %v9916_v17 }
0x2ab0   :  { %8738 = vmatprep.subr.bf16.mxu1 %v9917_v22  ;;  %v6909_v62 = vmul.f32 %v13462_v25, %v6893_v56 }
0x2ab1   :  { %7079 = vmatmul.mubr.bf16.vlgmr.msra.gmra.mrb[92].mxu0 %v6931_v31  ;;  %v13486_v42 = vadd.f32 %v13469_v5, %v6908_v51 }
0x2ab2   :  { %7088 = vmatprep.mubr.bf16.mxu0 %v13922_v59  ;;  %v13548_v43 = vadd.f32 %v13469_v5, %v6909_v62 }
0x2ab3   :  { %v6932_v57 = vpack.c.bf16 %v13486_v42, %v13489_v7  ;;  %8739 = vmatpush3.bf16.msra.mxu1 %v9918_v32 }
0x2ab4   :  { %8740 = vmatprep.subr.bf16.mxu1 %v9919_v61 }
0x2ab7   :  { %8741 = vmatpush3.bf16.msra.mxu1 %v9920_v11 }
0x2ab8   :  { %8742 = vmatprep.subr.bf16.mxu1 %v9921_v1 }
0x2ab9   :  { %7089 = vmatmul.mubr.bf16.gmra.mrb[96].mxu0 %v6932_v57 }
0x2aba   :  { %7098 = vmatprep.mubr.bf16.mxu0 %v13922_v59 }
0x2abb   :  { %8743 = vmatpush3.bf16.msra.mxu1 %v9922_v37 }
0x2abc   :  { %8744 = vmatprep.subr.bf16.mxu1 %v9923_v39 }
0x2abf   :  { %8745 = vmatpush3.bf16.msra.mxu1 %v9924_v19 }
0x2ac0   :  { %8746 = vmatprep.subr.bf16.mxu1 %v9925_v53 }
0x2ac3   :  { %8747 = vmatpush3.bf16.msra.mxu1 %v9926_v16 }
0x2ac4   :  { %8748 = vmatprep.subr.bf16.mxu1 %v9927_v60 }
0x2ac7   :  { %8749 = vmatpush3.bf16.msra.mxu1 %v9928_v10 }
0x2ac8   :  { %8750 = vmatprep.subr.bf16.mxu1 %v9929_v6 }
0x2acb   :  { %8751 = vmatpush3.bf16.msra.mxu1 %v9930_v23 }
0x2acc   :  { %9736 = vmatprep.subr.bf16.mxu1 %v13924_v30 }
0x2b19   :  { %v6850_v8 = vpop.xlane.xlu1 %6849 }
0x2b1a   :  { %v6864_v38 = vmul.f32 0.0078125, %v6850_v8 }
0x2b1b   :  { %v6852_v50 = vpop.xlane.xlu0 %6851 }
0x2b1c   :  { %v6874_v24 = vadd.f32 1e-12, %v6864_v38  ;;  %v6865_v20 = vmul.f32 0.0078125, %v6852_v50 }
0x2b1e   :  { %10369 = vrsqrt.f32 %v6874_v24  ;;  %v6875_v2 = vadd.f32 1e-12, %v6865_v20 }
0x2b20   :  { %10371 = vrsqrt.f32 %v6875_v2 }
0x2b21   :  { %v6854_v52 = vpop.xlane.xlu1 %6853 }
0x2b22   :  { %v6866_v41 = vmul.f32 0.0078125, %v6854_v52 }
0x2b23   :  { %v6856_v26 = vpop.xlane.xlu0 %6855 }
0x2b24   :  { %v6876_v4 = vadd.f32 1e-12, %v6866_v41  ;;  %v6867_v45 = vmul.f32 0.0078125, %v6856_v26 }
0x2b26   :  { %10373 = vrsqrt.f32 %v6876_v4  ;;  %v6877_v15 = vadd.f32 1e-12, %v6867_v45 }
0x2b28   :  { %v10370_v46 = vpop.eup %10369  ;;  %10375 = vrsqrt.f32 %v6877_v15 }
0x2b29   :  { %v6894_v28 = vmul.f32 %v10370_v46, %v13434_v63  ;;  %v6858_v3 = vpop.xlane.xlu1 %6857 }
0x2b2a   :  { %v10372_v21 = vpop.eup %10371  ;;  %v6868_v49 = vmul.f32 0.0078125, %v6858_v3 }
0x2b2b   :  { %v6910_v54 = vmul.f32 %v13462_v25, %v6894_v28  ;;  %v6895_v27 = vmul.f32 %v10372_v21, %v13437_v14 }
0x2b2c   :  { %v6878_v9 = vadd.f32 1e-12, %v6868_v49 }
0x2b2d   :  { %v13551_v58 = vadd.f32 %v13469_v5, %v6910_v54  ;;  %v6911_v31 = vmul.f32 %v13462_v25, %v6895_v27 }
0x2b2e   :  { %10377 = vrsqrt.f32 %v6878_v9 }
0x2b2f   :  { %v6933_v63 = vpack.c.bf16 %v13551_v58, %v13548_v43  ;;  %v13561_v13 = vadd.f32 %v13469_v5, %v6911_v31 }
0x2b30   :  { %v10374_v36 = vpop.eup %10373 }
0x2b31   :  { %v6896_v51 = vmul.f32 %v10374_v36, %v13444_v34  ;;  %7099 = vmatmul.mubr.bf16.gmra.mrb[100].mxu0 %v6933_v63 }
0x2b32   :  { %v10376_v48 = vpop.eup %10375  ;;  %7108 = vmatprep.mubr.bf16.mxu0 %v13922_v59 }
0x2b33   :  { %v6912_v57 = vmul.f32 %v13462_v25, %v6896_v51  ;;  %v6897_v17 = vmul.f32 %v10376_v48, %v13447_v44 }
0x2b35   :  { %v13564_v14 = vadd.f32 %v13469_v5, %v6912_v57  ;;  %v6913_v34 = vmul.f32 %v13462_v25, %v6897_v17 }
0x2b37   :  { %v6934_v29 = vpack.c.bf16 %v13564_v14, %v13561_v13  ;;  %v13574_v61 = vadd.f32 %v13469_v5, %v6913_v34 }
0x2b38   :  { %v10378_v22 = vpop.eup %10377 }
0x2b39   :  { %v6898_v32 = vmul.f32 %v10378_v22, %v13454_v12  ;;  %7109 = vmatmul.mubr.bf16.gmra.mrb[104].mxu0 %v6934_v29  ;;  %v8312_v12 = vld [vmem:[%s13899_s11 + $0x2] sm:$0x3] }
0x2b3a   :  { %7118 = vmatprep.mubr.bf16.mxu0 %v13922_v59  ;;  %v13587_v59 = vrot.slane %v8312_v12, %v10832_v35 }
0x2b3b   :  { %v6914_v55 = vmul.f32 %v13462_v25, %v6898_v32  ;;  %v13590_v25 = vrot.slane %v8312_v12, %v10839_v40 }
0x2b3d   :  { %v13577_v11 = vadd.f32 %v13469_v5, %v6914_v55 }
0x2b3f   :  { %v6935_v44 = vpack.c.bf16 %v13577_v11, %v13574_v61 }
0x2b41   :  { %7119 = vmatmul.mubr.bf16.gmra.mrb[108].mxu0 %v6935_v44 }
0x2b42   :  { %9724 = vmatprep.mubr.msk.bf16.mxu0 %vm10472_vm0, %v13924_v30 }
0x2b84   :  { %v7080_v33 = vpop.f32.mrb[92].mxu0 }
0x2b85   :  { %v13593_v5 = vadd.f32 %v7080_v33, %v13587_v59  ;;  %v7082_v1 = vpop.f32.mrb[93].mxu0 }
0x2b86   :  { %v13596_v37 = vadd.f32 %v7082_v1, %v13590_v25  ;;  %v7084_v8 = vpop.f32.mrb[94].mxu0 }
0x2b87   :  { %v7149_v38 = vmul.f32 0.044715, %v13593_v5  ;;  %v7085_v39 = vadd.f32 %v7084_v8, %v13587_v59  ;;  %v7086_v50 = vpop.f32.mrb[95].mxu0 }
0x2b88   :  { %v7150_v35 = vmul.f32 0.044715, %v13596_v37  ;;  %v13602_v19 = vadd.f32 %v7086_v50, %v13590_v25 }
0x2b89   :  { %v7169_v40 = vmul.f32 %v7149_v38, %v13593_v5  ;;  %v7151_v24 = vmul.f32 0.044715, %v7085_v39 }
0x2b8a   :  { %v7170_v20 = vmul.f32 %v7150_v35, %v13596_v37  ;;  %v7152_v2 = vmul.f32 0.044715, %v13602_v19 }
0x2b8b   :  { %v7189_v53 = vmul.f32 %v7169_v40, %v13593_v5  ;;  %v7171_v16 = vmul.f32 %v7151_v24, %v7085_v39 }
0x2b8c   :  { %v7190_v52 = vmul.f32 %v7170_v20, %v13596_v37  ;;  %v7172_v18 = vmul.f32 %v7152_v2, %v13602_v19  ;;  %v7090_v41 = vpop.f32.mrb[96].mxu0  ;;  %v7129_v2 = vmul.f32 0.5, %v13593_v5 }
0x2b8d   :  { %v7209_v60 = vadd.f32 %v7189_v53, %v13593_v5  ;;  %v7191_v26 = vmul.f32 %v7171_v16, %v7085_v39  ;;  %v13612_v10 = vadd.f32 %v7090_v41, %v13587_v59  ;;  %v7092_v4 = vpop.f32.mrb[97].mxu0  ;;  %v7131_v53 = vmul.f32 0.5, %v7085_v39 }
0x2b8e   :  { %v7192_v45 = vmul.f32 %v7172_v18, %v13602_v19  ;;  %v13616_v56 = vadd.f32 %v7092_v4, %v13590_v25  ;;  %v7094_v15 = vpop.f32.mrb[98].mxu0  ;;  %v7210_v6 = vadd.f32 %v7190_v52, %v13596_v37  ;;  %v7130_v18 = vmul.f32 0.5, %v13596_v37 }
0x2b8f   :  { %v7229_v23 = vmul.f32 0.7978846, %v7209_v60  ;;  %v7211_v46 = vadd.f32 %v7191_v26, %v7085_v39  ;;  %v7153_v62 = vmul.f32 0.044715, %v13612_v10  ;;  %v7096_v28 = vpop.f32.mrb[99].mxu0  ;;  %v7095_v21 = vadd.f32 %v7094_v15, %v13587_v59 }
0x2b90   :  { %v7154_v3 = vmul.f32 0.044715, %v13616_v56  ;;  %v7097_v49 = vadd.f32 %v7096_v28, %v13590_v25  ;;  %v7212_v54 = vadd.f32 %v7192_v45, %v13602_v19  ;;  %v7230_v63 = vmul.f32 0.7978846, %v7210_v6 }
0x2b91   :  { %10379 = vtanh.f32 %v7229_v23  ;;  %v7231_v9 = vmul.f32 0.7978846, %v7211_v46  ;;  %v7173_v27 = vmul.f32 %v7153_v62, %v13612_v10  ;;  %v7155_v31 = vmul.f32 0.044715, %v7095_v21 }
0x2b92   :  { %v7174_v36 = vmul.f32 %v7154_v3, %v13616_v56  ;;  %v7156_v51 = vmul.f32 0.044715, %v7097_v49  ;;  %v7232_v57 = vmul.f32 0.7978846, %v7212_v54  ;;  %v7132_v4 = vmul.f32 0.5, %v13602_v19 }
0x2b93   :  { %10381 = vtanh.f32 %v7231_v9  ;;  %v7193_v48 = vmul.f32 %v7173_v27, %v13612_v10  ;;  %v7175_v29 = vmul.f32 %v7155_v31, %v7095_v21  ;;  %v7133_v9 = vmul.f32 0.5, %v13612_v10 }
0x2b94   :  { %v7194_v17 = vmul.f32 %v7174_v36, %v13616_v56  ;;  %v7176_v22 = vmul.f32 %v7156_v51, %v7097_v49  ;;  %10383 = vtanh.f32 %v7230_v63  ;;  %v7135_v37 = vmul.f32 0.5, %v7095_v21 }
0x2b95   :  { %v7213_v34 = vadd.f32 %v7193_v48, %v13612_v10  ;;  %10385 = vtanh.f32 %v7232_v57  ;;  %v7195_v32 = vmul.f32 %v7175_v29, %v7095_v21  ;;  %v7134_v63 = vmul.f32 0.5, %v13616_v56 }
0x2b96   :  { %v7196_v55 = vmul.f32 %v7176_v22, %v7097_v49  ;;  %v7214_v44 = vadd.f32 %v7194_v17, %v13616_v56  ;;  %v7136_v19 = vmul.f32 0.5, %v7097_v49 }
0x2b97   :  { %v7233_v12 = vmul.f32 0.7978846, %v7213_v34  ;;  %v7215_v33 = vadd.f32 %v7195_v32, %v7095_v21 }
0x2b98   :  { %v7216_v1 = vadd.f32 %v7196_v55, %v7097_v49  ;;  %v7234_v8 = vmul.f32 0.7978846, %v7214_v44 }
0x2b99   :  { %10387 = vtanh.f32 %v7233_v12  ;;  %v7235_v38 = vmul.f32 0.7978846, %v7215_v33 }
0x2b9a   :  { %v7236_v50 = vmul.f32 0.7978846, %v7216_v1  ;;  %10389 = vtanh.f32 %v7234_v8 }
0x2b9b   :  { %v10380_v35 = vpop.eup %10379  ;;  %10391 = vtanh.f32 %v7235_v38 }
0x2b9c   :  { %v7269_v40 = vadd.f32 1.0, %v10380_v35  ;;  %10393 = vtanh.f32 %v7236_v50 }
0x2b9d   :  { %v10382_v24 = vpop.eup %10381 }
0x2b9e   :  { %v10384_v20 = vpop.eup %10383  ;;  %v7271_v16 = vadd.f32 1.0, %v10382_v24  ;;  %v7289_v60 = vmul.f32 %v7269_v40, %v7129_v2 }
0x2b9f   :  { %v10386_v52 = vpop.eup %10385  ;;  %v7270_v41 = vadd.f32 1.0, %v10384_v20 }
0x2ba0   :  { %v7291_v26 = vmul.f32 %v7271_v16, %v7131_v53  ;;  %v7272_v45 = vadd.f32 1.0, %v10386_v52 }
0x2ba1   :  { %v7290_v6 = vmul.f32 %v7270_v41, %v7130_v18 }
0x2ba2   :  { %v7309_v15 = vpack.c.bf16 %v7291_v26, %v7289_v60  ;;  %v7292_v23 = vmul.f32 %v7272_v45, %v7132_v4 }
0x2ba3   :  { %v10388_v46 = vpop.eup %10387 }
0x2ba4   :  { %v10390_v62 = vpop.eup %10389  ;;  %v7310_v28 = vpack.c.bf16 %v7292_v23, %v7290_v6  ;;  %v7273_v3 = vadd.f32 1.0, %v10388_v46 }
0x2ba5   :  { %v10392_v54 = vpop.eup %10391  ;;  %v7274_v5 = vadd.f32 1.0, %v10390_v62 }
0x2ba6   :  { %7488 = vmatprep.mubr.bf16.mxu1 %v7310_v28  ;;  %v10394_v39 = vpop.eup %10393  ;;  %v7275_v27 = vadd.f32 1.0, %v10392_v54  ;;  %v7293_v31 = vmul.f32 %v7273_v3, %v7133_v9 }
0x2ba7   :  { %7489 = vmatmul.mubr.bf16.vlgmr.msra.gmra.mrb[92].mxu1 %v7309_v15  ;;  %v7276_v36 = vadd.f32 1.0, %v10394_v39  ;;  %v7294_v48 = vmul.f32 %v7274_v5, %v7134_v63 }
0x2ba8   :  { %v7295_v51 = vmul.f32 %v7275_v27, %v7135_v37 }
0x2ba9   :  { %v7296_v57 = vmul.f32 %v7276_v36, %v7136_v19 }
0x2baa   :  { %v7311_v17 = vpack.c.bf16 %v7295_v51, %v7293_v31 }
0x2bab   :  { %v7312_v29 = vpack.c.bf16 %v7296_v57, %v7294_v48 }
0x2bad   :  { %7496 = vmatprep.mubr.bf16.mxu1 %v7312_v29 }
0x2baf   :  { %7497 = vmatmul.mubr.bf16.gmra.mrb[96].mxu1 %v7311_v17 }
0x2c04   :  { %v7100_v22 = vpop.f32.mrb[100].mxu0 }
0x2c05   :  { %v13636_v34 = vadd.f32 %v7100_v22, %v13587_v59  ;;  %v7102_v10 = vpop.f32.mrb[101].mxu0 }
0x2c06   :  { %v13639_v21 = vadd.f32 %v7102_v10, %v13590_v25  ;;  %v7104_v32 = vpop.f32.mrb[102].mxu0 }
0x2c07   :  { %v7157_v56 = vmul.f32 0.044715, %v13636_v34  ;;  %v13643_v49 = vadd.f32 %v7104_v32, %v13587_v59  ;;  %v7106_v55 = vpop.f32.mrb[103].mxu0 }
0x2c08   :  { %v7158_v44 = vmul.f32 0.044715, %v13639_v21  ;;  %v13647_v12 = vadd.f32 %v7106_v55, %v13590_v25 }
0x2c09   :  { %v7177_v33 = vmul.f32 %v7157_v56, %v13636_v34  ;;  %v7159_v1 = vmul.f32 0.044715, %v13643_v49 }
0x2c0a   :  { %v7178_v8 = vmul.f32 %v7158_v44, %v13639_v21  ;;  %v7160_v38 = vmul.f32 0.044715, %v13647_v12 }
0x2c0b   :  { %v7197_v50 = vmul.f32 %v7177_v33, %v13636_v34  ;;  %v7179_v35 = vmul.f32 %v7159_v1, %v13643_v49 }
0x2c0c   :  { %v7198_v40 = vmul.f32 %v7178_v8, %v13639_v21  ;;  %v7180_v24 = vmul.f32 %v7160_v38, %v13647_v12  ;;  %v7110_v20 = vpop.f32.mrb[104].mxu0 }
0x2c0d   :  { %v7217_v2 = vadd.f32 %v7197_v50, %v13636_v34  ;;  %v7199_v53 = vmul.f32 %v7179_v35, %v13643_v49  ;;  %v13660_v16 = vadd.f32 %v7110_v20, %v13587_v59  ;;  %v7112_v52 = vpop.f32.mrb[105].mxu0 }
0x2c0e   :  { %v7200_v18 = vmul.f32 %v7180_v24, %v13647_v12  ;;  %v13664_v41 = vadd.f32 %v7112_v52, %v13590_v25  ;;  %v7114_v60 = vpop.f32.mrb[106].mxu0  ;;  %v7218_v26 = vadd.f32 %v7198_v40, %v13639_v21  ;;  %v7137_v40 = vmul.f32 0.5, %v13636_v34 }
0x2c0f   :  { %v7237_v4 = vmul.f32 0.7978846, %v7217_v2  ;;  %v7219_v45 = vadd.f32 %v7199_v53, %v13643_v49  ;;  %v7161_v15 = vmul.f32 0.044715, %v13660_v16  ;;  %v7116_v6 = vpop.f32.mrb[107].mxu0  ;;  %v13671_v46 = vadd.f32 %v7114_v60, %v13587_v59 }
0x2c10   :  { %v7162_v23 = vmul.f32 0.044715, %v13664_v41  ;;  %v13674_v62 = vadd.f32 %v7116_v6, %v13590_v25  ;;  %v7220_v28 = vadd.f32 %v7200_v18, %v13647_v12  ;;  %v7238_v5 = vmul.f32 0.7978846, %v7218_v26 }
0x2c11   :  { %10395 = vtanh.f32 %v7237_v4  ;;  %v7239_v3 = vmul.f32 0.7978846, %v7219_v45  ;;  %v7181_v54 = vmul.f32 %v7161_v15, %v13660_v16  ;;  %v7163_v9 = vmul.f32 0.044715, %v13671_v46 }
0x2c12   :  { %v7182_v39 = vmul.f32 %v7162_v23, %v13664_v41  ;;  %v7164_v37 = vmul.f32 0.044715, %v13674_v62  ;;  %v7240_v63 = vmul.f32 0.7978846, %v7220_v28  ;;  %v7138_v26 = vmul.f32 0.5, %v13639_v21 }
0x2c13   :  { %10397 = vtanh.f32 %v7239_v3  ;;  %v7201_v27 = vmul.f32 %v7181_v54, %v13660_v16  ;;  %v7183_v36 = vmul.f32 %v7163_v9, %v13671_v46  ;;  %v7139_v23 = vmul.f32 0.5, %v13643_v49 }
0x2c14   :  { %v7202_v19 = vmul.f32 %v7182_v39, %v13664_v41  ;;  %v7184_v31 = vmul.f32 %v7164_v37, %v13674_v62  ;;  %v7120_v51 = vpop.f32.mrb[108].mxu0  ;;  %10399 = vtanh.f32 %v7238_v5  ;;  %v7140_v21 = vmul.f32 0.5, %v13647_v12 }
0x2c15   :  { %v7221_v48 = vadd.f32 %v7201_v27, %v13660_v16  ;;  %v13687_v57 = vadd.f32 %v7120_v51, %v13587_v59  ;;  %v7122_v17 = vpop.f32.mrb[109].mxu0  ;;  %10401 = vtanh.f32 %v7240_v63  ;;  %v7203_v29 = vmul.f32 %v7183_v36, %v13671_v46 }
0x2c16   :  { %v7204_v22 = vmul.f32 %v7184_v31, %v13674_v62  ;;  %v13692_v10 = vadd.f32 %v7122_v17, %v13590_v25  ;;  %v7124_v32 = vpop.f32.mrb[110].mxu0  ;;  %v7222_v56 = vadd.f32 %v7202_v19, %v13664_v41 }
0x2c17   :  { %v7241_v55 = vmul.f32 0.7978846, %v7221_v48  ;;  %v7165_v44 = vmul.f32 0.044715, %v13687_v57  ;;  %v13697_v33 = vadd.f32 %v7124_v32, %v13587_v59  ;;  %v7126_v1 = vpop.f32.mrb[111].mxu0  ;;  %v7223_v8 = vadd.f32 %v7203_v29, %v13671_v46 }
0x2c18   :  { %v7166_v38 = vmul.f32 0.044715, %v13692_v10  ;;  %v13702_v50 = vadd.f32 %v7126_v1, %v13590_v25  ;;  %v7224_v35 = vadd.f32 %v7204_v22, %v13674_v62  ;;  %v7242_v52 = vmul.f32 0.7978846, %v7222_v56 }
0x2c19   :  { %10403 = vtanh.f32 %v7241_v55  ;;  %v7185_v24 = vmul.f32 %v7165_v44, %v13687_v57  ;;  %v7167_v20 = vmul.f32 0.044715, %v13697_v33  ;;  %v7243_v2 = vmul.f32 0.7978846, %v7223_v8 }
0x2c1a   :  { %v7186_v59 = vmul.f32 %v7166_v38, %v13692_v10  ;;  %v7168_v53 = vmul.f32 0.044715, %v13702_v50  ;;  %v7244_v4 = vmul.f32 0.7978846, %v7224_v35  ;;  %v7141_v38 = vmul.f32 0.5, %v13660_v16 }
0x2c1b   :  { %v10396_v18 = vpop.eup %10395  ;;  %v7205_v60 = vmul.f32 %v7185_v24, %v13687_v57  ;;  %v7187_v25 = vmul.f32 %v7167_v20, %v13697_v33  ;;  %10405 = vtanh.f32 %v7243_v2  ;;  %v7143_v35 = vmul.f32 0.5, %v13671_v46 }
0x2c1c   :  { %v7277_v34 = vadd.f32 1.0, %v10396_v18  ;;  %v7206_v45 = vmul.f32 %v7186_v59, %v13692_v10  ;;  %v7188_v15 = vmul.f32 %v7168_v53, %v13702_v50  ;;  %10407 = vtanh.f32 %v7242_v52 }
0x2c1d   :  { %v10398_v6 = vpop.eup %10397  ;;  %v7225_v28 = vadd.f32 %v7205_v60, %v13687_v57  ;;  %v7207_v3 = vmul.f32 %v7187_v25, %v13697_v33  ;;  %10409 = vtanh.f32 %v7244_v4  ;;  %v7142_v20 = vmul.f32 0.5, %v13664_v41 }
0x2c1e   :  { %v10400_v54 = vpop.eup %10399  ;;  %v7279_v5 = vadd.f32 1.0, %v10398_v6  ;;  %v7208_v39 = vmul.f32 %v7188_v15, %v13702_v50  ;;  %v7226_v19 = vadd.f32 %v7206_v45, %v13692_v10  ;;  %v7297_v49 = vmul.f32 %v7277_v34, %v7137_v40 }
0x2c1f   :  { %v10402_v9 = vpop.eup %10401  ;;  %v7245_v37 = vmul.f32 0.7978846, %v7225_v28  ;;  %v7227_v27 = vadd.f32 %v7207_v3, %v13697_v33  ;;  %v7278_v63 = vadd.f32 1.0, %v10400_v54  ;;  %v7144_v52 = vmul.f32 0.5, %v13674_v62 }
0x2c20   :  { %v7299_v36 = vmul.f32 %v7279_v5, %v7139_v23  ;;  %v7280_v31 = vadd.f32 1.0, %v10402_v9  ;;  %v7228_v51 = vadd.f32 %v7208_v39, %v13702_v50  ;;  %v7246_v17 = vmul.f32 0.7978846, %v7226_v19 }
0x2c21   :  { %10411 = vtanh.f32 %v7245_v37  ;;  %v7247_v48 = vmul.f32 0.7978846, %v7227_v27  ;;  %v7298_v22 = vmul.f32 %v7278_v63, %v7138_v26  ;;  %v7145_v46 = vmul.f32 0.5, %v13687_v57 }
0x2c22   :  { %v7313_v29 = vpack.c.bf16 %v7299_v36, %v7297_v49  ;;  %v7300_v32 = vmul.f32 %v7280_v31, %v7140_v21  ;;  %v7248_v12 = vmul.f32 0.7978846, %v7228_v51  ;;  %v7147_v6 = vmul.f32 0.5, %v13697_v33 }
0x2c23   :  { %v10404_v56 = vpop.eup %10403  ;;  %10413 = vtanh.f32 %v7247_v48  ;;  %v7146_v28 = vmul.f32 0.5, %v13692_v10  ;;  %v7148_v5 = vmul.f32 0.5, %v13702_v50 }
0x2c24   :  { %v7314_v55 = vpack.c.bf16 %v7300_v32, %v7298_v22  ;;  %10415 = vtanh.f32 %v7246_v17  ;;  %v7281_v44 = vadd.f32 1.0, %v10404_v56 }
0x2c25   :  { %10417 = vtanh.f32 %v7248_v12  ;;  %v10406_v1 = vpop.eup %10405 }
0x2c26   :  { %7504 = vmatprep.mubr.bf16.mxu1 %v7314_v55  ;;  %v10408_v8 = vpop.eup %10407  ;;  %v7283_v40 = vadd.f32 1.0, %v10406_v1  ;;  %v7301_v59 = vmul.f32 %v7281_v44, %v7141_v38  ;;  %v8362_v44 = vld [vmem:[%s13900_s13 + $0x1] ss:$0 sm:$0xff] }
0x2c27   :  { %7505 = vmatmul.mubr.bf16.gmra.mrb[100].mxu1 %v7313_v29  ;;  %v10410_v24 = vpop.eup %10409  ;;  %v7282_v2 = vadd.f32 1.0, %v10408_v8 }
0x2c28   :  { %v7303_v53 = vmul.f32 %v7283_v40, %v7143_v35  ;;  %v7284_v18 = vadd.f32 1.0, %v10410_v24 }
0x2c29   :  { %v7302_v26 = vmul.f32 %v7282_v2, %v7142_v20 }
0x2c2a   :  { %v7315_v25 = vpack.c.bf16 %v7303_v53, %v7301_v59  ;;  %v7304_v4 = vmul.f32 %v7284_v18, %v7144_v52 }
0x2c2b   :  { %v10412_v60 = vpop.eup %10411 }
0x2c2c   :  { %v7285_v34 = vadd.f32 1.0, %v10412_v60  ;;  %v7316_v16 = vpack.c.bf16 %v7304_v4, %v7302_v26 }
0x2c2d   :  { %v10414_v45 = vpop.eup %10413 }
0x2c2e   :  { %v10416_v15 = vpop.eup %10415  ;;  %v7287_v23 = vadd.f32 1.0, %v10414_v45  ;;  %7512 = vmatprep.mubr.bf16.mxu1 %v7316_v16  ;;  %v7305_v62 = vmul.f32 %v7285_v34, %v7145_v46 }
0x2c2f   :  { %v10418_v41 = vpop.eup %10417  ;;  %v7286_v3 = vadd.f32 1.0, %v10416_v15  ;;  %7513 = vmatmul.mubr.bf16.gmra.mrb[104].mxu1 %v7315_v25 }
0x2c30   :  { %v7307_v54 = vmul.f32 %v7287_v23, %v7147_v6  ;;  %v7288_v39 = vadd.f32 1.0, %v10418_v41 }
0x2c31   :  { %v7306_v9 = vmul.f32 %v7286_v3, %v7146_v28 }
0x2c32   :  { %v7317_v21 = vpack.c.bf16 %v7307_v54, %v7305_v62  ;;  %v7308_v37 = vmul.f32 %v7288_v39, %v7148_v5 }
0x2c34   :  { %v7318_v27 = vpack.c.bf16 %v7308_v37, %v7306_v9 }
0x2c36   :  { %7520 = vmatprep.mubr.bf16.mxu1 %v7318_v27 }
0x2c37   :  { %7521 = vmatmul.mubr.bf16.gmra.mrb[108].mxu1 %v7317_v21 }
0x2c38   :  { %9752 = vmatprep.mubr.msk.bf16.mxu1 %vm10472_vm0, %v13924_v30 }
0x2c7a   :  { %v8752_v57 = vpop.f32.mrb[92].mxu1 }
0x2c7b   :  { %v8753_v33 = vpop.f32.mrb[93].mxu1 }
0x2c7c   :  { %v8754_v63 = vadd.f32 %v8753_v33, %v8752_v57  ;;  %v8755_v10 = vpop.f32.mrb[94].mxu1 }
0x2c7d   :  { %v8756_v19 = vpop.f32.mrb[95].mxu1 }
0x2c7e   :  { %v8757_v49 = vadd.f32 %v8756_v19, %v8755_v10  ;;  %v7491_v8 = vadd.f32 %v8754_v63, %v8362_v44 }
0x2c80   :  { %v7529_v59 = vadd.f32 %v7491_v8, %v13473_v47  ;;  %v7494_v18 = vadd.f32 %v8757_v49, %v8362_v44 }
0x2c82   :  { %v8758_v36 = vpop.f32.mrb[96].mxu1  ;;  %v7530_v15 = vadd.f32 %v7494_v18, %v13477_v0  ;;  %v9933_v18 = vld [vmem:[%s13903_s16 + $0x10] sm:$0xff]  }
0x2c83   :  { %v8759_v31 = vpop.f32.mrb[97].mxu1 }
0x2c84   :  { %v8760_v51 = vadd.f32 %v8759_v31, %v8758_v36  ;;  %v8761_v50 = vpop.f32.mrb[98].mxu1 }
0x2c85   :  { %v8762_v48 = vpop.f32.mrb[99].mxu1 }
0x2c86   :  { %v8763_v17 = vadd.f32 %v8762_v48, %v8761_v50  ;;  %v7499_v26 = vadd.f32 %v8760_v51, %v8362_v44 }
0x2c88   :  { %v7531_v23 = vadd.f32 %v7499_v26, %v13489_v7  ;;  %v7502_v41 = vadd.f32 %v8763_v17, %v8362_v44  ;;  %v9931_v7 = vld [vmem:[%s13903_s16] sm:$0xff]   ;;  %v9936_v26 = vld [vmem:[%s13903_s16 + $0x28] sm:$0xff]  }
0x2c89   :  { %9737 = vmatpush3.bf16.msra.mxu1 %v9931_v7  ;;  %9709 = vmatpush3.bf16.msra.mxu0 %v9931_v7 }
0x2c8a   :  { %v7532_v62 = vadd.f32 %v7502_v41, %v13486_v42  ;;  %9738 = vmatprep.subr.bf16.mxu1 %v13924_v30  ;;  %9710 = vmatprep.subr.bf16.mxu0 %v13924_v30 }
0x2cfa   :  { %v8764_v29 = vpop.f32.mrb[100].mxu1 }
0x2cfb   :  { %v8765_v22 = vpop.f32.mrb[101].mxu1 }
0x2cfc   :  { %v8766_v32 = vadd.f32 %v8765_v22, %v8764_v29  ;;  %v8767_v12 = vpop.f32.mrb[102].mxu1 }
0x2cfd   :  { %v8768_v56 = vpop.f32.mrb[103].mxu1 }
0x2cfe   :  { %v8769_v55 = vadd.f32 %v8768_v56, %v8767_v12  ;;  %v7507_v3 = vadd.f32 %v8766_v32, %v8362_v44 }
0x2d00   :  { %v7510_v1 = vadd.f32 %v8769_v55, %v8362_v44  ;;  %v7533_v0 = vadd.f32 %v7507_v3, %v13548_v43 }
0x2d02   :  { %v7534_v38 = vadd.f32 %v7510_v1, %v13551_v58  ;;  %v8770_v35 = vpop.f32.mrb[104].mxu1 }
0x2d03   :  { %v8771_v40 = vpop.f32.mrb[105].mxu1 }
0x2d04   :  { %7553 = vadd.xlane.f32.xlu0 %v7534_v38  ;;  %v8772_v24 = vadd.f32 %v8771_v40, %v8770_v35  ;;  %v8773_v20 = vpop.f32.mrb[106].mxu1 }
0x2d05   :  { %v8774_v2 = vpop.f32.mrb[107].mxu1 }
0x2d06   :  { %v7515_v53 = vadd.f32 %v8772_v24, %v8362_v44  ;;  %v8775_v52 = vadd.f32 %v8774_v2, %v8773_v20 }
0x2d08   :  { %7543 = vadd.xlane.f32.xlu0 %v7529_v59  ;;  %v7518_v60 = vadd.f32 %v8775_v52, %v8362_v44  ;;  %v7535_v25 = vadd.f32 %v7515_v53, %v13561_v13  ;;  %v9932_v53 = vld [vmem:[%s13903_s16 + $0x8] sm:$0xff]  }
0x2d09   :  { %9739 = vmatpush3.bf16.msra.mxu1 %v9932_v53  ;;  %9711 = vmatpush3.bf16.msra.mxu0 %v9932_v53 }
0x2d0a   :  { %7555 = vadd.xlane.f32.xlu1 %v7535_v25  ;;  %v8776_v4 = vpop.f32.mrb[108].mxu1  ;;  %v7536_v58 = vadd.f32 %v7518_v60, %v13564_v14  ;;  %9740 = vmatprep.subr.bf16.mxu1 %v13924_v30  ;;  %v9934_v60 = vld [vmem:[%s13903_s16 + $0x18] sm:$0xff]  }
0x2d0b   :  { %v8777_v34 = vpop.f32.mrb[109].mxu1  ;;  %9712 = vmatprep.subr.bf16.mxu0 %v13924_v30 }
0x2d0c   :  { %v8778_v45 = vadd.f32 %v8777_v34, %v8776_v4  ;;  %7557 = vadd.xlane.f32.xlu0 %v7536_v58  ;;  %v8779_v16 = vpop.f32.mrb[110].mxu1  ;;  %v9937_v4 = vld [vmem:[%s13903_s16 + $0x30] sm:$0xff]  }
0x2d0d   :  { %v8780_v46 = vpop.f32.mrb[111].mxu1  ;;  %9741 = vmatpush3.bf16.msra.mxu1 %v9933_v18  ;;  %9713 = vmatpush3.bf16.msra.mxu0 %v9933_v18 }
0x2d0e   :  { %v7523_v47 = vadd.f32 %v8778_v45, %v8362_v44  ;;  %v8781_v6 = vadd.f32 %v8780_v46, %v8779_v16  ;;  %7545 = vadd.xlane.f32.xlu1 %v7530_v15  ;;  %9742 = vmatprep.subr.bf16.mxu1 %v13924_v30 }
0x2d0f   :  { %9714 = vmatprep.subr.bf16.mxu0 %v13924_v30 }
0x2d10   :  { %v7526_v28 = vadd.f32 %v8781_v6, %v8362_v44  ;;  %7547 = vadd.xlane.f32.xlu0 %v7531_v23  ;;  %v7537_v13 = vadd.f32 %v7523_v47, %v13574_v61 }
0x2d11   :  { %9743 = vmatpush3.bf16.msra.mxu1 %v9934_v60  ;;  %9715 = vmatpush3.bf16.msra.mxu0 %v9934_v60 }
0x2d12   :  { %7559 = vadd.xlane.f32.xlu1 %v7537_v13  ;;  %v7538_v14 = vadd.f32 %v7526_v28, %v13577_v11  ;;  %9744 = vmatprep.subr.bf16.mxu1 %v13924_v30 }
0x2d13   :  { %9716 = vmatprep.subr.bf16.mxu0 %v13924_v30 }
0x2d14   :  { %7561 = vadd.xlane.f32.xlu0 %v7538_v14 }
0x2d16   :  { %7549 = vadd.xlane.f32.xlu1 %v7532_v62 }
0x2d1a   :  { %7551 = vadd.xlane.f32.xlu1 %v7533_v0 }
0x2d91   :  { %v7554_v61 = vpop.xlane.xlu0 %7553 }
0x2d92   :  { %v7568_v11 = vmul.f32 0.0078125, %v7554_v61 }
0x2d94   :  { %v13751_v54 = vsub.f32 %v7534_v38, %v7568_v11 }
0x2d95   :  { %v7544_v5 = vpop.xlane.xlu0 %7543 }
0x2d96   :  { %v7563_v42 = vmul.f32 0.0078125, %v7544_v5  ;;  %v7588_v43 = vmul.f32 %v13751_v54, %v13751_v54 }
0x2d97   :  { %v7556_v21 = vpop.xlane.xlu1 %7555 }
0x2d98   :  { %v13755_v39 = vsub.f32 %v7529_v59, %v7563_v42  ;;  %7603 = vadd.xlane.f32.xlu0 %v7588_v43  ;;  %v7569_v9 = vmul.f32 0.0078125, %v7556_v21 }
0x2d99   :  { %v7558_v37 = vpop.xlane.xlu0 %7557 }
0x2d9a   :  { %v7583_v27 = vmul.f32 %v13755_v39, %v13755_v39  ;;  %v13759_v57 = vsub.f32 %v7535_v25, %v7569_v9  ;;  %v7570_v33 = vmul.f32 0.0078125, %v7558_v37  ;;  %v9935_v25 = vld [vmem:[%s13903_s16 + $0x20] sm:$0xff]  }
0x2d9b   :  { %v7546_v63 = vpop.xlane.xlu1 %7545  ;;  %9745 = vmatpush3.bf16.msra.mxu1 %v9935_v25  ;;  %9717 = vmatpush3.bf16.msra.mxu0 %v9935_v25 }
0x2d9c   :  { %7593 = vadd.xlane.f32.xlu0 %v7583_v27  ;;  %v13761_v10 = vsub.f32 %v7536_v58, %v7570_v33  ;;  %v7564_v19 = vmul.f32 0.0078125, %v7546_v63  ;;  %v7589_v49 = vmul.f32 %v13759_v57, %v13759_v57  ;;  %9746 = vmatprep.subr.bf16.mxu1 %v13924_v30  ;;  %v9938_v58 = vld [vmem:[%s13903_s16 + $0x38] sm:$0xff]   ;;  %v8381_v33 = vld [vmem:[%s13901_s14 + $0x1] ss:$0 sm:$0xff] }
0x2d9d   :  { %v7548_v36 = vpop.xlane.xlu0 %7547  ;;  %9718 = vmatprep.subr.bf16.mxu0 %v13924_v30 }
0x2d9e   :  { %v13765_v31 = vsub.f32 %v7530_v15, %v7564_v19  ;;  %v7565_v51 = vmul.f32 0.0078125, %v7548_v36  ;;  %7605 = vadd.xlane.f32.xlu1 %v7589_v49  ;;  %v7590_v50 = vmul.f32 %v13761_v10, %v13761_v10 }
0x2d9f   :  { %v7560_v48 = vpop.xlane.xlu1 %7559  ;;  %9747 = vmatpush3.bf16.msra.mxu1 %v9936_v26  ;;  %9719 = vmatpush3.bf16.msra.mxu0 %v9936_v26 }
0x2da0   :  { %v13769_v17 = vsub.f32 %v7531_v23, %v7565_v51  ;;  %v7571_v29 = vmul.f32 0.0078125, %v7560_v48  ;;  %7607 = vadd.xlane.f32.xlu0 %v7590_v50  ;;  %v7584_v22 = vmul.f32 %v13765_v31, %v13765_v31  ;;  %9748 = vmatprep.subr.bf16.mxu1 %v13924_v30  ;;  %v8382_v48 = vld [vmem:[%s13902_s15 + $0x1] ss:$0 sm:$0xff] }
0x2da1   :  { %v7562_v32 = vpop.xlane.xlu0 %7561  ;;  %9720 = vmatprep.subr.bf16.mxu0 %v13924_v30 }
0x2da2   :  { %v13773_v12 = vsub.f32 %v7537_v13, %v7571_v29  ;;  %v7572_v56 = vmul.f32 0.0078125, %v7562_v32  ;;  %7595 = vadd.xlane.f32.xlu1 %v7584_v22  ;;  %v7585_v55 = vmul.f32 %v13769_v17, %v13769_v17 }
0x2da3   :  { %v7550_v44 = vpop.xlane.xlu1 %7549  ;;  %9749 = vmatpush3.bf16.msra.mxu1 %v9937_v4  ;;  %9721 = vmatpush3.bf16.msra.mxu0 %v9937_v4 }
0x2da4   :  { %v13777_v1 = vsub.f32 %v7538_v14, %v7572_v56  ;;  %v7566_v8 = vmul.f32 0.0078125, %v7550_v44  ;;  %7597 = vadd.xlane.f32.xlu0 %v7585_v55  ;;  %v7591_v38 = vmul.f32 %v13773_v12, %v13773_v12  ;;  %9750 = vmatprep.subr.bf16.mxu1 %v13924_v30 }
0x2da5   :  { %9722 = vmatprep.subr.bf16.mxu0 %v13924_v30 }
0x2da6   :  { %v13781_v35 = vsub.f32 %v7532_v62, %v7566_v8  ;;  %7609 = vadd.xlane.f32.xlu1 %v7591_v38  ;;  %v7592_v40 = vmul.f32 %v13777_v1, %v13777_v1 }
0x2da7   :  { %v7552_v24 = vpop.xlane.xlu1 %7551  ;;  %9751 = vmatpush3.bf16.msra.mxu1 %v9938_v58  ;;  %9723 = vmatpush3.bf16.msra.mxu0 %v9938_v58 }
0x2da8   :  { %v7567_v20 = vmul.f32 0.0078125, %v7552_v24  ;;  %7611 = vadd.xlane.f32.xlu0 %v7592_v40  ;;  %v7586_v2 = vmul.f32 %v13781_v35, %v13781_v35 }
0x2daa   :  { %v13787_v59 = vsub.f32 %v7533_v0, %v7567_v20  ;;  %7599 = vadd.xlane.f32.xlu1 %v7586_v2 }
0x2dac   :  { %v7587_v52 = vmul.f32 %v13787_v59, %v13787_v59 }
0x2dae   :  { %7601 = vadd.xlane.f32.xlu1 %v7587_v52 }
0x2e25   :  { %v7604_v34 = vpop.xlane.xlu0 %7603 }
0x2e26   :  { %v7618_v45 = vmul.f32 0.0078125, %v7604_v34 }
0x2e28   :  { %v7628_v16 = vadd.f32 1e-12, %v7618_v45 }
0x2e29   :  { %v7594_v15 = vpop.xlane.xlu0 %7593 }
0x2e2a   :  { %10419 = vrsqrt.f32 %v7628_v16  ;;  %v7613_v46 = vmul.f32 0.0078125, %v7594_v15 }
0x2e2b   :  { %v7606_v6 = vpop.xlane.xlu1 %7605 }
0x2e2c   :  { %v7623_v47 = vadd.f32 1e-12, %v7613_v46  ;;  %v7619_v23 = vmul.f32 0.0078125, %v7606_v6 }
0x2e2d   :  { %v7608_v41 = vpop.xlane.xlu0 %7607 }
0x2e2e   :  { %10421 = vrsqrt.f32 %v7623_v47  ;;  %v7629_v28 = vadd.f32 1e-12, %v7619_v23  ;;  %v7620_v13 = vmul.f32 0.0078125, %v7608_v41 }
0x2e2f   :  { %v7596_v14 = vpop.xlane.xlu1 %7595 }
0x2e30   :  { %10423 = vrsqrt.f32 %v7629_v28  ;;  %v7630_v3 = vadd.f32 1e-12, %v7620_v13  ;;  %v7614_v62 = vmul.f32 0.0078125, %v7596_v14 }
0x2e31   :  { %v7598_v0 = vpop.xlane.xlu0 %7597 }
0x2e32   :  { %10425 = vrsqrt.f32 %v7630_v3  ;;  %v7624_v7 = vadd.f32 1e-12, %v7614_v62  ;;  %v7615_v61 = vmul.f32 0.0078125, %v7598_v0 }
0x2e33   :  { %v7610_v5 = vpop.xlane.xlu1 %7609 }
0x2e34   :  { %v10420_v11 = vpop.eup %10419  ;;  %10427 = vrsqrt.f32 %v7624_v7  ;;  %v7625_v42 = vadd.f32 1e-12, %v7615_v61  ;;  %v7621_v43 = vmul.f32 0.0078125, %v7610_v5  ;;  %v7685_v61 = vld [vmem:[%s13905_s18] sm:$0xff] }
0x2e35   :  { %v7612_v21 = vpop.xlane.xlu0 %7611  ;;  %v7648_v9 = vmul.f32 %v10420_v11, %v13751_v54 }
0x2e36   :  { %v7631_v37 = vadd.f32 1e-12, %v7621_v43  ;;  %v7622_v27 = vmul.f32 0.0078125, %v7612_v21  ;;  %10429 = vrsqrt.f32 %v7625_v42  ;;  %v7686_v43 = vld [vmem:[%s13905_s18 + $0x8] sm:$0xff] }
0x2e37   :  { %v7600_v63 = vpop.xlane.xlu1 %7599  ;;  %v7664_v50 = vmul.f32 %v8381_v33, %v7648_v9 }
0x2e38   :  { %v10422_v19 = vpop.eup %10421  ;;  %10431 = vrsqrt.f32 %v7631_v37  ;;  %v7632_v49 = vadd.f32 1e-12, %v7622_v27  ;;  %v7616_v36 = vmul.f32 0.0078125, %v7600_v63 }
0x2e39   :  { %v7643_v54 = vmul.f32 %v10422_v19, %v13755_v39  ;;  %v7680_v38 = vadd.f32 %v8382_v48, %v7664_v50 }
0x2e3a   :  { %v10424_v51 = vpop.eup %10423  ;;  %10433 = vrsqrt.f32 %v7632_v49  ;;  %v7626_v22 = vadd.f32 1e-12, %v7616_v36 }
0x2e3b   :  { %v7649_v29 = vmul.f32 %v10424_v51, %v13759_v57  ;;  %v7602_v32 = vpop.xlane.xlu1 %7601  ;;  %v7659_v24 = vmul.f32 %v8381_v33, %v7643_v54 }
0x2e3c   :  { %v10426_v56 = vpop.eup %10425  ;;  %v7617_v55 = vmul.f32 0.0078125, %v7602_v32  ;;  %10435 = vrsqrt.f32 %v7626_v22  ;;  %v7687_v22 = vld [vmem:[%s13905_s18 + $0x10] sm:$0xff] }
0x2e3d   :  { %v7665_v44 = vmul.f32 %v8381_v33, %v7649_v29  ;;  %v7650_v2 = vmul.f32 %v10426_v56, %v13761_v10  ;;  %v7675_v60 = vadd.f32 %v8382_v48, %v7659_v24 }
0x2e3e   :  { %v10428_v8 = vpop.eup %10427  ;;  %v7627_v40 = vadd.f32 1e-12, %v7617_v55 }
0x2e3f   :  { %v7681_v20 = vadd.f32 %v8382_v48, %v7665_v44  ;;  %v7644_v53 = vmul.f32 %v10428_v8, %v13765_v31  ;;  %v7666_v25 = vmul.f32 %v8381_v33, %v7650_v2  ;;  %v7688_v8 = vld [vmem:[%s13905_s18 + $0x18] sm:$0xff] }
0x2e40   :  { %10437 = vrsqrt.f32 %v7627_v40  ;;  %v10430_v52 = vpop.eup %10429 }
0x2e41   :  { %v7872_v39 = vpack.c.bf16 %v7681_v20, %v7680_v38  ;;  %v7660_v18 = vmul.f32 %v8381_v33, %v7644_v53  ;;  %v7645_v34 = vmul.f32 %v10430_v52, %v13769_v17  ;;  %v7682_v15 = vadd.f32 %v8382_v48, %v7666_v25 }
0x2e42   :  { %v10432_v57 = vpop.eup %10431 }
0x2e43   :  { %v7676_v26 = vadd.f32 %v8382_v48, %v7660_v18  ;;  %v7651_v4 = vmul.f32 %v10432_v57, %v13773_v12  ;;  %9753 = vmatmul.mubr.bf16.vlgmr.msra.gmra.mrb[112].mxu1 %v7872_v39  ;;  %v7661_v47 = vmul.f32 %v8381_v33, %v7645_v34 }
0x2e44   :  { %v10434_v58 = vpop.eup %10433  ;;  %9756 = vmatprep.mubr.msk.bf16.mxu1 %vm10472_vm0, %v13924_v30 }
0x2e45   :  { %v7690_v10 = vpack.c.bf16 %v7676_v26, %v7675_v60  ;;  %v7667_v45 = vmul.f32 %v8381_v33, %v7651_v4  ;;  %v7652_v31 = vmul.f32 %v10434_v58, %v13777_v1  ;;  %v7677_v13 = vadd.f32 %v8382_v48, %v7661_v47 }
0x2e46   :  { %v10436_v16 = vpop.eup %10435 }
0x2e47   :  { %v7683_v46 = vadd.f32 %v8382_v48, %v7667_v45  ;;  %9725 = vmatmul.mubr.bf16.vlgmr.msra.gmra.mrb[112].mxu0 %v7690_v10  ;;  %v7646_v6 = vmul.f32 %v10436_v16, %v13781_v35  ;;  %v7668_v23 = vmul.f32 %v8381_v33, %v7652_v31  ;;  %v7689_v16 = vld [vmem:[%s13905_s18 + $0x20] sm:$0xff]  ;;  %s10476_s18 = smov 121  }
0x2e48   :  { %9728 = vmatprep.mubr.msk.bf16.mxu0 %vm10472_vm0, %v13924_v30 }
0x2e49   :  { %v7873_v12 = vpack.c.bf16 %v7683_v46, %v7682_v15  ;;  %v7662_v41 = vmul.f32 %v8381_v33, %v7646_v6  ;;  %v7684_v1 = vadd.f32 %v8382_v48, %v7668_v23 }
0x2e4a   :  { %v10438_v17 = vpop.eup %10437 }
0x2e4b   :  { %v7647_v28 = vmul.f32 %v10438_v17, %v13787_v59  ;;  %9757 = vmatmul.mubr.bf16.gmra.mrb[116].mxu1 %v7873_v12  ;;  %v7678_v14 = vadd.f32 %v8382_v48, %v7662_v41  ;;  %v7874_v35 = vpack.c.bf16 %v7684_v1, %v7684_v1  ;;  %v8383_v59 = vld [vmem:[%s13904_s17] ss:$0 sm:$0xff] }
0x2e4c   :  { %9760 = vmatprep.mubr.msk.bf16.mxu1 %vm10472_vm0, %v13924_v30 }
0x2e4d   :  { %v7691_v3 = vpack.c.bf16 %v7678_v14, %v7677_v13  ;;  %v7663_v62 = vmul.f32 %v8381_v33, %v7647_v28 }
0x2e4f   :  { %9729 = vmatmul.mubr.bf16.gmra.mrb[116].mxu0 %v7691_v3  ;;  %v7679_v0 = vadd.f32 %v8382_v48, %v7663_v62 }
0x2e50   :  { %9732 = vmatprep.mubr.msk.bf16.mxu0 %vm10472_vm0, %v13924_v30 }
0x2e51   :  { %v7692_v7 = vpack.c.bf16 %v7679_v0, %v7679_v0 }
0x2e53   :  { %9761 = vmatmul.mubr.bf16.gmra.mrb[120].mxu1 %v7874_v35 }
0x2e57   :  { %9733 = vmatmul.mubr.bf16.gmra.mrb[120].mxu0 %v7692_v7 }
0x2f16   :  { %v7909_v11 = vpop.f32.mrb[112].mxu1 }
0x2f17   :  { %v7910_v5 = vadd.f32 %v8383_v59, %v7909_v11  ;;  %v9754_v42 = vpop.f32.mrb[113].mxu1 }
0x2f18   :  { %v7912_v30 = vpop.f32.mrb[114].mxu1 }
0x2f19   :  { %v7931_v21 = vmul.f32 %v7910_v5, %v7685_v61  ;;  %v7913_v9 = vadd.f32 %v8383_v59, %v7912_v30  ;;  %v9755_v37 = vpop.f32.mrb[115].mxu1 }
0x2f1a   :  { %v7798_v27 = vpop.f32.mrb[112].mxu0 }
0x2f1b   :  { %v7932_v33 = vmul.f32 %v7913_v9, %v7686_v43  ;;  %v7799_v63 = vadd.f32 %v8383_v59, %v7798_v27  ;;  %v9726_v19 = vpop.f32.mrb[113].mxu0  ;;  %v7936_v36 = vsel %vm7825_vm4, %v7931_v21, 0.0 }
0x2f1c   :  { %v7801_v49 = vpop.f32.mrb[114].mxu0 }
0x2f1d   :  { %v7937_v51 = vsel %vm7825_vm4, %v7932_v33, 0.0  ;;  %v7820_v50 = vmul.f32 %v7799_v63, %v7685_v61  ;;  %v7802_v48 = vadd.f32 %v8383_v59, %v7801_v49  ;;  %v9727_v54 = vpop.f32.mrb[115].mxu0 }
0x2f1e   :  { %v7938_v29 = vadd.f32 %v7937_v51, %v7936_v36  ;;  %v7917_v32 = vpop.f32.mrb[116].mxu1 }
0x2f1f   :  { %v7821_v56 = vmul.f32 %v7802_v48, %v7686_v43  ;;  %v7918_v55 = vadd.f32 %v8383_v59, %v7917_v32  ;;  %v9758_v44 = vpop.f32.mrb[117].mxu1  ;;  %v7826_v40 = vsel %vm7825_vm4, %v7820_v50, 0.0 }
0x2f20   :  { %v7920_v38 = vpop.f32.mrb[118].mxu1 }
0x2f21   :  { %v7827_v24 = vsel %vm7825_vm4, %v7821_v56, 0.0  ;;  %v7933_v20 = vmul.f32 %v7918_v55, %v7687_v22  ;;  %v7921_v2 = vadd.f32 %v8383_v59, %v7920_v38  ;;  %v9759_v53 = vpop.f32.mrb[119].mxu1 }
0x2f22   :  { %v7828_v52 = vadd.f32 %v7827_v24, %v7826_v40  ;;  %v7806_v57 = vpop.f32.mrb[116].mxu0 }
0x2f23   :  { %v7939_v39 = vsel %vm7825_vm4, %v7933_v20, 0.0  ;;  %v7934_v18 = vmul.f32 %v7921_v2, %v7688_v8  ;;  %v7807_v25 = vadd.f32 %v8383_v59, %v7806_v57  ;;  %v9730_v26 = vpop.f32.mrb[117].mxu0 }
0x2f24   :  { %v7940_v60 = vadd.f32 %v7939_v39, %v7938_v29  ;;  %v7809_v58 = vpop.f32.mrb[118].mxu0 }
0x2f25   :  { %v7941_v4 = vsel %vm7825_vm4, %v7934_v18, 0.0  ;;  %v7822_v10 = vmul.f32 %v7807_v25, %v7687_v22  ;;  %v7810_v45 = vadd.f32 %v8383_v59, %v7809_v58  ;;  %v9731_v31 = vpop.f32.mrb[119].mxu0 }
0x2f26   :  { %v7942_v34 = vadd.f32 %v7941_v4, %v7940_v60  ;;  %v7925_v15 = vpop.f32.mrb[120].mxu1 }
0x2f27   :  { %v7926_v46 = vadd.f32 %v8383_v59, %v7925_v15  ;;  %v9762_v47 = vpop.f32.mrb[121].mxu1  ;;  %v7829_v6 = vsel %vm7825_vm4, %v7822_v10, 0.0  ;;  %v7823_v12 = vmul.f32 %v7810_v45, %v7688_v8 }
0x2f28   :  { %v7928_v23 = vpop.f32.mrb[122].mxu1  ;;  %v7830_v17 = vadd.f32 %v7829_v6, %v7828_v52 }
0x2f29   :  { %v7935_v41 = vmul.f32 %v7926_v46, %v7689_v16  ;;  %v9763_v28 = vpop.f32.mrb[123].mxu1  ;;  %v7831_v13 = vsel %vm7825_vm4, %v7823_v12, 0.0 }
0x2f2a   :  { %v7832_v14 = vadd.f32 %v7831_v13, %v7830_v17  ;;  %v7814_v3 = vpop.f32.mrb[120].mxu0 }
0x2f2b   :  { %v7943_v1 = vsel %vm7825_vm4, %v7935_v41, 0.0  ;;  %v7815_v35 = vadd.f32 %v8383_v59, %v7814_v3  ;;  %v9734_v0 = vpop.f32.mrb[121].mxu0 }
0x2f2c   :  { %v7944_v62 = vadd.f32 %v7943_v1, %v7942_v34  ;;  %v7817_v7 = vpop.f32.mrb[122].mxu0 }
0x2f2d   :  { %v7824_v11 = vmul.f32 %v7815_v35, %v7689_v16  ;;  %v9735_v5 = vpop.f32.mrb[123].mxu0 }
0x2f2e   :  { %v7945_v61 = vrot.slane %v7944_v62, 4 }
0x2f2f   :  { %v7833_v43 = vsel %vm7825_vm4, %v7824_v11, 0.0 }
0x2f30   :  { %v7946_v42 = vadd.f32 %v7945_v61, %v7944_v62  ;;  %v7834_v30 = vadd.f32 %v7833_v43, %v7832_v14 }
0x2f32   :  { %v7947_v21 = vrot.slane %v7946_v42, 2  ;;  %v7835_v9 = vrot.slane %v7834_v30, 4 }
0x2f34   :  { %v7948_v37 = vadd.f32 %v7947_v21, %v7946_v42  ;;  %v7836_v27 = vadd.f32 %v7835_v9, %v7834_v30 }
0x2f36   :  { %v7949_v33 = vrot.slane %v7948_v37, 1  ;;  %v7837_v63 = vrot.slane %v7836_v27, 2 }
0x2f38   :  { %v7950_v19 = vadd.f32 %v7949_v33, %v7948_v37  ;;  %v7838_v49 = vadd.f32 %v7837_v63, %v7836_v27 }
0x2f3a   :  { %v7963_v36 = vsel %vm7854_vm5, %v7950_v19, -inf  ;;  %v7839_v59 = vrot.slane %v7838_v49, 1  ;;  %v7951_v50 = vsel %vm7841_vm6, %v7950_v19, -inf }
0x2f3b   :  { %7964 = vmax.xlane.f32.xlu0 %v7963_v36 }
0x2f3c   :  { %v7840_v51 = vadd.f32 %v7839_v59, %v7838_v49 }
0x2f3e   :  { %v7855_v48 = vsel %vm7854_vm5, %v7840_v51, -inf  ;;  %v7842_v54 = vsel %vm7841_vm6, %v7840_v51, -inf }
0x2f3f   :  { %7952 = vmax.xlane.f32.xlu0 %v7951_v50  ;;  %7856 = vmax.xlane.f32.xlu1 %v7855_v48 }
0x2f43   :  { %7843 = vmax.xlane.f32.xlu1 %v7842_v54 }
0x2fc8   :  { %v7965_v29 = vpop.xlane.xlu0 %7964 }
0x2fc9   :  { %v7966_v22 = vsub.f32 %v7950_v19, %v7965_v29 }
0x2fcb   :  { %v7967_v32 = vmul.f32 1.442695, %v7966_v22 }
0x2fcc   :  { %v7857_v56 = vpop.xlane.xlu1 %7856  ;;  %v7953_v40 = vpop.xlane.xlu0 %7952 }
0x2fcd   :  { %10439 = vpow2.f32 %v7967_v32  ;;  %v7858_v55 = vsub.f32 %v7840_v51, %v7857_v56  ;;  %v7954_v24 = vsub.f32 %v7950_v19, %v7953_v40 }
0x2fcf   :  { %v7859_v44 = vmul.f32 1.442695, %v7858_v55  ;;  %v7955_v20 = vmul.f32 1.442695, %v7954_v24 }
0x2fd0   :  { %v7844_v52 = vpop.xlane.xlu1 %7843 }
0x2fd1   :  { %10441 = vpow2.f32 %v7859_v44  ;;  %v7845_v39 = vsub.f32 %v7840_v51, %v7844_v52 }
0x2fd2   :  { %10443 = vpow2.f32 %v7955_v20 }
0x2fd3   :  { %v7846_v18 = vmul.f32 1.442695, %v7845_v39 }
0x2fd5   :  { %10445 = vpow2.f32 %v7846_v18 }
0x2fd7   :  { %v10440_v8 = vpop.eup %10439 }
0x2fd8   :  { %7970 = vrot.lane.b32.xlu0 %v10440_v8, %s10476_s18 }
0x2fdb   :  { %v10442_v38 = vpop.eup %10441 }
0x2fdc   :  { %7862 = vrot.lane.b32.xlu1 %v10442_v38, %s10476_s18  ;;  %v10444_v2 = vpop.eup %10443 }
0x2fdd   :  { %v7957_v53 = vsel %vm7841_vm6, %v10444_v2, 0.0 }
0x2fdf   :  { %v10446_v25 = vpop.eup %10445 }
0x2fe0   :  { %v7848_v4 = vsel %vm7841_vm6, %v10446_v25, 0.0 }
0x3000   :  { %7958 = vadd.xlane.f32.xlu1 %v7957_v53 }
0x304a   :  { %v7971_v57 = vpop.permute.xlu0 %7970 }
0x304b   :  { %v7973_v60 = vsel %vm7841_vm6, %v7971_v57, 0.0 }
0x304c   :  { %7974 = vadd.xlane.f32.xlu0 %v7973_v60 }
0x304e   :  { %v7863_v26 = vpop.permute.xlu1 %7862 }
0x304f   :  { %v7865_v58 = vsel %vm7841_vm6, %v7863_v26, 0.0 }
0x3050   :  { %7849 = vadd.xlane.f32.xlu0 %v7848_v4  ;;  %7866 = vadd.xlane.f32.xlu1 %v7865_v58 }
0x308d   :  { %v7959_v34 = vpop.xlane.xlu1 %7958 }
0x308e   :  { %10447 = vlog2.f32 %v7959_v34 }
0x3098   :  { %v10448_v16 = vpop.eup %10447 }
0x3099   :  { %v7961_v46 = vmul.f32 0.6931472, %v10448_v16 }
0x309b   :  { %v7962_v23 = vsub.f32 %v7954_v24, %v7961_v46 }
0x30d9   :  { %v7975_v10 = vpop.xlane.xlu0 %7974 }
0x30da   :  { %10449 = vlog2.f32 %v7975_v10 }
0x30dd   :  { %v7850_v45 = vpop.xlane.xlu0 %7849  ;;  %v7867_v31 = vpop.xlane.xlu1 %7866 }
0x30de   :  { %10451 = vlog2.f32 %v7850_v45 }
0x30df   :  { %10453 = vlog2.f32 %v7867_v31 }
0x30e4   :  { %v10450_v15 = vpop.eup %10449 }
0x30e5   :  { %v7977_v47 = vmul.f32 0.6931472, %v10450_v15 }
0x30e7   :  { %v7978_v6 = vsub.f32 %v7966_v22, %v7977_v47 }
0x30e8   :  { %v10452_v12 = vpop.eup %10451 }
0x30e9   :  { %v10454_v17 = vpop.eup %10453  ;;  %v7852_v41 = vmul.f32 0.6931472, %v10452_v12  ;;  %v7979_v28 = vsel %vm7841_vm6, %v7962_v23, %v7978_v6 }
0x30ea   :  { %v7869_v13 = vmul.f32 0.6931472, %v10454_v17  ;;  %v7981_v3 = vrot.slane %v7979_v28, 7 }
0x30eb   :  { %v7853_v14 = vsub.f32 %v7845_v39, %v7852_v41 }
0x30ec   :  { %v7870_v1 = vsub.f32 %v7858_v55, %v7869_v13 }
0x30ee   :  { %v7871_v62 = vsel %vm7841_vm6, %v7853_v14, %v7870_v1 }
0x30ef   :  { %v7984_v35 = vsel %vm7983_vm7, %v7871_v62, %v7981_v3 }
0x30f0   :  { %7986 = vst.msk [vmem:[%s13906_s19] sm:$0x3] %vm7985_vm8, %v7984_v35 }

</bundles_post_ra>
